<compile_context>
chip_gen: v7x
topology: tpu7x:2x2x1
jax: 0.10.0
libtpu: 0.0.40
codegen_flags: <defaults>
</compile_context>

<pallas_src>
import functools
import math

import jax
import jax.numpy as jnp
from jax.experimental import pallas as pl
from jax.experimental.pallas import tpu as pltpu

F32 = jnp.float32
BF16 = jnp.bfloat16
LN_EPS = 1e-5
SOFTMAX_APPROX_RECIP = True


# ----------------------------- shared math helpers ---------------------------

def _mm(a, b):
    """bf16 MXU matmul with f32 accumulation."""
    return jnp.dot(a.astype(BF16), b.astype(BF16), preferred_element_type=F32)


def _gelu(x):
    # nn.GELU() default == exact erf-based GELU (f32 on the VPU/EUP).
    return 0.5 * x * (1.0 + jax.lax.erf(x * (1.0 / math.sqrt(2.0))))


def _layer_norm(x, g, b):
    mu = jnp.mean(x, axis=-1, keepdims=True)
    d = x - mu
    var = jnp.mean(d * d, axis=-1, keepdims=True)
    return d * jax.lax.rsqrt(var + LN_EPS) * g + b


def _patchify(x_img, ps):
    """[B, C, H, W] -> [B, num_patches, C*ps*ps] (row-major patch order)."""
    B, C, H, W = x_img.shape
    gh, gw = H // ps, W // ps
    p = x_img.reshape(B, C, gh, ps, gw, ps)
    p = p.transpose(0, 2, 4, 1, 3, 5)
    return p.reshape(B, gh * gw, C * ps * ps)


def _const_spec(shape):
    """Whole array VMEM-resident, constant over the (batch_tile, depth) grid."""
    nd = len(shape)
    return pl.BlockSpec(shape, lambda bt, d, _nd=nd: (0,) * _nd)


def _layer_spec(shape):
    """Per-layer stacked weight: stream layer `d`, constant over batch tiles."""
    nd = len(shape)
    return pl.BlockSpec((1,) + tuple(shape[1:]),
                        lambda bt, d, _nd=nd: (d,) + (0,) * (_nd - 1))


# ---------------------------------- kernel -----------------------------------

def vit_fused_kernel(patches_ref, w_pe_ref, b_pe_ref, cls_pos_ref, pos_ref,
                     ln1g_ref, ln1b_ref, wqkv_ref, wproj_ref, bproj_ref,
                     ln2g_ref, ln2b_ref, wfc1_ref, bfc1_ref, wfc2_ref, bfc2_ref,
                     lnfg_ref, lnfb_ref,
                     o_ref,
                     x_scr, attn_scr,
                     *, num_heads, head_dim, tokens, samples, n_patches):
    d = pl.program_id(1)
    D = num_heads * head_dim
    N, Bb, P = tokens, samples, n_patches
    scale = head_dim ** -0.5

    # ---- first layer only: prepare_tokens into the resident activation scratch
    @pl.when(d == 0)
    def _prepare():
        # Patch embed for the whole batch tile: [Bb*P, CK] @ [CK, D].
        tok = _mm(patches_ref[...], w_pe_ref[...]) + b_pe_ref[...]
        for s in range(Bb):                       # static unroll over samples
            x_scr[s * N:s * N + 1, :] = cls_pos_ref[...]          # CLS + pos[0]
            x_scr[s * N + 1:s * N + 1 + P, :] = (
                tok[s * P:(s + 1) * P, :] + pos_ref[...])          # patches+pos

    x = x_scr[...]                                                 # [Bb*N, D] f32

    # ---- Attention branch: x + proj(MHSA(LN1(x))) ----
    h = _layer_norm(x, ln1g_ref[0], ln1b_ref[0])
    qkv = _mm(h, wqkv_ref[0])                                      # [Bb*N, 3D] f32

    for s in range(Bb):                           # per-sample attention (N small)
        qkv_s = qkv[s * N:(s + 1) * N, :].astype(BF16)             # cast once/sample
        for hh in range(num_heads):               # 128-lane aligned head slices
            lo = hh * head_dim
            q = qkv_s[:, lo:lo + head_dim]
            k = qkv_s[:, D + lo:D + lo + head_dim]
            v = qkv_s[:, 2 * D + lo:2 * D + lo + head_dim]

            sc = jnp.einsum('qd,kd->qk', q, k,
                            preferred_element_type=F32) * scale
            sc = sc - jnp.max(sc, axis=-1, keepdims=True)
            p = jnp.exp(sc)
            denom = jnp.sum(p, axis=-1, keepdims=True)
            p = p * pl.reciprocal(denom, approx=SOFTMAX_APPROX_RECIP)
            o_h = jnp.dot(p.astype(BF16), v, preferred_element_type=F32)
            # Write head output at its lane offset -> single proj matmul below.
            attn_scr[s * N:(s + 1) * N, lo:lo + head_dim] = o_h

    x = x + _mm(attn_scr[...], wproj_ref[0]) + bproj_ref[0]

    # ---- MLP branch: x + fc2(GELU(fc1(LN2(x)))) ----
    h2 = _layer_norm(x, ln2g_ref[0], ln2b_ref[0])
    h2 = _gelu(_mm(h2, wfc1_ref[0]) + bfc1_ref[0])
    x = x + _mm(h2, wfc2_ref[0]) + bfc2_ref[0]
    x_scr[...] = x

    # ---- last layer: final LayerNorm on the CLS rows only (forward returns x[:,0])
    @pl.when(d == pl.num_programs(1) - 1)
    def _finalize():
        for s in range(Bb):
            o_ref[s, :, :] = _layer_norm(x[s * N:s * N + 1, :],
                                         lnfg_ref[...], lnfb_ref[...])


# --------------------------------- wrapper -----------------------------------

def vit_forward(x_img, params, cfg, *, batch_tile=None):
    """VisionTransformer.forward: returns the normalized CLS token [B, D]."""
    B = x_img.shape[0]
    ps, D = cfg["patch_size"], cfg["embed_dim"]
    nH = cfg["num_heads"]
    hd = D // nH
    L = cfg["depth"]
    Hd = params["wfc1"].shape[-1]
    P = (cfg["img_size"] // ps) ** 2
    CK = cfg["channel_size"] * ps * ps
    N = P + 1

    Bb = batch_tile if batch_tile is not None else min(B, 8)
    assert B % Bb == 0, "batch must be divisible by batch_tile"
    Bt = B // Bb                      # keep >= 2 when possible (v7x megacore)

    # Layout plumbing stays in the JAX wrapper.
    patches = _patchify(x_img, ps).reshape(B * P, CK)
    cls_pos = params["cls"] + params["pos"][0:1, :]     # CLS token + pos[0]
    pos_patch = params["pos"][1:, :]                    # [P, D]

    kernel = functools.partial(vit_fused_kernel, num_heads=nH, head_dim=hd,
                               tokens=N, samples=Bb, n_patches=P)

    args = (patches, params["w_pe"], params["b_pe"], cls_pos, pos_patch,
            params["ln1_g"], params["ln1_b"], params["wqkv"], params["wproj"],
            params["bproj"], params["ln2_g"], params["ln2_b"], params["wfc1"],
            params["bfc1"], params["wfc2"], params["bfc2"],
            params["lnf_g"], params["lnf_b"])

    in_specs = [
        pl.BlockSpec((Bb * P, CK), lambda bt, d: (bt, 0)),   # patches per tile
        _const_spec(params["w_pe"].shape),
        _const_spec(params["b_pe"].shape),
        _const_spec(cls_pos.shape),
        _const_spec(pos_patch.shape),
        _layer_spec(params["ln1_g"].shape),
        _layer_spec(params["ln1_b"].shape),
        _layer_spec(params["wqkv"].shape),
        _layer_spec(params["wproj"].shape),
        _layer_spec(params["bproj"].shape),
        _layer_spec(params["ln2_g"].shape),
        _layer_spec(params["ln2_b"].shape),
        _layer_spec(params["wfc1"].shape),
        _layer_spec(params["bfc1"].shape),
        _layer_spec(params["wfc2"].shape),
        _layer_spec(params["bfc2"].shape),
        _const_spec(params["lnf_g"].shape),
        _const_spec(params["lnf_b"].shape),
    ]

    flops = (L * B * (6 * N * D * D + 4 * N * N * D + 2 * N * D * D
                      + 4 * N * D * Hd)
             + 2 * B * P * CK * D)
    transcendentals = L * B * (nH * N * N + N * Hd + 2 * N)
    bytes_accessed = (B * P * CK * 4 + B * D * 4
                      + L * Bt * (4 * D * D + 2 * D * Hd) * 2   # bf16 weights
                      + L * (6 * D + Hd) * 4                     # biases / LN
                      + (P + 2) * D * 4 + CK * D * 2)

    out = pl.pallas_call(
        kernel,
        out_shape=jax.ShapeDtypeStruct((B, 1, D), F32),
        grid_spec=pltpu.PrefetchScalarGridSpec(
            num_scalar_prefetch=0,
            grid=(Bt, L),                         # (batch tiles, depth)
            in_specs=in_specs,
            out_specs=pl.BlockSpec((Bb, 1, D), lambda bt, d: (bt, 0, 0)),
            scratch_shapes=[pltpu.VMEM((Bb * N, D), F32),   # resident activations
                            pltpu.VMEM((Bb * N, D), F32)],  # concat'd head outputs
        ),
        compiler_params=pltpu.CompilerParams(
            dimension_semantics=("parallel", "arbitrary")),
        cost_estimate=pl.CostEstimate(
            flops=int(flops), transcendentals=int(transcendentals),
            bytes_accessed=int(bytes_accessed)),
    )(*args)
    return out[:, 0, :]


# ----------------------------- params & reference ----------------------------

def init_params(key, cfg):
    D = cfg["embed_dim"]
    Hd = int(cfg["mlp_ratio"] * D)
    CK = cfg["channel_size"] * cfg["patch_size"] ** 2
    P = (cfg["img_size"] // cfg["patch_size"]) ** 2
    L = cfg["depth"]

    def tn(k, shape, dtype=F32):
        return (0.02 * jax.random.truncated_normal(k, -2.0, 2.0, shape)).astype(dtype)

    ks = jax.random.split(key, 8)
    return {
        # Conv2d(k=s=patch) as a matmul over flattened patches; weight stored
        # transposed to [C*ps*ps, D] and kept in bf16 (MXU operand).
        "w_pe": tn(ks[0], (CK, D), dtype=BF16),
        "b_pe": jnp.zeros((1, D), F32),
        # cls_token / pos_embed are zero-init in the PyTorch ctor; small random
        # values here so the test actually exercises those additions.
        "cls": tn(ks[1], (1, D)),
        "pos": tn(ks[2], (P + 1, D)),
        # Per-layer weights stacked along a leading depth axis (streamed by grid).
        "ln1_g": jnp.ones((L, 1, D), F32), "ln1_b": jnp.zeros((L, 1, D), F32),
        "wqkv": tn(ks[3], (L, D, 3 * D), dtype=BF16),   # qkv_bias=False (default)
        "wproj": tn(ks[4], (L, D, D), dtype=BF16),
        "bproj": jnp.zeros((L, 1, D), F32),
        "ln2_g": jnp.ones((L, 1, D), F32), "ln2_b": jnp.zeros((L, 1, D), F32),
        "wfc1": tn(ks[5], (L, D, Hd), dtype=BF16),
        "bfc1": jnp.zeros((L, 1, Hd), F32),
        "wfc2": tn(ks[6], (L, Hd, D), dtype=BF16),
        "bfc2": jnp.zeros((L, 1, D), F32),
        "lnf_g": jnp.ones((1, D), F32), "lnf_b": jnp.zeros((1, D), F32),
    }


def reference_forward(x_img, params, cfg):
    """Pure-JAX reference (mirrors the bf16 matmul casting, exact softmax)."""
    B = x_img.shape[0]
    ps, D = cfg["patch_size"], cfg["embed_dim"]
    nH = cfg["num_heads"]
    hd = D // nH

    def mm(a, b):
        return jnp.einsum('...ij,jk->...ik', a.astype(BF16), b.astype(BF16),
                          preferred_element_type=F32)

    p = _patchify(x_img, ps)
    tok = mm(p, params["w_pe"]) + params["b_pe"]
    cls = jnp.broadcast_to(params["cls"][None], (B, 1, D))
    x = jnp.concatenate([cls, tok], axis=1) + params["pos"][None]
    N = x.shape[1]

    for l in range(cfg["depth"]):
        h = _layer_norm(x, params["ln1_g"][l], params["ln1_b"][l])
        qkv = mm(h, params["wqkv"][l]).reshape(B, N, 3, nH, hd).transpose(2, 0, 3, 1, 4)
        q, k, v = qkv[0], qkv[1], qkv[2]                         # [B, nH, N, hd]
        s = jnp.einsum('bhqd,bhkd->bhqk', q.astype(BF16), k.astype(BF16),
                       preferred_element_type=F32) * (hd ** -0.5)
        a = jax.nn.softmax(s, axis=-1)
        o = jnp.einsum('bhqk,bhkd->bhqd', a.astype(BF16), v.astype(BF16),
                       preferred_element_type=F32)
        o = o.transpose(0, 2, 1, 3).reshape(B, N, D)
        x = x + mm(o, params["wproj"][l]) + params["bproj"][l]
        h2 = _layer_norm(x, params["ln2_g"][l], params["ln2_b"][l])
        h2 = _gelu(mm(h2, params["wfc1"][l]) + params["bfc1"][l])
        x = x + mm(h2, params["wfc2"][l]) + params["bfc2"][l]

    x = _layer_norm(x, params["lnf_g"], params["lnf_b"])
    return x[:, 0]


# ----------------------------------- main -------------------------------------

if __name__ == "__main__":
    # Small but lane-dense shapes consistent with the module:
    # 32x32 RGB image, patch 8 -> 16 patches + CLS = 17 tokens,
    # embed_dim=256, 2 heads (head_dim=128), mlp hidden=1024, depth=4,
    # batch=8 split into 2 batch tiles of 4 (parallel axis for v7x megacore).
    cfg = dict(img_size=32, patch_size=8, channel_size=3, embed_dim=256,
               depth=4, num_heads=2, mlp_ratio=4.0)
    B = 8

    key = jax.random.PRNGKey(0)
    k_img, k_par = jax.random.split(key)
    x_img = jax.random.normal(
        k_img, (B, cfg["channel_size"], cfg["img_size"], cfg["img_size"]), dtype=F32)
    params = init_params(k_par, cfg)

    out = jax.block_until_ready(vit_forward(x_img, params, cfg, batch_tile=4))
    ref = jax.block_until_ready(reference_forward(x_img, params, cfg))

    assert out.shape == (B, cfg["embed_dim"])
    max_diff = float(jnp.max(jnp.abs(out - ref)))
    assert jnp.allclose(out, ref, atol=2e-2, rtol=2e-2), f"max abs diff {max_diff}"

    print("KERNEL_OK")
</pallas_src>

<mosaic_0001>
module attributes {stable_mosaic.version = 11 : i64} {
  func.func @vit_fused_kernel(%arg0: i32, %arg1: i32, %arg2: memref<64x192xf32, #tpu.memory_space<vmem>>, %arg3: memref<192x256xbf16, #tpu.memory_space<vmem>>, %arg4: memref<1x256xf32, #tpu.memory_space<vmem>>, %arg5: memref<1x256xf32, #tpu.memory_space<vmem>>, %arg6: memref<16x256xf32, #tpu.memory_space<vmem>>, %arg7: memref<1x1x256xf32, #tpu.memory_space<vmem>>, %arg8: memref<1x1x256xf32, #tpu.memory_space<vmem>>, %arg9: memref<1x256x768xbf16, #tpu.memory_space<vmem>>, %arg10: memref<1x256x256xbf16, #tpu.memory_space<vmem>>, %arg11: memref<1x1x256xf32, #tpu.memory_space<vmem>>, %arg12: memref<1x1x256xf32, #tpu.memory_space<vmem>>, %arg13: memref<1x1x256xf32, #tpu.memory_space<vmem>>, %arg14: memref<1x256x1024xbf16, #tpu.memory_space<vmem>>, %arg15: memref<1x1x1024xf32, #tpu.memory_space<vmem>>, %arg16: memref<1x1024x256xbf16, #tpu.memory_space<vmem>>, %arg17: memref<1x1x256xf32, #tpu.memory_space<vmem>>, %arg18: memref<1x256xf32, #tpu.memory_space<vmem>>, %arg19: memref<1x256xf32, #tpu.memory_space<vmem>>, %arg20: memref<4x1x256xf32, #tpu.memory_space<vmem>>, %arg21: memref<68x256xf32, #tpu.memory_space<vmem>>, %arg22: memref<68x256xf32, #tpu.memory_space<vmem>>) attributes {dimension_semantics = [#tpu.dimension_semantics<parallel>, #tpu.dimension_semantics<arbitrary>], iteration_bounds = array<i64: 2, 4>, scalar_prefetch = 0 : i64, scratch_operands = 2 : i64, tpu.core_type = #tpu.core_type<tc>, window_params = [{transform_indices = @transform_0, window_bounds = array<i64: 64, 192>}, {pipeline_mode = #tpu.pipeline_mode<synchronous>, transform_indices = @transform_1, window_bounds = array<i64: 192, 256>}, {pipeline_mode = #tpu.pipeline_mode<synchronous>, transform_indices = @transform_2, window_bounds = array<i64: 1, 256>}, {pipeline_mode = #tpu.pipeline_mode<synchronous>, transform_indices = @transform_3, window_bounds = array<i64: 1, 256>}, {pipeline_mode = #tpu.pipeline_mode<synchronous>, transform_indices = @transform_4, window_bounds = array<i64: 16, 256>}, {transform_indices = @transform_5, window_bounds = array<i64: 1, 1, 256>}, {transform_indices = @transform_6, window_bounds = array<i64: 1, 1, 256>}, {transform_indices = @transform_7, window_bounds = array<i64: 1, 256, 768>}, {transform_indices = @transform_8, window_bounds = array<i64: 1, 256, 256>}, {transform_indices = @transform_9, window_bounds = array<i64: 1, 1, 256>}, {transform_indices = @transform_10, window_bounds = array<i64: 1, 1, 256>}, {transform_indices = @transform_11, window_bounds = array<i64: 1, 1, 256>}, {transform_indices = @transform_12, window_bounds = array<i64: 1, 256, 1024>}, {transform_indices = @transform_13, window_bounds = array<i64: 1, 1, 1024>}, {transform_indices = @transform_14, window_bounds = array<i64: 1, 1024, 256>}, {transform_indices = @transform_15, window_bounds = array<i64: 1, 1, 256>}, {pipeline_mode = #tpu.pipeline_mode<synchronous>, transform_indices = @transform_16, window_bounds = array<i64: 1, 256>}, {pipeline_mode = #tpu.pipeline_mode<synchronous>, transform_indices = @transform_17, window_bounds = array<i64: 1, 256>}, {transform_indices = @transform_18, window_bounds = array<i64: 4, 1, 256>}]} {
    %c0_i32 = arith.constant 0 : i32
    %0 = arith.cmpi eq, %arg1, %c0_i32 : i32
    %1 = arith.extui %0 : i1 to i32
    %c0_i32_0 = arith.constant 0 : i32
    %2 = arith.cmpi ne, %1, %c0_i32_0 : i32
    scf.if %2 {
      %c0_108 = arith.constant 0 : index
      %c0_109 = arith.constant 0 : index
      %255 = vector.load %arg2[%c0_108, %c0_109] : memref<64x192xf32, #tpu.memory_space<vmem>>, vector<64x192xf32>
      %c0_110 = arith.constant 0 : index
      %c0_111 = arith.constant 0 : index
      %256 = vector.load %arg3[%c0_110, %c0_111] : memref<192x256xbf16, #tpu.memory_space<vmem>>, vector<192x256xbf16>
      %257 = arith.truncf %255 : vector<64x192xf32> to vector<64x192xbf16>
      %cst_112 = arith.constant dense<0.000000e+00> : vector<64x256xf32>
      %258 = tpu.matmul %257, %256, %cst_112 {dimension_numbers = #tpu.dot_dimension_numbers<[1], [0], [0], [1], [0, 0, 1, 1], [], []>} : vector<64x192xbf16>, vector<192x256xbf16>, vector<64x256xf32> -> vector<64x256xf32>
      %c0_113 = arith.constant 0 : index
      %c0_114 = arith.constant 0 : index
      %259 = vector.load %arg4[%c0_113, %c0_114] : memref<1x256xf32, #tpu.memory_space<vmem>>, vector<1x256xf32>
      %260 = vector.broadcast %259 : vector<1x256xf32> to vector<64x256xf32>
      %261 = arith.addf %258, %260 : vector<64x256xf32>
      %c0_115 = arith.constant 0 : index
      %c0_116 = arith.constant 0 : index
      %262 = vector.load %arg5[%c0_115, %c0_116] : memref<1x256xf32, #tpu.memory_space<vmem>>, vector<1x256xf32>
      %c0_117 = arith.constant 0 : index
      %c0_118 = arith.constant 0 : index
      %263 = vector.load %arg21[%c0_117, %c0_118] : memref<68x256xf32, #tpu.memory_space<vmem>>, vector<1x256xf32>
      tpu.vector_store %arg21[%c0_117, %c0_118], %262 {strides = array<i32>} : memref<68x256xf32, #tpu.memory_space<vmem>>, vector<1x256xf32>,
      %264 = vector.extract_strided_slice %261 {offsets = [0, 0], sizes = [16, 256], strides = [1, 1]} : vector<64x256xf32> to vector<16x256xf32>
      %c0_119 = arith.constant 0 : index
      %c0_120 = arith.constant 0 : index
      %265 = vector.load %arg6[%c0_119, %c0_120] : memref<16x256xf32, #tpu.memory_space<vmem>>, vector<16x256xf32>
      %266 = arith.addf %264, %265 : vector<16x256xf32>
      %c1 = arith.constant 1 : index
      %c0_121 = arith.constant 0 : index
      %267 = vector.load %arg21[%c1, %c0_121] : memref<68x256xf32, #tpu.memory_space<vmem>>, vector<16x256xf32>
      tpu.vector_store %arg21[%c1, %c0_121], %266 {strides = array<i32>} : memref<68x256xf32, #tpu.memory_space<vmem>>, vector<16x256xf32>,
      %c0_122 = arith.constant 0 : index
      %c0_123 = arith.constant 0 : index
      %268 = vector.load %arg5[%c0_122, %c0_123] : memref<1x256xf32, #tpu.memory_space<vmem>>, vector<1x256xf32>
      %c17_124 = arith.constant 17 : index
      %c0_125 = arith.constant 0 : index
      %269 = vector.load %arg21[%c17_124, %c0_125] : memref<68x256xf32, #tpu.memory_space<vmem>>, vector<1x256xf32>
      tpu.vector_store %arg21[%c17_124, %c0_125], %268 {strides = array<i32>} : memref<68x256xf32, #tpu.memory_space<vmem>>, vector<1x256xf32>,
      %270 = vector.extract_strided_slice %261 {offsets = [16, 0], sizes = [16, 256], strides = [1, 1]} : vector<64x256xf32> to vector<16x256xf32>
      %c0_126 = arith.constant 0 : index
      %c0_127 = arith.constant 0 : index
      %271 = vector.load %arg6[%c0_126, %c0_127] : memref<16x256xf32, #tpu.memory_space<vmem>>, vector<16x256xf32>
      %272 = arith.addf %270, %271 : vector<16x256xf32>
      %c18 = arith.constant 18 : index
      %c0_128 = arith.constant 0 : index
      %273 = vector.load %arg21[%c18, %c0_128] : memref<68x256xf32, #tpu.memory_space<vmem>>, vector<16x256xf32>
      tpu.vector_store %arg21[%c18, %c0_128], %272 {strides = array<i32>} : memref<68x256xf32, #tpu.memory_space<vmem>>, vector<16x256xf32>,
      %c0_129 = arith.constant 0 : index
      %c0_130 = arith.constant 0 : index
      %274 = vector.load %arg5[%c0_129, %c0_130] : memref<1x256xf32, #tpu.memory_space<vmem>>, vector<1x256xf32>
      %c34_131 = arith.constant 34 : index
      %c0_132 = arith.constant 0 : index
      %275 = vector.load %arg21[%c34_131, %c0_132] : memref<68x256xf32, #tpu.memory_space<vmem>>, vector<1x256xf32>
      tpu.vector_store %arg21[%c34_131, %c0_132], %274 {strides = array<i32>} : memref<68x256xf32, #tpu.memory_space<vmem>>, vector<1x256xf32>,
      %276 = vector.extract_strided_slice %261 {offsets = [32, 0], sizes = [16, 256], strides = [1, 1]} : vector<64x256xf32> to vector<16x256xf32>
      %c0_133 = arith.constant 0 : index
      %c0_134 = arith.constant 0 : index
      %277 = vector.load %arg6[%c0_133, %c0_134] : memref<16x256xf32, #tpu.memory_space<vmem>>, vector<16x256xf32>
      %278 = arith.addf %276, %277 : vector<16x256xf32>
      %c35 = arith.constant 35 : index
      %c0_135 = arith.constant 0 : index
      %279 = vector.load %arg21[%c35, %c0_135] : memref<68x256xf32, #tpu.memory_space<vmem>>, vector<16x256xf32>
      tpu.vector_store %arg21[%c35, %c0_135], %278 {strides = array<i32>} : memref<68x256xf32, #tpu.memory_space<vmem>>, vector<16x256xf32>,
      %c0_136 = arith.constant 0 : index
      %c0_137 = arith.constant 0 : index
      %280 = vector.load %arg5[%c0_136, %c0_137] : memref<1x256xf32, #tpu.memory_space<vmem>>, vector<1x256xf32>
      %c51_138 = arith.constant 51 : index
      %c0_139 = arith.constant 0 : index
      %281 = vector.load %arg21[%c51_138, %c0_139] : memref<68x256xf32, #tpu.memory_space<vmem>>, vector<1x256xf32>
      tpu.vector_store %arg21[%c51_138, %c0_139], %280 {strides = array<i32>} : memref<68x256xf32, #tpu.memory_space<vmem>>, vector<1x256xf32>,
      %282 = vector.extract_strided_slice %261 {offsets = [48, 0], sizes = [16, 256], strides = [1, 1]} : vector<64x256xf32> to vector<16x256xf32>
      %c0_140 = arith.constant 0 : index
      %c0_141 = arith.constant 0 : index
      %283 = vector.load %arg6[%c0_140, %c0_141] : memref<16x256xf32, #tpu.memory_space<vmem>>, vector<16x256xf32>
      %284 = arith.addf %282, %283 : vector<16x256xf32>
      %c52 = arith.constant 52 : index
      %c0_142 = arith.constant 0 : index
      %285 = vector.load %arg21[%c52, %c0_142] : memref<68x256xf32, #tpu.memory_space<vmem>>, vector<16x256xf32>
      tpu.vector_store %arg21[%c52, %c0_142], %284 {strides = array<i32>} : memref<68x256xf32, #tpu.memory_space<vmem>>, vector<16x256xf32>,
    } else {
    }
    %c0 = arith.constant 0 : index
    %c0_1 = arith.constant 0 : index
    %3 = vector.load %arg21[%c0, %c0_1] : memref<68x256xf32, #tpu.memory_space<vmem>>, vector<68x256xf32>
    %c0_2 = arith.constant 0 : index
    %c0_3 = arith.constant 0 : index
    %c0_4 = arith.constant 0 : index
    %4 = vector.load %arg7[%c0_2, %c0_3, %c0_4] : memref<1x1x256xf32, #tpu.memory_space<vmem>>, vector<1x1x256xf32>
    %5 = vector.shape_cast %4 : vector<1x1x256xf32> to vector<1x256xf32>
    %c0_5 = arith.constant 0 : index
    %c0_6 = arith.constant 0 : index
    %c0_7 = arith.constant 0 : index
    %6 = vector.load %arg8[%c0_5, %c0_6, %c0_7] : memref<1x1x256xf32, #tpu.memory_space<vmem>>, vector<1x1x256xf32>
    %7 = vector.shape_cast %6 : vector<1x1x256xf32> to vector<1x256xf32>
    %cst = arith.constant dense<0.000000e+00> : vector<68xf32>
    %8 = vector.multi_reduction <add>, %3, %cst [1] : vector<68x256xf32> to vector<68xf32>
    %9 = vector.shape_cast %8 : vector<68xf32> to vector<68x1xf32>
    %cst_8 = arith.constant 2.560000e+02 : f32
    %10 = vector.broadcast %cst_8 : f32 to vector<68x1xf32>
    %11 = arith.divf %9, %10 : vector<68x1xf32>
    %12 = vector.broadcast %11 : vector<68x1xf32> to vector<68x256xf32>
    %13 = arith.subf %3, %12 : vector<68x256xf32>
    %14 = arith.mulf %13, %13 : vector<68x256xf32>
    %cst_9 = arith.constant dense<0.000000e+00> : vector<68xf32>
    %15 = vector.multi_reduction <add>, %14, %cst_9 [1] : vector<68x256xf32> to vector<68xf32>
    %16 = vector.shape_cast %15 : vector<68xf32> to vector<68x1xf32>
    %cst_10 = arith.constant 2.560000e+02 : f32
    %17 = vector.broadcast %cst_10 : f32 to vector<68x1xf32>
    %18 = arith.divf %16, %17 : vector<68x1xf32>
    %cst_11 = arith.constant 9.99999974E-6 : f32
    %19 = vector.broadcast %cst_11 : f32 to vector<68x1xf32>
    %20 = arith.addf %18, %19 : vector<68x1xf32>
    %21 = math.rsqrt %20 : vector<68x1xf32>
    %22 = vector.broadcast %21 : vector<68x1xf32> to vector<68x256xf32>
    %23 = arith.mulf %13, %22 : vector<68x256xf32>
    %24 = vector.broadcast %5 : vector<1x256xf32> to vector<68x256xf32>
    %25 = arith.mulf %23, %24 : vector<68x256xf32>
    %26 = vector.broadcast %7 : vector<1x256xf32> to vector<68x256xf32>
    %27 = arith.addf %25, %26 : vector<68x256xf32>
    %c0_12 = arith.constant 0 : index
    %c0_13 = arith.constant 0 : index
    %c0_14 = arith.constant 0 : index
    %28 = vector.load %arg9[%c0_12, %c0_13, %c0_14] : memref<1x256x768xbf16, #tpu.memory_space<vmem>>, vector<1x256x768xbf16>
    %29 = vector.shape_cast %28 : vector<1x256x768xbf16> to vector<256x768xbf16>
    %30 = arith.truncf %27 : vector<68x256xf32> to vector<68x256xbf16>
    %cst_15 = arith.constant dense<0.000000e+00> : vector<68x768xf32>
    %31 = tpu.matmul %30, %29, %cst_15 {dimension_numbers = #tpu.dot_dimension_numbers<[1], [0], [0], [1], [0, 0, 1, 1], [], []>} : vector<68x256xbf16>, vector<256x768xbf16>, vector<68x768xf32> -> vector<68x768xf32>
    %32 = vector.extract_strided_slice %31 {offsets = [0, 0], sizes = [17, 768], strides = [1, 1]} : vector<68x768xf32> to vector<17x768xf32>
    %33 = arith.truncf %32 : vector<17x768xf32> to vector<17x768xbf16>
    %34 = vector.extract_strided_slice %33 {offsets = [0, 0], sizes = [17, 128], strides = [1, 1]} : vector<17x768xbf16> to vector<17x128xbf16>
    %35 = vector.extract_strided_slice %33 {offsets = [0, 256], sizes = [17, 128], strides = [1, 1]} : vector<17x768xbf16> to vector<17x128xbf16>
    %36 = vector.extract_strided_slice %33 {offsets = [0, 512], sizes = [17, 128], strides = [1, 1]} : vector<17x768xbf16> to vector<17x128xbf16>
    "tpu.trace_start"() <{level = 10 : i32, message = "qd,kd->qk"}> : () -> ()
    %cst_16 = arith.constant dense<0.000000e+00> : vector<17x17xf32>
    %37 = tpu.matmul %34, %35, %cst_16 {dimension_numbers = #tpu.dot_dimension_numbers<[1], [1], [0], [0], [0, 0, 1, 0], [], []>} : vector<17x128xbf16>, vector<17x128xbf16>, vector<17x17xf32> -> vector<17x17xf32>
    "tpu.trace_stop"() : () -> ()
    %cst_17 = arith.constant 0.0883883461 : f32
    %38 = vector.broadcast %cst_17 : f32 to vector<17x17xf32>
    %39 = arith.mulf %37, %38 : vector<17x17xf32>
    %cst_18 = arith.constant dense<0xFF800000> : vector<17xf32>
    %40 = vector.multi_reduction <maximumf>, %39, %cst_18 [1] : vector<17x17xf32> to vector<17xf32>
    %41 = vector.shape_cast %40 : vector<17xf32> to vector<17x1xf32>
    %42 = vector.broadcast %41 : vector<17x1xf32> to vector<17x17xf32>
    %43 = arith.subf %39, %42 : vector<17x17xf32>
    %44 = math.exp %43 : vector<17x17xf32>
    %cst_19 = arith.constant dense<0.000000e+00> : vector<17xf32>
    %45 = vector.multi_reduction <add>, %44, %cst_19 [1] : vector<17x17xf32> to vector<17xf32>
    %46 = vector.shape_cast %45 : vector<17xf32> to vector<17x1xf32>
    %47 = tpu.reciprocal %46 {approx = true} : vector<17x1xf32> -> vector<17x1xf32>
    %48 = vector.broadcast %47 : vector<17x1xf32> to vector<17x17xf32>
    %49 = arith.mulf %44, %48 : vector<17x17xf32>
    %50 = arith.truncf %49 : vector<17x17xf32> to vector<17x17xbf16>
    %cst_20 = arith.constant dense<0.000000e+00> : vector<17x128xf32>
    %51 = tpu.matmul %50, %36, %cst_20 {dimension_numbers = #tpu.dot_dimension_numbers<[1], [0], [0], [1], [0, 0, 1, 1], [], []>} : vector<17x17xbf16>, vector<17x128xbf16>, vector<17x128xf32> -> vector<17x128xf32>
    %c0_21 = arith.constant 0 : index
    %c0_22 = arith.constant 0 : index
    %52 = vector.load %arg22[%c0_21, %c0_22] : memref<68x256xf32, #tpu.memory_space<vmem>>, vector<17x128xf32>
    tpu.vector_store %arg22[%c0_21, %c0_22], %51 {strides = array<i32>} : memref<68x256xf32, #tpu.memory_space<vmem>>, vector<17x128xf32>,
    %53 = vector.extract_strided_slice %33 {offsets = [0, 128], sizes = [17, 128], strides = [1, 1]} : vector<17x768xbf16> to vector<17x128xbf16>
    %54 = vector.extract_strided_slice %33 {offsets = [0, 384], sizes = [17, 128], strides = [1, 1]} : vector<17x768xbf16> to vector<17x128xbf16>
    %55 = vector.extract_strided_slice %33 {offsets = [0, 640], sizes = [17, 128], strides = [1, 1]} : vector<17x768xbf16> to vector<17x128xbf16>
    "tpu.trace_start"() <{level = 10 : i32, message = "qd,kd->qk"}> : () -> ()
    %cst_23 = arith.constant dense<0.000000e+00> : vector<17x17xf32>
    %56 = tpu.matmul %53, %54, %cst_23 {dimension_numbers = #tpu.dot_dimension_numbers<[1], [1], [0], [0], [0, 0, 1, 0], [], []>} : vector<17x128xbf16>, vector<17x128xbf16>, vector<17x17xf32> -> vector<17x17xf32>
    "tpu.trace_stop"() : () -> ()
    %cst_24 = arith.constant 0.0883883461 : f32
    %57 = vector.broadcast %cst_24 : f32 to vector<17x17xf32>
    %58 = arith.mulf %56, %57 : vector<17x17xf32>
    %cst_25 = arith.constant dense<0xFF800000> : vector<17xf32>
    %59 = vector.multi_reduction <maximumf>, %58, %cst_25 [1] : vector<17x17xf32> to vector<17xf32>
    %60 = vector.shape_cast %59 : vector<17xf32> to vector<17x1xf32>
    %61 = vector.broadcast %60 : vector<17x1xf32> to vector<17x17xf32>
    %62 = arith.subf %58, %61 : vector<17x17xf32>
    %63 = math.exp %62 : vector<17x17xf32>
    %cst_26 = arith.constant dense<0.000000e+00> : vector<17xf32>
    %64 = vector.multi_reduction <add>, %63, %cst_26 [1] : vector<17x17xf32> to vector<17xf32>
    %65 = vector.shape_cast %64 : vector<17xf32> to vector<17x1xf32>
    %66 = tpu.reciprocal %65 {approx = true} : vector<17x1xf32> -> vector<17x1xf32>
    %67 = vector.broadcast %66 : vector<17x1xf32> to vector<17x17xf32>
    %68 = arith.mulf %63, %67 : vector<17x17xf32>
    %69 = arith.truncf %68 : vector<17x17xf32> to vector<17x17xbf16>
    %cst_27 = arith.constant dense<0.000000e+00> : vector<17x128xf32>
    %70 = tpu.matmul %69, %55, %cst_27 {dimension_numbers = #tpu.dot_dimension_numbers<[1], [0], [0], [1], [0, 0, 1, 1], [], []>} : vector<17x17xbf16>, vector<17x128xbf16>, vector<17x128xf32> -> vector<17x128xf32>
    %c0_28 = arith.constant 0 : index
    %c128 = arith.constant 128 : index
    %71 = vector.load %arg22[%c0_28, %c128] : memref<68x256xf32, #tpu.memory_space<vmem>>, vector<17x128xf32>
    tpu.vector_store %arg22[%c0_28, %c128], %70 {strides = array<i32>} : memref<68x256xf32, #tpu.memory_space<vmem>>, vector<17x128xf32>,
    %72 = vector.extract_strided_slice %31 {offsets = [17, 0], sizes = [17, 768], strides = [1, 1]} : vector<68x768xf32> to vector<17x768xf32>
    %73 = arith.truncf %72 : vector<17x768xf32> to vector<17x768xbf16>
    %74 = vector.extract_strided_slice %73 {offsets = [0, 0], sizes = [17, 128], strides = [1, 1]} : vector<17x768xbf16> to vector<17x128xbf16>
    %75 = vector.extract_strided_slice %73 {offsets = [0, 256], sizes = [17, 128], strides = [1, 1]} : vector<17x768xbf16> to vector<17x128xbf16>
    %76 = vector.extract_strided_slice %73 {offsets = [0, 512], sizes = [17, 128], strides = [1, 1]} : vector<17x768xbf16> to vector<17x128xbf16>
    "tpu.trace_start"() <{level = 10 : i32, message = "qd,kd->qk"}> : () -> ()
    %cst_29 = arith.constant dense<0.000000e+00> : vector<17x17xf32>
    %77 = tpu.matmul %74, %75, %cst_29 {dimension_numbers = #tpu.dot_dimension_numbers<[1], [1], [0], [0], [0, 0, 1, 0], [], []>} : vector<17x128xbf16>, vector<17x128xbf16>, vector<17x17xf32> -> vector<17x17xf32>
    "tpu.trace_stop"() : () -> ()
    %cst_30 = arith.constant 0.0883883461 : f32
    %78 = vector.broadcast %cst_30 : f32 to vector<17x17xf32>
    %79 = arith.mulf %77, %78 : vector<17x17xf32>
    %cst_31 = arith.constant dense<0xFF800000> : vector<17xf32>
    %80 = vector.multi_reduction <maximumf>, %79, %cst_31 [1] : vector<17x17xf32> to vector<17xf32>
    %81 = vector.shape_cast %80 : vector<17xf32> to vector<17x1xf32>
    %82 = vector.broadcast %81 : vector<17x1xf32> to vector<17x17xf32>
    %83 = arith.subf %79, %82 : vector<17x17xf32>
    %84 = math.exp %83 : vector<17x17xf32>
    %cst_32 = arith.constant dense<0.000000e+00> : vector<17xf32>
    %85 = vector.multi_reduction <add>, %84, %cst_32 [1] : vector<17x17xf32> to vector<17xf32>
    %86 = vector.shape_cast %85 : vector<17xf32> to vector<17x1xf32>
    %87 = tpu.reciprocal %86 {approx = true} : vector<17x1xf32> -> vector<17x1xf32>
    %88 = vector.broadcast %87 : vector<17x1xf32> to vector<17x17xf32>
    %89 = arith.mulf %84, %88 : vector<17x17xf32>
    %90 = arith.truncf %89 : vector<17x17xf32> to vector<17x17xbf16>
    %cst_33 = arith.constant dense<0.000000e+00> : vector<17x128xf32>
    %91 = tpu.matmul %90, %76, %cst_33 {dimension_numbers = #tpu.dot_dimension_numbers<[1], [0], [0], [1], [0, 0, 1, 1], [], []>} : vector<17x17xbf16>, vector<17x128xbf16>, vector<17x128xf32> -> vector<17x128xf32>
    %c17 = arith.constant 17 : index
    %c0_34 = arith.constant 0 : index
    %92 = vector.load %arg22[%c17, %c0_34] : memref<68x256xf32, #tpu.memory_space<vmem>>, vector<17x128xf32>
    tpu.vector_store %arg22[%c17, %c0_34], %91 {strides = array<i32>} : memref<68x256xf32, #tpu.memory_space<vmem>>, vector<17x128xf32>,
    %93 = vector.extract_strided_slice %73 {offsets = [0, 128], sizes = [17, 128], strides = [1, 1]} : vector<17x768xbf16> to vector<17x128xbf16>
    %94 = vector.extract_strided_slice %73 {offsets = [0, 384], sizes = [17, 128], strides = [1, 1]} : vector<17x768xbf16> to vector<17x128xbf16>
    %95 = vector.extract_strided_slice %73 {offsets = [0, 640], sizes = [17, 128], strides = [1, 1]} : vector<17x768xbf16> to vector<17x128xbf16>
    "tpu.trace_start"() <{level = 10 : i32, message = "qd,kd->qk"}> : () -> ()
    %cst_35 = arith.constant dense<0.000000e+00> : vector<17x17xf32>
    %96 = tpu.matmul %93, %94, %cst_35 {dimension_numbers = #tpu.dot_dimension_numbers<[1], [1], [0], [0], [0, 0, 1, 0], [], []>} : vector<17x128xbf16>, vector<17x128xbf16>, vector<17x17xf32> -> vector<17x17xf32>
    "tpu.trace_stop"() : () -> ()
    %cst_36 = arith.constant 0.0883883461 : f32
    %97 = vector.broadcast %cst_36 : f32 to vector<17x17xf32>
    %98 = arith.mulf %96, %97 : vector<17x17xf32>
    %cst_37 = arith.constant dense<0xFF800000> : vector<17xf32>
    %99 = vector.multi_reduction <maximumf>, %98, %cst_37 [1] : vector<17x17xf32> to vector<17xf32>
    %100 = vector.shape_cast %99 : vector<17xf32> to vector<17x1xf32>
    %101 = vector.broadcast %100 : vector<17x1xf32> to vector<17x17xf32>
    %102 = arith.subf %98, %101 : vector<17x17xf32>
    %103 = math.exp %102 : vector<17x17xf32>
    %cst_38 = arith.constant dense<0.000000e+00> : vector<17xf32>
    %104 = vector.multi_reduction <add>, %103, %cst_38 [1] : vector<17x17xf32> to vector<17xf32>
    %105 = vector.shape_cast %104 : vector<17xf32> to vector<17x1xf32>
    %106 = tpu.reciprocal %105 {approx = true} : vector<17x1xf32> -> vector<17x1xf32>
    %107 = vector.broadcast %106 : vector<17x1xf32> to vector<17x17xf32>
    %108 = arith.mulf %103, %107 : vector<17x17xf32>
    %109 = arith.truncf %108 : vector<17x17xf32> to vector<17x17xbf16>
    %cst_39 = arith.constant dense<0.000000e+00> : vector<17x128xf32>
    %110 = tpu.matmul %109, %95, %cst_39 {dimension_numbers = #tpu.dot_dimension_numbers<[1], [0], [0], [1], [0, 0, 1, 1], [], []>} : vector<17x17xbf16>, vector<17x128xbf16>, vector<17x128xf32> -> vector<17x128xf32>
    %c17_40 = arith.constant 17 : index
    %c128_41 = arith.constant 128 : index
    %111 = vector.load %arg22[%c17_40, %c128_41] : memref<68x256xf32, #tpu.memory_space<vmem>>, vector<17x128xf32>
    tpu.vector_store %arg22[%c17_40, %c128_41], %110 {strides = array<i32>} : memref<68x256xf32, #tpu.memory_space<vmem>>, vector<17x128xf32>,
    %112 = vector.extract_strided_slice %31 {offsets = [34, 0], sizes = [17, 768], strides = [1, 1]} : vector<68x768xf32> to vector<17x768xf32>
    %113 = arith.truncf %112 : vector<17x768xf32> to vector<17x768xbf16>
    %114 = vector.extract_strided_slice %113 {offsets = [0, 0], sizes = [17, 128], strides = [1, 1]} : vector<17x768xbf16> to vector<17x128xbf16>
    %115 = vector.extract_strided_slice %113 {offsets = [0, 256], sizes = [17, 128], strides = [1, 1]} : vector<17x768xbf16> to vector<17x128xbf16>
    %116 = vector.extract_strided_slice %113 {offsets = [0, 512], sizes = [17, 128], strides = [1, 1]} : vector<17x768xbf16> to vector<17x128xbf16>
    "tpu.trace_start"() <{level = 10 : i32, message = "qd,kd->qk"}> : () -> ()
    %cst_42 = arith.constant dense<0.000000e+00> : vector<17x17xf32>
    %117 = tpu.matmul %114, %115, %cst_42 {dimension_numbers = #tpu.dot_dimension_numbers<[1], [1], [0], [0], [0, 0, 1, 0], [], []>} : vector<17x128xbf16>, vector<17x128xbf16>, vector<17x17xf32> -> vector<17x17xf32>
    "tpu.trace_stop"() : () -> ()
    %cst_43 = arith.constant 0.0883883461 : f32
    %118 = vector.broadcast %cst_43 : f32 to vector<17x17xf32>
    %119 = arith.mulf %117, %118 : vector<17x17xf32>
    %cst_44 = arith.constant dense<0xFF800000> : vector<17xf32>
    %120 = vector.multi_reduction <maximumf>, %119, %cst_44 [1] : vector<17x17xf32> to vector<17xf32>
    %121 = vector.shape_cast %120 : vector<17xf32> to vector<17x1xf32>
    %122 = vector.broadcast %121 : vector<17x1xf32> to vector<17x17xf32>
    %123 = arith.subf %119, %122 : vector<17x17xf32>
    %124 = math.exp %123 : vector<17x17xf32>
    %cst_45 = arith.constant dense<0.000000e+00> : vector<17xf32>
    %125 = vector.multi_reduction <add>, %124, %cst_45 [1] : vector<17x17xf32> to vector<17xf32>
    %126 = vector.shape_cast %125 : vector<17xf32> to vector<17x1xf32>
    %127 = tpu.reciprocal %126 {approx = true} : vector<17x1xf32> -> vector<17x1xf32>
    %128 = vector.broadcast %127 : vector<17x1xf32> to vector<17x17xf32>
    %129 = arith.mulf %124, %128 : vector<17x17xf32>
    %130 = arith.truncf %129 : vector<17x17xf32> to vector<17x17xbf16>
    %cst_46 = arith.constant dense<0.000000e+00> : vector<17x128xf32>
    %131 = tpu.matmul %130, %116, %cst_46 {dimension_numbers = #tpu.dot_dimension_numbers<[1], [0], [0], [1], [0, 0, 1, 1], [], []>} : vector<17x17xbf16>, vector<17x128xbf16>, vector<17x128xf32> -> vector<17x128xf32>
    %c34 = arith.constant 34 : index
    %c0_47 = arith.constant 0 : index
    %132 = vector.load %arg22[%c34, %c0_47] : memref<68x256xf32, #tpu.memory_space<vmem>>, vector<17x128xf32>
    tpu.vector_store %arg22[%c34, %c0_47], %131 {strides = array<i32>} : memref<68x256xf32, #tpu.memory_space<vmem>>, vector<17x128xf32>,
    %133 = vector.extract_strided_slice %113 {offsets = [0, 128], sizes = [17, 128], strides = [1, 1]} : vector<17x768xbf16> to vector<17x128xbf16>
    %134 = vector.extract_strided_slice %113 {offsets = [0, 384], sizes = [17, 128], strides = [1, 1]} : vector<17x768xbf16> to vector<17x128xbf16>
    %135 = vector.extract_strided_slice %113 {offsets = [0, 640], sizes = [17, 128], strides = [1, 1]} : vector<17x768xbf16> to vector<17x128xbf16>
    "tpu.trace_start"() <{level = 10 : i32, message = "qd,kd->qk"}> : () -> ()
    %cst_48 = arith.constant dense<0.000000e+00> : vector<17x17xf32>
    %136 = tpu.matmul %133, %134, %cst_48 {dimension_numbers = #tpu.dot_dimension_numbers<[1], [1], [0], [0], [0, 0, 1, 0], [], []>} : vector<17x128xbf16>, vector<17x128xbf16>, vector<17x17xf32> -> vector<17x17xf32>
    "tpu.trace_stop"() : () -> ()
    %cst_49 = arith.constant 0.0883883461 : f32
    %137 = vector.broadcast %cst_49 : f32 to vector<17x17xf32>
    %138 = arith.mulf %136, %137 : vector<17x17xf32>
    %cst_50 = arith.constant dense<0xFF800000> : vector<17xf32>
    %139 = vector.multi_reduction <maximumf>, %138, %cst_50 [1] : vector<17x17xf32> to vector<17xf32>
    %140 = vector.shape_cast %139 : vector<17xf32> to vector<17x1xf32>
    %141 = vector.broadcast %140 : vector<17x1xf32> to vector<17x17xf32>
    %142 = arith.subf %138, %141 : vector<17x17xf32>
    %143 = math.exp %142 : vector<17x17xf32>
    %cst_51 = arith.constant dense<0.000000e+00> : vector<17xf32>
    %144 = vector.multi_reduction <add>, %143, %cst_51 [1] : vector<17x17xf32> to vector<17xf32>
    %145 = vector.shape_cast %144 : vector<17xf32> to vector<17x1xf32>
    %146 = tpu.reciprocal %145 {approx = true} : vector<17x1xf32> -> vector<17x1xf32>
    %147 = vector.broadcast %146 : vector<17x1xf32> to vector<17x17xf32>
    %148 = arith.mulf %143, %147 : vector<17x17xf32>
    %149 = arith.truncf %148 : vector<17x17xf32> to vector<17x17xbf16>
    %cst_52 = arith.constant dense<0.000000e+00> : vector<17x128xf32>
    %150 = tpu.matmul %149, %135, %cst_52 {dimension_numbers = #tpu.dot_dimension_numbers<[1], [0], [0], [1], [0, 0, 1, 1], [], []>} : vector<17x17xbf16>, vector<17x128xbf16>, vector<17x128xf32> -> vector<17x128xf32>
    %c34_53 = arith.constant 34 : index
    %c128_54 = arith.constant 128 : index
    %151 = vector.load %arg22[%c34_53, %c128_54] : memref<68x256xf32, #tpu.memory_space<vmem>>, vector<17x128xf32>
    tpu.vector_store %arg22[%c34_53, %c128_54], %150 {strides = array<i32>} : memref<68x256xf32, #tpu.memory_space<vmem>>, vector<17x128xf32>,
    %152 = vector.extract_strided_slice %31 {offsets = [51, 0], sizes = [17, 768], strides = [1, 1]} : vector<68x768xf32> to vector<17x768xf32>
    %153 = arith.truncf %152 : vector<17x768xf32> to vector<17x768xbf16>
    %154 = vector.extract_strided_slice %153 {offsets = [0, 0], sizes = [17, 128], strides = [1, 1]} : vector<17x768xbf16> to vector<17x128xbf16>
    %155 = vector.extract_strided_slice %153 {offsets = [0, 256], sizes = [17, 128], strides = [1, 1]} : vector<17x768xbf16> to vector<17x128xbf16>
    %156 = vector.extract_strided_slice %153 {offsets = [0, 512], sizes = [17, 128], strides = [1, 1]} : vector<17x768xbf16> to vector<17x128xbf16>
    "tpu.trace_start"() <{level = 10 : i32, message = "qd,kd->qk"}> : () -> ()
    %cst_55 = arith.constant dense<0.000000e+00> : vector<17x17xf32>
    %157 = tpu.matmul %154, %155, %cst_55 {dimension_numbers = #tpu.dot_dimension_numbers<[1], [1], [0], [0], [0, 0, 1, 0], [], []>} : vector<17x128xbf16>, vector<17x128xbf16>, vector<17x17xf32> -> vector<17x17xf32>
    "tpu.trace_stop"() : () -> ()
    %cst_56 = arith.constant 0.0883883461 : f32
    %158 = vector.broadcast %cst_56 : f32 to vector<17x17xf32>
    %159 = arith.mulf %157, %158 : vector<17x17xf32>
    %cst_57 = arith.constant dense<0xFF800000> : vector<17xf32>
    %160 = vector.multi_reduction <maximumf>, %159, %cst_57 [1] : vector<17x17xf32> to vector<17xf32>
    %161 = vector.shape_cast %160 : vector<17xf32> to vector<17x1xf32>
    %162 = vector.broadcast %161 : vector<17x1xf32> to vector<17x17xf32>
    %163 = arith.subf %159, %162 : vector<17x17xf32>
    %164 = math.exp %163 : vector<17x17xf32>
    %cst_58 = arith.constant dense<0.000000e+00> : vector<17xf32>
    %165 = vector.multi_reduction <add>, %164, %cst_58 [1] : vector<17x17xf32> to vector<17xf32>
    %166 = vector.shape_cast %165 : vector<17xf32> to vector<17x1xf32>
    %167 = tpu.reciprocal %166 {approx = true} : vector<17x1xf32> -> vector<17x1xf32>
    %168 = vector.broadcast %167 : vector<17x1xf32> to vector<17x17xf32>
    %169 = arith.mulf %164, %168 : vector<17x17xf32>
    %170 = arith.truncf %169 : vector<17x17xf32> to vector<17x17xbf16>
    %cst_59 = arith.constant dense<0.000000e+00> : vector<17x128xf32>
    %171 = tpu.matmul %170, %156, %cst_59 {dimension_numbers = #tpu.dot_dimension_numbers<[1], [0], [0], [1], [0, 0, 1, 1], [], []>} : vector<17x17xbf16>, vector<17x128xbf16>, vector<17x128xf32> -> vector<17x128xf32>
    %c51 = arith.constant 51 : index
    %c0_60 = arith.constant 0 : index
    %172 = vector.load %arg22[%c51, %c0_60] : memref<68x256xf32, #tpu.memory_space<vmem>>, vector<17x128xf32>
    tpu.vector_store %arg22[%c51, %c0_60], %171 {strides = array<i32>} : memref<68x256xf32, #tpu.memory_space<vmem>>, vector<17x128xf32>,
    %173 = vector.extract_strided_slice %153 {offsets = [0, 128], sizes = [17, 128], strides = [1, 1]} : vector<17x768xbf16> to vector<17x128xbf16>
    %174 = vector.extract_strided_slice %153 {offsets = [0, 384], sizes = [17, 128], strides = [1, 1]} : vector<17x768xbf16> to vector<17x128xbf16>
    %175 = vector.extract_strided_slice %153 {offsets = [0, 640], sizes = [17, 128], strides = [1, 1]} : vector<17x768xbf16> to vector<17x128xbf16>
    "tpu.trace_start"() <{level = 10 : i32, message = "qd,kd->qk"}> : () -> ()
    %cst_61 = arith.constant dense<0.000000e+00> : vector<17x17xf32>
    %176 = tpu.matmul %173, %174, %cst_61 {dimension_numbers = #tpu.dot_dimension_numbers<[1], [1], [0], [0], [0, 0, 1, 0], [], []>} : vector<17x128xbf16>, vector<17x128xbf16>, vector<17x17xf32> -> vector<17x17xf32>
    "tpu.trace_stop"() : () -> ()
    %cst_62 = arith.constant 0.0883883461 : f32
    %177 = vector.broadcast %cst_62 : f32 to vector<17x17xf32>
    %178 = arith.mulf %176, %177 : vector<17x17xf32>
    %cst_63 = arith.constant dense<0xFF800000> : vector<17xf32>
    %179 = vector.multi_reduction <maximumf>, %178, %cst_63 [1] : vector<17x17xf32> to vector<17xf32>
    %180 = vector.shape_cast %179 : vector<17xf32> to vector<17x1xf32>
    %181 = vector.broadcast %180 : vector<17x1xf32> to vector<17x17xf32>
    %182 = arith.subf %178, %181 : vector<17x17xf32>
    %183 = math.exp %182 : vector<17x17xf32>
    %cst_64 = arith.constant dense<0.000000e+00> : vector<17xf32>
    %184 = vector.multi_reduction <add>, %183, %cst_64 [1] : vector<17x17xf32> to vector<17xf32>
    %185 = vector.shape_cast %184 : vector<17xf32> to vector<17x1xf32>
    %186 = tpu.reciprocal %185 {approx = true} : vector<17x1xf32> -> vector<17x1xf32>
    %187 = vector.broadcast %186 : vector<17x1xf32> to vector<17x17xf32>
    %188 = arith.mulf %183, %187 : vector<17x17xf32>
    %189 = arith.truncf %188 : vector<17x17xf32> to vector<17x17xbf16>
    %cst_65 = arith.constant dense<0.000000e+00> : vector<17x128xf32>
    %190 = tpu.matmul %189, %175, %cst_65 {dimension_numbers = #tpu.dot_dimension_numbers<[1], [0], [0], [1], [0, 0, 1, 1], [], []>} : vector<17x17xbf16>, vector<17x128xbf16>, vector<17x128xf32> -> vector<17x128xf32>
    %c51_66 = arith.constant 51 : index
    %c128_67 = arith.constant 128 : index
    %191 = vector.load %arg22[%c51_66, %c128_67] : memref<68x256xf32, #tpu.memory_space<vmem>>, vector<17x128xf32>
    tpu.vector_store %arg22[%c51_66, %c128_67], %190 {strides = array<i32>} : memref<68x256xf32, #tpu.memory_space<vmem>>, vector<17x128xf32>,
    %c0_68 = arith.constant 0 : index
    %c0_69 = arith.constant 0 : index
    %192 = vector.load %arg22[%c0_68, %c0_69] : memref<68x256xf32, #tpu.memory_space<vmem>>, vector<68x256xf32>
    %c0_70 = arith.constant 0 : index
    %c0_71 = arith.constant 0 : index
    %c0_72 = arith.constant 0 : index
    %193 = vector.load %arg10[%c0_70, %c0_71, %c0_72] : memref<1x256x256xbf16, #tpu.memory_space<vmem>>, vector<1x256x256xbf16>
    %194 = vector.shape_cast %193 : vector<1x256x256xbf16> to vector<256x256xbf16>
    %195 = arith.truncf %192 : vector<68x256xf32> to vector<68x256xbf16>
    %cst_73 = arith.constant dense<0.000000e+00> : vector<68x256xf32>
    %196 = tpu.matmul %195, %194, %cst_73 {dimension_numbers = #tpu.dot_dimension_numbers<[1], [0], [0], [1], [0, 0, 1, 1], [], []>} : vector<68x256xbf16>, vector<256x256xbf16>, vector<68x256xf32> -> vector<68x256xf32>
    %197 = arith.addf %3, %196 : vector<68x256xf32>
    %c0_74 = arith.constant 0 : index
    %c0_75 = arith.constant 0 : index
    %c0_76 = arith.constant 0 : index
    %198 = vector.load %arg11[%c0_74, %c0_75, %c0_76] : memref<1x1x256xf32, #tpu.memory_space<vmem>>, vector<1x1x256xf32>
    %199 = vector.shape_cast %198 : vector<1x1x256xf32> to vector<1x256xf32>
    %200 = vector.broadcast %199 : vector<1x256xf32> to vector<68x256xf32>
    %201 = arith.addf %197, %200 : vector<68x256xf32>
    %c0_77 = arith.constant 0 : index
    %c0_78 = arith.constant 0 : index
    %c0_79 = arith.constant 0 : index
    %202 = vector.load %arg12[%c0_77, %c0_78, %c0_79] : memref<1x1x256xf32, #tpu.memory_space<vmem>>, vector<1x1x256xf32>
    %203 = vector.shape_cast %202 : vector<1x1x256xf32> to vector<1x256xf32>
    %c0_80 = arith.constant 0 : index
    %c0_81 = arith.constant 0 : index
    %c0_82 = arith.constant 0 : index
    %204 = vector.load %arg13[%c0_80, %c0_81, %c0_82] : memref<1x1x256xf32, #tpu.memory_space<vmem>>, vector<1x1x256xf32>
    %205 = vector.shape_cast %204 : vector<1x1x256xf32> to vector<1x256xf32>
    %cst_83 = arith.constant dense<0.000000e+00> : vector<68xf32>
    %206 = vector.multi_reduction <add>, %201, %cst_83 [1] : vector<68x256xf32> to vector<68xf32>
    %207 = vector.shape_cast %206 : vector<68xf32> to vector<68x1xf32>
    %cst_84 = arith.constant 2.560000e+02 : f32
    %208 = vector.broadcast %cst_84 : f32 to vector<68x1xf32>
    %209 = arith.divf %207, %208 : vector<68x1xf32>
    %210 = vector.broadcast %209 : vector<68x1xf32> to vector<68x256xf32>
    %211 = arith.subf %201, %210 : vector<68x256xf32>
    %212 = arith.mulf %211, %211 : vector<68x256xf32>
    %cst_85 = arith.constant dense<0.000000e+00> : vector<68xf32>
    %213 = vector.multi_reduction <add>, %212, %cst_85 [1] : vector<68x256xf32> to vector<68xf32>
    %214 = vector.shape_cast %213 : vector<68xf32> to vector<68x1xf32>
    %cst_86 = arith.constant 2.560000e+02 : f32
    %215 = vector.broadcast %cst_86 : f32 to vector<68x1xf32>
    %216 = arith.divf %214, %215 : vector<68x1xf32>
    %cst_87 = arith.constant 9.99999974E-6 : f32
    %217 = vector.broadcast %cst_87 : f32 to vector<68x1xf32>
    %218 = arith.addf %216, %217 : vector<68x1xf32>
    %219 = math.rsqrt %218 : vector<68x1xf32>
    %220 = vector.broadcast %219 : vector<68x1xf32> to vector<68x256xf32>
    %221 = arith.mulf %211, %220 : vector<68x256xf32>
    %222 = vector.broadcast %203 : vector<1x256xf32> to vector<68x256xf32>
    %223 = arith.mulf %221, %222 : vector<68x256xf32>
    %224 = vector.broadcast %205 : vector<1x256xf32> to vector<68x256xf32>
    %225 = arith.addf %223, %224 : vector<68x256xf32>
    %c0_88 = arith.constant 0 : index
    %c0_89 = arith.constant 0 : index
    %c0_90 = arith.constant 0 : index
    %226 = vector.load %arg14[%c0_88, %c0_89, %c0_90] : memref<1x256x1024xbf16, #tpu.memory_space<vmem>>, vector<1x256x1024xbf16>
    %227 = vector.shape_cast %226 : vector<1x256x1024xbf16> to vector<256x1024xbf16>
    %228 = arith.truncf %225 : vector<68x256xf32> to vector<68x256xbf16>
    %cst_91 = arith.constant dense<0.000000e+00> : vector<68x1024xf32>
    %229 = tpu.matmul %228, %227, %cst_91 {dimension_numbers = #tpu.dot_dimension_numbers<[1], [0], [0], [1], [0, 0, 1, 1], [], []>} : vector<68x256xbf16>, vector<256x1024xbf16>, vector<68x1024xf32> -> vector<68x1024xf32>
    %c0_92 = arith.constant 0 : index
    %c0_93 = arith.constant 0 : index
    %c0_94 = arith.constant 0 : index
    %230 = vector.load %arg15[%c0_92, %c0_93, %c0_94] : memref<1x1x1024xf32, #tpu.memory_space<vmem>>, vector<1x1x1024xf32>
    %231 = vector.shape_cast %230 : vector<1x1x1024xf32> to vector<1x1024xf32>
    %232 = vector.broadcast %231 : vector<1x1024xf32> to vector<68x1024xf32>
    %233 = arith.addf %229, %232 : vector<68x1024xf32>
    %cst_95 = arith.constant 5.000000e-01 : f32
    %234 = vector.broadcast %cst_95 : f32 to vector<68x1024xf32>
    %235 = arith.mulf %234, %233 : vector<68x1024xf32>
    %cst_96 = arith.constant 0.707106769 : f32
    %236 = vector.broadcast %cst_96 : f32 to vector<68x1024xf32>
    %237 = arith.mulf %233, %236 : vector<68x1024xf32>
    %238 = math.erf %237 : vector<68x1024xf32>
    %cst_97 = arith.constant 1.000000e+00 : f32
    %239 = vector.broadcast %cst_97 : f32 to vector<68x1024xf32>
    %240 = arith.addf %239, %238 : vector<68x1024xf32>
    %241 = arith.mulf %235, %240 : vector<68x1024xf32>
    %c0_98 = arith.constant 0 : index
    %c0_99 = arith.constant 0 : index
    %c0_100 = arith.constant 0 : index
    %242 = vector.load %arg16[%c0_98, %c0_99, %c0_100] : memref<1x1024x256xbf16, #tpu.memory_space<vmem>>, vector<1x1024x256xbf16>
    %243 = vector.shape_cast %242 : vector<1x1024x256xbf16> to vector<1024x256xbf16>
    %244 = arith.truncf %241 : vector<68x1024xf32> to vector<68x1024xbf16>
    %cst_101 = arith.constant dense<0.000000e+00> : vector<68x256xf32>
    %245 = tpu.matmul %244, %243, %cst_101 {dimension_numbers = #tpu.dot_dimension_numbers<[1], [0], [0], [1], [0, 0, 1, 1], [], []>} : vector<68x1024xbf16>, vector<1024x256xbf16>, vector<68x256xf32> -> vector<68x256xf32>
    %246 = arith.addf %201, %245 : vector<68x256xf32>
    %c0_102 = arith.constant 0 : index
    %c0_103 = arith.constant 0 : index
    %c0_104 = arith.constant 0 : index
    %247 = vector.load %arg17[%c0_102, %c0_103, %c0_104] : memref<1x1x256xf32, #tpu.memory_space<vmem>>, vector<1x1x256xf32>
    %248 = vector.shape_cast %247 : vector<1x1x256xf32> to vector<1x256xf32>
    %249 = vector.broadcast %248 : vector<1x256xf32> to vector<68x256xf32>
    %250 = arith.addf %246, %249 : vector<68x256xf32>
    %c0_105 = arith.constant 0 : index
    %c0_106 = arith.constant 0 : index
    %251 = vector.load %arg21[%c0_105, %c0_106] : memref<68x256xf32, #tpu.memory_space<vmem>>, vector<68x256xf32>
    tpu.vector_store %arg21[%c0_105, %c0_106], %250 {strides = array<i32>} : memref<68x256xf32, #tpu.memory_space<vmem>>, vector<68x256xf32>,
    %c3_i32 = arith.constant 3 : i32
    %252 = arith.cmpi eq, %arg1, %c3_i32 : i32
    %253 = arith.extui %252 : i1 to i32
    %c0_i32_107 = arith.constant 0 : i32
    %254 = arith.cmpi ne, %253, %c0_i32_107 : i32
    scf.if %254 {
      %255 = vector.extract_strided_slice %250 {offsets = [0, 0], sizes = [1, 256], strides = [1, 1]} : vector<68x256xf32> to vector<1x256xf32>
      %c0_108 = arith.constant 0 : index
      %c0_109 = arith.constant 0 : index
      %256 = vector.load %arg18[%c0_108, %c0_109] : memref<1x256xf32, #tpu.memory_space<vmem>>, vector<1x256xf32>
      %c0_110 = arith.constant 0 : index
      %c0_111 = arith.constant 0 : index
      %257 = vector.load %arg19[%c0_110, %c0_111] : memref<1x256xf32, #tpu.memory_space<vmem>>, vector<1x256xf32>
      %cst_112 = arith.constant dense<0.000000e+00> : vector<1xf32>
      %258 = vector.multi_reduction <add>, %255, %cst_112 [1] : vector<1x256xf32> to vector<1xf32>
      %259 = vector.shape_cast %258 : vector<1xf32> to vector<1x1xf32>
      %cst_113 = arith.constant 2.560000e+02 : f32
      %260 = vector.broadcast %cst_113 : f32 to vector<1x1xf32>
      %261 = arith.divf %259, %260 : vector<1x1xf32>
      %262 = vector.broadcast %261 : vector<1x1xf32> to vector<1x256xf32>
      %263 = arith.subf %255, %262 : vector<1x256xf32>
      %264 = arith.mulf %263, %263 : vector<1x256xf32>
      %cst_114 = arith.constant dense<0.000000e+00> : vector<1xf32>
      %265 = vector.multi_reduction <add>, %264, %cst_114 [1] : vector<1x256xf32> to vector<1xf32>
      %266 = vector.shape_cast %265 : vector<1xf32> to vector<1x1xf32>
      %cst_115 = arith.constant 2.560000e+02 : f32
      %267 = vector.broadcast %cst_115 : f32 to vector<1x1xf32>
      %268 = arith.divf %266, %267 : vector<1x1xf32>
      %cst_116 = arith.constant 9.99999974E-6 : f32
      %269 = vector.broadcast %cst_116 : f32 to vector<1x1xf32>
      %270 = arith.addf %268, %269 : vector<1x1xf32>
      %271 = math.rsqrt %270 : vector<1x1xf32>
      %272 = vector.broadcast %271 : vector<1x1xf32> to vector<1x256xf32>
      %273 = arith.mulf %263, %272 : vector<1x256xf32>
      %274 = arith.mulf %273, %256 : vector<1x256xf32>
      %275 = arith.addf %274, %257 : vector<1x256xf32>
      %c0_117 = arith.constant 0 : index
      %c0_118 = arith.constant 0 : index
      %c0_119 = arith.constant 0 : index
      %276 = vector.load %arg20[%c0_117, %c0_118, %c0_119] : memref<4x1x256xf32, #tpu.memory_space<vmem>>, vector<1x1x256xf32>
      %277 = vector.shape_cast %276 : vector<1x1x256xf32> to vector<1x256xf32>
      %278 = vector.shape_cast %275 : vector<1x256xf32> to vector<1x1x256xf32>
      tpu.vector_store %arg20[%c0_117, %c0_118, %c0_119], %278 {strides = array<i32>} : memref<4x1x256xf32, #tpu.memory_space<vmem>>, vector<1x1x256xf32>,
      %279 = vector.extract_strided_slice %250 {offsets = [17, 0], sizes = [1, 256], strides = [1, 1]} : vector<68x256xf32> to vector<1x256xf32>
      %c0_120 = arith.constant 0 : index
      %c0_121 = arith.constant 0 : index
      %280 = vector.load %arg18[%c0_120, %c0_121] : memref<1x256xf32, #tpu.memory_space<vmem>>, vector<1x256xf32>
      %c0_122 = arith.constant 0 : index
      %c0_123 = arith.constant 0 : index
      %281 = vector.load %arg19[%c0_122, %c0_123] : memref<1x256xf32, #tpu.memory_space<vmem>>, vector<1x256xf32>
      %cst_124 = arith.constant dense<0.000000e+00> : vector<1xf32>
      %282 = vector.multi_reduction <add>, %279, %cst_124 [1] : vector<1x256xf32> to vector<1xf32>
      %283 = vector.shape_cast %282 : vector<1xf32> to vector<1x1xf32>
      %cst_125 = arith.constant 2.560000e+02 : f32
      %284 = vector.broadcast %cst_125 : f32 to vector<1x1xf32>
      %285 = arith.divf %283, %284 : vector<1x1xf32>
      %286 = vector.broadcast %285 : vector<1x1xf32> to vector<1x256xf32>
      %287 = arith.subf %279, %286 : vector<1x256xf32>
      %288 = arith.mulf %287, %287 : vector<1x256xf32>
      %cst_126 = arith.constant dense<0.000000e+00> : vector<1xf32>
      %289 = vector.multi_reduction <add>, %288, %cst_126 [1] : vector<1x256xf32> to vector<1xf32>
      %290 = vector.shape_cast %289 : vector<1xf32> to vector<1x1xf32>
      %cst_127 = arith.constant 2.560000e+02 : f32
      %291 = vector.broadcast %cst_127 : f32 to vector<1x1xf32>
      %292 = arith.divf %290, %291 : vector<1x1xf32>
      %cst_128 = arith.constant 9.99999974E-6 : f32
      %293 = vector.broadcast %cst_128 : f32 to vector<1x1xf32>
      %294 = arith.addf %292, %293 : vector<1x1xf32>
      %295 = math.rsqrt %294 : vector<1x1xf32>
      %296 = vector.broadcast %295 : vector<1x1xf32> to vector<1x256xf32>
      %297 = arith.mulf %287, %296 : vector<1x256xf32>
      %298 = arith.mulf %297, %280 : vector<1x256xf32>
      %299 = arith.addf %298, %281 : vector<1x256xf32>
      %c1 = arith.constant 1 : index
      %c0_129 = arith.constant 0 : index
      %c0_130 = arith.constant 0 : index
      %300 = vector.load %arg20[%c1, %c0_129, %c0_130] : memref<4x1x256xf32, #tpu.memory_space<vmem>>, vector<1x1x256xf32>
      %301 = vector.shape_cast %300 : vector<1x1x256xf32> to vector<1x256xf32>
      %302 = vector.shape_cast %299 : vector<1x256xf32> to vector<1x1x256xf32>
      tpu.vector_store %arg20[%c1, %c0_129, %c0_130], %302 {strides = array<i32>} : memref<4x1x256xf32, #tpu.memory_space<vmem>>, vector<1x1x256xf32>,
      %303 = vector.extract_strided_slice %250 {offsets = [34, 0], sizes = [1, 256], strides = [1, 1]} : vector<68x256xf32> to vector<1x256xf32>
      %c0_131 = arith.constant 0 : index
      %c0_132 = arith.constant 0 : index
      %304 = vector.load %arg18[%c0_131, %c0_132] : memref<1x256xf32, #tpu.memory_space<vmem>>, vector<1x256xf32>
      %c0_133 = arith.constant 0 : index
      %c0_134 = arith.constant 0 : index
      %305 = vector.load %arg19[%c0_133, %c0_134] : memref<1x256xf32, #tpu.memory_space<vmem>>, vector<1x256xf32>
      %cst_135 = arith.constant dense<0.000000e+00> : vector<1xf32>
      %306 = vector.multi_reduction <add>, %303, %cst_135 [1] : vector<1x256xf32> to vector<1xf32>
      %307 = vector.shape_cast %306 : vector<1xf32> to vector<1x1xf32>
      %cst_136 = arith.constant 2.560000e+02 : f32
      %308 = vector.broadcast %cst_136 : f32 to vector<1x1xf32>
      %309 = arith.divf %307, %308 : vector<1x1xf32>
      %310 = vector.broadcast %309 : vector<1x1xf32> to vector<1x256xf32>
      %311 = arith.subf %303, %310 : vector<1x256xf32>
      %312 = arith.mulf %311, %311 : vector<1x256xf32>
      %cst_137 = arith.constant dense<0.000000e+00> : vector<1xf32>
      %313 = vector.multi_reduction <add>, %312, %cst_137 [1] : vector<1x256xf32> to vector<1xf32>
      %314 = vector.shape_cast %313 : vector<1xf32> to vector<1x1xf32>
      %cst_138 = arith.constant 2.560000e+02 : f32
      %315 = vector.broadcast %cst_138 : f32 to vector<1x1xf32>
      %316 = arith.divf %314, %315 : vector<1x1xf32>
      %cst_139 = arith.constant 9.99999974E-6 : f32
      %317 = vector.broadcast %cst_139 : f32 to vector<1x1xf32>
      %318 = arith.addf %316, %317 : vector<1x1xf32>
      %319 = math.rsqrt %318 : vector<1x1xf32>
      %320 = vector.broadcast %319 : vector<1x1xf32> to vector<1x256xf32>
      %321 = arith.mulf %311, %320 : vector<1x256xf32>
      %322 = arith.mulf %321, %304 : vector<1x256xf32>
      %323 = arith.addf %322, %305 : vector<1x256xf32>
      %c2 = arith.constant 2 : index
      %c0_140 = arith.constant 0 : index
      %c0_141 = arith.constant 0 : index
      %324 = vector.load %arg20[%c2, %c0_140, %c0_141] : memref<4x1x256xf32, #tpu.memory_space<vmem>>, vector<1x1x256xf32>
      %325 = vector.shape_cast %324 : vector<1x1x256xf32> to vector<1x256xf32>
      %326 = vector.shape_cast %323 : vector<1x256xf32> to vector<1x1x256xf32>
      tpu.vector_store %arg20[%c2, %c0_140, %c0_141], %326 {strides = array<i32>} : memref<4x1x256xf32, #tpu.memory_space<vmem>>, vector<1x1x256xf32>,
      %327 = vector.extract_strided_slice %250 {offsets = [51, 0], sizes = [1, 256], strides = [1, 1]} : vector<68x256xf32> to vector<1x256xf32>
      %c0_142 = arith.constant 0 : index
      %c0_143 = arith.constant 0 : index
      %328 = vector.load %arg18[%c0_142, %c0_143] : memref<1x256xf32, #tpu.memory_space<vmem>>, vector<1x256xf32>
      %c0_144 = arith.constant 0 : index
      %c0_145 = arith.constant 0 : index
      %329 = vector.load %arg19[%c0_144, %c0_145] : memref<1x256xf32, #tpu.memory_space<vmem>>, vector<1x256xf32>
      %cst_146 = arith.constant dense<0.000000e+00> : vector<1xf32>
      %330 = vector.multi_reduction <add>, %327, %cst_146 [1] : vector<1x256xf32> to vector<1xf32>
      %331 = vector.shape_cast %330 : vector<1xf32> to vector<1x1xf32>
      %cst_147 = arith.constant 2.560000e+02 : f32
      %332 = vector.broadcast %cst_147 : f32 to vector<1x1xf32>
      %333 = arith.divf %331, %332 : vector<1x1xf32>
      %334 = vector.broadcast %333 : vector<1x1xf32> to vector<1x256xf32>
      %335 = arith.subf %327, %334 : vector<1x256xf32>
      %336 = arith.mulf %335, %335 : vector<1x256xf32>
      %cst_148 = arith.constant dense<0.000000e+00> : vector<1xf32>
      %337 = vector.multi_reduction <add>, %336, %cst_148 [1] : vector<1x256xf32> to vector<1xf32>
      %338 = vector.shape_cast %337 : vector<1xf32> to vector<1x1xf32>
      %cst_149 = arith.constant 2.560000e+02 : f32
      %339 = vector.broadcast %cst_149 : f32 to vector<1x1xf32>
      %340 = arith.divf %338, %339 : vector<1x1xf32>
      %cst_150 = arith.constant 9.99999974E-6 : f32
      %341 = vector.broadcast %cst_150 : f32 to vector<1x1xf32>
      %342 = arith.addf %340, %341 : vector<1x1xf32>
      %343 = math.rsqrt %342 : vector<1x1xf32>
      %344 = vector.broadcast %343 : vector<1x1xf32> to vector<1x256xf32>
      %345 = arith.mulf %335, %344 : vector<1x256xf32>
      %346 = arith.mulf %345, %328 : vector<1x256xf32>
      %347 = arith.addf %346, %329 : vector<1x256xf32>
      %c3 = arith.constant 3 : index
      %c0_151 = arith.constant 0 : index
      %c0_152 = arith.constant 0 : index
      %348 = vector.load %arg20[%c3, %c0_151, %c0_152] : memref<4x1x256xf32, #tpu.memory_space<vmem>>, vector<1x1x256xf32>
      %349 = vector.shape_cast %348 : vector<1x1x256xf32> to vector<1x256xf32>
      %350 = vector.shape_cast %347 : vector<1x256xf32> to vector<1x1x256xf32>
      tpu.vector_store %arg20[%c3, %c0_151, %c0_152], %350 {strides = array<i32>} : memref<4x1x256xf32, #tpu.memory_space<vmem>>, vector<1x1x256xf32>,
    } else {
    }
    return
  }
  func.func @transform_0(%arg0: i32, %arg1: i32) -> (i32, i32) {
    %c0_i32 = arith.constant 0 : i32
    %c0_i32_0 = arith.constant 0 : i32
    return %arg0, %c0_i32 : i32, i32
  }
  func.func @transform_1(%arg0: i32, %arg1: i32) -> (i32, i32) {
    %c0_i32 = arith.constant 0 : i32
    %c0_i32_0 = arith.constant 0 : i32
    %c0_i32_1 = arith.constant 0 : i32
    return %c0_i32, %c0_i32_0 : i32, i32
  }
  func.func @transform_2(%arg0: i32, %arg1: i32) -> (i32, i32) {
    %c0_i32 = arith.constant 0 : i32
    %c0_i32_0 = arith.constant 0 : i32
    %c0_i32_1 = arith.constant 0 : i32
    return %c0_i32, %c0_i32_0 : i32, i32
  }
  func.func @transform_3(%arg0: i32, %arg1: i32) -> (i32, i32) {
    %c0_i32 = arith.constant 0 : i32
    %c0_i32_0 = arith.constant 0 : i32
    %c0_i32_1 = arith.constant 0 : i32
    return %c0_i32, %c0_i32_0 : i32, i32
  }
  func.func @transform_4(%arg0: i32, %arg1: i32) -> (i32, i32) {
    %c0_i32 = arith.constant 0 : i32
    %c0_i32_0 = arith.constant 0 : i32
    %c0_i32_1 = arith.constant 0 : i32
    return %c0_i32, %c0_i32_0 : i32, i32
  }
  func.func @transform_5(%arg0: i32, %arg1: i32) -> (i32, i32, i32) {
    %c0_i32 = arith.constant 0 : i32
    %c0_i32_0 = arith.constant 0 : i32
    %c0_i32_1 = arith.constant 0 : i32
    return %arg1, %c0_i32, %c0_i32_0 : i32, i32, i32
  }
  func.func @transform_6(%arg0: i32, %arg1: i32) -> (i32, i32, i32) {
    %c0_i32 = arith.constant 0 : i32
    %c0_i32_0 = arith.constant 0 : i32
    %c0_i32_1 = arith.constant 0 : i32
    return %arg1, %c0_i32, %c0_i32_0 : i32, i32, i32
  }
  func.func @transform_7(%arg0: i32, %arg1: i32) -> (i32, i32, i32) {
    %c0_i32 = arith.constant 0 : i32
    %c0_i32_0 = arith.constant 0 : i32
    %c0_i32_1 = arith.constant 0 : i32
    return %arg1, %c0_i32, %c0_i32_0 : i32, i32, i32
  }
  func.func @transform_8(%arg0: i32, %arg1: i32) -> (i32, i32, i32) {
    %c0_i32 = arith.constant 0 : i32
    %c0_i32_0 = arith.constant 0 : i32
    %c0_i32_1 = arith.constant 0 : i32
    return %arg1, %c0_i32, %c0_i32_0 : i32, i32, i32
  }
  func.func @transform_9(%arg0: i32, %arg1: i32) -> (i32, i32, i32) {
    %c0_i32 = arith.constant 0 : i32
    %c0_i32_0 = arith.constant 0 : i32
    %c0_i32_1 = arith.constant 0 : i32
    return %arg1, %c0_i32, %c0_i32_0 : i32, i32, i32
  }
  func.func @transform_10(%arg0: i32, %arg1: i32) -> (i32, i32, i32) {
    %c0_i32 = arith.constant 0 : i32
    %c0_i32_0 = arith.constant 0 : i32
    %c0_i32_1 = arith.constant 0 : i32
    return %arg1, %c0_i32, %c0_i32_0 : i32, i32, i32
  }
  func.func @transform_11(%arg0: i32, %arg1: i32) -> (i32, i32, i32) {
    %c0_i32 = arith.constant 0 : i32
    %c0_i32_0 = arith.constant 0 : i32
    %c0_i32_1 = arith.constant 0 : i32
    return %arg1, %c0_i32, %c0_i32_0 : i32, i32, i32
  }
  func.func @transform_12(%arg0: i32, %arg1: i32) -> (i32, i32, i32) {
    %c0_i32 = arith.constant 0 : i32
    %c0_i32_0 = arith.constant 0 : i32
    %c0_i32_1 = arith.constant 0 : i32
    return %arg1, %c0_i32, %c0_i32_0 : i32, i32, i32
  }
  func.func @transform_13(%arg0: i32, %arg1: i32) -> (i32, i32, i32) {
    %c0_i32 = arith.constant 0 : i32
    %c0_i32_0 = arith.constant 0 : i32
    %c0_i32_1 = arith.constant 0 : i32
    return %arg1, %c0_i32, %c0_i32_0 : i32, i32, i32
  }
  func.func @transform_14(%arg0: i32, %arg1: i32) -> (i32, i32, i32) {
    %c0_i32 = arith.constant 0 : i32
    %c0_i32_0 = arith.constant 0 : i32
    %c0_i32_1 = arith.constant 0 : i32
    return %arg1, %c0_i32, %c0_i32_0 : i32, i32, i32
  }
  func.func @transform_15(%arg0: i32, %arg1: i32) -> (i32, i32, i32) {
    %c0_i32 = arith.constant 0 : i32
    %c0_i32_0 = arith.constant 0 : i32
    %c0_i32_1 = arith.constant 0 : i32
    return %arg1, %c0_i32, %c0_i32_0 : i32, i32, i32
  }
  func.func @transform_16(%arg0: i32, %arg1: i32) -> (i32, i32) {
    %c0_i32 = arith.constant 0 : i32
    %c0_i32_0 = arith.constant 0 : i32
    %c0_i32_1 = arith.constant 0 : i32
    return %c0_i32, %c0_i32_0 : i32, i32
  }
  func.func @transform_17(%arg0: i32, %arg1: i32) -> (i32, i32) {
    %c0_i32 = arith.constant 0 : i32
    %c0_i32_0 = arith.constant 0 : i32
    %c0_i32_1 = arith.constant 0 : i32
    return %c0_i32, %c0_i32_0 : i32, i32
  }
  func.func @transform_18(%arg0: i32, %arg1: i32) -> (i32, i32, i32) {
    %c0_i32 = arith.constant 0 : i32
    %c0_i32_0 = arith.constant 0 : i32
    %c0_i32_1 = arith.constant 0 : i32
    return %arg0, %c0_i32, %c0_i32_0 : i32, i32, i32
  }
}

</mosaic_0001>

<bundles_post_ra>
// kernel: tpu_custom_call.1
= control target key start
LH: loop header
LB: loop body
LE: loop exit
PB: predicated region body
PF: predicated region fallthrough
CT: control target
= control target key end

     0   :  { %s13286_s0 = inlined_call_operand.vmem [shape: f32[128,192], index: 0, kind: input, shape index: {}]   ;;  %s13287_s1 = inlined_call_operand.hbm [shape: bf16[192,256], index: 1, kind: input, shape index: {}]   ;;  %s13288_s2 = inlined_call_operand.hbm [shape: f32[1,256], index: 2, kind: input, shape index: {}]   ;;  %s13289_s3 = inlined_call_operand.hbm [shape: f32[1,256], index: 3, kind: input, shape index: {}]   ;;  %s13290_s4 = inlined_call_operand.hbm [shape: f32[16,256], index: 4, kind: input, shape index: {}]   ;;  %s13291_s5 = inlined_call_operand.hbm [shape: f32[4,1,256], index: 5, kind: input, shape index: {}]   ;;  %s13292_s6 = inlined_call_operand.hbm [shape: f32[4,1,256], index: 6, kind: input, shape index: {}]   ;;  %s13293_s7 = inlined_call_operand.hbm [shape: bf16[4,256,768], index: 7, kind: input, shape index: {}]   ;;  %s13294_s8 = inlined_call_operand.hbm [shape: bf16[4,256,256], index: 8, kind: input, shape index: {}]   ;;  %s13295_s9 = inlined_call_operand.hbm [shape: f32[4,1,256], index: 9, kind: input, shape index: {}]   ;;  %s13296_s10 = inlined_call_operand.hbm [shape: f32[4,1,256], index: 10, kind: input, shape index: {}]   ;;  %s13297_s11 = inlined_call_operand.hbm [shape: f32[4,1,256], index: 11, kind: input, shape index: {}]   ;;  %s13298_s12 = inlined_call_operand.hbm [shape: bf16[4,256,1024], index: 12, kind: input, shape index: {}]   ;;  %s13299_s13 = inlined_call_operand.hbm [shape: f32[4,1,1024], index: 13, kind: input, shape index: {}]   ;;  %s13300_s14 = inlined_call_operand.hbm [shape: bf16[4,1024,256], index: 14, kind: input, shape index: {}]   ;;  %s13301_s15 = inlined_call_operand.hbm [shape: f32[4,1,256], index: 15, kind: input, shape index: {}]   ;;  %s13302_s16 = inlined_call_operand.hbm [shape: f32[1,256], index: 16, kind: input, shape index: {}]   ;;  %s13303_s17 = inlined_call_operand.hbm [shape: f32[1,256], index: 17, kind: input, shape index: {}]   ;;  %s13304_s18 = inlined_call_operand.hbm [shape: f32[8,1,256], index: 18, kind: output, shape index: {}]  }
   0x1   :  { %13386 = sst [smem:[#allocation88_spill]] %s13286_s0 }
   0x2   :  { %13387 = sst [smem:[#allocation89_spill]] %s13287_s1 }
   0x3   :  { %13388 = sst [smem:[#allocation90_spill]] %s13288_s2 }
   0x4   :  { %13389 = sst [smem:[#allocation91_spill]] %s13289_s3 }
   0x5   :  { %13390 = sst [smem:[#allocation92_spill]] %s13291_s5 }
   0x6   :  { %13391 = sst [smem:[#allocation93_spill]] %s13292_s6 }
   0x7   :  { %13392 = sst [smem:[#allocation94_spill]] %s13293_s7 }
   0x8   :  { %13393 = sst [smem:[#allocation95_spill]] %s13294_s8 }
   0x9   :  { %13394 = sst [smem:[#allocation96_spill]] %s13295_s9 }
   0xa   :  { %13395 = sst [smem:[#allocation97_spill]] %s13296_s10 }
   0xb   :  { %13396 = sst [smem:[#allocation98_spill]] %s13300_s14 }
   0xc   :  { %13397 = sst [smem:[#allocation99_spill]] %s13301_s15 }
   0xd   :  { %13398 = sst [smem:[#allocation100_spill]] %s13302_s16 }
   0xe   :  { %13399 = sst [smem:[#allocation101_spill]] %s13303_s17 }
   0xf   :  { %13400 = sst [smem:[#allocation102_spill]] %s13304_s18 }
  0x10   :  { %23 = vsyncpa [#allocation5], 0 }
  0x11   :  { %24 = vsyncpa [#allocation8], 0 }
  0x12   :  { %25 = vsyncpa [#allocation11], 0 }
  0x13   :  { %26 = vsyncpa [#allocation6], 0 }
  0x14   :  { %28 = vsyncpa [#allocation6 + $0x1], 0  ;;  %s10480_s27 = smov 0   ;;  %s10482_s28 = smov 0  }
  0x15   :  { %s10484_s29 = smov 0   ;;  %s10486_s30 = smov 0  }
  0x16   :  { %s10488_s0 = smov 0   ;;  %s10490_s19 = smov 0  }
  0x17   :  { %s10492_s1 = smov 0   ;;  %s10494_s20 = smov 0  }
  0x18   :  { %s10496_s21 = smov 0   ;;  %s10498_s22 = smov 0  }
  0x19   :  { %s10500_s2 = smov 0  }
  0x1a LB: > { %13401 = sst [smem:[#allocation33_spill]] %s10313_s27  ;;  %s10534_s23 = sadd.s32 4294967295, %s10353_s2   ;;  %s10353_s2 = sphi %s10500_s2, %s34_s2   ;;  %s10349_s22 = sphi %s10498_s22, %s13592_s22   ;;  %s10345_s21 = sphi %s10496_s21, %s13594_s21   ;;  %s10341_s20 = sphi %s10494_s20, %s13590_s20   ;;  %s10337_s1 = sphi %s10492_s1, %s13593_s1   ;;  %s10333_s19 = sphi %s10490_s19, %s13589_s19   ;;  %s10329_s0 = sphi %s10488_s0, %s13588_s0   ;;  %s10325_s30 = sphi %s10486_s30, %s13587_s30   ;;  %s10321_s29 = sphi %s10484_s29, %s13586_s29   ;;  %s10317_s28 = sphi %s10482_s28, %s13585_s28   ;;  %s10313_s27 = sphi %s10480_s27, %s13584_s27  }
  0x1b   : > { %13402 = sst [smem:[#allocation34_spill]] %s10317_s28  ;;  %s7986_s24 = sadd.s32 4294967294, %s10353_s2  }
  0x1c   : > { %13403 = sst [smem:[#allocation35_spill]] %s10321_s29  ;;  %p176_p0 = scmp.ne.s32.totalorder %s10329_s0, %s10325_s30 }
  0x1d   : > { %13404 = sst [smem:[#allocation36_spill]] %s10329_s0  ;;  %p13321_p1 = scmp.eq.s32.totalorder %s10534_s23, 0 }
  0x1e   : > { %13405 = sst [smem:[#allocation37_spill]] %s10333_s19  ;;  %p501_p2 = scmp.ne.s32.totalorder %s10321_s29, %s10317_s28 }
  0x1f   : > { %13406 = sst [smem:[#allocation38_spill]] %s10337_s1  ;;  %p10544_p3 = por %p13321_p1, %p176_p0 }
  0x20   : > { %13407 = sst [smem:[#allocation39_spill]] %s10341_s20  ;;  %p502_p4 = scmp.eq.s32.totalorder %s10534_s23, 7 }
  0x21   : > { %13408 = sst [smem:[#allocation40_spill]] %s10349_s22  ;;  %p507_p5 = scmp.ne.s32.totalorder %s10317_s28, %s10313_s27 }
  0x22   : > { %13409 = sst [smem:[#allocation41_spill]] %s10353_s2  ;;  %p508_p6 = scmp.eq.s32.totalorder %s7986_s24, 7 }
  0x23   : > { %13410 = sst [smem:[#allocation42_spill]] %s10534_s23  ;;  %p10551_p7 = por %p502_p4, %p501_p2 }
  0x24   : > { %s13411_s26 = scalar_select %p10544_p3, 1, 0 }
  0x25   : > { %s13413_s18 = scalar_select %p10551_p7, 1, 0 }
  0x26   : > { %13412 = sst [smem:[#allocation43_spill]] %s13411_s26  ;;  %p7987_p8 = scmp.ge.s32.totalorder %s10353_s2, 1 }
  0x27   : > { %13414 = sst [smem:[#allocation44_spill]] %s13413_s18  ;;  %p10556_p9 = por %p508_p6, %p507_p5 }
  0x28   : > { %p515_p10 = scmp.lt.s32.totalorder %s10353_s2, 9  ;;  %s10355_s25 = smov [#allocation4]  }
  0x29   : > { %s13415_s1 = scalar_select %p10556_p9, 1, 0 }
  0x2a   : > { %p10561_p11 = pnand %p7987_p8, %p515_p10  ;;  %s527_s20 = sshll.u32 %s10355_s25, 4  ;;  %s528_s20 = int_to_ptr.vmem [resolvable:$true] %s527_s20 }
  0x2b   : > { %13416 = sst [smem:[#allocation45_spill]] %s13415_s1  ;;  %s13420_s28 = sld [smem:[#allocation89_spill]] }
  0x2c   : > { %s13417_s30 = scalar_select %p10561_p11, 1, 0 }
  0x2d   : > { %p8814_p12 = pneg %p10561_p11 }
  0x2e   : > { %13418 = sst [smem:[#allocation46_spill]] %s13417_s30 }
  0x2f   : > { %p10569_p13 = pnand %p8814_p12, %p13321_p1 }
  0x31   : > { %s13419_s24 = scalar_select %p10569_p13, 1, 0 }
  0x32   : > { %s13421_s26 = smov %s13420_s28  ;;  %s9713_s1 = scalar_lea.hbm %s13420_s28, 3072 }
  0x33   : > { %p9714_p0 = scmp.ne.s32.totalorder %s13421_s26, %s9713_s1  ;;  %p10581_p2 = pneg %p10569_p13 }
  0x34   : > { %p9720_p6 = scmp.lt.u32.totalorder %s9713_s1, %s13421_s26 }
  0x35   : > { %s13422_s25 = scalar_select %p10581_p2, 1, 0 }
  0x36   : > { %p9716_p4 = pnand %p10581_p2, %p9714_p0 }
  0x38   : > { %p9717_p5 = pneg %p9716_p4 }
  0x3a   : > { %p9722_p8 = pnand %p9720_p6, %p9717_p5 }
  0x3c   : > { %9725 = shalt.err (!%p9722_p8)
}
  0x3d   : > { %s9726_s18 = scalar_lea.vmem %s528_s20, 3072  ;;  %p9734_p9 = scmp.lt.s32.totalorder %s528_s20, %s528_s20 }
  0x3e   : > { %p9727_p10 = scmp.ne.s32.totalorder %s528_s20, %s9726_s18  ;;  %p9735_p7 = scmp.lt.s32.totalorder %s9726_s18, %s9726_s18 }
  0x40   : > { %p9729_p12 = pnand %p9727_p10, %p10581_p2  ;;  %p9736_p3 = por %p9735_p7, %p9734_p9 }
  0x42   : > { %p9730_p1 = pneg %p9729_p12 }
  0x44   : > { %p9737_p11 = pnand %p9736_p3, %p9730_p1 }
  0x46   : > { %9740 = shalt.err (!%p9737_p11)
}
  0x47   : > { %s13325_s15 = smov 128   ;;  %s13327_s17 = smov 8  }
  0x48   : > { %8817 = dma.hbm_to_vmem [thread:$0]  (!%p10569_p13), %s13421_s26, 3072, %s528_s20, [#allocation5], %s13325_s15, %s13325_s15, %s13327_s17  }
  0x49   : > { %s43_s1 = sadd.s32 1, %s10345_s21  ;;  %s46_s23 = sadd.s32 1, %s10349_s22 }
  0x4a   : > { %p44_p1 = scmp.ge.s32.totalorder %s43_s1, 4  ;;  %s163_s30 = sadd.s32 1, %s10333_s19 }
  0x4b   : > { %p170_p3 = scmp.ne.s32.totalorder %s10333_s19, %s10329_s0  ;;  %p171_p7 = scmp.eq.s32.totalorder %s10353_s2, 0 }
  0x4c   : > { %s13596_s1 = smov (%p44_p1, %s43_s1), 0  ;;  %s13598_s23 = smov (!%p44_p1, %s46_s23), %s10349_s22 }
  0x4d   : > { %13423 = sst [smem:[#allocation47_spill]] %s13596_s1  ;;  %s160_s18 = ssub.s32 %s10345_s21, %s13596_s1 }
  0x4e   : > { %p48_p9 = scmp.ge.s32.totalorder %s13598_s23, 2  ;;  %p161_p11 = scmp.eq.s32.totalorder %s160_s18, 0 }
  0x4f   : > { %p172_p0 = por %p171_p7, %p170_p3  ;;  %p8877_p4 = scmp.lt.s32.totalorder %s10353_s2, 8 }
  0x50   : > { %s13600_s23 = smov (%p48_p9, %s13598_s23), 0  ;;  %s608_s28 = sand.u32 1, %s10353_s2  }
  0x51   : > { %13424 = sst [smem:[#allocation48_spill]] %s13600_s23  ;;  %s488_s27 = ssub.s32 %s10349_s22, %s13600_s23 }
  0x52   : > { %s10615_s20 = scalar_select %p161_p11, %s10333_s19, %s163_s30  }
  0x53   : > { %p489_p5 = scmp.eq.s32.totalorder %s488_s27, 0  ;;  %s10621_s15 = sand.u32 1, %s10333_s19  }
  0x54   : > { %13425 = sst [smem:[#allocation49_spill]] %s10615_s20  ;;  %s10624_s17 = sshll.u32 %s10345_s21, 5 }
  0x55   : > { %s13426_s26 = sadd.s32 1, %s10321_s29  ;;  %s10632_s18 = sshll.u32 %s10621_s15, 1 }
  0x56   : > { %s10629_s1 = scalar_select %p489_p5, %s10321_s29, %s13426_s26  }
  0x57   : > { %s13428_s5 = sld [smem:[#allocation92_spill]]  ;;  %p10640_p6 = pnand %p8877_p4, %p172_p0 }
  0x58   : > { %13427 = sst [smem:[#allocation50_spill]] %s10629_s1  ;;  %s612_s23 = scalar_lea.vmem [#allocation12], %s10632_s18 }
  0x59   : > { %s13429_s27 = scalar_select %p10640_p6, 1, 0 }
  0x5a   : > { %s620_s26 = sshll.u32 %s612_s23, 4  ;;  %s10647_s22 = scalar_lea.sflag [#allocation5], %s608_s28  ;;  %s10645_s26 = int_to_ptr.vmem [resolvable:$true] %s620_s26 }
  0x5b   : > { %p10653_p10 = pneg %p10640_p6 }
  0x5d   : > { %s10638_s30 = scalar_lea.hbm %s13428_s5, %s10624_s17  ;;  %s9746_s1 = scalar_lea.hbm %s13428_s5, 128 }
  0x5e   : > { %s9741_s20 = scalar_lea.hbm %s10638_s30, 32  ;;  %p9747_p3 = scmp.lt.u32.totalorder %s10638_s30, %s13428_s5 }
  0x5f   : > { %p9742_p8 = scmp.ne.s32.totalorder %s10638_s30, %s9741_s20  ;;  %p9748_p7 = scmp.lt.u32.totalorder %s9746_s1, %s9741_s20 }
  0x60   : > { %s13430_s16 = scalar_select %p10653_p10, 1, 0 }
  0x61   : > { %p9744_p12 = pnand %p10653_p10, %p9742_p8  ;;  %p9749_p9 = por %p9748_p7, %p9747_p3 }
  0x62   : > { %p9750_p11 = scmp.lt.u32.totalorder %s9741_s20, %s10638_s30 }
  0x63   : > { %p9745_p1 = pneg %p9744_p12 }
  0x64   : > { %p9751_p0 = por %p9750_p11, %p9749_p9 }
  0x66   : > { %p9752_p4 = pnand %p9751_p0, %p9745_p1 }
  0x68   : > { %9755 = shalt.err (!%p9752_p4)
}
  0x69   : > { %s9756_s28 = scalar_lea.vmem %s10645_s26, 32  ;;  %s10358_s19 = smov [#allocation12]  }
  0x6a   : > { %p9757_p5 = scmp.ne.s32.totalorder %s10645_s26, %s9756_s28  ;;  %s9761_s0 = sshll.u32 %s10358_s19, 4  ;;  %s9762_s0 = int_to_ptr.vmem [resolvable:$false] %s9761_s0 }
  0x6b   : > { %s9763_s29 = scalar_lea.vmem %s9762_s0, 64  ;;  %p9764_p13 = scmp.lt.s32.totalorder %s10645_s26, %s9762_s0 }
  0x6c   : > { %p9759_p8 = pnand %p9757_p5, %p10653_p10  ;;  %p9765_p2 = scmp.lt.s32.totalorder %s9763_s29, %s9756_s28 }
  0x6e   : > { %p9760_p12 = pneg %p9759_p8  ;;  %p9766_p3 = por %p9765_p2, %p9764_p13 }
  0x70   : > { %p9767_p7 = pnand %p9766_p3, %p9760_p12 }
  0x72   : > { %9770 = shalt.err (!%p9767_p7)
}
  0x73   : > { %8836 = dma.hbm_to_vmem [thread:$0]  (!%p10640_p6), %s10638_s30, 32, %s10645_s26, %s10647_s22  }
  0x74   : > { %s13431_s6 = sld [smem:[#allocation93_spill]]  ;;  %s631_s28 = scalar_lea.vmem [#allocation13], %s10632_s18 }
  0x75   : > { %s639_s19 = sshll.u32 %s631_s28, 4  ;;  %s8763_s0 = smul.u32 768, %s10621_s15  ;;  %s640_s19 = int_to_ptr.vmem [resolvable:$true] %s639_s19 }
  0x7a   : > { %s10681_s23 = scalar_lea.hbm %s13431_s6, %s10624_s17  ;;  %s9776_s26 = scalar_lea.hbm %s13431_s6, 128 }
  0x7b   : > { %s9771_s29 = scalar_lea.hbm %s10681_s23, 32  ;;  %p9777_p9 = scmp.lt.u32.totalorder %s10681_s23, %s13431_s6 }
  0x7c   : > { %p9772_p13 = scmp.ne.s32.totalorder %s10681_s23, %s9771_s29  ;;  %p9778_p11 = scmp.lt.u32.totalorder %s9776_s26, %s9771_s29 }
  0x7d   : > { %p9780_p4 = scmp.lt.u32.totalorder %s9771_s29, %s10681_s23 }
  0x7e   : > { %p9774_p2 = pnand %p9772_p13, %p10653_p10  ;;  %p9779_p0 = por %p9778_p11, %p9777_p9 }
  0x80   : > { %p9775_p1 = pneg %p9774_p2  ;;  %p9781_p5 = por %p9780_p4, %p9779_p0 }
  0x82   : > { %p9782_p8 = pnand %p9781_p5, %p9775_p1 }
  0x84   : > { %9785 = shalt.err (!%p9782_p8)
}
  0x85   : > { %s9786_s28 = scalar_lea.vmem %s640_s19, 32  ;;  %s10359_s2 = smov [#allocation13]  }
  0x86   : > { %p9787_p12 = scmp.ne.s32.totalorder %s640_s19, %s9786_s28  ;;  %s9791_s14 = sshll.u32 %s10359_s2, 4  ;;  %s9792_s14 = int_to_ptr.vmem [resolvable:$false] %s9791_s14 }
  0x87   : > { %s9793_s5 = scalar_lea.vmem %s9792_s14, 64  ;;  %p9794_p13 = scmp.lt.s32.totalorder %s640_s19, %s9792_s14 }
  0x88   : > { %p9789_p3 = pnand %p9787_p12, %p10653_p10  ;;  %p9795_p2 = scmp.lt.s32.totalorder %s9793_s5, %s9786_s28 }
  0x8a   : > { %p9790_p7 = pneg %p9789_p3  ;;  %p9796_p6 = por %p9795_p2, %p9794_p13 }
  0x8c   : > { %p9797_p9 = pnand %p9796_p6, %p9790_p7 }
  0x8e   : > { %9800 = shalt.err (!%p9797_p9)
}
  0x8f   : > { %p13432_p11 = scmp.ne.s32.totalorder %s13429_s27, 0  ;;  %s8764_s29 = smul.u32 12288, %s10345_s21 }
  0x90   : > { %s650_s30 = scalar_lea.vmem [#allocation14], %s8763_s0  ;;  %s13433_s7 = sld [smem:[#allocation94_spill]] }
  0x91   : > { %8839 = dma.hbm_to_vmem [thread:$0]  (!%p13432_p11), %s10681_s23, 32, %s640_s19, %s10647_s22  }
  0x92   : > { %s657_s26 = sshll.u32 %s650_s30, 4  ;;  %s8002_s14 = sshll.u32 %s10621_s15, 8  ;;  %s10709_s26 = int_to_ptr.vmem [resolvable:$true] %s657_s26 }
  0x96   : > { %s10707_s20 = scalar_lea.hbm %s13433_s7, %s8764_s29  ;;  %s9806_s0 = scalar_lea.hbm %s13433_s7, 49152 }
  0x97   : > { %s9801_s28 = scalar_lea.hbm %s10707_s20, 12288  ;;  %p9807_p4 = scmp.lt.u32.totalorder %s10707_s20, %s13433_s7 }
  0x98   : > { %p9802_p6 = scmp.ne.s32.totalorder %s10707_s20, %s9801_s28  ;;  %p9808_p5 = scmp.lt.u32.totalorder %s9806_s0, %s9801_s28 }
  0x99   : > { %p9810_p12 = scmp.lt.u32.totalorder %s9801_s28, %s10707_s20 }
  0x9a   : > { %p9804_p1 = pnand %p9802_p6, %p10653_p10  ;;  %p9809_p8 = por %p9808_p5, %p9807_p4 }
  0x9c   : > { %p9805_p0 = pneg %p9804_p1  ;;  %p9811_p3 = por %p9810_p12, %p9809_p8 }
  0x9e   : > { %p9812_p7 = pnand %p9811_p3, %p9805_p0 }
  0xa0   : > { %9815 = shalt.err (!%p9812_p7)
}
  0xa1   : > { %s9816_s29 = scalar_lea.vmem %s10709_s26, 12288  ;;  %s10360_s1 = smov [#allocation14]  }
  0xa2   : > { %p9817_p13 = scmp.ne.s32.totalorder %s10709_s26, %s9816_s29  ;;  %s9821_s2 = sshll.u32 %s10360_s1, 4  ;;  %s9822_s2 = int_to_ptr.vmem [resolvable:$false] %s9821_s2 }
  0xa3   : > { %s9823_s23 = scalar_lea.vmem %s9822_s2, 24576  ;;  %p9824_p6 = scmp.lt.s32.totalorder %s10709_s26, %s9822_s2 }
  0xa4   : > { %p9819_p2 = pnand %p9817_p13, %p10653_p10  ;;  %p9825_p1 = scmp.lt.s32.totalorder %s9823_s23, %s9816_s29 }
  0xa6   : > { %p9820_p9 = pneg %p9819_p2  ;;  %p9826_p4 = por %p9825_p1, %p9824_p6 }
  0xa8   : > { %p9827_p5 = pnand %p9826_p4, %p9820_p9 }
  0xaa   : > { %9830 = shalt.err (!%p9827_p5)
}
  0xab   : > { %s10361_s28 = smov 384   ;;  %s10362_s19 = smov 24  }
  0xac   : > { %8842 = dma.hbm_to_vmem [thread:$0]  (!%p13432_p11), %s10707_s20, 12288, %s10709_s26, %s10647_s22, %s10361_s28, %s10361_s28, %s10362_s19  }
  0xad   : > { %s8488_s0 = sshll.u32 %s10345_s21, 12  ;;  %s13434_s8 = sld [smem:[#allocation95_spill]] }
  0xae   : > { %s671_s29 = scalar_lea.vmem [#allocation15], %s8002_s14 }
  0xaf   : > { %s678_s2 = sshll.u32 %s671_s29, 4  ;;  %s10742_s2 = int_to_ptr.vmem [resolvable:$true] %s678_s2 }
  0xb3   : > { %s10738_s1 = scalar_lea.hbm %s13434_s8, %s8488_s0  ;;  %s9836_s28 = scalar_lea.hbm %s13434_s8, 16384 }
  0xb4   : > { %s9831_s23 = scalar_lea.hbm %s10738_s1, 4096  ;;  %p9837_p3 = scmp.lt.u32.totalorder %s10738_s1, %s13434_s8 }
  0xb5   : > { %p9832_p0 = scmp.ne.s32.totalorder %s10738_s1, %s9831_s23  ;;  %p9838_p7 = scmp.lt.u32.totalorder %s9836_s28, %s9831_s23 }
  0xb6   : > { %p9840_p2 = scmp.lt.u32.totalorder %s9831_s23, %s10738_s1 }
  0xb7   : > { %p9834_p8 = pnand %p9832_p0, %p10653_p10  ;;  %p9839_p13 = por %p9838_p7, %p9837_p3 }
  0xb9   : > { %p9835_p12 = pneg %p9834_p8  ;;  %p9841_p9 = por %p9840_p2, %p9839_p13 }
  0xbb   : > { %p9842_p6 = pnand %p9841_p9, %p9835_p12 }
  0xbd   : > { %9845 = shalt.err (!%p9842_p6)
}
  0xbe   : > { %s9846_s14 = scalar_lea.vmem %s10742_s2, 4096  ;;  %s10363_s5 = smov [#allocation15]  }
  0xbf   : > { %p9847_p1 = scmp.ne.s32.totalorder %s10742_s2, %s9846_s14  ;;  %s9851_s30 = sshll.u32 %s10363_s5, 4  ;;  %s9852_s30 = int_to_ptr.vmem [resolvable:$false] %s9851_s30 }
  0xc0   : > { %s9853_s29 = scalar_lea.vmem %s9852_s30, 8192  ;;  %p9854_p0 = scmp.lt.s32.totalorder %s10742_s2, %s9852_s30 }
  0xc1   : > { %p9849_p4 = pnand %p9847_p1, %p10653_p10  ;;  %p9855_p8 = scmp.lt.s32.totalorder %s9853_s29, %s9846_s14 }
  0xc3   : > { %p9850_p5 = pneg %p9849_p4  ;;  %p9856_p3 = por %p9855_p8, %p9854_p0 }
  0xc5   : > { %p9857_p7 = pnand %p9856_p3, %p9850_p5 }
  0xc7   : > { %9860 = shalt.err (!%p9857_p7)
}
  0xc8   : > { %s13435_s23 = smov 8   ;;  %s13436_s26 = smov 128  }
  0xc9   : > { %8845 = dma.hbm_to_vmem [thread:$0]  (!%p13432_p11), %s10738_s1, 4096, %s10742_s2, %s10647_s22, %s13436_s26, %s13436_s26, %s13435_s23  }
  0xca   : > { %s13437_s9 = sld [smem:[#allocation96_spill]]  ;;  %s692_s0 = scalar_lea.vmem [#allocation16], %s10632_s18 }
  0xcb   : > { %s700_s14 = sshll.u32 %s692_s0, 4  ;;  %s701_s14 = int_to_ptr.vmem [resolvable:$true] %s700_s14 }
  0xd0   : > { %s10773_s19 = scalar_lea.hbm %s13437_s9, %s10624_s17  ;;  %s9866_s1 = scalar_lea.hbm %s13437_s9, 128 }
  0xd1   : > { %s9861_s5 = scalar_lea.hbm %s10773_s19, 32  ;;  %p9867_p9 = scmp.lt.u32.totalorder %s10773_s19, %s13437_s9 }
  0xd2   : > { %p9862_p12 = scmp.ne.s32.totalorder %s10773_s19, %s9861_s5  ;;  %p9868_p6 = scmp.lt.u32.totalorder %s9866_s1, %s9861_s5 }
  0xd3   : > { %p9870_p4 = scmp.lt.u32.totalorder %s9861_s5, %s10773_s19 }
  0xd4   : > { %p9864_p13 = pnand %p9862_p12, %p10653_p10  ;;  %p9869_p1 = por %p9868_p6, %p9867_p9 }
  0xd6   : > { %p9865_p2 = pneg %p9864_p13  ;;  %p9871_p5 = por %p9870_p4, %p9869_p1 }
  0xd8   : > { %p9872_p0 = pnand %p9871_p5, %p9865_p2 }
  0xda   : > { %9875 = shalt.err (!%p9872_p0)
}
  0xdb   : > { %s9876_s28 = scalar_lea.vmem %s701_s14, 32  ;;  %s10364_s0 = smov [#allocation16]  }
  0xdc   : > { %p9877_p8 = scmp.ne.s32.totalorder %s701_s14, %s9876_s28  ;;  %s9881_s6 = sshll.u32 %s10364_s0, 4  ;;  %s9882_s6 = int_to_ptr.vmem [resolvable:$false] %s9881_s6 }
  0xdd   : > { %s9883_s30 = scalar_lea.vmem %s9882_s6, 64  ;;  %p9884_p12 = scmp.lt.s32.totalorder %s701_s14, %s9882_s6 }
  0xde   : > { %p9879_p3 = pnand %p9877_p8, %p10653_p10  ;;  %p9885_p13 = scmp.lt.s32.totalorder %s9883_s30, %s9876_s28 }
  0xe0   : > { %p9880_p7 = pneg %p9879_p3  ;;  %p9886_p11 = por %p9885_p13, %p9884_p12 }
  0xe2   : > { %p9887_p6 = pnand %p9886_p11, %p9880_p7 }
  0xe4   : > { %9890 = shalt.err (!%p9887_p6)
}
  0xe5   : > { %p13438_p9 = scmp.ne.s32.totalorder %s13429_s27, 0  ;;  %s13439_s10 = sld [smem:[#allocation97_spill]] }
  0xe6   : > { %s711_s6 = scalar_lea.vmem [#allocation17], %s10632_s18 }
  0xe7   : > { %8848 = dma.hbm_to_vmem [thread:$0]  (!%p13438_p9), %s10773_s19, 32, %s701_s14, %s10647_s22  }
  0xe8   : > { %s719_s2 = sshll.u32 %s711_s6, 4  ;;  %s720_s2 = int_to_ptr.vmem [resolvable:$true] %s719_s2 }
  0xeb   : > { %s10798_s1 = scalar_lea.hbm %s13439_s10, %s10624_s17  ;;  %s9896_s19 = scalar_lea.hbm %s13439_s10, 128 }
  0xec   : > { %s9891_s20 = scalar_lea.hbm %s10798_s1, 32  ;;  %p9897_p4 = scmp.lt.u32.totalorder %s10798_s1, %s13439_s10 }
  0xed   : > { %p9892_p11 = scmp.ne.s32.totalorder %s10798_s1, %s9891_s20  ;;  %p9898_p5 = scmp.lt.u32.totalorder %s9896_s19, %s9891_s20 }
  0xee   : > { %p9900_p8 = scmp.lt.u32.totalorder %s9891_s20, %s10798_s1 }
  0xef   : > { %p9894_p2 = pnand %p9892_p11, %p10653_p10  ;;  %p9899_p0 = por %p9898_p5, %p9897_p4 }
  0xf1   : > { %p9895_p1 = pneg %p9894_p2  ;;  %p9901_p3 = por %p9900_p8, %p9899_p0 }
  0xf3   : > { %p9902_p7 = pnand %p9901_p3, %p9895_p1 }
  0xf5   : > { %9905 = shalt.err (!%p9902_p7)
}
  0xf6   : > { %s9906_s5 = scalar_lea.vmem %s720_s2, 32  ;;  %s10365_s29 = smov [#allocation17]  }
  0xf7   : > { %p9907_p12 = scmp.ne.s32.totalorder %s720_s2, %s9906_s5  ;;  %s9911_s6 = sshll.u32 %s10365_s29, 4  ;;  %s9912_s6 = int_to_ptr.vmem [resolvable:$false] %s9911_s6 }
  0xf8   : > { %s9913_s28 = scalar_lea.vmem %s9912_s6, 64  ;;  %p9914_p11 = scmp.lt.s32.totalorder %s720_s2, %s9912_s6 }
  0xf9   : > { %p9909_p13 = pnand %p9907_p12, %p10653_p10  ;;  %p9915_p2 = scmp.lt.s32.totalorder %s9913_s28, %s9906_s5 }
  0xfb   : > { %p9910_p6 = pneg %p9909_p13  ;;  %p9916_p9 = por %p9915_p2, %p9914_p11 }
  0xfd   : > { %p9917_p4 = pnand %p9916_p9, %p9910_p6 }
  0xff   : > { %9920 = shalt.err (!%p9917_p4)
}
 0x100   : > { %p13440_p5 = scmp.ne.s32.totalorder %s13429_s27, 0  ;;  %s10823_s19 = scalar_lea.hbm %s13297_s11, %s10624_s17 }
 0x101   : > { %s730_s14 = scalar_lea.vmem [#allocation18], %s10632_s18  ;;  %s9921_s29 = scalar_lea.hbm %s10823_s19, 32 }
 0x102   : > { %8851 = dma.hbm_to_vmem [thread:$0]  (!%p13440_p5), %s10798_s1, 32, %s720_s2, %s10647_s22  }
 0x103   : > { %s738_s30 = sshll.u32 %s730_s14, 4  ;;  %p9922_p9 = scmp.ne.s32.totalorder %s10823_s19, %s9921_s29  ;;  %s739_s30 = int_to_ptr.vmem [resolvable:$true] %s738_s30 }
 0x104   : > { %s9926_s2 = scalar_lea.hbm %s13297_s11, 128  ;;  %p9927_p8 = scmp.lt.u32.totalorder %s10823_s19, %s13297_s11 }
 0x105   : > { %p9924_p1 = pnand %p9922_p9, %p10653_p10  ;;  %p9928_p3 = scmp.lt.u32.totalorder %s9926_s2, %s9921_s29 }
 0x106   : > { %p9930_p12 = scmp.lt.u32.totalorder %s9921_s29, %s10823_s19 }
 0x107   : > { %p9925_p0 = pneg %p9924_p1  ;;  %p9929_p7 = por %p9928_p3, %p9927_p8 }
 0x109   : > { %p9931_p13 = por %p9930_p12, %p9929_p7 }
 0x10b   : > { %p9932_p6 = pnand %p9931_p13, %p9925_p0 }
 0x10d   : > { %9935 = shalt.err (!%p9932_p6)
}
 0x10e   : > { %s9936_s0 = scalar_lea.vmem %s739_s30, 32  ;;  %s10366_s14 = smov [#allocation18]  }
 0x10f   : > { %p9937_p11 = scmp.ne.s32.totalorder %s739_s30, %s9936_s0  ;;  %s9941_s5 = sshll.u32 %s10366_s14, 4  ;;  %s9942_s5 = int_to_ptr.vmem [resolvable:$false] %s9941_s5 }
 0x110   : > { %s9943_s6 = scalar_lea.vmem %s9942_s5, 64  ;;  %p9944_p9 = scmp.lt.s32.totalorder %s739_s30, %s9942_s5 }
 0x111   : > { %p9939_p2 = pnand %p9937_p11, %p10653_p10  ;;  %p9945_p1 = scmp.lt.s32.totalorder %s9943_s6, %s9936_s0 }
 0x113   : > { %p9940_p4 = pneg %p9939_p2  ;;  %p9946_p5 = por %p9945_p1, %p9944_p9 }
 0x115   : > { %p9947_p3 = pnand %p9946_p5, %p9940_p4 }
 0x117   : > { %9950 = shalt.err (!%p9947_p3)
}
 0x118   : > { %p13441_p8 = scmp.ne.s32.totalorder %s13429_s27, 0  ;;  %s13347_s29 = sshll.u32 %s10345_s21, 14 }
 0x119   : > { %s10851_s28 = scalar_lea.hbm %s13298_s12, %s13347_s29  ;;  %s13442_s5 = sshll.u32 %s10621_s15, 10 }
 0x11a   : > { %8854 = dma.hbm_to_vmem [thread:$0]  (!%p13441_p8), %s10823_s19, 32, %s739_s30, %s10647_s22  }
 0x11b   : > { %s749_s20 = scalar_lea.vmem [#allocation19], %s13442_s5  ;;  %s9951_s14 = scalar_lea.hbm %s10851_s28, 16384 }
 0x11c   : > { %s756_s0 = sshll.u32 %s749_s20, 4  ;;  %p9952_p5 = scmp.ne.s32.totalorder %s10851_s28, %s9951_s14  ;;  %s10855_s0 = int_to_ptr.vmem [resolvable:$true] %s756_s0 }
 0x11d   : > { %s9956_s6 = scalar_lea.hbm %s13298_s12, 65536  ;;  %p9957_p12 = scmp.lt.u32.totalorder %s10851_s28, %s13298_s12 }
 0x11e   : > { %p9954_p0 = pnand %p9952_p5, %p10653_p10  ;;  %p9958_p13 = scmp.lt.u32.totalorder %s9956_s6, %s9951_s14 }
 0x11f   : > { %p9960_p11 = scmp.lt.u32.totalorder %s9951_s14, %s10851_s28 }
 0x120   : > { %p9955_p7 = pneg %p9954_p0  ;;  %p9959_p6 = por %p9958_p13, %p9957_p12 }
 0x122   : > { %p9961_p2 = por %p9960_p11, %p9959_p6 }
 0x124   : > { %p9962_p4 = pnand %p9961_p2, %p9955_p7 }
 0x126   : > { %9965 = shalt.err (!%p9962_p4)
}
 0x127   : > { %s9966_s5 = scalar_lea.vmem %s10855_s0, 16384  ;;  %s10367_s20 = smov [#allocation19]  }
 0x128   : > { %p9967_p9 = scmp.ne.s32.totalorder %s10855_s0, %s9966_s5  ;;  %s9971_s19 = sshll.u32 %s10367_s20, 4  ;;  %s9972_s19 = int_to_ptr.vmem [resolvable:$false] %s9971_s19 }
 0x129   : > { %s9973_s30 = scalar_lea.vmem %s9972_s19, 32768  ;;  %p9974_p5 = scmp.lt.s32.totalorder %s10855_s0, %s9972_s19 }
 0x12a   : > { %p9969_p1 = pnand %p9967_p9, %p10653_p10  ;;  %p9975_p0 = scmp.lt.s32.totalorder %s9973_s30, %s9966_s5 }
 0x12c   : > { %p9970_p3 = pneg %p9969_p1  ;;  %p9976_p12 = por %p9975_p0, %p9974_p5 }
 0x12e   : > { %p9977_p13 = pnand %p9976_p12, %p9970_p3 }
 0x130   : > { %9980 = shalt.err (!%p9977_p13)
}
 0x131   : > { %s10368_s14 = smov 512   ;;  %s10369_s6 = smov 32  }
 0x132   : > { %8857 = dma.hbm_to_vmem [thread:$0]  (!%p13441_p8), %s10851_s28, 16384, %s10855_s0, %s10647_s22, %s10368_s14, %s10368_s14, %s10369_s6  }
 0x133   : > { %s10370_s1 = smov [#allocation7]   ;;  %s8017_s20 = sshll.u32 %s10621_s15, 3 }
 0x134   : > { %s541_s2 = sshll.u32 %s10370_s1, 4  ;;  %s13443_s5 = sld [smem:[#allocation90_spill]]  ;;  %s542_s2 = int_to_ptr.vmem [resolvable:$true] %s541_s2 }
 0x135   : > { %p13444_p6 = scmp.ne.s32.totalorder %s13422_s25, 0 }
 0x13a   : > { %s9981_s30 = scalar_lea.hbm %s13443_s5, 32 }
 0x13b   : > { %p9982_p7 = scmp.ne.s32.totalorder %s13443_s5, %s9981_s30  ;;  %p9988_p4 = scmp.lt.u32.totalorder %s9981_s30, %s13443_s5 }
 0x13d   : > { %p9984_p11 = pnand %p9982_p7, %p13444_p6 }
 0x13f   : > { %p9985_p2 = pneg %p9984_p11 }
 0x141   : > { %p9990_p9 = pnand %p9988_p4, %p9985_p2 }
 0x143   : > { %9993 = shalt.err (!%p9990_p9)
}
 0x144   : > { %s9994_s28 = scalar_lea.vmem %s542_s2, 32  ;;  %p10002_p0 = scmp.lt.s32.totalorder %s542_s2, %s542_s2 }
 0x145   : > { %p9995_p1 = scmp.ne.s32.totalorder %s542_s2, %s9994_s28  ;;  %p10003_p12 = scmp.lt.s32.totalorder %s9994_s28, %s9994_s28 }
 0x147   : > { %p9997_p3 = pnand %p9995_p1, %p13444_p6  ;;  %p10004_p13 = por %p10003_p12, %p10002_p0 }
 0x149   : > { %p9998_p5 = pneg %p9997_p3 }
 0x14b   : > { %p10005_p8 = pnand %p10004_p13, %p9998_p5 }
 0x14d   : > { %10008 = shalt.err (!%p10005_p8)
}
 0x14e   : > { %p13445_p7 = scmp.ne.s32.totalorder %s13419_s24, 0  ;;  %s8493_s9 = sshll.u32 %s10345_s21, 7 }
 0x14f   : > { %s770_s10 = scalar_lea.vmem [#allocation20], %s8017_s20  ;;  %s776_s6 = scalar_lea.hbm %s13299_s13, %s8493_s9 }
 0x150   : > { %8820 = dma.hbm_to_vmem [thread:$0]  (!%p13445_p7), %s13443_s5, 32, %s542_s2, [#allocation8]  }
 0x151   : > { %s778_s29 = sshll.u32 %s770_s10, 4  ;;  %s10009_s1 = scalar_lea.hbm %s776_s6, 128  ;;  %s779_s29 = int_to_ptr.vmem [resolvable:$true] %s778_s29 }
 0x152   : > { %p10010_p11 = scmp.ne.s32.totalorder %s776_s6, %s10009_s1  ;;  %s10014_s28 = scalar_lea.hbm %s13299_s13, 512 }
 0x153   : > { %p10015_p4 = scmp.lt.u32.totalorder %s776_s6, %s13299_s13  ;;  %p10016_p9 = scmp.lt.u32.totalorder %s10014_s28, %s10009_s1 }
 0x154   : > { %p10012_p8 = pnand %p10010_p11, %p10653_p10  ;;  %p10018_p3 = scmp.lt.u32.totalorder %s10009_s1, %s776_s6 }
 0x155   : > { %p10017_p1 = por %p10016_p9, %p10015_p4 }
 0x156   : > { %p10013_p2 = pneg %p10012_p8 }
 0x157   : > { %p10019_p5 = por %p10018_p3, %p10017_p1 }
 0x159   : > { %p10020_p0 = pnand %p10019_p5, %p10013_p2 }
 0x15b   : > { %10023 = shalt.err (!%p10020_p0)
}
 0x15c   : > { %s10024_s2 = scalar_lea.vmem %s779_s29, 128  ;;  %s10371_s20 = smov [#allocation20]  }
 0x15d   : > { %p10025_p12 = scmp.ne.s32.totalorder %s779_s29, %s10024_s2  ;;  %s10029_s9 = sshll.u32 %s10371_s20, 4  ;;  %s10030_s9 = int_to_ptr.vmem [resolvable:$false] %s10029_s9 }
 0x15e   : > { %s10031_s10 = scalar_lea.vmem %s10030_s9, 256  ;;  %p10032_p8 = scmp.lt.s32.totalorder %s779_s29, %s10030_s9 }
 0x15f   : > { %p10027_p13 = pnand %p10025_p12, %p10653_p10  ;;  %p10033_p7 = scmp.lt.s32.totalorder %s10031_s10, %s10024_s2 }
 0x161   : > { %p10028_p11 = pneg %p10027_p13  ;;  %p10034_p6 = por %p10033_p7, %p10032_p8 }
 0x163   : > { %p10035_p4 = pnand %p10034_p6, %p10028_p11 }
 0x165   : > { %10038 = shalt.err (!%p10035_p4)
}
 0x166   : > { %p13446_p9 = scmp.ne.s32.totalorder %s13429_s27, 0  ;;  %s10372_s0 = smov [#allocation9]  }
 0x167   : > { %s552_s14 = sshll.u32 %s10372_s0, 4  ;;  %s10373_s1 = smov [#allocation10]   ;;  %s553_s14 = int_to_ptr.vmem [resolvable:$true] %s552_s14 }
 0x168   : > { %8860 = dma.hbm_to_vmem [thread:$0]  (!%p13446_p9), %s776_s6, 128, %s779_s29, %s10647_s22  }
 0x169   : > { %s562_s19 = sshll.u32 %s10373_s1, 4  ;;  %s13447_s3 = sld [smem:[#allocation91_spill]]  ;;  %s10915_s19 = int_to_ptr.vmem [resolvable:$true] %s562_s19 }
 0x16a   : > { %p13448_p7 = scmp.ne.s32.totalorder %s13422_s25, 0 }
 0x16f   : > { %s10039_s7 = scalar_lea.hbm %s13447_s3, 32 }
 0x170   : > { %p10040_p6 = scmp.ne.s32.totalorder %s13447_s3, %s10039_s7  ;;  %p10046_p3 = scmp.lt.u32.totalorder %s10039_s7, %s13447_s3 }
 0x172   : > { %p10042_p2 = pnand %p10040_p6, %p13448_p7 }
 0x174   : > { %p10043_p1 = pneg %p10042_p2 }
 0x176   : > { %p10048_p5 = pnand %p10046_p3, %p10043_p1 }
 0x178   : > { %10051 = shalt.err (!%p10048_p5)
}
 0x179   : > { %s10052_s6 = scalar_lea.vmem %s553_s14, 32  ;;  %p10060_p11 = scmp.lt.s32.totalorder %s553_s14, %s553_s14 }
 0x17a   : > { %p10053_p0 = scmp.ne.s32.totalorder %s553_s14, %s10052_s6  ;;  %p10061_p8 = scmp.lt.s32.totalorder %s10052_s6, %s10052_s6 }
 0x17c   : > { %p10055_p12 = pnand %p10053_p0, %p13448_p7  ;;  %p10062_p4 = por %p10061_p8, %p10060_p11 }
 0x17e   : > { %p10056_p13 = pneg %p10055_p12 }
 0x180   : > { %p10063_p9 = pnand %p10062_p4, %p10056_p13 }
 0x182   : > { %10066 = shalt.err (!%p10063_p9)
}
 0x183   : > { %p13449_p6 = scmp.ne.s32.totalorder %s13419_s24, 0  ;;  %s10067_s30 = scalar_lea.hbm %s13290_s4, 512 }
 0x184   : > { %p10068_p2 = scmp.ne.s32.totalorder %s13290_s4, %s10067_s30  ;;  %p10074_p9 = scmp.lt.u32.totalorder %s10067_s30, %s13290_s4 }
 0x185   : > { %8823 = dma.hbm_to_vmem [thread:$0]  (!%p13449_p6), %s13447_s3, 32, %s553_s14, [#allocation8]  }
 0x186   : > { %p10070_p1 = pnand %p10068_p2, %p13448_p7 }
 0x188   : > { %p10071_p3 = pneg %p10070_p1 }
 0x18a   : > { %p10076_p5 = pnand %p10074_p9, %p10071_p3 }
 0x18c   : > { %10079 = shalt.err (!%p10076_p5)
}
 0x18d   : > { %s10080_s14 = scalar_lea.vmem %s10915_s19, 512  ;;  %p10088_p11 = scmp.lt.s32.totalorder %s10915_s19, %s10915_s19 }
 0x18e   : > { %p10081_p0 = scmp.ne.s32.totalorder %s10915_s19, %s10080_s14  ;;  %p10089_p8 = scmp.lt.s32.totalorder %s10080_s14, %s10080_s14 }
 0x190   : > { %p10083_p12 = pnand %p10081_p0, %p13448_p7  ;;  %p10090_p4 = por %p10089_p8, %p10088_p11 }
 0x192   : > { %p10084_p13 = pneg %p10083_p12 }
 0x194   : > { %p10091_p2 = pnand %p10090_p4, %p10084_p13 }
 0x196   : > { %10094 = shalt.err (!%p10091_p2)
}
 0x197   : > { %s10374_s20 = smov 256   ;;  %s10375_s29 = smov 16  }
 0x198   : > { %8826 = dma.hbm_to_vmem [thread:$0]  (!%p13449_p6), %s13290_s4, 512, %s10915_s19, [#allocation11], %s10374_s20, %s10374_s20, %s10375_s29  }
 0x199   : > { %s13450_s10 = sshll.u32 %s10345_s21, 14  ;;  %s13451_s30 = sld [smem:[#allocation98_spill]] }
 0x19a   : > { %s13453_s8 = sshll.u32 %s10621_s15, 10  ;;  %s10376_s3 = smov [#allocation23]  }
 0x19b   : > { %s789_s2 = scalar_lea.vmem [#allocation21], %s13453_s8  ;;  %s10969_s5 = sshll.u32 %s10376_s3, 4  ;;  %s577_s5 = int_to_ptr.vmem [resolvable:$true] %s10969_s5 }
 0x19c   : > { %s796_s14 = sshll.u32 %s789_s2, 4  ;;  %s10967_s14 = int_to_ptr.vmem [resolvable:$true] %s796_s14 }
 0x19f   : > { %s13452_s7 = smov %s13451_s30  ;;  %s10963_s28 = scalar_lea.hbm %s13451_s30, %s13450_s10 }
 0x1a0   : > { %s10095_s6 = scalar_lea.hbm %s10963_s28, 16384  ;;  %s10100_s15 = scalar_lea.hbm %s13452_s7, 65536 }
 0x1a1   : > { %p10096_p1 = scmp.ne.s32.totalorder %s10963_s28, %s10095_s6  ;;  %p10101_p5 = scmp.lt.u32.totalorder %s10963_s28, %s13452_s7 }
 0x1a2   : > { %p10102_p0 = scmp.lt.u32.totalorder %s10100_s15, %s10095_s6  ;;  %p10104_p13 = scmp.lt.u32.totalorder %s10095_s6, %s10963_s28 }
 0x1a3   : > { %p10098_p3 = pnand %p10096_p1, %p10653_p10 }
 0x1a4   : > { %p10103_p12 = por %p10102_p0, %p10101_p5 }
 0x1a5   : > { %p10099_p9 = pneg %p10098_p3 }
 0x1a6   : > { %p10105_p11 = por %p10104_p13, %p10103_p12 }
 0x1a8   : > { %p10106_p8 = pnand %p10105_p11, %p10099_p9 }
 0x1aa   : > { %10109 = shalt.err (!%p10106_p8)
}
 0x1ab   : > { %s10110_s3 = scalar_lea.vmem %s10967_s14, 16384  ;;  %s10377_s10 = smov [#allocation21]  }
 0x1ac   : > { %p10111_p4 = scmp.ne.s32.totalorder %s10967_s14, %s10110_s3  ;;  %s10115_s0 = sshll.u32 %s10377_s10, 4  ;;  %s10116_s0 = int_to_ptr.vmem [resolvable:$false] %s10115_s0 }
 0x1ad   : > { %s10117_s1 = scalar_lea.vmem %s10116_s0, 32768  ;;  %p10118_p3 = scmp.lt.s32.totalorder %s10967_s14, %s10116_s0 }
 0x1ae   : > { %p10113_p2 = pnand %p10111_p4, %p10653_p10  ;;  %p10119_p6 = scmp.lt.s32.totalorder %s10117_s1, %s10110_s3 }
 0x1b0   : > { %p10114_p1 = pneg %p10113_p2  ;;  %p10120_p5 = por %p10119_p6, %p10118_p3 }
 0x1b2   : > { %p10121_p0 = pnand %p10120_p5, %p10114_p1 }
 0x1b4   : > { %10124 = shalt.err (!%p10121_p0)
}
 0x1b5   : > { %p13454_p9 = scmp.ne.s32.totalorder %s13429_s27, 0  ;;  %s13455_s2 = sld [smem:[#allocation100_spill]] }
 0x1b7   : > { %8863 = dma.hbm_to_vmem [thread:$0]  (!%p13454_p9), %s10963_s28, 16384, %s10967_s14, %s10647_s22, %s13436_s26, %s13436_s26, %s13435_s23  }
 0x1bb   : > { %s13456_s6 = smov %s13455_s2  ;;  %s10125_s19 = scalar_lea.hbm %s13455_s2, 32 }
 0x1bc   : > { %p10126_p6 = scmp.ne.s32.totalorder %s13456_s6, %s10125_s19  ;;  %p10132_p11 = scmp.lt.u32.totalorder %s10125_s19, %s13456_s6 }
 0x1be   : > { %p10128_p12 = pnand %p10126_p6, %p13448_p7 }
 0x1c0   : > { %p10129_p13 = pneg %p10128_p12 }
 0x1c2   : > { %p10134_p8 = pnand %p10132_p11, %p10129_p13 }
 0x1c4   : > { %10137 = shalt.err (!%p10134_p8)
}
 0x1c5   : > { %s10138_s3 = scalar_lea.vmem %s577_s5, 32  ;;  %p10146_p3 = scmp.lt.s32.totalorder %s577_s5, %s577_s5 }
 0x1c6   : > { %p10139_p4 = scmp.ne.s32.totalorder %s577_s5, %s10138_s3  ;;  %p10147_p5 = scmp.lt.s32.totalorder %s10138_s3, %s10138_s3 }
 0x1c8   : > { %p10141_p2 = pnand %p10139_p4, %p13448_p7  ;;  %p10148_p0 = por %p10147_p5, %p10146_p3 }
 0x1ca   : > { %p10142_p1 = pneg %p10141_p2 }
 0x1cc   : > { %p10149_p9 = pnand %p10148_p0, %p10142_p1 }
 0x1ce   : > { %10152 = shalt.err (!%p10149_p9)
}
 0x1cf   : > { %p13457_p6 = scmp.ne.s32.totalorder %s13419_s24, 0  ;;  %s10378_s28 = smov [#allocation24]  }
 0x1d0   : > { %s587_s14 = sshll.u32 %s10378_s28, 4  ;;  %s13458_s1 = sld [smem:[#allocation99_spill]]  ;;  %s588_s14 = int_to_ptr.vmem [resolvable:$true] %s587_s14 }
 0x1d1   : > { %8829 = dma.hbm_to_vmem [thread:$0]  (!%p13457_p6), %s13456_s6, 32, %s577_s5, [#allocation8]  }
 0x1d2   : > { %s13460_s20 = sld [smem:[#allocation101_spill]] }
 0x1d6   : > { %s13459_s8 = smov %s13458_s1  ;;  %s11019_s30 = scalar_lea.hbm %s13458_s1, %s10624_s17 }
 0x1d8   : > { %s13461_s15 = smov %s13460_s20  ;;  %s10153_s29 = scalar_lea.hbm %s13460_s20, 32 }
 0x1d9   : > { %p10154_p9 = scmp.ne.s32.totalorder %s13461_s15, %s10153_s29  ;;  %p10160_p11 = scmp.lt.u32.totalorder %s10153_s29, %s13461_s15 }
 0x1db   : > { %p10156_p12 = pnand %p10154_p9, %p13448_p7 }
 0x1dd   : > { %p10157_p13 = pneg %p10156_p12 }
 0x1df   : > { %p10162_p8 = pnand %p10160_p11, %p10157_p13 }
 0x1e1   : > { %10165 = shalt.err (!%p10162_p8)
}
 0x1e2   : > { %s10166_s26 = scalar_lea.vmem %s588_s14, 32  ;;  %p10174_p3 = scmp.lt.s32.totalorder %s588_s14, %s588_s14 }
 0x1e3   : > { %p10167_p4 = scmp.ne.s32.totalorder %s588_s14, %s10166_s26  ;;  %p10175_p5 = scmp.lt.s32.totalorder %s10166_s26, %s10166_s26 }
 0x1e5   : > { %p10169_p2 = pnand %p10167_p4, %p13448_p7  ;;  %p10176_p0 = por %p10175_p5, %p10174_p3 }
 0x1e7   : > { %p10170_p1 = pneg %p10169_p2 }
 0x1e9   : > { %p10177_p10 = pnand %p10176_p0, %p10170_p1 }
 0x1eb   : > { %10180 = shalt.err (!%p10177_p10)
}
 0x1ec   : > { %8832 = dma.hbm_to_vmem [thread:$0]  (!%p13457_p6), %s13461_s15, 32, %s588_s14, [#allocation11]  }
 0x1ed   : > { %s810_s25 = scalar_lea.vmem [#allocation22], %s10632_s18  ;;  %s10181_s0 = scalar_lea.hbm %s11019_s30, 32 }
 0x1ee   : > { %s818_s10 = sshll.u32 %s810_s25, 4  ;;  %p10182_p7 = scmp.ne.s32.totalorder %s11019_s30, %s10181_s0  ;;  %s819_s10 = int_to_ptr.vmem [resolvable:$true] %s818_s10 }
 0x1ef   : > { %p13462_p9 = scmp.ne.s32.totalorder %s13430_s16, 0  ;;  %s10186_s2 = scalar_lea.hbm %s13459_s8, 128 }
 0x1f0   : > { %p10187_p13 = scmp.lt.u32.totalorder %s11019_s30, %s13459_s8  ;;  %p10188_p11 = scmp.lt.u32.totalorder %s10186_s2, %s10181_s0 }
 0x1f1   : > { %p10184_p12 = pnand %p10182_p7, %p13462_p9  ;;  %p10190_p4 = scmp.lt.u32.totalorder %s10181_s0, %s11019_s30 }
 0x1f2   : > { %p10189_p8 = por %p10188_p11, %p10187_p13 }
 0x1f3   : > { %p10185_p10 = pneg %p10184_p12 }
 0x1f4   : > { %p10191_p6 = por %p10190_p4, %p10189_p8 }
 0x1f6   : > { %p10192_p2 = pnand %p10191_p6, %p10185_p10 }
 0x1f8   : > { %10195 = shalt.err (!%p10192_p2)
}
 0x1f9   : > { %s10196_s18 = scalar_lea.vmem %s819_s10, 32  ;;  %s10379_s14 = smov [#allocation22]  }
 0x1fa   : > { %p10197_p1 = scmp.ne.s32.totalorder %s819_s10, %s10196_s18  ;;  %s10201_s29 = sshll.u32 %s10379_s14, 4  ;;  %s10202_s29 = int_to_ptr.vmem [resolvable:$false] %s10201_s29 }
 0x1fb   : > { %s10203_s9 = scalar_lea.vmem %s10202_s29, 64  ;;  %p10204_p0 = scmp.lt.s32.totalorder %s819_s10, %s10202_s29 }
 0x1fc   : > { %p10199_p3 = pnand %p10197_p1, %p13462_p9  ;;  %p10205_p7 = scmp.lt.s32.totalorder %s10203_s9, %s10196_s18 }
 0x1fe   : > { %p10200_p5 = pneg %p10199_p3  ;;  %p10206_p12 = por %p10205_p7, %p10204_p0 }
 0x200   : > { %p10207_p11 = pnand %p10206_p12, %p10200_p5 }
 0x202   : > { %10210 = shalt.err (!%p10207_p11)
}
 0x203   : > { %p13463_p13 = scmp.ne.s32.totalorder %s13429_s27, 0  ;;  %s13464_s3 = sld [smem:[#allocation46_spill]] }
 0x205   : > { %8866 = dma.hbm_to_vmem [thread:$0]  (!%p13463_p13), %s11019_s30, 32, %s819_s10, %s10647_s22  }
 0x209   : > { %p13465_p10 = scmp.ne.s32.totalorder %s13464_s3, 0 }
 0x20b   : > { %827 = sbr.rel (%p13465_p10) target bundleno = 6560 (0x19a0), region = 92 }
 0x212   : > { %s13466_s16 = sld [smem:[#allocation42_spill]] }
 0x218   : > { %p13467_p9 = scmp.eq.s32.totalorder %s13466_s16, 0 }
 0x21a   : > { %10284 = dma.done.wait (%p13467_p9), [#allocation5], 3072   ;;  %p13468_p8 = pmov %p13467_p9 }
 0x21c   : > { %10286 = vsyncadd (%p13468_p8), [#allocation5], 4294964224  ;;  %p13469_p4 = pmov %p13468_p8 }
 0x21e   : > { %10288 = dma.done.wait (%p13469_p4), [#allocation8], 64   ;;  %p13470_p6 = pmov %p13469_p4 }
 0x21f   : > { %p13471_p2 = pmov %p13469_p4 }
 0x220   : > { %10290 = vsyncadd (%p13470_p6), [#allocation8], 4294967232 }
 0x221   : > { %10292 = dma.done.wait (%p13471_p2), [#allocation11], 512   ;;  %p13472_p1 = pmov %p13471_p2 }
 0x222   : > { %s13473_s22 = sld [smem:[#allocation36_spill]]  ;;  %s13474_s27 = sld [smem:[#allocation43_spill]] }
 0x223   : > { %10294 = vsyncadd (%p13472_p1), [#allocation11], 4294966784  ;;  %s845_s30 = sand.u32 1, %s13466_s16  }
 0x224   : > { %s846_s26 = scalar_lea.sflag [#allocation5], %s845_s30 }
 0x228   : > { %s847_s5 = sand.u32 1, %s13473_s22   ;;  %p13475_p3 = scmp.ne.s32.totalorder %s13474_s27, 0 }
 0x229   : > { %s11074_s23 = sshll.u32 %s847_s5, 1 }
 0x22a   : > { %s849_s17 = scalar_lea.vmem [#allocation12], %s11074_s23 }
 0x22b   : > { %10296 = dma.done.wait (%p13475_p3), %s846_s26, 49472  }
 0x22c   : > { %10298 = vsyncadd (%p13475_p3), %s846_s26, 4294917824  ;;  %s8765_s28 = smul.u32 768, %s847_s5  ;;  %s8033_s25 = sshll.u32 %s847_s5, 8 }
 0x22d   : > { %s8037_s10 = sshll.u32 %s847_s5, 10  ;;  %s8038_s0 = sshll.u32 %s847_s5, 3 }
 0x22e   : > { %s858_s1 = scalar_lea.vmem [#allocation13], %s11074_s23  ;;  %s11082_s24 = scalar_lea.vmem [#allocation14], %s8765_s28 }
 0x22f   : > { %s11084_s2 = scalar_lea.vmem [#allocation15], %s8033_s25  ;;  %s885_s19 = scalar_lea.vmem [#allocation16], %s11074_s23 }
 0x230   : > { %s11089_s14 = scalar_lea.vmem [#allocation19], %s8037_s10  ;;  %s11091_s29 = scalar_lea.vmem [#allocation20], %s8038_s0 }
 0x231   : > { %s11093_s9 = scalar_lea.vmem [#allocation21], %s8037_s10  ;;  %p13476_p5 = pmov %p13472_p1 }
 0x232   : > { %p13477_p0 = pmov %p13472_p1 }
 0x233   : > { %10300 = dma.done.wait (%p13476_p5), [#allocation8], 32  }
 0x234   : > { %10302 = vsyncadd (%p13477_p0), [#allocation8], 4294967264  ;;  %p13478_p7 = pmov %p13477_p0 }
 0x235   : > { %p13479_p12 = pmov %p13477_p0 }
 0x236   : > { %10304 = dma.done.wait (%p13478_p7), [#allocation11], 32  }
 0x237   : > { %10306 = vsyncadd (%p13479_p12), [#allocation11], 4294967264  ;;  %s13480_s22 = sld [smem:[#allocation34_spill]]  ;;  %s13481_s27 = sld [smem:[#allocation39_spill]] }
 0x238   : > { %s13482_s0 = sld [smem:[#allocation88_spill]]  ;;  %s13483_s20 = sld [smem:[#allocation38_spill]] }
 0x23d   : > { %s1053_s30 = sand.u32 1, %s13480_s22   ;;  %s8044_s5 = sshll.u32 %s13481_s27, 3 }
 0x23e   : > { %s8043_s26 = sshll.u32 %s1053_s30, 3  ;;  %p1057_p11 = scmp.lt.s32.totalorder %s8044_s5, 15 }
 0x23f   : > { %s11113_s18 = scalar_lea.vmem [#allocation25], %s8043_s26  ;;  %p8047_p13 = scmp.ne.s32.totalorder %s13483_s20, 0 }
 0x240   : > { %s13602_s5 = smov (!%p1057_p11, %s8044_s5), 15  ;;  %v8991_v0 = vld [vmem:[#allocation4 + $0x4] ss:$8 sps:$4 sm:$0xff] (!%p8047_p13)   ;;  %v8993_v1 = vld [vmem:[#allocation4] ss:$8 sps:$4 sm:$0xff] (!%p8047_p13)   ;;  %vm1249_vm0 = vcmask (!%p8047_p13), 523264   ;;  %v1119_v48 = vlaneseq (!%p8047_p13) }
 0x241   : > { %s8496_s28 = sshll.u32 %s13602_s5, 4  ;;  %1068 = sbr.rel (%p8047_p13) target bundleno = 859 (0x35b), region = 164  ;;  %1262 = vmatprep.subr.bf16.mxu0 (!%p8047_p13), %v8991_v0  ;;  %8691 = vmatprep.subr.bf16.mxu1 (!%p8047_p13), %v8991_v0  ;;  %v8994_v2 = vld [vmem:[#allocation4 + $0x14] ss:$8 sps:$4 sm:$0xff] (!%p8047_p13)   ;;  %v8996_v3 = vld [vmem:[#allocation4 + $0x10] ss:$8 sps:$4 sm:$0xff] (!%p8047_p13)  }
 0x242   : > { %s11111_s3 = scalar_lea.vmem %s13482_s0, %s8496_s28  ;;  %1263 = vmatpush1.bf16.msra.mxu0 (!%p8047_p13), %v8993_v1  ;;  %8703 = vmatpush1.bf16.msra.mxu1 (!%p8047_p13), %v8993_v1  ;;  %v8997_v4 = vld [vmem:[#allocation4 + $0x24] ss:$8 sps:$4 sm:$0xff] (!%p8047_p13)   ;;  %v8999_v5 = vld [vmem:[#allocation4 + $0x20] ss:$8 sps:$4 sm:$0xff] (!%p8047_p13)   ;;  %v9000_v6 = vld [vmem:[#allocation4 + $0x34] ss:$8 sps:$4 sm:$0xff] (!%p8047_p13)  }
 0x243   : > { %1264 = vmatprep.subr.bf16.mxu0 (!%p8047_p13), %v8994_v2  ;;  %8692 = vmatprep.subr.bf16.mxu1 (!%p8047_p13), %v8994_v2  ;;  %v9002_v7 = vld [vmem:[#allocation4 + $0x30] ss:$8 sps:$4 sm:$0xff] (!%p8047_p13)   ;;  %v9003_v8 = vld [vmem:[#allocation4 + $0x44] ss:$8 sps:$4 sm:$0xff] (!%p8047_p13)   ;;  %v9005_v9 = vld [vmem:[#allocation4 + $0x40] ss:$8 sps:$4 sm:$0xff] (!%p8047_p13)  }
 0x244   : > { %v9006_v10 = vld [vmem:[#allocation4 + $0x54] ss:$8 sps:$4 sm:$0xff] (!%p8047_p13)   ;;  %v1070_v11 = vld [vmem:[%s11111_s3 + $0x8] sm:$0xff] (!%p8047_p13)  ;;  %v9008_v17 = vld [vmem:[#allocation4 + $0x50] ss:$8 sps:$4 sm:$0xff] (!%p8047_p13)   ;;  %vm1338_vm1 = vcmp.lt.s32.totalorder (!%p8047_p13), %v1119_v48, 256 }
 0x245   : > { %v1072_v12 = vld [vmem:[%s11111_s3 + $0x18] sm:$0xff] (!%p8047_p13)  ;;  %v1078_v13 = vld [vmem:[%s11111_s3 + $0x48] sm:$0xff] (!%p8047_p13)  ;;  %v1069_v30 = vld [vmem:[%s11111_s3] sm:$0xff] (!%p8047_p13)  ;;  %v1120_v53 = vshrl.u32 (!%p8047_p13), %v1119_v48, 7  ;;  %vm1354_vm2 = vcmask (!%p8047_p13), 1040384   ;;  %vm1424_vm3 = vcmask (!%p8047_p13), 1042432  }
 0x246   : > { %1265 = vmatpush1.bf16.msra.mxu0 (!%p8047_p13), %v8996_v3  ;;  %8704 = vmatpush1.bf16.msra.mxu1 (!%p8047_p13), %v8996_v3  ;;  %v1110_v14 = vpack.c.bf16 (!%p8047_p13), %v1072_v12, %v1070_v11  ;;  %v1080_v15 = vld [vmem:[%s11111_s3 + $0x58] sm:$0xff] (!%p8047_p13)  ;;  %v9009_v18 = vld [vmem:[#allocation4 + $0x64] ss:$8 sps:$4 sm:$0xff] (!%p8047_p13)   ;;  %v9011_v19 = vld [vmem:[#allocation4 + $0x60] ss:$8 sps:$4 sm:$0xff] (!%p8047_p13)   ;;  %vm1389_vm4 = vcmask (!%p8047_p13), 1041408  }
 0x247   : > { %1266 = vmatprep.subr.bf16.mxu0 (!%p8047_p13), %v8997_v4  ;;  %8693 = vmatprep.subr.bf16.mxu1 (!%p8047_p13), %v8997_v4  ;;  %v1114_v16 = vpack.c.bf16 (!%p8047_p13), %v1080_v15, %v1078_v13  ;;  %v9012_v20 = vld [vmem:[#allocation4 + $0x74] ss:$8 sps:$4 sm:$0xff] (!%p8047_p13)   ;;  %v9014_v21 = vld [vmem:[#allocation4 + $0x70] ss:$8 sps:$4 sm:$0xff] (!%p8047_p13)   ;;  %v9015_v22 = vld [vmem:[#allocation4 + $0x84] ss:$8 sps:$4 sm:$0xff] (!%p8047_p13)  }
 0x248   : > { %8072 = vmatprep.mubr.msk.bf16.mxu0 %vm1249_vm0, %v1110_v14  ;;  %v9017_v23 = vld [vmem:[#allocation4 + $0x80] ss:$8 sps:$4 sm:$0xff]   ;;  %v9018_v24 = vld [vmem:[#allocation4 + $0x94] ss:$8 sps:$4 sm:$0xff]   ;;  %v9020_v25 = vld [vmem:[#allocation4 + $0x90] ss:$8 sps:$4 sm:$0xff]  }
 0x249   : > { %8074 = vmatprep.mubr.msk.bf16.mxu1 %vm1249_vm0, %v1114_v16  ;;  %v9021_v26 = vld [vmem:[#allocation4 + $0xa4] ss:$8 sps:$4 sm:$0xff]   ;;  %v9023_v27 = vld [vmem:[#allocation4 + $0xa0] ss:$8 sps:$4 sm:$0xff]   ;;  %v9024_v28 = vld [vmem:[#allocation4 + $0xb4] ss:$8 sps:$4 sm:$0xff]  }
 0x24a   : > { %1267 = vmatpush1.bf16.msra.mxu0 %v8999_v5  ;;  %8705 = vmatpush1.bf16.msra.mxu1 %v8999_v5  ;;  %v9026_v29 = vld [vmem:[#allocation4 + $0xb0] ss:$8 sps:$4 sm:$0xff]   ;;  %v1077_v32 = vld [vmem:[%s11111_s3 + $0x40] sm:$0xff]  ;;  %v1074_v34 = vld [vmem:[%s11111_s3 + $0x28] sm:$0xff]  ;;  %v1121_v54 = vsub.s32 0, %v1120_v53  ;;  %v1125_v56 = vsub.s32 1, %v1120_v53 }
 0x24b   : > { %1268 = vmatprep.subr.bf16.mxu0 %v9000_v6  ;;  %8694 = vmatprep.subr.bf16.mxu1 %v9000_v6  ;;  %v1071_v31 = vld [vmem:[%s11111_s3 + $0x10] sm:$0xff]  ;;  %v1076_v35 = vld [vmem:[%s11111_s3 + $0x38] sm:$0xff]  ;;  %v1082_v36 = vld [vmem:[%s11111_s3 + $0x68] sm:$0xff]  ;;  %vm1459_vm5 = vcmask 1043456  }
 0x24c   : > { %v1079_v33 = vld [vmem:[%s11111_s3 + $0x50] sm:$0xff]  ;;  %v1084_v37 = vld [vmem:[%s11111_s3 + $0x78] sm:$0xff]  ;;  %v1109_v38 = vpack.c.bf16 %v1071_v31, %v1069_v30  ;;  %v1112_v40 = vpack.c.bf16 %v1076_v35, %v1074_v34  ;;  %v1073_v42 = vld [vmem:[%s11111_s3 + $0x20] sm:$0xff] }
 0x24d   : > { %v1113_v39 = vpack.c.bf16 %v1079_v33, %v1077_v32  ;;  %v1116_v41 = vpack.c.bf16 %v1084_v37, %v1082_v36  ;;  %v1075_v43 = vld [vmem:[%s11111_s3 + $0x30] sm:$0xff]  ;;  %v1081_v44 = vld [vmem:[%s11111_s3 + $0x60] sm:$0xff] }
 0x24e   : > { %1269 = vmatpush1.bf16.msra.mxu0 %v9002_v7  ;;  %8706 = vmatpush1.bf16.msra.mxu1 %v9002_v7  ;;  %v1083_v45 = vld [vmem:[%s11111_s3 + $0x70] sm:$0xff]  ;;  %v1111_v46 = vpack.c.bf16 %v1075_v43, %v1073_v42  ;;  %v1335_v49 = vld [vmem:[#allocation9] sm:$0x3]  ;;  %v1117_v55 = vld [vmem:[#allocation7] sm:$0x3] }
 0x24f   : > { %1270 = vmatprep.subr.bf16.mxu0 %v9003_v8  ;;  %8695 = vmatprep.subr.bf16.mxu1 %v9003_v8  ;;  %v1115_v47 = vpack.c.bf16 %v1083_v45, %v1081_v44  ;;  %1340 = vst.msk [vmem:[#allocation2] ss:$8 sm:$0x3] %vm1338_vm1, %v1335_v49  ;;  %v1373_v50 = vld [vmem:[#allocation9] sm:$0x3]  ;;  %v11136_v57 = vrot.slane %v1117_v55, %v1121_v54  ;;  %v11140_v60 = vld [vmem:[#allocation10] sm:$0xff] }
 0x250   : > { %v1408_v51 = vld [vmem:[#allocation9] sm:$0x3]  ;;  %1375 = vst.msk [vmem:[#allocation2 + $0x21] ss:$8 sm:$0x3] %vm1338_vm1, %v1373_v50  ;;  %v11138_v58 = vrot.slane %v1117_v55, %v1125_v56  ;;  %v11144_v1 = vld [vmem:[#allocation10 + $0x8] sm:$0xff] }
 0x251   : > { %v1443_v52 = vld [vmem:[#allocation9] sm:$0x3]  ;;  %1410 = vst.msk [vmem:[#allocation2 + $0x42] ss:$8 sm:$0x3] %vm1338_vm1, %v1408_v51  ;;  %v11148_v6 = vld [vmem:[#allocation10 + $0x10] sm:$0xff] }
 0x252   : > { %1271 = vmatpush1.bf16.msra.mxu0 %v9005_v9  ;;  %8707 = vmatpush1.bf16.msra.mxu1 %v9005_v9  ;;  %1445 = vst.msk [vmem:[#allocation2 + $0x63] ss:$8 sm:$0x3] %vm1338_vm1, %v1443_v52  ;;  %v11154_v13 = vld [vmem:[#allocation10 + $0x18] sm:$0xff] }
 0x253   : > { %1272 = vmatprep.subr.bf16.mxu0 %v9006_v10  ;;  %8696 = vmatprep.subr.bf16.mxu1 %v9006_v10 }
 0x256   : > { %1273 = vmatpush1.bf16.msra.mxu0 %v9008_v17  ;;  %8708 = vmatpush1.bf16.msra.mxu1 %v9008_v17 }
 0x257   : > { %1274 = vmatprep.subr.bf16.mxu0 %v9009_v18  ;;  %8697 = vmatprep.subr.bf16.mxu1 %v9009_v18 }
 0x25a   : > { %1275 = vmatpush1.bf16.msra.mxu0 %v9011_v19  ;;  %8709 = vmatpush1.bf16.msra.mxu1 %v9011_v19 }
 0x25b   : > { %1276 = vmatprep.subr.bf16.mxu0 %v9012_v20  ;;  %8698 = vmatprep.subr.bf16.mxu1 %v9012_v20 }
 0x25e   : > { %1277 = vmatpush1.bf16.msra.mxu0 %v9014_v21  ;;  %8710 = vmatpush1.bf16.msra.mxu1 %v9014_v21 }
 0x25f   : > { %1278 = vmatprep.subr.bf16.mxu0 %v9015_v22  ;;  %8699 = vmatprep.subr.bf16.mxu1 %v9015_v22 }
 0x262   : > { %1279 = vmatpush1.bf16.msra.mxu0 %v9017_v23  ;;  %8711 = vmatpush1.bf16.msra.mxu1 %v9017_v23 }
 0x263   : > { %1280 = vmatprep.subr.bf16.mxu0 %v9018_v24  ;;  %8700 = vmatprep.subr.bf16.mxu1 %v9018_v24 }
 0x266   : > { %1281 = vmatpush1.bf16.msra.mxu0 %v9020_v25  ;;  %8712 = vmatpush1.bf16.msra.mxu1 %v9020_v25 }
 0x267   : > { %1282 = vmatprep.subr.bf16.mxu0 %v9021_v26  ;;  %8701 = vmatprep.subr.bf16.mxu1 %v9021_v26 }
 0x26a   : > { %1283 = vmatpush1.bf16.msra.mxu0 %v9023_v27  ;;  %8713 = vmatpush1.bf16.msra.mxu1 %v9023_v27 }
 0x26b   : > { %1284 = vmatprep.subr.bf16.mxu0 %v9024_v28  ;;  %8702 = vmatprep.subr.bf16.mxu1 %v9024_v28 }
 0x26e   : > { %1285 = vmatpush1.bf16.msra.mxu0 %v9026_v29  ;;  %8714 = vmatpush1.bf16.msra.mxu1 %v9026_v29 }
 0x271   : > { %1295 = vmatmul.mubr.bf16.vlgmr.msra.gmra.mrb[0].mxu0 %v1109_v38  ;;  %1315 = vmatmul.mubr.bf16.vlgmr.msra.gmra.mrb[0].mxu1 %v1113_v39 }
 0x272   : > { %8073 = vmatprep.mubr.msk.bf16.mxu0 %vm1249_vm0, %v1112_v40  ;;  %8075 = vmatprep.mubr.msk.bf16.mxu1 %vm1249_vm0, %v1116_v41 }
 0x279   : > { %1305 = vmatmul.mubr.bf16.gmra.mrb[4].mxu0 %v1111_v46  ;;  %1325 = vmatmul.mubr.bf16.gmra.mrb[4].mxu1 %v1115_v47 }
 0x344   : > { %v1296_v59 = vpop.f32.mrb[0].mxu0  ;;  %v1316_v61 = vpop.f32.mrb[0].mxu1 }
 0x345   : > { %v1297_v62 = vadd.f32 %v1296_v59, %v11136_v57  ;;  %v1317_v63 = vadd.f32 %v1316_v61, %v11136_v57  ;;  %v1298_v0 = vpop.f32.mrb[1].mxu0  ;;  %v1318_v2 = vpop.f32.mrb[1].mxu1 }
 0x346   : > { %v1299_v3 = vadd.f32 %v1298_v0, %v11138_v58  ;;  %v1319_v4 = vadd.f32 %v1318_v2, %v11138_v58  ;;  %v1300_v5 = vpop.f32.mrb[2].mxu0  ;;  %v1320_v7 = vpop.f32.mrb[2].mxu1 }
 0x347   : > { %v1346_v8 = vadd.f32 %v11140_v60, %v1297_v62  ;;  %v1416_v9 = vadd.f32 %v11140_v60, %v1317_v63  ;;  %v1301_v10 = vadd.f32 %v1300_v5, %v11136_v57  ;;  %v1321_v11 = vadd.f32 %v1320_v7, %v11136_v57  ;;  %v1302_v12 = vpop.f32.mrb[3].mxu0  ;;  %v1322_v14 = vpop.f32.mrb[3].mxu1 }
 0x348   : > { %v1347_v15 = vadd.f32 %v11144_v1, %v1299_v3  ;;  %v1417_v16 = vadd.f32 %v11144_v1, %v1319_v4  ;;  %v1303_v17 = vadd.f32 %v1302_v12, %v11138_v58  ;;  %v1323_v18 = vadd.f32 %v1322_v14, %v11138_v58 }
 0x349   : > { %v1355_v19 = vrot.slane %v1346_v8, 7  ;;  %v1425_v20 = vrot.slane %v1416_v9, 5  ;;  %v1348_v21 = vadd.f32 %v11148_v6, %v1301_v10  ;;  %v1418_v22 = vadd.f32 %v11148_v6, %v1321_v11 }
 0x34a   : > { %v1356_v23 = vrot.slane %v1347_v15, 7  ;;  %v1426_v24 = vrot.slane %v1417_v16, 5  ;;  %v1349_v25 = vadd.f32 %v11154_v13, %v1303_v17  ;;  %v1419_v26 = vadd.f32 %v11154_v13, %v1323_v18 }
 0x34b   : > { %1367 = vst [vmem:[#allocation2] sm:$0xfe] %v1355_v19  ;;  %1437 = vst [vmem:[#allocation2 + $0x40] sm:$0xf8] %v1425_v20  ;;  %v1357_v27 = vrot.slane %v1348_v21, 7  ;;  %v1427_v28 = vrot.slane %v1418_v22, 5 }
 0x34c   : > { %1368 = vst [vmem:[#allocation2 + $0x8] sm:$0xfe] %v1356_v23  ;;  %1438 = vst [vmem:[#allocation2 + $0x48] sm:$0xf8] %v1426_v24  ;;  %v1359_v29 = vrot.slane %v1349_v25, 7  ;;  %v1429_v30 = vrot.slane %v1419_v26, 5 }
 0x34d   : > { %v1306_v31 = vpop.f32.mrb[4].mxu0  ;;  %v1326_v32 = vpop.f32.mrb[4].mxu1  ;;  %v1358_v33 = vsel %vm1354_vm2, %v1355_v19, %v1357_v27  ;;  %1371 = vst [vmem:[#allocation2 + $0x20] sm:$0x1] %v1357_v27  ;;  %v1428_v34 = vsel %vm1424_vm3, %v1425_v20, %v1427_v28  ;;  %1441 = vst [vmem:[#allocation2 + $0x60] sm:$0x7] %v1427_v28 }
 0x34e   : > { %v1307_v35 = vadd.f32 %v1306_v31, %v11136_v57  ;;  %v1327_v36 = vadd.f32 %v1326_v32, %v11136_v57  ;;  %v1308_v37 = vpop.f32.mrb[5].mxu0  ;;  %v1328_v38 = vpop.f32.mrb[5].mxu1  ;;  %1369 = vst [vmem:[#allocation2 + $0x10] sm:$0xff] %v1358_v33  ;;  %1439 = vst [vmem:[#allocation2 + $0x50] sm:$0xff] %v1428_v34  ;;  %v1360_v39 = vsel %vm1354_vm2, %v1356_v23, %v1359_v29 }
 0x34f   : > { %1372 = vst [vmem:[#allocation2 + $0x28] sm:$0x1] %v1359_v29  ;;  %v1430_v40 = vsel %vm1424_vm3, %v1426_v24, %v1429_v30  ;;  %1442 = vst [vmem:[#allocation2 + $0x68] sm:$0x7] %v1429_v30  ;;  %v1309_v41 = vadd.f32 %v1308_v37, %v11138_v58  ;;  %v1329_v42 = vadd.f32 %v1328_v38, %v11138_v58  ;;  %v1310_v43 = vpop.f32.mrb[6].mxu0  ;;  %v1330_v44 = vpop.f32.mrb[6].mxu1 }
 0x350   : > { %1370 = vst [vmem:[#allocation2 + $0x18] sm:$0xff] %v1360_v39  ;;  %1440 = vst [vmem:[#allocation2 + $0x58] sm:$0xff] %v1430_v40  ;;  %v1381_v45 = vadd.f32 %v11140_v60, %v1307_v35  ;;  %v1451_v46 = vadd.f32 %v11140_v60, %v1327_v36  ;;  %v1311_v47 = vadd.f32 %v1310_v43, %v11136_v57  ;;  %v1312_v49 = vpop.f32.mrb[7].mxu0  ;;  %v1332_v50 = vpop.f32.mrb[7].mxu1 }
 0x351   : > { %v1331_v48 = vadd.f32 %v1330_v44, %v11136_v57  ;;  %v1382_v51 = vadd.f32 %v11144_v1, %v1309_v41  ;;  %v1452_v52 = vadd.f32 %v11144_v1, %v1329_v42  ;;  %v1313_v53 = vadd.f32 %v1312_v49, %v11138_v58 }
 0x352   : > { %v1333_v54 = vadd.f32 %v1332_v50, %v11138_v58  ;;  %v1390_v55 = vrot.slane %v1381_v45, 6  ;;  %v1460_v56 = vrot.slane %v1451_v46, 4  ;;  %v1383_v59 = vadd.f32 %v11148_v6, %v1311_v47 }
 0x353   : > { %v1453_v60 = vadd.f32 %v11148_v6, %v1331_v48  ;;  %v1391_v61 = vrot.slane %v1382_v51, 6  ;;  %v1461_v62 = vrot.slane %v1452_v52, 4  ;;  %v1384_v57 = vadd.f32 %v11154_v13, %v1313_v53 }
 0x354   : > { %v1454_v63 = vadd.f32 %v11154_v13, %v1333_v54  ;;  %1402 = vst [vmem:[#allocation2 + $0x20] sm:$0xfc] %v1390_v55  ;;  %1472 = vst [vmem:[#allocation2 + $0x60] sm:$0xf0] %v1460_v56  ;;  %v1392_v0 = vrot.slane %v1383_v59, 6 }
 0x355   : > { %v1462_v1 = vrot.slane %v1453_v60, 4  ;;  %1403 = vst [vmem:[#allocation2 + $0x28] sm:$0xfc] %v1391_v61  ;;  %1473 = vst [vmem:[#allocation2 + $0x68] sm:$0xf0] %v1461_v62  ;;  %v1394_v2 = vrot.slane %v1384_v57, 6 }
 0x356   : > { %v1464_v58 = vrot.slane %v1454_v63, 4  ;;  %v1393_v3 = vsel %vm1389_vm4, %v1390_v55, %v1392_v0  ;;  %1406 = vst [vmem:[#allocation2 + $0x40] sm:$0x3] %v1392_v0 }
 0x357   : > { %v1463_v4 = vsel %vm1459_vm5, %v1460_v56, %v1462_v1  ;;  %1476 = vst [vmem:[#allocation2 + $0x80] sm:$0xf] %v1462_v1  ;;  %1404 = vst [vmem:[#allocation2 + $0x30] sm:$0xff] %v1393_v3  ;;  %v1395_v5 = vsel %vm1389_vm4, %v1391_v61, %v1394_v2 }
 0x358   : > { %1474 = vst [vmem:[#allocation2 + $0x70] sm:$0xff] %v1463_v4  ;;  %1407 = vst [vmem:[#allocation2 + $0x48] sm:$0x3] %v1394_v2  ;;  %v1465_v6 = vsel %vm1459_vm5, %v1461_v62, %v1464_v58 }
 0x359   : > { %1477 = vst [vmem:[#allocation2 + $0x88] sm:$0xf] %v1464_v58  ;;  %1405 = vst [vmem:[#allocation2 + $0x38] sm:$0xff] %v1395_v5 }
 0x35a   : > { %1475 = vst [vmem:[#allocation2 + $0x78] sm:$0xff] %v1465_v6 }
 0x35b PF: > { %v11188_v7 = vld [vmem:[#allocation2] sm:$0xff]  ;;  %v11190_v8 = vld [vmem:[#allocation2 + $0x8] sm:$0xff]  ;;  %v11198_v12 = vld [vmem:[#allocation2 + $0x10] sm:$0xff]  ;;  %vm1522_vm6 = vcmask 1043456   ;;  %vm2856_vm7 = vsmask.f32 7424 }
 0x35c   : > { %v11192_v9 = vld [vmem:[#allocation2 + $0x20] sm:$0xff]  ;;  %v1498_v10 = vadd.f32 %v11190_v8, %v11188_v7  ;;  %v11196_v11 = vld [vmem:[#allocation2 + $0x28] sm:$0xff]  ;;  %v11200_v13 = vld [vmem:[#allocation2 + $0x18] sm:$0xff]  ;;  %vm3279_vm8 = vcmask 1046528   ;;  %vm3645_vm9 = vsmask.f32 6400 }
 0x35d   : > { %v1504_v14 = vadd.f32 %v11196_v11, %v11192_v9  ;;  %v1501_v17 = vadd.f32 %v11200_v13, %v11198_v12  ;;  %v11212_v19 = vld [vmem:[#allocation2 + $0x40] sm:$0xff]  ;;  %v11216_v21 = vld [vmem:[#allocation2 + $0x50] sm:$0xff]  ;;  %v11218_v22 = vld [vmem:[#allocation2 + $0x58] sm:$0xff]  ;;  %vm2641_vm10 = vcmask 1040384   ;;  %vm2598_vm11 = vcmask 138240   ;;  %s13505_s16 = scalar_lea.vmem [#allocation17], %s11074_s23 }
 0x35e   : > { %v11204_v15 = vld [vmem:[#allocation2 + $0x30] sm:$0xff]  ;;  %1499 = vadd.xlane.f32.xlu0 %v1498_v10  ;;  %v11220_v23 = vld [vmem:[#allocation2 + $0x60] sm:$0xff]  ;;  %v11222_v24 = vld [vmem:[#allocation2 + $0x68] sm:$0xff]  ;;  %v1513_v30 = vadd.f32 %v11218_v22, %v11216_v21  ;;  %vm2605_vm12 = vcmask 131072   ;;  %vm3444_vm13 = vcmask 1041408   ;;  %vm3848_vm14 = vcmask 1042432  }
 0x35f   : > { %1505 = vadd.xlane.f32.xlu1 %v1504_v14  ;;  %v11214_v20 = vld [vmem:[#allocation2 + $0x48] sm:$0xff]  ;;  %v11226_v26 = vld [vmem:[#allocation2 + $0x70] sm:$0xff]  ;;  %v11230_v28 = vld [vmem:[#allocation2 + $0x80] sm:$0xf]  ;;  %v1516_v31 = vadd.f32 %v11222_v24, %v11220_v23 }
 0x360   : > { %v11206_v16 = vld [vmem:[#allocation2 + $0x38] sm:$0xff]  ;;  %v1510_v25 = vadd.f32 %v11214_v20, %v11212_v19  ;;  %v11232_v29 = vld [vmem:[#allocation2 + $0x88] sm:$0xf]  ;;  %v1523_v33 = vsel %vm1522_vm6, %v11230_v28, 0.0  ;;  %v9029_v37 = vld [vmem:[%s11082_s24] ss:$24 sps:$4 sm:$0xff]  }
 0x361   : > { %v1507_v18 = vadd.f32 %v11206_v16, %v11204_v15  ;;  %v11228_v27 = vld [vmem:[#allocation2 + $0x78] sm:$0xff]  ;;  %v1524_v34 = vsel %vm1522_vm6, %v11232_v29, 0.0  ;;  %v9027_v36 = vld [vmem:[%s11082_s24 + $0x4] ss:$24 sps:$4 sm:$0xff]   ;;  %v9035_v41 = vld [vmem:[%s11082_s24 + $0x60] ss:$24 sps:$4 sm:$0xff]  }
 0x362   : > { %1502 = vadd.xlane.f32.xlu0 %v1501_v17  ;;  %v1519_v32 = vadd.f32 %v11228_v27, %v11226_v26  ;;  %v1525_v35 = vadd.f32 %v1524_v34, %v1523_v33  ;;  %v9030_v38 = vld [vmem:[%s11082_s24 + $0x34] ss:$24 sps:$4 sm:$0xff]   ;;  %2292 = vmatprep.subr.bf16.mxu0 %v9027_v36  ;;  %v9032_v39 = vld [vmem:[%s11082_s24 + $0x30] ss:$24 sps:$4 sm:$0xff]   ;;  %v9033_v40 = vld [vmem:[%s11082_s24 + $0x64] ss:$24 sps:$4 sm:$0xff]  }
 0x363   : > { %1508 = vadd.xlane.f32.xlu1 %v1507_v18  ;;  %2293 = vmatpush1.bf16.msra.mxu0 %v9029_v37  ;;  %v9036_v42 = vld [vmem:[%s11082_s24 + $0x94] ss:$24 sps:$4 sm:$0xff]   ;;  %v9038_v43 = vld [vmem:[%s11082_s24 + $0x90] ss:$24 sps:$4 sm:$0xff]   ;;  %v9039_v44 = vld [vmem:[%s11082_s24 + $0xc4] ss:$24 sps:$4 sm:$0xff]  }
 0x364   : > { %2294 = vmatprep.subr.bf16.mxu0 %v9030_v38  ;;  %v9041_v45 = vld [vmem:[%s11082_s24 + $0xc0] ss:$24 sps:$4 sm:$0xff]   ;;  %v9042_v46 = vld [vmem:[%s11082_s24 + $0xf4] ss:$24 sps:$4 sm:$0xff]   ;;  %v9044_v47 = vld [vmem:[%s11082_s24 + $0xf0] ss:$24 sps:$4 sm:$0xff]  }
 0x365   : > { %v9045_v48 = vld [vmem:[%s11082_s24 + $0x124] ss:$24 sps:$4 sm:$0xff]   ;;  %v9047_v49 = vld [vmem:[%s11082_s24 + $0x120] ss:$24 sps:$4 sm:$0xff]   ;;  %v9048_v50 = vld [vmem:[%s11082_s24 + $0x154] ss:$24 sps:$4 sm:$0xff]  }
 0x366   : > { %1511 = vadd.xlane.f32.xlu0 %v1510_v25  ;;  %v9050_v51 = vld [vmem:[%s11082_s24 + $0x150] ss:$24 sps:$4 sm:$0xff]   ;;  %v9051_v52 = vld [vmem:[%s11082_s24 + $0x184] ss:$24 sps:$4 sm:$0xff]   ;;  %v9053_v53 = vld [vmem:[%s11082_s24 + $0x180] ss:$24 sps:$4 sm:$0xff]  }
 0x367   : > { %1514 = vadd.xlane.f32.xlu1 %v1513_v30  ;;  %2295 = vmatpush1.bf16.msra.mxu0 %v9032_v39  ;;  %v9054_v54 = vld [vmem:[%s11082_s24 + $0x1b4] ss:$24 sps:$4 sm:$0xff]  }
 0x368   : > { %2296 = vmatprep.subr.bf16.mxu0 %v9033_v40 }
 0x36a   : > { %1517 = vadd.xlane.f32.xlu0 %v1516_v31 }
 0x36b   : > { %1520 = vadd.xlane.f32.xlu1 %v1519_v32  ;;  %2297 = vmatpush1.bf16.msra.mxu0 %v9035_v41 }
 0x36c   : > { %2298 = vmatprep.subr.bf16.mxu0 %v9036_v42 }
 0x36e   : > { %1526 = vadd.xlane.f32.xlu0 %v1525_v35 }
 0x36f   : > { %2299 = vmatpush1.bf16.msra.mxu0 %v9038_v43 }
 0x370   : > { %2300 = vmatprep.subr.bf16.mxu0 %v9039_v44 }
 0x373   : > { %2301 = vmatpush1.bf16.msra.mxu0 %v9041_v45 }
 0x374   : > { %2302 = vmatprep.subr.bf16.mxu0 %v9042_v46 }
 0x377   : > { %2303 = vmatpush1.bf16.msra.mxu0 %v9044_v47 }
 0x378   : > { %2304 = vmatprep.subr.bf16.mxu0 %v9045_v48 }
 0x37b   : > { %2305 = vmatpush1.bf16.msra.mxu0 %v9047_v49 }
 0x37c   : > { %2306 = vmatprep.subr.bf16.mxu0 %v9048_v50 }
 0x37f   : > { %2307 = vmatpush1.bf16.msra.mxu0 %v9050_v51 }
 0x380   : > { %2308 = vmatprep.subr.bf16.mxu0 %v9051_v52 }
 0x383   : > { %2309 = vmatpush1.bf16.msra.mxu0 %v9053_v53 }
 0x384   : > { %2310 = vmatprep.subr.bf16.mxu0 %v9054_v54 }
 0x3eb   : > { %v1500_v55 = vpop.xlane.xlu0 %1499 }
 0x3ec   : > { %v1529_v56 = vmul.f32 0.00390625, %v1500_v55  ;;  %v1506_v59 = vpop.xlane.xlu1 %1505  ;;  %v9056_v55 = vld [vmem:[%s11082_s24 + $0x1b0] ss:$24 sps:$4 sm:$0xff]  }
 0x3ed   : > { %v1531_v60 = vmul.f32 0.00390625, %v1506_v59  ;;  %2311 = vmatpush1.bf16.msra.mxu0 %v9056_v55  ;;  %v9057_v59 = vld [vmem:[%s11082_s24 + $0x1e4] ss:$24 sps:$4 sm:$0xff]  }
 0x3ee   : > { %v11264_v61 = vsub.f32 %v11188_v7, %v1529_v56  ;;  %v11267_v62 = vsub.f32 %v11190_v8, %v1529_v56  ;;  %2312 = vmatprep.subr.bf16.mxu0 %v9057_v59 }
 0x3ef   : > { %v11270_v57 = vsub.f32 %v11192_v9, %v1531_v60  ;;  %v11273_v63 = vsub.f32 %v11196_v11, %v1531_v60  ;;  %v1503_v0 = vpop.xlane.xlu0 %1502  ;;  %v9059_v60 = vld [vmem:[%s11082_s24 + $0x1e0] ss:$24 sps:$4 sm:$0xff]  }
 0x3f0   : > { %v1530_v1 = vmul.f32 0.00390625, %v1503_v0  ;;  %v1509_v2 = vpop.xlane.xlu1 %1508  ;;  %v1556_v58 = vmul.f32 %v11264_v61, %v11264_v61  ;;  %v1557_v3 = vmul.f32 %v11267_v62, %v11267_v62  ;;  %v9060_v0 = vld [vmem:[%s11082_s24 + $0x214] ss:$24 sps:$4 sm:$0xff]  }
 0x3f1   : > { %v1532_v4 = vmul.f32 0.00390625, %v1509_v2  ;;  %v1560_v5 = vmul.f32 %v11270_v57, %v11270_v57  ;;  %v1561_v6 = vmul.f32 %v11273_v63, %v11273_v63  ;;  %2313 = vmatpush1.bf16.msra.mxu0 %v9059_v60  ;;  %v9063_v2 = vld [vmem:[%s11082_s24 + $0x244] ss:$24 sps:$4 sm:$0xff]  }
 0x3f2   : > { %v11284_v7 = vsub.f32 %v11198_v12, %v1530_v1  ;;  %v11287_v8 = vsub.f32 %v11200_v13, %v1530_v1  ;;  %v1574_v9 = vadd.f32 %v1557_v3, %v1556_v58  ;;  %v9062_v1 = vld [vmem:[%s11082_s24 + $0x210] ss:$24 sps:$4 sm:$0xff]   ;;  %2314 = vmatprep.subr.bf16.mxu0 %v9060_v0  ;;  %v9065_v58 = vld [vmem:[%s11082_s24 + $0x240] ss:$24 sps:$4 sm:$0xff]   ;;  %v9066_v3 = vld [vmem:[%s11082_s24 + $0x274] ss:$24 sps:$4 sm:$0xff]  }
 0x3f3   : > { %v11290_v10 = vsub.f32 %v11204_v15, %v1532_v4  ;;  %v11293_v11 = vsub.f32 %v11206_v16, %v1532_v4  ;;  %v1512_v14 = vpop.xlane.xlu0 %1511  ;;  %v1580_v25 = vadd.f32 %v1561_v6, %v1560_v5  ;;  %v9068_v4 = vld [vmem:[%s11082_s24 + $0x270] ss:$24 sps:$4 sm:$0xff]   ;;  %v9069_v5 = vld [vmem:[%s11082_s24 + $0x2a4] ss:$24 sps:$4 sm:$0xff]   ;;  %v9071_v6 = vld [vmem:[%s11082_s24 + $0x2a0] ss:$24 sps:$4 sm:$0xff]  }
 0x3f4   : > { %v1533_v17 = vmul.f32 0.00390625, %v1512_v14  ;;  %1575 = vadd.xlane.f32.xlu1 %v1574_v9  ;;  %v1515_v18 = vpop.xlane.xlu1 %1514  ;;  %v1558_v30 = vmul.f32 %v11284_v7, %v11284_v7  ;;  %v1559_v12 = vmul.f32 %v11287_v8, %v11287_v8  ;;  %v9072_v9 = vld [vmem:[%s11082_s24 + $0x2d4] ss:$24 sps:$4 sm:$0xff]   ;;  %v9074_v14 = vld [vmem:[%s11082_s24 + $0x2d0] ss:$24 sps:$4 sm:$0xff]  }
 0x3f5   : > { %v1534_v13 = vmul.f32 0.00390625, %v1515_v18  ;;  %v1562_v31 = vmul.f32 %v11290_v10, %v11290_v10  ;;  %v1563_v15 = vmul.f32 %v11293_v11, %v11293_v11  ;;  %2315 = vmatpush1.bf16.msra.mxu0 %v9062_v1 }
 0x3f6   : > { %v11304_v16 = vsub.f32 %v11212_v19, %v1533_v17  ;;  %v11307_v32 = vsub.f32 %v11214_v20, %v1533_v17  ;;  %v1577_v33 = vadd.f32 %v1559_v12, %v1558_v30  ;;  %2316 = vmatprep.subr.bf16.mxu0 %v9063_v2  ;;  %v9077_v17 = vld [vmem:[%s11082_s24 + $0xc] ss:$24 sps:$4 sm:$0xff]  }
 0x3f7   : > { %v11310_v34 = vsub.f32 %v11216_v21, %v1534_v13  ;;  %v11313_v35 = vsub.f32 %v11218_v22, %v1534_v13  ;;  %v1518_v36 = vpop.xlane.xlu0 %1517  ;;  %v1583_v39 = vadd.f32 %v1563_v15, %v1562_v31  ;;  %v13354_v31 = vlaneseq }
 0x3f8   : > { %v1535_v37 = vmul.f32 0.00390625, %v1518_v36  ;;  %1581 = vadd.xlane.f32.xlu1 %v1580_v25  ;;  %1578 = vadd.xlane.f32.xlu0 %v1577_v33  ;;  %v1521_v38 = vpop.xlane.xlu1 %1520  ;;  %v1564_v19 = vmul.f32 %v11304_v16, %v11304_v16  ;;  %v1565_v20 = vmul.f32 %v11307_v32, %v11307_v32 }
 0x3f9   : > { %v1536_v40 = vmul.f32 0.00390625, %v1521_v38  ;;  %v1566_v21 = vmul.f32 %v11310_v34, %v11310_v34  ;;  %v1567_v22 = vmul.f32 %v11313_v35, %v11313_v35  ;;  %2317 = vmatpush1.bf16.msra.mxu0 %v9065_v58 }
 0x3fa   : > { %v11324_v41 = vsub.f32 %v11220_v23, %v1535_v37  ;;  %v11327_v42 = vsub.f32 %v11222_v24, %v1535_v37  ;;  %v1586_v43 = vadd.f32 %v1565_v20, %v1564_v19  ;;  %2318 = vmatprep.subr.bf16.mxu0 %v9066_v3  ;;  %v11370_v19 = vshrl.u32 %v13354_v31, 7 }
 0x3fb   : > { %v11330_v44 = vsub.f32 %v11226_v26, %v1536_v40  ;;  %v11333_v45 = vsub.f32 %v11228_v27, %v1536_v40  ;;  %v1527_v46 = vpop.xlane.xlu0 %1526  ;;  %v1589_v48 = vadd.f32 %v1567_v22, %v1566_v21 }
 0x3fc   : > { %v1537_v47 = vmul.f32 0.00390625, %v1527_v46  ;;  %1584 = vadd.xlane.f32.xlu0 %v1583_v39  ;;  %1587 = vadd.xlane.f32.xlu1 %v1586_v43  ;;  %v1568_v23 = vmul.f32 %v11324_v41, %v11324_v41  ;;  %v1569_v24 = vmul.f32 %v11327_v42, %v11327_v42  ;;  %13484 = vst [vmem:[#allocation51_spill] sm:$0xff] %v11370_v19 }
 0x3fd   : > { %v1570_v26 = vmul.f32 %v11330_v44, %v11330_v44  ;;  %v1571_v27 = vmul.f32 %v11333_v45, %v11333_v45  ;;  %2319 = vmatpush1.bf16.msra.mxu0 %v9068_v4 }
 0x3fe   : > { %v11344_v49 = vsub.f32 %v11230_v28, %v1537_v47  ;;  %v11347_v50 = vsub.f32 %v11232_v29, %v1537_v47  ;;  %v1592_v51 = vadd.f32 %v1569_v24, %v1568_v23  ;;  %2320 = vmatprep.subr.bf16.mxu0 %v9069_v5  ;;  %v11373_v47 = vsub.s32 1, %v11370_v19  ;;  %v1496_v24 = vld [vmem:[%s849_s17] sm:$0x3]  ;;  %s13506_s17 = scalar_lea.vmem [#allocation18], %s11074_s23 }
 0x3ff   : > { %v1595_v52 = vadd.f32 %v1571_v27, %v1570_v26 }
 0x400   : > { %1590 = vadd.xlane.f32.xlu0 %v1589_v48  ;;  %1593 = vadd.xlane.f32.xlu1 %v1592_v51  ;;  %v1572_v53 = vmul.f32 %v11344_v49, %v11344_v49  ;;  %v1573_v54 = vmul.f32 %v11347_v50, %v11347_v50  ;;  %13485 = vst [vmem:[#allocation52_spill] sm:$0xff] %v11373_v47  ;;  %v11376_v48 = vsub.s32 0, %v11370_v19 }
 0x401   : > { %2321 = vmatpush1.bf16.msra.mxu0 %v9071_v6  ;;  %v11384_v55 = vrot.slane %v1496_v24, %v11373_v47 }
 0x402   : > { %v1598_v28 = vsel %vm1522_vm6, %v1572_v53, 0.0  ;;  %v1599_v29 = vsel %vm1522_vm6, %v1573_v54, 0.0  ;;  %2322 = vmatprep.subr.bf16.mxu0 %v9072_v9  ;;  %13486 = vst [vmem:[#allocation53_spill] sm:$0xff] %v11376_v48  ;;  %v1497_v53 = vld [vmem:[%s858_s1] sm:$0x3]  ;;  %s13549_s1 = scalar_lea.vmem [#allocation22], %s11074_s23 }
 0x403   : > { %v1600_v56 = vadd.f32 %v1599_v29, %v1598_v28  ;;  %v11388_v29 = vrot.slane %v1496_v24, %v11376_v48  ;;  %v11391_v2 = vrot.slane %v1497_v53, %v11373_v47  ;;  %v11394_v58 = vrot.slane %v1497_v53, %v11376_v48  ;;  %v9078_v24 = vld [vmem:[%s11082_s24 + $0x38] ss:$24 sps:$4 sm:$0xff]   ;;  %s13570_s23 = sld [smem:[#allocation38_spill]] }
 0x404   : > { %1596 = vadd.xlane.f32.xlu0 %v1595_v52 }
 0x405   : > { %1601 = vadd.xlane.f32.xlu1 %v1600_v56  ;;  %2323 = vmatpush1.bf16.msra.mxu0 %v9074_v14 }
 0x406   : > { %2373 = vmatprep.subr.bf16.mxu0 %v9077_v17 }
 0x409   : > { %p8476_p10 = scmp.ne.s32.totalorder %s13570_s23, 3 }
 0x40a   : > { %vm7549_vm15 = vcmask (!%p8476_p10), 1043459   ;;  %vm7479_vm0 = vcmask (!%p8476_p10), 1042434   ;;  %vm7409_vm1 = vcmask (!%p8476_p10), 1041409  }
 0x481   : > { %v1576_v18 = vpop.xlane.xlu1 %1575 }
 0x482   : > { %v1603_v25 = vmul.f32 0.00390625, %v1576_v18 }
 0x484   : > { %v1612_v30 = vadd.f32 1e-05, %v1603_v25 }
 0x485   : > { %v1582_v12 = vpop.xlane.xlu1 %1581  ;;  %v1579_v13 = vpop.xlane.xlu0 %1578 }
 0x486   : > { %9411 = vrsqrt.f32 %v1612_v30  ;;  %v1605_v15 = vmul.f32 0.00390625, %v1582_v12  ;;  %v1604_v33 = vmul.f32 0.00390625, %v1579_v13 }
 0x488   : > { %v1614_v36 = vadd.f32 1e-05, %v1605_v15  ;;  %v1613_v37 = vadd.f32 1e-05, %v1604_v33 }
 0x489   : > { %v1588_v38 = vpop.xlane.xlu1 %1587  ;;  %v1585_v39 = vpop.xlane.xlu0 %1584 }
 0x48a   : > { %9413 = vrsqrt.f32 %v1614_v36  ;;  %v1607_v20 = vmul.f32 0.00390625, %v1588_v38  ;;  %v1606_v40 = vmul.f32 0.00390625, %v1585_v39  ;;  %v9075_v38 = vld [vmem:[%s11082_s24 + $0x8] ss:$24 sps:$4 sm:$0xff]  }
 0x48b   : > { %9415 = vrsqrt.f32 %v1613_v37 }
 0x48c   : > { %v1616_v21 = vadd.f32 1e-05, %v1607_v20  ;;  %v1615_v22 = vadd.f32 1e-05, %v1606_v40 }
 0x48d   : > { %v1594_v43 = vpop.xlane.xlu1 %1593  ;;  %v1591_v46 = vpop.xlane.xlu0 %1590 }
 0x48e   : > { %9417 = vrsqrt.f32 %v1616_v21  ;;  %v1608_v23 = vmul.f32 0.00390625, %v1591_v46  ;;  %v1609_v26 = vmul.f32 0.00390625, %v1594_v43 }
 0x48f   : > { %9419 = vrsqrt.f32 %v1615_v22  ;;  %v9080_v22 = vld [vmem:[%s11082_s24 + $0x3c] ss:$24 sps:$4 sm:$0xff]  }
 0x490   : > { %v9412_v27 = vpop.eup %9411  ;;  %v1617_v51 = vadd.f32 1e-05, %v1608_v23  ;;  %v1618_v60 = vadd.f32 1e-05, %v1609_v26 }
 0x491   : > { %v1597_v52 = vpop.xlane.xlu0 %1596  ;;  %v1631_v54 = vmul.f32 %v9412_v27, %v11267_v62  ;;  %v1630_v28 = vmul.f32 %v9412_v27, %v11264_v61 }
 0x492   : > { %v1610_v56 = vmul.f32 0.00390625, %v1597_v52  ;;  %v1602_v59 = vpop.xlane.xlu1 %1601  ;;  %9421 = vrsqrt.f32 %v1617_v51  ;;  %v9083_v52 = vld [vmem:[%s11082_s24 + $0x6c] ss:$24 sps:$4 sm:$0xff]  }
 0x493   : > { %v1611_v3 = vmul.f32 0.00390625, %v1602_v59  ;;  %v1660_v4 = vmul.f32 %v11384_v55, %v1631_v54  ;;  %v1659_v61 = vmul.f32 %v11388_v29, %v1630_v28 }
 0x494   : > { %v9414_v0 = vpop.eup %9413  ;;  %v1619_v1 = vadd.f32 1e-05, %v1610_v56 }
 0x495   : > { %v9416_v62 = vpop.eup %9415  ;;  %v1635_v5 = vmul.f32 %v9414_v0, %v11273_v63  ;;  %v1620_v30 = vadd.f32 1e-05, %v1611_v3  ;;  %v1689_v12 = vadd.f32 %v11391_v2, %v1660_v4  ;;  %v1688_v13 = vadd.f32 %v11394_v58, %v1659_v61 }
 0x496   : > { %9423 = vrsqrt.f32 %v1619_v1  ;;  %v1633_v6 = vmul.f32 %v9416_v62, %v11287_v8  ;;  %v1632_v9 = vmul.f32 %v9416_v62, %v11284_v7  ;;  %v1634_v36 = vmul.f32 %v9414_v0, %v11270_v57  ;;  %v9086_v62 = vld [vmem:[%s11082_s24 + $0x9c] ss:$24 sps:$4 sm:$0xff]  }
 0x497   : > { %9425 = vrsqrt.f32 %v1618_v60  ;;  %v1664_v63 = vmul.f32 %v11384_v55, %v1635_v5  ;;  %v9081_v60 = vld [vmem:[%s11082_s24 + $0x68] ss:$24 sps:$4 sm:$0xff]  }
 0x498   : > { %v9418_v14 = vpop.eup %9417  ;;  %v1662_v17 = vmul.f32 %v11384_v55, %v1633_v6  ;;  %v1661_v18 = vmul.f32 %v11388_v29, %v1632_v9  ;;  %9427 = vrsqrt.f32 %v1620_v30  ;;  %v1663_v46 = vmul.f32 %v11388_v29, %v1634_v36  ;;  %v9089_v6 = vld [vmem:[%s11082_s24 + $0xcc] ss:$24 sps:$4 sm:$0xff]  }
 0x499   : > { %v9420_v25 = vpop.eup %9419  ;;  %v1639_v40 = vmul.f32 %v9418_v14, %v11307_v32  ;;  %v1693_v57 = vadd.f32 %v11391_v2, %v1664_v63  ;;  %v1638_v59 = vmul.f32 %v9418_v14, %v11304_v16 }
 0x49a   : > { %v1691_v8 = vadd.f32 %v11391_v2, %v1662_v17  ;;  %v1690_v7 = vadd.f32 %v11394_v58, %v1661_v18  ;;  %v1637_v15 = vmul.f32 %v9420_v25, %v11293_v11  ;;  %v1636_v33 = vmul.f32 %v9420_v25, %v11290_v10 }
 0x49b   : > { %v1668_v26 = vmul.f32 %v11384_v55, %v1639_v40  ;;  %v1692_v56 = vadd.f32 %v11394_v58, %v1663_v46  ;;  %v1667_v16 = vmul.f32 %v11388_v29, %v1638_v59  ;;  %v9093_v40 = vld [vmem:[%s11082_s24 + $0x128] ss:$24 sps:$4 sm:$0xff]   ;;  %v9104_v46 = vld [vmem:[%s11082_s24 + $0x1bc] ss:$24 sps:$4 sm:$0xff]   ;;  %v9120_v59 = vld [vmem:[%s11082_s24 + $0x2d8] ss:$24 sps:$4 sm:$0xff]  }
 0x49c   : > { %v11411_v37 = vpack.c.bf16 %v1691_v8, %v1689_v12  ;;  %v11414_v39 = vpack.c.bf16 %v1690_v7, %v1688_v13  ;;  %v1666_v20 = vmul.f32 %v11384_v55, %v1637_v15  ;;  %v9422_v21 = vpop.eup %9421  ;;  %v1665_v11 = vmul.f32 %v11388_v29, %v1636_v33  ;;  %v9087_v12 = vld [vmem:[%s11082_s24 + $0xc8] ss:$24 sps:$4 sm:$0xff]   ;;  %v9092_v8 = vld [vmem:[%s11082_s24 + $0xfc] ss:$24 sps:$4 sm:$0xff]   ;;  %v9090_v15 = vld [vmem:[%s11082_s24 + $0xf8] ss:$24 sps:$4 sm:$0xff]  }
 0x49d   : > { %v1641_v43 = vmul.f32 %v9422_v21, %v11313_v35  ;;  %v1640_v53 = vmul.f32 %v9422_v21, %v11310_v34  ;;  %v1697_v0 = vadd.f32 %v11391_v2, %v1668_v26  ;;  %v1696_v25 = vadd.f32 %v11394_v58, %v1667_v16  ;;  %v9095_v33 = vld [vmem:[%s11082_s24 + $0x12c] ss:$24 sps:$4 sm:$0xff]   ;;  %v9110_v26 = vld [vmem:[%s11082_s24 + $0x21c] ss:$24 sps:$4 sm:$0xff]   ;;  %v9132_v16 = vld [vmem:[%s11082_s24 + $0xa0] ss:$24 sps:$4 sm:$0xff]  }
 0x49e   : > { %2324 = vmatprep.mubr.bf16.mxu0 %v11411_v37  ;;  %v1695_v10 = vadd.f32 %v11391_v2, %v1666_v20  ;;  %v1694_v35 = vadd.f32 %v11394_v58, %v1665_v11 }
 0x49f   : > { %2325 = vmatmul.mubr.bf16.vlgmr.msra.gmra.mrb[0].mxu0 %v11414_v39  ;;  %v1670_v27 = vmul.f32 %v11384_v55, %v1641_v43  ;;  %v1669_v3 = vmul.f32 %v11388_v29, %v1640_v53  ;;  %v9099_v43 = vld [vmem:[%s11082_s24 + $0x188] ss:$24 sps:$4 sm:$0xff]   ;;  %v9114_v53 = vld [vmem:[%s11082_s24 + $0x278] ss:$24 sps:$4 sm:$0xff]  }
 0x4a0   : > { %v9424_v23 = vpop.eup %9423  ;;  %2374 = vmatpush1.bf16.msra.mxu0 %v9075_v38  ;;  %v11426_v32 = vpack.c.bf16 %v1695_v10, %v1693_v57  ;;  %v11442_v34 = vpack.c.bf16 %v1694_v35, %v1692_v56  ;;  %v9116_v35 = vld [vmem:[%s11082_s24 + $0x27c] ss:$24 sps:$4 sm:$0xff]  }
 0x4a1   : > { %v9426_v51 = vpop.eup %9425  ;;  %2375 = vmatprep.subr.bf16.mxu0 %v9080_v22  ;;  %v1699_v54 = vadd.f32 %v11391_v2, %v1670_v27  ;;  %v1645_v28 = vmul.f32 %v9424_v23, %v11333_v45  ;;  %v1698_v9 = vadd.f32 %v11394_v58, %v1669_v3  ;;  %v1644_v14 = vmul.f32 %v9424_v23, %v11330_v44  ;;  %v9098_v22 = vld [vmem:[%s11082_s24 + $0x15c] ss:$24 sps:$4 sm:$0xff]   ;;  %v9102_v23 = vld [vmem:[%s11082_s24 + $0x1b8] ss:$24 sps:$4 sm:$0xff]  }
 0x4a2   : > { %2334 = vmatprep.mubr.bf16.mxu0 %v11426_v32  ;;  %v1643_v1 = vmul.f32 %v9426_v51, %v11327_v42  ;;  %v9428_v61 = vpop.eup %9427  ;;  %v9084_v42 = vld [vmem:[%s11082_s24 + $0x98] ss:$24 sps:$4 sm:$0xff]   ;;  %v1642_v30 = vmul.f32 %v9426_v51, %v11324_v41  ;;  %v9113_v51 = vld [vmem:[%s11082_s24 + $0x24c] ss:$24 sps:$4 sm:$0xff]   ;;  %v9122_v56 = vld [vmem:[%s11082_s24 + $0x2dc] ss:$24 sps:$4 sm:$0xff]  }
 0x4a3   : > { %v11446_v4 = vpack.c.bf16 %v1699_v54, %v1697_v0  ;;  %v1674_v45 = vmul.f32 %v11384_v55, %v1645_v28  ;;  %v1647_v18 = vmul.f32 %v9428_v61, %v11347_v50  ;;  %v11463_v63 = vpack.c.bf16 %v1698_v9, %v1696_v25  ;;  %v9108_v27 = vld [vmem:[%s11082_s24 + $0x218] ss:$24 sps:$4 sm:$0xff]   ;;  %v9119_v54 = vld [vmem:[%s11082_s24 + $0x2ac] ss:$24 sps:$4 sm:$0xff]   ;;  %v9117_v28 = vld [vmem:[%s11082_s24 + $0x2a8] ss:$24 sps:$4 sm:$0xff]  }
 0x4a4   : > { %2376 = vmatpush1.bf16.msra.mxu0 %v9078_v24  ;;  %v1672_v5 = vmul.f32 %v11384_v55, %v1643_v1  ;;  %v1673_v44 = vmul.f32 %v11388_v29, %v1644_v14  ;;  %v1671_v41 = vmul.f32 %v11388_v29, %v1642_v30  ;;  %v1646_v38 = vmul.f32 %v9428_v61, %v11344_v49  ;;  %v9096_v49 = vld [vmem:[%s11082_s24 + $0x158] ss:$24 sps:$4 sm:$0xff]   ;;  %v9107_v24 = vld [vmem:[%s11082_s24 + $0x1ec] ss:$24 sps:$4 sm:$0xff]  }
 0x4a5   : > { %2377 = vmatprep.subr.bf16.mxu0 %v9083_v52  ;;  %v1703_v17 = vadd.f32 %v11391_v2, %v1674_v45  ;;  %v1676_v50 = vmul.f32 %v11384_v55, %v1647_v18  ;;  %v9111_v52 = vld [vmem:[%s11082_s24 + $0x248] ss:$24 sps:$4 sm:$0xff]   ;;  %v9128_v1 = vld [vmem:[%s11082_s24 + $0x44] ss:$24 sps:$4 sm:$0xff]   ;;  %v9131_v3 = vld [vmem:[%s11082_s24 + $0x74] ss:$24 sps:$4 sm:$0xff]  }
 0x4a6   : > { %v1701_v13 = vadd.f32 %v11391_v2, %v1672_v5  ;;  %v1702_v36 = vadd.f32 %v11394_v58, %v1673_v44  ;;  %v1700_v55 = vadd.f32 %v11394_v58, %v1671_v41  ;;  %v1675_v11 = vmul.f32 %v11388_v29, %v1646_v38  ;;  %v9123_v0 = vld [vmem:[%s11082_s24 + $0x10] ss:$24 sps:$4 sm:$0xff]   ;;  %v9134_v61 = vld [vmem:[%s11082_s24 + $0xa4] ss:$24 sps:$4 sm:$0xff]   ;;  %v9138_v9 = vld [vmem:[%s11082_s24 + $0x100] ss:$24 sps:$4 sm:$0xff]  }
 0x4a7   : > { %2335 = vmatmul.mubr.bf16.gmra.mrb[4].mxu0 %v11442_v34  ;;  %v1705_v20 = vadd.f32 %v11391_v2, %v1676_v50  ;;  %v9101_v2 = vld [vmem:[%s11082_s24 + $0x18c] ss:$24 sps:$4 sm:$0xff]   ;;  %v9129_v45 = vld [vmem:[%s11082_s24 + $0x70] ss:$24 sps:$4 sm:$0xff]   ;;  %v9144_v25 = vld [vmem:[%s11082_s24 + $0x160] ss:$24 sps:$4 sm:$0xff]  }
 0x4a8   : > { %2378 = vmatpush1.bf16.msra.mxu0 %v9081_v60  ;;  %2344 = vmatprep.mubr.bf16.mxu0 %v11446_v4  ;;  %v11467_v7 = vpack.c.bf16 %v1703_v17, %v1701_v13  ;;  %v11480_v21 = vpack.c.bf16 %v1702_v36, %v1700_v55  ;;  %v1704_v10 = vadd.f32 %v11394_v58, %v1675_v11  ;;  %v9105_v58 = vld [vmem:[%s11082_s24 + $0x1e8] ss:$24 sps:$4 sm:$0xff]   ;;  %v9125_v60 = vld [vmem:[%s11082_s24 + $0x14] ss:$24 sps:$4 sm:$0xff]   ;;  %v9146_v18 = vld [vmem:[%s11082_s24 + $0x164] ss:$24 sps:$4 sm:$0xff]  }
 0x4a9   : > { %2379 = vmatprep.subr.bf16.mxu0 %v9086_v62  ;;  %v11484_v57 = vpack.c.bf16 %v1705_v20, %v1705_v20  ;;  %v9126_v62 = vld [vmem:[%s11082_s24 + $0x40] ss:$24 sps:$4 sm:$0xff]   ;;  %v9135_v5 = vld [vmem:[%s11082_s24 + $0xd0] ss:$24 sps:$4 sm:$0xff]   ;;  %v9143_v14 = vld [vmem:[%s11082_s24 + $0x134] ss:$24 sps:$4 sm:$0xff]  }
 0x4aa   : > { %v11492_v29 = vpack.c.bf16 %v1704_v10, %v1704_v10  ;;  %v9141_v17 = vld [vmem:[%s11082_s24 + $0x130] ss:$24 sps:$4 sm:$0xff]   ;;  %v9149_v30 = vld [vmem:[%s11082_s24 + $0x194] ss:$24 sps:$4 sm:$0xff]   ;;  %v9152_v13 = vld [vmem:[%s11082_s24 + $0x1c4] ss:$24 sps:$4 sm:$0xff]  }
 0x4ab   : > { %v9155_v44 = vld [vmem:[%s11082_s24 + $0x1f4] ss:$24 sps:$4 sm:$0xff]   ;;  %v9153_v50 = vld [vmem:[%s11082_s24 + $0x1f0] ss:$24 sps:$4 sm:$0xff]   ;;  %v9158_v41 = vld [vmem:[%s11082_s24 + $0x224] ss:$24 sps:$4 sm:$0xff]  }
 0x4ac   : > { %2380 = vmatpush1.bf16.msra.mxu0 %v9084_v42  ;;  %v9137_v42 = vld [vmem:[%s11082_s24 + $0xd4] ss:$24 sps:$4 sm:$0xff]   ;;  %v9159_v36 = vld [vmem:[%s11082_s24 + $0x250] ss:$24 sps:$4 sm:$0xff]   ;;  %v9162_v38 = vld [vmem:[%s11082_s24 + $0x280] ss:$24 sps:$4 sm:$0xff]  }
 0x4ad   : > { %2381 = vmatprep.subr.bf16.mxu0 %v9089_v6  ;;  %v9140_v6 = vld [vmem:[%s11082_s24 + $0x104] ss:$24 sps:$4 sm:$0xff]   ;;  %v9167_v20 = vld [vmem:[%s11082_s24 + $0x2b4] ss:$24 sps:$4 sm:$0xff]   ;;  %v9165_v55 = vld [vmem:[%s11082_s24 + $0x2b0] ss:$24 sps:$4 sm:$0xff]  }
 0x4af   : > { %2345 = vmatmul.mubr.bf16.gmra.mrb[8].mxu0 %v11463_v63 }
 0x4b0   : > { %2382 = vmatpush1.bf16.msra.mxu0 %v9087_v12  ;;  %2354 = vmatprep.mubr.bf16.mxu0 %v11467_v7  ;;  %v9147_v12 = vld [vmem:[%s11082_s24 + $0x190] ss:$24 sps:$4 sm:$0xff]  }
 0x4b1   : > { %2383 = vmatprep.subr.bf16.mxu0 %v9092_v8  ;;  %v9150_v8 = vld [vmem:[%s11082_s24 + $0x1c0] ss:$24 sps:$4 sm:$0xff]  }
 0x4b4   : > { %2384 = vmatpush1.bf16.msra.mxu0 %v9090_v15  ;;  %v9156_v15 = vld [vmem:[%s11082_s24 + $0x220] ss:$24 sps:$4 sm:$0xff]  }
 0x4b5   : > { %2385 = vmatprep.subr.bf16.mxu0 %v9095_v33  ;;  %v9161_v33 = vld [vmem:[%s11082_s24 + $0x254] ss:$24 sps:$4 sm:$0xff]  }
 0x4b7   : > { %2355 = vmatmul.mubr.bf16.gmra.mrb[12].mxu0 %v11480_v21 }
 0x4b8   : > { %2386 = vmatpush1.bf16.msra.mxu0 %v9093_v40  ;;  %2364 = vmatprep.mubr.bf16.mxu0 %v11484_v57  ;;  %v9170_v40 = vld [vmem:[%s11082_s24 + $0x2e4] ss:$24 sps:$4 sm:$0xff]  }
 0x4b9   : > { %2387 = vmatprep.subr.bf16.mxu0 %v9098_v22  ;;  %v9168_v22 = vld [vmem:[%s11082_s24 + $0x2e0] ss:$24 sps:$4 sm:$0xff]  }
 0x4bc   : > { %2388 = vmatpush1.bf16.msra.mxu0 %v9096_v49 }
 0x4bd   : > { %2389 = vmatprep.subr.bf16.mxu0 %v9101_v2 }
 0x4bf   : > { %2365 = vmatmul.mubr.bf16.gmra.mrb[16].mxu0 %v11492_v29 }
 0x4c0   : > { %2390 = vmatpush1.bf16.msra.mxu0 %v9099_v43  ;;  %2405 = vmatprep.mubr.bf16.mxu0 %v11411_v37 }
 0x4c1   : > { %2391 = vmatprep.subr.bf16.mxu0 %v9104_v46 }
 0x4c4   : > { %2392 = vmatpush1.bf16.msra.mxu0 %v9102_v23 }
 0x4c5   : > { %2393 = vmatprep.subr.bf16.mxu0 %v9107_v24 }
 0x4c8   : > { %2394 = vmatpush1.bf16.msra.mxu0 %v9105_v58 }
 0x4c9   : > { %2395 = vmatprep.subr.bf16.mxu0 %v9110_v26 }
 0x4cc   : > { %2396 = vmatpush1.bf16.msra.mxu0 %v9108_v27 }
 0x4cd   : > { %2397 = vmatprep.subr.bf16.mxu0 %v9113_v51 }
 0x4d0   : > { %2398 = vmatpush1.bf16.msra.mxu0 %v9111_v52 }
 0x4d1   : > { %2399 = vmatprep.subr.bf16.mxu0 %v9116_v35 }
 0x4d4   : > { %2400 = vmatpush1.bf16.msra.mxu0 %v9114_v53 }
 0x4d5   : > { %2401 = vmatprep.subr.bf16.mxu0 %v9119_v54 }
 0x4d8   : > { %2402 = vmatpush1.bf16.msra.mxu0 %v9117_v28 }
 0x4d9   : > { %2403 = vmatprep.subr.bf16.mxu0 %v9122_v56 }
 0x4dc   : > { %2404 = vmatpush1.bf16.msra.mxu0 %v9120_v59 }
 0x4dd   : > { %2454 = vmatprep.subr.bf16.mxu0 %v9125_v60 }
 0x4df   : > { %2406 = vmatmul.mubr.bf16.vlgmr.msra.gmra.mrb[20].mxu0 %v11414_v39 }
 0x4e0   : > { %2415 = vmatprep.mubr.bf16.mxu0 %v11426_v32  ;;  %2455 = vmatpush1.bf16.msra.mxu0 %v9123_v0 }
 0x4e1   : > { %2456 = vmatprep.subr.bf16.mxu0 %v9128_v1 }
 0x4e4   : > { %2457 = vmatpush1.bf16.msra.mxu0 %v9126_v62 }
 0x4e5   : > { %2458 = vmatprep.subr.bf16.mxu0 %v9131_v3 }
 0x4e7   : > { %2416 = vmatmul.mubr.bf16.gmra.mrb[24].mxu0 %v11442_v34 }
 0x4e8   : > { %2425 = vmatprep.mubr.bf16.mxu0 %v11446_v4  ;;  %2459 = vmatpush1.bf16.msra.mxu0 %v9129_v45 }
 0x4e9   : > { %2460 = vmatprep.subr.bf16.mxu0 %v9134_v61 }
 0x4ec   : > { %2461 = vmatpush1.bf16.msra.mxu0 %v9132_v16 }
 0x4ed   : > { %2462 = vmatprep.subr.bf16.mxu0 %v9137_v42 }
 0x4ef   : > { %2426 = vmatmul.mubr.bf16.gmra.mrb[28].mxu0 %v11463_v63 }
 0x4f0   : > { %2435 = vmatprep.mubr.bf16.mxu0 %v11467_v7  ;;  %2463 = vmatpush1.bf16.msra.mxu0 %v9135_v5 }
 0x4f1   : > { %2464 = vmatprep.subr.bf16.mxu0 %v9140_v6 }
 0x4f4   : > { %2465 = vmatpush1.bf16.msra.mxu0 %v9138_v9 }
 0x4f5   : > { %2466 = vmatprep.subr.bf16.mxu0 %v9143_v14 }
 0x4f7   : > { %2436 = vmatmul.mubr.bf16.gmra.mrb[32].mxu0 %v11480_v21 }
 0x4f8   : > { %2445 = vmatprep.mubr.bf16.mxu0 %v11484_v57  ;;  %2467 = vmatpush1.bf16.msra.mxu0 %v9141_v17 }
 0x4f9   : > { %2468 = vmatprep.subr.bf16.mxu0 %v9146_v18 }
 0x4fc   : > { %2469 = vmatpush1.bf16.msra.mxu0 %v9144_v25 }
 0x4fd   : > { %2470 = vmatprep.subr.bf16.mxu0 %v9149_v30 }
 0x4ff   : > { %2446 = vmatmul.mubr.bf16.gmra.mrb[36].mxu0 %v11492_v29 }
 0x500   : > { %2471 = vmatpush1.bf16.msra.mxu0 %v9147_v12  ;;  %2486 = vmatprep.mubr.bf16.mxu0 %v11411_v37  ;;  %v9164_v37 = vld [vmem:[%s11082_s24 + $0x284] ss:$24 sps:$4 sm:$0xff]  }
 0x501   : > { %2472 = vmatprep.subr.bf16.mxu0 %v9152_v13 }
 0x504   : > { %2473 = vmatpush1.bf16.msra.mxu0 %v9150_v8 }
 0x505   : > { %2474 = vmatprep.subr.bf16.mxu0 %v9155_v44 }
 0x508   : > { %2475 = vmatpush1.bf16.msra.mxu0 %v9153_v50 }
 0x509   : > { %2476 = vmatprep.subr.bf16.mxu0 %v9158_v41 }
 0x50c   : > { %2477 = vmatpush1.bf16.msra.mxu0 %v9156_v15 }
 0x50d   : > { %2478 = vmatprep.subr.bf16.mxu0 %v9161_v33 }
 0x510   : > { %2479 = vmatpush1.bf16.msra.mxu0 %v9159_v36 }
 0x511   : > { %2480 = vmatprep.subr.bf16.mxu0 %v9164_v37 }
 0x514   : > { %2481 = vmatpush1.bf16.msra.mxu0 %v9162_v38 }
 0x515   : > { %2482 = vmatprep.subr.bf16.mxu0 %v9167_v20 }
 0x518   : > { %2483 = vmatpush1.bf16.msra.mxu0 %v9165_v55 }
 0x519   : > { %2484 = vmatprep.subr.bf16.mxu0 %v9170_v40 }
 0x51c   : > { %2485 = vmatpush1.bf16.msra.mxu0 %v9168_v22 }
 0x51f   : > { %2487 = vmatmul.mubr.bf16.vlgmr.msra.gmra.mrb[40].mxu0 %v11414_v39 }
 0x520   : > { %2496 = vmatprep.mubr.bf16.mxu0 %v11426_v32 }
 0x527   : > { %2497 = vmatmul.mubr.bf16.gmra.mrb[44].mxu0 %v11442_v34 }
 0x528   : > { %2506 = vmatprep.mubr.bf16.mxu0 %v11446_v4 }
 0x52f   : > { %2507 = vmatmul.mubr.bf16.gmra.mrb[48].mxu0 %v11463_v63 }
 0x530   : > { %2516 = vmatprep.mubr.bf16.mxu0 %v11467_v7 }
 0x537   : > { %2517 = vmatmul.mubr.bf16.gmra.mrb[52].mxu0 %v11480_v21 }
 0x538   : > { %2526 = vmatprep.mubr.bf16.mxu0 %v11484_v57 }
 0x53f   : > { %2527 = vmatmul.mubr.bf16.gmra.mrb[56].mxu0 %v11492_v29 }
 0x572   : > { %v2326_v11 = vpop.f32.mrb[0].mxu0 }
 0x573   : > { %v11561_v49 = vpop.f32.mrb[1].mxu0 }
 0x574   : > { %v2330_v39 = vpop.f32.mrb[2].mxu0 }
 0x575   : > { %v2535_v2 = vpack.c.bf16 %v2330_v39, %v2326_v11  ;;  %v11563_v32 = vpop.f32.mrb[3].mxu0 }
 0x576   : > { %v2536_v34 = vpack.c.bf16 %v11563_v32, %v11561_v49 }
 0x577   : > { %8567 = vmatprep.mubr.bf16.mxu0 %v2535_v2 }
 0x57a   : > { %v11567_v4 = vpop.f32.mrb[4].mxu0 }
 0x57b   : > { %v11569_v63 = vpop.f32.mrb[5].mxu0 }
 0x57c   : > { %v2340_v7 = vpop.f32.mrb[6].mxu0 }
 0x57d   : > { %v2844_v21 = vpack.c.bf16 %v2340_v7, %v11567_v4  ;;  %v2342_v57 = vpop.f32.mrb[7].mxu0 }
 0x57e   : > { %v2845_v10 = vpack.c.bf16 %v2342_v57, %v11569_v63 }
 0x57f   : > { %v2860_v43 = vshll.u32 %v2844_v21, 16  ;;  %v2858_v52 = vshrl.u32 %v2844_v21, 16 }
 0x580   : > { %v3064_v29 = vshll.u32 %v2845_v10, 16  ;;  %v3062_v28 = vshrl.u32 %v2845_v10, 16 }
 0x581   : > { %v2862_v23 = vrot.slane %v2860_v43, 1 }
 0x582   : > { %v2346_v46 = vpop.f32.mrb[8].mxu0  ;;  %v3066_v26 = vrot.slane %v3064_v29, 1 }
 0x583   : > { %v11573_v24 = vpack.c.bf16 %v2346_v46, %v2346_v46  ;;  %v2348_v58 = vpop.f32.mrb[9].mxu0  ;;  %v2863_v60 = vor.u32 %v2862_v23, %v2858_v52 }
 0x584   : > { %v11575_v27 = vpack.c.bf16 %v2348_v58, %v2348_v58  ;;  %v2350_v51 = vpop.f32.mrb[10].mxu0  ;;  %v3067_v1 = vor.u32 %v3066_v26, %v3062_v28 }
 0x585   : > { %v2865_v35 = vshll.u32 %v11573_v24, 16  ;;  %v3265_v53 = vpack.c.bf16 %v2350_v51, %v2346_v46  ;;  %v2352_v54 = vpop.f32.mrb[11].mxu0 }
 0x586   : > { %v3069_v56 = vshll.u32 %v11575_v27, 16  ;;  %v3266_v59 = vpack.c.bf16 %v2352_v54, %v2348_v58 }
 0x587   : > { %v2867_v0 = vrot.slane %v2865_v35, 1  ;;  %v3280_v9 = vrot.slane %v3265_v53, 1 }
 0x588   : > { %v3071_v62 = vrot.slane %v3069_v56, 1  ;;  %v3458_v25 = vrot.slane %v3266_v59, 1 }
 0x589   : > { %v11580_v3 = vsel %vm2856_vm7, %v2863_v60, %v2867_v0 }
 0x58a   : > { %v2356_v45 = vpop.f32.mrb[12].mxu0  ;;  %v11583_v61 = vsel %vm2856_vm7, %v3067_v1, %v3071_v62 }
 0x58b   : > { %v3271_v16 = vpack.c.bf16 %v2356_v45, %v2356_v45  ;;  %v2358_v42 = vpop.f32.mrb[13].mxu0 }
 0x58c   : > { %v3272_v5 = vpack.c.bf16 %v2358_v42, %v2358_v42  ;;  %v2360_v6 = vpop.f32.mrb[14].mxu0 }
 0x58d   : > { %v11585_v14 = vrot.slane %v3271_v16, 1  ;;  %v3633_v17 = vpack.c.bf16 %v2360_v6, %v2356_v45  ;;  %v2362_v18 = vpop.f32.mrb[15].mxu0 }
 0x58e   : > { %v11587_v30 = vrot.slane %v3272_v5, 1  ;;  %v3634_v12 = vpack.c.bf16 %v2362_v18, %v2358_v42 }
 0x58f   : > { %v11591_v13 = vsel %vm3279_vm8, %v3280_v9, %v11585_v14  ;;  %v3647_v44 = vshrl.u32 %v3633_v17, 16  ;;  %v3650_v50 = vshll.u32 %v3633_v17, 16 }
 0x590   : > { %v11595_v8 = vsel %vm3279_vm8, %v3458_v25, %v11587_v30  ;;  %v3861_v41 = vshrl.u32 %v3634_v12, 16  ;;  %v3864_v15 = vshll.u32 %v3634_v12, 16 }
 0x591   : > { %v3649_v55 = vrot.slane %v3647_v44, 1  ;;  %v3652_v40 = vrot.slane %v3650_v50, 2 }
 0x592   : > { %v2366_v33 = vpop.f32.mrb[16].mxu0  ;;  %v3863_v2 = vrot.slane %v3861_v41, 1  ;;  %v3866_v7 = vrot.slane %v3864_v15, 2  ;;  %v2541_v15 = vpack.c.bf16 %v11567_v4, %v11567_v4 }
 0x593   : > { %v3639_v36 = vpack.c.bf16 %v2366_v33, %v2366_v33  ;;  %v2368_v37 = vpop.f32.mrb[17].mxu0  ;;  %v3653_v23 = vor.u32 %v3652_v40, %v3649_v55 }
 0x594   : > { %v3640_v38 = vpack.c.bf16 %v2368_v37, %v2368_v37  ;;  %v2370_v20 = vpop.f32.mrb[18].mxu0  ;;  %v3867_v26 = vor.u32 %v3866_v7, %v3863_v2 }
 0x595   : > { %v3655_v22 = vshrl.u32 %v3639_v36, 16  ;;  %v3658_v11 = vshll.u32 %v3639_v36, 16  ;;  %v2371_v39 = vpop.f32.mrb[19].mxu0 }
 0x596   : > { %v3869_v21 = vshrl.u32 %v3640_v38, 16  ;;  %v3872_v57 = vshll.u32 %v3640_v38, 16 }
 0x597   : > { %v11597_v10 = vrot.slane %v3655_v22, 1  ;;  %v3660_v43 = vrot.slane %v3658_v11, 2 }
 0x598   : > { %v11599_v29 = vrot.slane %v3869_v21, 1  ;;  %v3874_v46 = vrot.slane %v3872_v57, 2 }
 0x599   : > { %v3661_v58 = vor.u32 %v3660_v43, %v11597_v10 }
 0x59a   : > { %v3875_v51 = vor.u32 %v3874_v46, %v11599_v29 }
 0x59b   : > { %v11604_v52 = vsel %vm3645_vm9, %v3653_v23, %v3661_v58 }
 0x59c   : > { %v11607_v35 = vsel %vm3645_vm9, %v3867_v26, %v3875_v51 }
 0x5b2   : > { %v2407_v53 = vpop.f32.mrb[20].mxu0 }
 0x5b3   : > { %v2409_v54 = vpop.f32.mrb[21].mxu0 }
 0x5b4   : > { %v2411_v28 = vpop.f32.mrb[22].mxu0 }
 0x5b5   : > { %v2537_v56 = vpack.c.bf16 %v2411_v28, %v2407_v53  ;;  %v2413_v59 = vpop.f32.mrb[23].mxu0 }
 0x5b6   : > { %v11609_v60 = vpack.c.bf16 %v2413_v59, %v2409_v54 }
 0x5b7   : > { %8563 = vmatprep.subr.bf16.mxu0 %v2537_v56 }
 0x5b8   : > { %8564 = vmatpush3.bf16.xpose.msra.mxu0 %v2537_v56 }
 0x5ba   : > { %v2417_v0 = vpop.f32.mrb[24].mxu0 }
 0x5bb   : > { %v2543_v1 = vpack.c.bf16 %v2417_v0, %v2417_v0  ;;  %v11611_v62 = vpop.f32.mrb[25].mxu0 }
 0x5bc   : > { %v2421_v45 = vpop.f32.mrb[26].mxu0 }
 0x5bd   : > { %v2846_v16 = vpack.c.bf16 %v2421_v45, %v2417_v0  ;;  %v2423_v42 = vpop.f32.mrb[27].mxu0  ;;  %8565 = vmatprep.subr.bf16.mxu0 %v2543_v1 }
 0x5be   : > { %v2847_v5 = vpack.c.bf16 %v2423_v42, %v11611_v62 }
 0x5bf   : > { %v2876_v6 = vshll.u32 %v2846_v16, 16  ;;  %v2874_v33 = vshrl.u32 %v2846_v16, 16 }
 0x5c0   : > { %v3080_v9 = vshll.u32 %v2847_v5, 16  ;;  %8566 = vmatpush3.bf16.xpose.msra.mxu0 %v2543_v1  ;;  %v3078_v20 = vshrl.u32 %v2847_v5, 16 }
 0x5c1   : > { %v2878_v18 = vrot.slane %v2876_v6, 1 }
 0x5c2   : > { %v2427_v17 = vpop.f32.mrb[28].mxu0  ;;  %v3082_v44 = vrot.slane %v3080_v9, 1 }
 0x5c3   : > { %v11614_v25 = vpack.c.bf16 %v2427_v17, %v2427_v17  ;;  %v2429_v12 = vpop.f32.mrb[29].mxu0  ;;  %v2879_v22 = vor.u32 %v2878_v18, %v2874_v33 }
 0x5c4   : > { %v2853_v50 = vpack.c.bf16 %v2429_v12, %v2429_v12  ;;  %v2431_v41 = vpop.f32.mrb[30].mxu0  ;;  %v3083_v39 = vor.u32 %v3082_v44, %v3078_v20 }
 0x5c5   : > { %v2881_v36 = vshll.u32 %v11614_v25, 16  ;;  %v3267_v37 = vpack.c.bf16 %v2431_v41, %v2427_v17  ;;  %v2433_v38 = vpop.f32.mrb[31].mxu0 }
 0x5c6   : > { %v3085_v55 = vshll.u32 %v2853_v50, 16  ;;  %v3268_v40 = vpack.c.bf16 %v2433_v38, %v2429_v12  ;;  %v3089_v57 = vshrl.u32 %v2853_v50, 16 }
 0x5c7   : > { %v2883_v11 = vrot.slane %v2881_v36, 1  ;;  %8568 = vmatmul.mubr.bf16.vlgmr.msra.gmra.mrb[60].mxu0 %v2541_v15  ;;  %v3287_v26 = vrot.slane %v3267_v37, 1 }
 0x5c8   : > { %v3087_v2 = vrot.slane %v3085_v55, 1  ;;  %8615 = vmatprep.mubr.bf16.mxu0 %v11583_v61  ;;  %v3465_v28 = vrot.slane %v3268_v40, 1 }
 0x5c9   : > { %v11621_v7 = vsel %vm2856_vm7, %v2879_v22, %v2883_v11  ;;  %v3073_v11 = vshrl.u32 %v11575_v27, 16 }
 0x5ca   : > { %v2437_v21 = vpop.f32.mrb[32].mxu0  ;;  %v3088_v4 = vsel %vm2856_vm7, %v3083_v39, %v3087_v2 }
 0x5cb   : > { %v3273_v43 = vpack.c.bf16 %v2437_v21, %v2437_v21  ;;  %v2439_v46 = vpop.f32.mrb[33].mxu0  ;;  %8611 = vmatprep.subr.bf16.mxu0 %v3088_v4 }
 0x5cc   : > { %v3274_v23 = vpack.c.bf16 %v2439_v46, %v2439_v46  ;;  %v2441_v58 = vpop.f32.mrb[34].mxu0  ;;  %8612 = vmatpush3.bf16.xpose.msra.mxu0 %v3088_v4 }
 0x5cd   : > { %v3288_v51 = vrot.slane %v3273_v43, 1  ;;  %v3635_v53 = vpack.c.bf16 %v2441_v58, %v2437_v21  ;;  %v2443_v54 = vpop.f32.mrb[35].mxu0  ;;  %8613 = vmatprep.subr.bf16.mxu0 %v3089_v57 }
 0x5ce   : > { %v11624_v61 = vrot.slane %v3274_v23, 1  ;;  %v3636_v56 = vpack.c.bf16 %v2443_v54, %v2439_v46 }
 0x5cf   : > { %v3289_v59 = vsel %vm3279_vm8, %v3287_v26, %v3288_v51  ;;  %v3666_v1 = vshrl.u32 %v3635_v53, 16  ;;  %v3669_v45 = vshll.u32 %v3635_v53, 16 }
 0x5d0   : > { %v11629_v0 = vsel %vm3279_vm8, %v3465_v28, %v11624_v61  ;;  %v3880_v16 = vshrl.u32 %v3636_v56, 16  ;;  %v3883_v42 = vshll.u32 %v3636_v56, 16  ;;  %v10380_v28 = vmov 0  }
 0x5d1   : > { %v3668_v12 = vrot.slane %v3666_v1, 1  ;;  %v3671_v44 = vrot.slane %v3669_v45, 2 }
 0x5d2   : > { %v2447_v5 = vpop.f32.mrb[36].mxu0  ;;  %v3882_v33 = vrot.slane %v3880_v16, 1  ;;  %v3885_v36 = vrot.slane %v3883_v42, 2 }
 0x5d3   : > { %v3641_v6 = vpack.c.bf16 %v2447_v5, %v2447_v5  ;;  %v2449_v9 = vpop.f32.mrb[37].mxu0  ;;  %v3672_v39 = vor.u32 %v3671_v44, %v3668_v12 }
 0x5d4   : > { %v3642_v17 = vpack.c.bf16 %v2449_v9, %v2449_v9  ;;  %v2451_v18 = vpop.f32.mrb[38].mxu0  ;;  %8614 = vmatpush3.bf16.xpose.msra.mxu0 %v3089_v57  ;;  %v3886_v21 = vor.u32 %v3885_v36, %v3882_v33 }
 0x5d5   : > { %v3674_v50 = vshrl.u32 %v3641_v6, 16  ;;  %v3677_v41 = vshll.u32 %v3641_v6, 16  ;;  %v2452_v15 = vpop.f32.mrb[39].mxu0  ;;  %8627 = vmatprep.subr.bf16.mxu0 %v3289_v59 }
 0x5d6   : > { %v3888_v37 = vshrl.u32 %v3642_v17, 16  ;;  %v3891_v38 = vshll.u32 %v3642_v17, 16 }
 0x5d7   : > { %v11631_v20 = vrot.slane %v3674_v50, 1  ;;  %v3679_v55 = vrot.slane %v3677_v41, 2 }
 0x5d8   : > { %v11633_v40 = vrot.slane %v3888_v37, 1  ;;  %v3893_v22 = vrot.slane %v3891_v38, 2 }
 0x5d9   : > { %v3680_v2 = vor.u32 %v3679_v55, %v11631_v20 }
 0x5da   : > { %v3894_v4 = vor.u32 %v3893_v22, %v11633_v40 }
 0x5db   : > { %8616 = vmatmul.mubr.bf16.vlgmr.msra.gmra.mrb[64].mxu0 %v3073_v11  ;;  %v11639_v57 = vsel %vm3645_vm9, %v3672_v39, %v3680_v2 }
 0x5dc   : > { %8628 = vmatpush3.bf16.xpose.msra.mxu0 %v3289_v59  ;;  %8631 = vmatprep.mubr.bf16.mxu0 %v11591_v13  ;;  %v11643_v43 = vsel %vm3645_vm9, %v3886_v21, %v3894_v4  ;;  %v11649_v13 = vsel %vm2641_vm10, 65535, %v10380_v28 }
 0x5dd   : > { %8629 = vmatprep.subr.bf16.mxu0 %v3288_v51 }
 0x5e4   : > { %8630 = vmatpush3.bf16.xpose.msra.mxu0 %v3288_v51 }
 0x5eb   : > { %8632 = vmatmul.mubr.bf16.vlgmr.msra.gmra.mrb[68].mxu0 %v11585_v14 }
 0x5f2   : > { %v2488_v27 = vpop.f32.mrb[40].mxu0 }
 0x5f3   : > { %v2490_v46 = vpop.f32.mrb[41].mxu0 }
 0x5f4   : > { %v2492_v23 = vpop.f32.mrb[42].mxu0 }
 0x5f5   : > { %v2539_v58 = vpack.c.bf16 %v2492_v23, %v2488_v27  ;;  %v2494_v26 = vpop.f32.mrb[43].mxu0 }
 0x5f6   : > { %v11646_v53 = vpack.c.bf16 %v2494_v26, %v2490_v46 }
 0x5f7   : > { %8571 = vmatprep.subr.bf16.mxu1 %v2539_v58 }
 0x5f8   : > { %8572 = vmatpush3.bf16.msra.mxu1 %v2539_v58 }
 0x5fa   : > { %v2498_v54 = vpop.f32.mrb[44].mxu0 }
 0x5fb   : > { %v2545_v56 = vpack.c.bf16 %v2498_v54, %v2498_v54  ;;  %v2500_v59 = vpop.f32.mrb[45].mxu0 }
 0x5fc   : > { %v2546_v51 = vpack.c.bf16 %v2500_v59, %v2500_v59  ;;  %v2502_v1 = vpop.f32.mrb[46].mxu0 }
 0x5fd   : > { %v2645_v14 = vand.u32 %v11649_v13, %v2545_v56  ;;  %v2848_v45 = vpack.c.bf16 %v2502_v1, %v2498_v54  ;;  %v2504_v16 = vpop.f32.mrb[47].mxu0 }
 0x5fe   : > { %v11653_v42 = vand.u32 %v11649_v13, %v2546_v51  ;;  %v2849_v5 = vpack.c.bf16 %v2504_v16, %v2500_v59 }
 0x5ff   : > { %v2978_v6 = vshll.u32 %v2848_v45, 16  ;;  %8573 = vmatprep.subr.bf16.mxu1 %v2645_v14  ;;  %v2976_v33 = vshrl.u32 %v2848_v45, 16 }
 0x600   : > { %v3182_v9 = vshll.u32 %v2849_v5, 16  ;;  %8574 = vmatpush3.bf16.msra.mxu1 %v2645_v14  ;;  %v3180_v22 = vshrl.u32 %v2849_v5, 16 }
 0x601   : > { %8579 = vmatprep.subr.bf16.mxu1 %v11609_v60  ;;  %v2980_v18 = vrot.slane %v2978_v6, 1 }
 0x602   : > { %v2508_v17 = vpop.f32.mrb[48].mxu0  ;;  %v3184_v50 = vrot.slane %v3182_v9, 1 }
 0x603   : > { %v2854_v12 = vpack.c.bf16 %v2508_v17, %v2508_v17  ;;  %v2510_v44 = vpop.f32.mrb[49].mxu0  ;;  %v2981_v21 = vor.u32 %v2980_v18, %v2976_v33 }
 0x604   : > { %v2855_v41 = vpack.c.bf16 %v2510_v44, %v2510_v44  ;;  %v2512_v15 = vpop.f32.mrb[50].mxu0  ;;  %v3185_v46 = vor.u32 %v3184_v50, %v3180_v22 }
 0x605   : > { %v2983_v36 = vshll.u32 %v2854_v12, 16  ;;  %v2987_v37 = vshrl.u32 %v2854_v12, 16  ;;  %v3269_v38 = vpack.c.bf16 %v2512_v15, %v2508_v17  ;;  %v2514_v55 = vpop.f32.mrb[51].mxu0 }
 0x606   : > { %v3187_v11 = vshll.u32 %v2855_v41, 16  ;;  %v3191_v39 = vshrl.u32 %v2855_v41, 16  ;;  %v3270_v2 = vpack.c.bf16 %v2514_v55, %v2510_v44 }
 0x607   : > { %v2985_v4 = vrot.slane %v2983_v36, 1  ;;  %v11657_v27 = vand.u32 %v2987_v37, %v11649_v13  ;;  %v3380_v14 = vrot.slane %v3269_v38, 1 }
 0x608   : > { %v3189_v23 = vrot.slane %v3187_v11, 1  ;;  %v11660_v58 = vand.u32 %v3191_v39, %v11649_v13  ;;  %v3558_v6 = vrot.slane %v3270_v2, 1 }
 0x609   : > { %v11663_v26 = vsel %vm2856_vm7, %v2981_v21, %v2985_v4 }
 0x60a   : > { %v2518_v54 = vpop.f32.mrb[52].mxu0  ;;  %v11666_v28 = vsel %vm2856_vm7, %v3185_v46, %v3189_v23 }
 0x60b   : > { %v3275_v56 = vpack.c.bf16 %v2518_v54, %v2518_v54  ;;  %v2520_v59 = vpop.f32.mrb[53].mxu0 }
 0x60c   : > { %v3276_v51 = vpack.c.bf16 %v2520_v59, %v2520_v59  ;;  %v2522_v1 = vpop.f32.mrb[54].mxu0 }
 0x60d   : > { %v3381_v45 = vrot.slane %v3275_v56, 1  ;;  %v3637_v16 = vpack.c.bf16 %v2522_v1, %v2518_v54  ;;  %v2524_v5 = vpop.f32.mrb[55].mxu0 }
 0x60e   : > { %v3559_v9 = vrot.slane %v3276_v51, 1  ;;  %v3638_v17 = vpack.c.bf16 %v2524_v5, %v2520_v59 }
 0x60f   : > { %v11669_v18 = vsel %vm3279_vm8, %v3380_v14, %v3381_v45  ;;  %v11672_v12 = vand.u32 %v3381_v45, %v11649_v13  ;;  %v3771_v41 = vshrl.u32 %v3637_v16, 16  ;;  %v3774_v15 = vshll.u32 %v3637_v16, 16 }
 0x610   : > { %v3560_v44 = vsel %vm3279_vm8, %v3558_v6, %v3559_v9  ;;  %v3569_v50 = vand.u32 %v3559_v9, %v11649_v13  ;;  %v3985_v33 = vshrl.u32 %v3638_v17, 16  ;;  %v3988_v36 = vshll.u32 %v3638_v17, 16 }
 0x611   : > { %8651 = vmatprep.subr.bf16.mxu0 %v3560_v44  ;;  %v3773_v39 = vrot.slane %v3771_v41, 1  ;;  %v3776_v2 = vrot.slane %v3774_v15, 2 }
 0x612   : > { %v2528_v37 = vpop.f32.mrb[56].mxu0  ;;  %8652 = vmatpush3.bf16.msra.mxu0 %v3560_v44  ;;  %v3987_v23 = vrot.slane %v3985_v33, 1  ;;  %v3990_v54 = vrot.slane %v3988_v36, 2 }
 0x613   : > { %v3643_v38 = vpack.c.bf16 %v2528_v37, %v2528_v37  ;;  %v2530_v55 = vpop.f32.mrb[57].mxu0  ;;  %8653 = vmatprep.subr.bf16.mxu0 %v3569_v50  ;;  %v3777_v16 = vor.u32 %v3776_v2, %v3773_v39 }
 0x614   : > { %v3644_v22 = vpack.c.bf16 %v2530_v55, %v2530_v55  ;;  %v2532_v11 = vpop.f32.mrb[58].mxu0  ;;  %v3991_v9 = vor.u32 %v3990_v54, %v3987_v23 }
 0x615   : > { %v3779_v21 = vshrl.u32 %v3643_v38, 16  ;;  %v3782_v4 = vshll.u32 %v3643_v38, 16  ;;  %v2533_v46 = vpop.f32.mrb[59].mxu0 }
 0x616   : > { %v3993_v56 = vshrl.u32 %v3644_v22, 16  ;;  %v3996_v59 = vshll.u32 %v3644_v22, 16  ;;  %8654 = vmatpush3.bf16.msra.mxu0 %v3569_v50 }
 0x617   : > { %v3781_v51 = vrot.slane %v3779_v21, 1  ;;  %v3784_v1 = vrot.slane %v3782_v4, 2  ;;  %8659 = vmatprep.subr.bf16.mxu0 %v11639_v57 }
 0x618   : > { %v3995_v14 = vrot.slane %v3993_v56, 1  ;;  %v3998_v45 = vrot.slane %v3996_v59, 2 }
 0x619   : > { %v3785_v5 = vor.u32 %v3784_v1, %v3781_v51  ;;  %v11678_v6 = vand.u32 %v3781_v51, %v11649_v13 }
 0x61a   : > { %v3999_v17 = vor.u32 %v3998_v45, %v3995_v14  ;;  %v11681_v44 = vand.u32 %v3995_v14, %v11649_v13 }
 0x61b   : > { %v11684_v41 = vsel %vm3645_vm9, %v3777_v16, %v3785_v5 }
 0x61c   : > { %v11687_v50 = vsel %vm3645_vm9, %v3991_v9, %v3999_v17 }
 0x69a   : > { %v8569_v15 = vpop.f32.mrb[60].mxu0 }
 0x69b   : > { %v2581_v33 = vpop.f32.mrb[61].mxu0  ;;  %v2597_v55 = vmul.f32 0.088388346, %v8569_v15 }
 0x69c   : > { %v2595_v36 = vmul.f32 0.088388346, %v2581_v33  ;;  %v8570_v37 = vpop.f32.mrb[62].mxu0 }
 0x69d   : > { %v2584_v38 = vpop.f32.mrb[63].mxu0  ;;  %v2606_v39 = vsel %vm2605_vm12, %v2597_v55, -inf }
 0x69e   : > { %v2596_v22 = vmul.f32 0.088388346, %v2584_v38  ;;  %v2599_v11 = vsel %vm2598_vm11, %v2595_v36, -inf }
 0x69f   : > { %2600 = vmax.xlane.f32.xlu0 %v2599_v11 }
 0x6a0   : > { %v2602_v13 = vsel %vm2598_vm11, %v2596_v22, -inf }
 0x6a1   : > { %2603 = vmax.xlane.f32.xlu1 %v2602_v13 }
 0x6a3   : > { %2607 = vmax.xlane.f32.xlu0 %v2606_v39 }
 0x6ae   : > { %v11692_v2 = vpop.f32.mrb[64].mxu0 }
 0x6af   : > { %v11694_v21 = vpop.f32.mrb[65].mxu0 }
 0x6b0   : > { %v8618_v4 = vpop.f32.mrb[66].mxu0 }
 0x6b1   : > { %v11696_v46 = vpop.f32.mrb[67].mxu0 }
 0x6be   : > { %v11698_v23 = vpop.f32.mrb[68].mxu0 }
 0x6bf   : > { %v11700_v54 = vpop.f32.mrb[69].mxu0 }
 0x6c0   : > { %v8634_v56 = vpop.f32.mrb[70].mxu0 }
 0x6c1   : > { %v11702_v59 = vpop.f32.mrb[71].mxu0 }
 0x72c   : > { %v2601_v51 = vpop.xlane.xlu0 %2600 }
 0x72d   : > { %v2609_v1 = vsub.f32 %v2595_v36, %v2601_v51 }
 0x72e   : > { %v2604_v14 = vpop.xlane.xlu1 %2603 }
 0x72f   : > { %v2612_v45 = vmul.f32 1.442695, %v2609_v1  ;;  %v2610_v16 = vsub.f32 %v2596_v22, %v2604_v14 }
 0x730   : > { %v2608_v5 = vpop.xlane.xlu0 %2607 }
 0x731   : > { %9429 = vpow2.f32 %v2612_v45  ;;  %v2614_v9 = vmul.f32 1.442695, %v2610_v16  ;;  %v2611_v17 = vsub.f32 %v2597_v55, %v2608_v5 }
 0x733   : > { %9431 = vpow2.f32 %v2614_v9  ;;  %v2616_v15 = vmul.f32 1.442695, %v2611_v17  ;;  %v2544_v9 = vpack.c.bf16 %v11611_v62, %v11611_v62  ;;  %v2542_v17 = vpack.c.bf16 %v11569_v63, %v11569_v63 }
 0x735   : > { %9433 = vpow2.f32 %v2616_v15 }
 0x73b   : > { %v9430_v33 = vpop.eup %9429 }
 0x73c   : > { %v2618_v37 = vsel %vm2598_vm11, %v9430_v33, 0.0 }
 0x73d   : > { %v9432_v38 = vpop.eup %9431  ;;  %2619 = vadd.xlane.f32.xlu1 %v2618_v37 }
 0x73e   : > { %v2621_v11 = vsel %vm2598_vm11, %v9432_v38, 0.0 }
 0x73f   : > { %v9434_v13 = vpop.eup %9433  ;;  %2622 = vadd.xlane.f32.xlu0 %v2621_v11 }
 0x740   : > { %v2624_v36 = vsel %vm2605_vm12, %v9434_v13, 0.0 }
 0x741   : > { %2625 = vadd.xlane.f32.xlu1 %v2624_v36 }
 0x7ca   : > { %v2620_v22 = vpop.xlane.xlu1 %2619 }
 0x7cb   : > { %9435 = vrcp.f32 %v2620_v22 }
 0x7cc   : > { %v2623_v39 = vpop.xlane.xlu0 %2622 }
 0x7cd   : > { %9437 = vrcp.f32 %v2623_v39 }
 0x7ce   : > { %v2626_v55 = vpop.xlane.xlu1 %2625 }
 0x7cf   : > { %9439 = vrcp.f32 %v2626_v55 }
 0x7d5   : > { %v9436_v4 = vpop.eup %9435 }
 0x7d6   : > { %v2630_v51 = vmul.f32 %v9436_v4, %v9430_v33 }
 0x7d7   : > { %v9438_v56 = vpop.eup %9437 }
 0x7d8   : > { %v2631_v1 = vmul.f32 %v9438_v56, %v9432_v38 }
 0x7d9   : > { %v9440_v14 = vpop.eup %9439 }
 0x7da   : > { %v2633_v45 = vpack.c.bf16 %v2631_v1, %v2630_v51  ;;  %v2632_v16 = vmul.f32 %v9440_v14, %v9434_v13 }
 0x7dc   : > { %8575 = vmatprep.mubr.msk.bf16.mxu1 %vm2598_vm11, %v2633_v45  ;;  %v2634_v5 = vpack.c.bf16 %v2632_v16, %v2632_v16 }
 0x7de   : > { %8576 = vmatmul.mubr.msk.bf16.vlgmr.msra.gmra.mrb[0].mxu1 %vm2598_vm11, %v2634_v5 }
 0x7df   : > { %8580 = vmatpush3.bf16.xpose.msra.mxu1 %v11609_v60  ;;  %8583 = vmatprep.mubr.bf16.mxu1 %v2536_v34 }
 0x7e0   : > { %8581 = vmatprep.subr.bf16.mxu1 %v2544_v9 }
 0x7e7   : > { %8582 = vmatpush3.bf16.xpose.msra.mxu1 %v2544_v9 }
 0x7e8   : > { %8587 = vmatprep.subr.bf16.mxu1 %v11646_v53 }
 0x7ee   : > { %8584 = vmatmul.mubr.bf16.vlgmr.msra.gmra.mrb[4].mxu1 %v2542_v17 }
 0x7ef   : > { %8588 = vmatpush3.bf16.msra.mxu1 %v11646_v53 }
 0x7f0   : > { %8589 = vmatprep.subr.bf16.mxu1 %v11653_v42 }
 0x7f3   : > { %8590 = vmatpush3.bf16.msra.mxu1 %v11653_v42 }
 0x7f4   : > { %8595 = vmatprep.subr.bf16.mxu1 %v11621_v7 }
 0x8b1   : > { %v8577_v60 = vpop.f32.mrb[0].mxu1 }
 0x8b2   : > { %2697 = vst [vmem:[#allocation3 + $0x20] sm:$0x1] %v8577_v60  ;;  %v2681_v49 = vpop.f32.mrb[1].mxu1 }
 0x8b3   : > { %2695 = vst [vmem:[#allocation3] sm:$0xff] %v2681_v49  ;;  %v8578_v32 = vpop.f32.mrb[2].mxu1 }
 0x8b4   : > { %v2684_v34 = vpop.f32.mrb[3].mxu1 }
 0x8b5   : > { %2696 = vst [vmem:[#allocation3 + $0x10] sm:$0xff] %v2684_v34 }
 0x8c1   : > { %v8585_v62 = vpop.f32.mrb[4].mxu1 }
 0x8c2   : > { %v2732_v15 = vpop.f32.mrb[5].mxu1  ;;  %v2748_v38 = vmul.f32 0.088388346, %v8585_v62 }
 0x8c3   : > { %v2746_v33 = vmul.f32 0.088388346, %v2732_v15  ;;  %v8586_v63 = vpop.f32.mrb[6].mxu1 }
 0x8c4   : > { %v2735_v37 = vpop.f32.mrb[7].mxu1  ;;  %v2755_v13 = vsel %vm2605_vm12, %v2748_v38, -inf }
 0x8c5   : > { %v2747_v53 = vmul.f32 0.088388346, %v2735_v37  ;;  %v2749_v11 = vsel %vm2598_vm11, %v2746_v33, -inf }
 0x8c6   : > { %2750 = vmax.xlane.f32.xlu0 %v2749_v11 }
 0x8c7   : > { %v2752_v42 = vsel %vm2598_vm11, %v2747_v53, -inf }
 0x8c8   : > { %2753 = vmax.xlane.f32.xlu1 %v2752_v42  ;;  %v2885_v42 = vshrl.u32 %v11614_v25, 16 }
 0x8ca   : > { %2756 = vmax.xlane.f32.xlu0 %v2755_v13  ;;  %v2869_v13 = vshrl.u32 %v11573_v24, 16 }
 0x953   : > { %v2751_v36 = vpop.xlane.xlu0 %2750 }
 0x954   : > { %v2758_v22 = vsub.f32 %v2746_v33, %v2751_v36 }
 0x955   : > { %v2754_v39 = vpop.xlane.xlu1 %2753 }
 0x956   : > { %v2761_v55 = vmul.f32 1.442695, %v2758_v22  ;;  %v2759_v4 = vsub.f32 %v2747_v53, %v2754_v39 }
 0x957   : > { %v2757_v56 = vpop.xlane.xlu0 %2756 }
 0x958   : > { %9441 = vpow2.f32 %v2761_v55  ;;  %v2763_v51 = vmul.f32 1.442695, %v2759_v4  ;;  %v2760_v1 = vsub.f32 %v2748_v38, %v2757_v56 }
 0x95a   : > { %9443 = vpow2.f32 %v2763_v51  ;;  %v2765_v14 = vmul.f32 1.442695, %v2760_v1  ;;  %v3141_v1 = vmul.f32 0.088388346, %v11694_v21  ;;  %v3341_v21 = vmul.f32 0.088388346, %v11702_v59 }
 0x95c   : > { %9445 = vpow2.f32 %v2765_v14 }
 0x962   : > { %v9442_v45 = vpop.eup %9441 }
 0x963   : > { %v2767_v16 = vsel %vm2598_vm11, %v9442_v45, 0.0 }
 0x964   : > { %v9444_v5 = vpop.eup %9443  ;;  %2768 = vadd.xlane.f32.xlu1 %v2767_v16 }
 0x965   : > { %v2770_v9 = vsel %vm2598_vm11, %v9444_v5, 0.0 }
 0x966   : > { %v9446_v17 = vpop.eup %9445  ;;  %2771 = vadd.xlane.f32.xlu0 %v2770_v9  ;;  %v3144_v9 = vsel %vm2598_vm11, %v3141_v1, -inf }
 0x967   : > { %v2773_v60 = vsel %vm2605_vm12, %v9446_v17, 0.0 }
 0x968   : > { %2774 = vadd.xlane.f32.xlu1 %v2773_v60 }
 0x9f1   : > { %v2769_v49 = vpop.xlane.xlu1 %2768 }
 0x9f2   : > { %9447 = vrcp.f32 %v2769_v49 }
 0x9f3   : > { %v2772_v32 = vpop.xlane.xlu0 %2771 }
 0x9f4   : > { %9449 = vrcp.f32 %v2772_v32 }
 0x9f5   : > { %v2775_v34 = vpop.xlane.xlu1 %2774 }
 0x9f6   : > { %9451 = vrcp.f32 %v2775_v34 }
 0x9fc   : > { %v9448_v62 = vpop.eup %9447 }
 0x9fd   : > { %v2779_v33 = vmul.f32 %v9448_v62, %v9442_v45  ;;  %v3142_v45 = vmul.f32 0.088388346, %v11696_v46  ;;  %v3342_v46 = vmul.f32 0.088388346, %v11698_v23 }
 0x9fe   : > { %v9450_v15 = vpop.eup %9449 }
 0x9ff   : > { %v2780_v63 = vmul.f32 %v9450_v15, %v9444_v5  ;;  %v3143_v5 = vmul.f32 0.088388346, %v11692_v2  ;;  %v3147_v60 = vsel %vm2598_vm11, %v3142_v45, -inf  ;;  %v3346_v2 = vsel %vm2598_vm11, %v3341_v21, -inf }
 0xa00   : > { %v9452_v37 = vpop.eup %9451  ;;  %v3349_v34 = vsel %vm2605_vm12, %v3342_v46, -inf }
 0xa01   : > { %v2781_v38 = vmul.f32 %v9452_v37, %v9446_v17  ;;  %v2782_v53 = vpack.c.bf16 %v2780_v63, %v2779_v33  ;;  %v3340_v17 = vmul.f32 0.088388346, %v11700_v54  ;;  %v3150_v49 = vsel %vm2605_vm12, %v3143_v5, -inf }
 0xa03   : > { %8591 = vmatprep.mubr.msk.bf16.mxu1 %vm2598_vm11, %v2782_v53  ;;  %v2783_v11 = vpack.c.bf16 %v2781_v38, %v2781_v38  ;;  %v3343_v32 = vsel %vm2598_vm11, %v3340_v17, -inf }
 0xa05   : > { %8592 = vmatmul.mubr.msk.bf16.vlgmr.msra.gmra.mrb[8].mxu1 %vm2598_vm11, %v2783_v11 }
 0xa06   : > { %8596 = vmatpush3.bf16.xpose.msra.mxu1 %v11621_v7  ;;  %8599 = vmatprep.mubr.bf16.mxu1 %v11580_v3 }
 0xa07   : > { %8597 = vmatprep.subr.bf16.mxu1 %v2885_v42 }
 0xa0e   : > { %8598 = vmatpush3.bf16.xpose.msra.mxu1 %v2885_v42 }
 0xa0f   : > { %8603 = vmatprep.subr.bf16.mxu1 %v11663_v26 }
 0xa15   : > { %8600 = vmatmul.mubr.bf16.vlgmr.msra.gmra.mrb[12].mxu1 %v2869_v13 }
 0xa16   : > { %8604 = vmatpush3.bf16.msra.mxu1 %v11663_v26 }
 0xa17   : > { %8605 = vmatprep.subr.bf16.mxu1 %v11657_v27 }
 0xa1a   : > { %8606 = vmatpush3.bf16.msra.mxu1 %v11657_v27 }
 0xa1b   : > { %8619 = vmatprep.subr.bf16.mxu1 %v11666_v28 }
 0xad8   : > { %v8593_v25 = vpop.f32.mrb[8].mxu1 }
 0xad9   : > { %2843 = vst [vmem:[#allocation3 + $0x28] sm:$0x1] %v8593_v25  ;;  %v11739_v7 = vpop.f32.mrb[9].mxu1 }
 0xada   : > { %v8594_v3 = vpop.f32.mrb[10].mxu1 }
 0xadb   : > { %v11741_v36 = vpop.f32.mrb[11].mxu1 }
 0xadc   : > { %v4124_v22 = vpack.c.bf16 %v11741_v36, %v11739_v7  ;;  %v9183_v7 = vld [vmem:[%s11084_s2 + $0x40] ss:$8 sps:$4 sm:$0xff]   ;;  %v9188_v36 = vld [vmem:[%s11084_s2 + $0x54] ss:$8 sps:$4 sm:$0xff]  }
 0xae8   : > { %v8601_v24 = vpop.f32.mrb[12].mxu1 }
 0xae9   : > { %v2923_v39 = vpop.f32.mrb[13].mxu1  ;;  %v2939_v56 = vmul.f32 0.088388346, %v8601_v24 }
 0xaea   : > { %v2937_v55 = vmul.f32 0.088388346, %v2923_v39  ;;  %v8602_v26 = vpop.f32.mrb[14].mxu1 }
 0xaeb   : > { %v2926_v4 = vpop.f32.mrb[15].mxu1  ;;  %v2946_v16 = vsel %vm2605_vm12, %v2939_v56, -inf }
 0xaec   : > { %v2938_v51 = vmul.f32 0.088388346, %v2926_v4  ;;  %v2940_v27 = vsel %vm2598_vm11, %v2937_v55, -inf }
 0xaed   : > { %2941 = vmax.xlane.f32.xlu0 %v2940_v27 }
 0xaee   : > { %v2943_v14 = vsel %vm2598_vm11, %v2938_v51, -inf }
 0xaef   : > { %2944 = vmax.xlane.f32.xlu1 %v2943_v14 }
 0xaf1   : > { %2947 = vmax.xlane.f32.xlu0 %v2946_v16 }
 0xaf3   : > { %3145 = vmax.xlane.f32.xlu1 %v3144_v9 }
 0xaf5   : > { %3148 = vmax.xlane.f32.xlu0 %v3147_v60 }
 0xaf7   : > { %3151 = vmax.xlane.f32.xlu1 %v3150_v49 }
 0xaf9   : > { %3344 = vmax.xlane.f32.xlu0 %v3343_v32 }
 0xafb   : > { %3347 = vmax.xlane.f32.xlu1 %v3346_v2 }
 0xafd   : > { %3350 = vmax.xlane.f32.xlu0 %v3349_v34 }
 0xb7a   : > { %v2942_v54 = vpop.xlane.xlu0 %2941 }
 0xb7b   : > { %v2949_v62 = vsub.f32 %v2937_v55, %v2942_v54 }
 0xb7c   : > { %v2945_v15 = vpop.xlane.xlu1 %2944 }
 0xb7d   : > { %v2952_v33 = vmul.f32 1.442695, %v2949_v62  ;;  %v2950_v63 = vsub.f32 %v2938_v51, %v2945_v15 }
 0xb7e   : > { %v2948_v59 = vpop.xlane.xlu0 %2947 }
 0xb7f   : > { %9453 = vpow2.f32 %v2952_v33  ;;  %v2954_v37 = vmul.f32 1.442695, %v2950_v63  ;;  %v2951_v38 = vsub.f32 %v2939_v56, %v2948_v59 }
 0xb80   : > { %v3146_v53 = vpop.xlane.xlu1 %3145 }
 0xb81   : > { %9455 = vpow2.f32 %v2954_v37  ;;  %v2956_v23 = vmul.f32 1.442695, %v2951_v38  ;;  %v3153_v11 = vsub.f32 %v3141_v1, %v3146_v53 }
 0xb82   : > { %v3149_v42 = vpop.xlane.xlu0 %3148 }
 0xb83   : > { %9457 = vpow2.f32 %v2956_v23  ;;  %v3156_v13 = vmul.f32 1.442695, %v3153_v11  ;;  %v3154_v25 = vsub.f32 %v3142_v45, %v3149_v42 }
 0xb84   : > { %v3152_v3 = vpop.xlane.xlu1 %3151 }
 0xb85   : > { %9459 = vpow2.f32 %v3156_v13  ;;  %v3158_v24 = vmul.f32 1.442695, %v3154_v25  ;;  %v3155_v39 = vsub.f32 %v3143_v5, %v3152_v3 }
 0xb86   : > { %v3345_v55 = vpop.xlane.xlu0 %3344 }
 0xb87   : > { %9461 = vpow2.f32 %v3158_v24  ;;  %v3160_v26 = vmul.f32 1.442695, %v3155_v39  ;;  %v3352_v4 = vsub.f32 %v3340_v17, %v3345_v55 }
 0xb88   : > { %v3348_v51 = vpop.xlane.xlu1 %3347 }
 0xb89   : > { %v9454_v27 = vpop.eup %9453  ;;  %9463 = vpow2.f32 %v3160_v26  ;;  %v3355_v56 = vmul.f32 1.442695, %v3352_v4  ;;  %v3353_v14 = vsub.f32 %v3341_v21, %v3348_v51 }
 0xb8a   : > { %v3351_v16 = vpop.xlane.xlu0 %3350  ;;  %v2958_v1 = vsel %vm2598_vm11, %v9454_v27, 0.0 }
 0xb8b   : > { %v9456_v9 = vpop.eup %9455  ;;  %9465 = vpow2.f32 %v3355_v56  ;;  %v3357_v60 = vmul.f32 1.442695, %v3353_v14  ;;  %v3354_v45 = vsub.f32 %v3342_v46, %v3351_v16  ;;  %2959 = vadd.xlane.f32.xlu1 %v2958_v1 }
 0xb8c   : > { %v2961_v49 = vsel %vm2598_vm11, %v9456_v9, 0.0 }
 0xb8d   : > { %v9458_v5 = vpop.eup %9457  ;;  %9467 = vpow2.f32 %v3357_v60  ;;  %v3359_v32 = vmul.f32 1.442695, %v3354_v45  ;;  %2962 = vadd.xlane.f32.xlu0 %v2961_v49 }
 0xb8e   : > { %v2964_v17 = vsel %vm2605_vm12, %v9458_v5, 0.0 }
 0xb8f   : > { %v9460_v2 = vpop.eup %9459  ;;  %9469 = vpow2.f32 %v3359_v32  ;;  %2965 = vadd.xlane.f32.xlu1 %v2964_v17 }
 0xb90   : > { %v3162_v21 = vsel %vm2598_vm11, %v9460_v2, 0.0 }
 0xb91   : > { %v9462_v34 = vpop.eup %9461  ;;  %3163 = vadd.xlane.f32.xlu0 %v3162_v21 }
 0xb92   : > { %v3165_v54 = vsel %vm2598_vm11, %v9462_v34, 0.0 }
 0xb93   : > { %v9464_v62 = vpop.eup %9463  ;;  %3166 = vadd.xlane.f32.xlu1 %v3165_v54 }
 0xb94   : > { %v3168_v46 = vsel %vm2605_vm12, %v9464_v62, 0.0 }
 0xb95   : > { %v9466_v15 = vpop.eup %9465  ;;  %3169 = vadd.xlane.f32.xlu0 %v3168_v46 }
 0xb96   : > { %v3361_v33 = vsel %vm2598_vm11, %v9466_v15, 0.0 }
 0xb97   : > { %v9468_v63 = vpop.eup %9467  ;;  %3362 = vadd.xlane.f32.xlu1 %v3361_v33 }
 0xb98   : > { %v3364_v59 = vsel %vm2598_vm11, %v9468_v63, 0.0 }
 0xb99   : > { %v9470_v37 = vpop.eup %9469  ;;  %3365 = vadd.xlane.f32.xlu0 %v3364_v59 }
 0xb9a   : > { %v3367_v38 = vsel %vm2605_vm12, %v9470_v37, 0.0 }
 0xb9b   : > { %3368 = vadd.xlane.f32.xlu1 %v3367_v38 }
 0xc18   : > { %v2960_v53 = vpop.xlane.xlu1 %2959 }
 0xc19   : > { %9471 = vrcp.f32 %v2960_v53 }
 0xc1a   : > { %v2963_v23 = vpop.xlane.xlu0 %2962 }
 0xc1b   : > { %9473 = vrcp.f32 %v2963_v23 }
 0xc1c   : > { %v2966_v11 = vpop.xlane.xlu1 %2965 }
 0xc1d   : > { %9475 = vrcp.f32 %v2966_v11 }
 0xc1e   : > { %v3164_v42 = vpop.xlane.xlu0 %3163 }
 0xc1f   : > { %9477 = vrcp.f32 %v3164_v42 }
 0xc20   : > { %v3167_v13 = vpop.xlane.xlu1 %3166 }
 0xc21   : > { %9479 = vrcp.f32 %v3167_v13 }
 0xc22   : > { %v3170_v25 = vpop.xlane.xlu0 %3169 }
 0xc23   : > { %v9472_v3 = vpop.eup %9471  ;;  %9481 = vrcp.f32 %v3170_v25 }
 0xc24   : > { %v3363_v24 = vpop.xlane.xlu1 %3362  ;;  %v2970_v26 = vmul.f32 %v9472_v3, %v9454_v27 }
 0xc25   : > { %v9474_v39 = vpop.eup %9473  ;;  %9483 = vrcp.f32 %v3363_v24 }
 0xc26   : > { %v3366_v55 = vpop.xlane.xlu0 %3365  ;;  %v2971_v4 = vmul.f32 %v9474_v39, %v9456_v9 }
 0xc27   : > { %v9476_v51 = vpop.eup %9475  ;;  %9485 = vrcp.f32 %v3366_v55 }
 0xc28   : > { %v2972_v56 = vmul.f32 %v9476_v51, %v9458_v5  ;;  %v3369_v14 = vpop.xlane.xlu1 %3368  ;;  %v2973_v16 = vpack.c.bf16 %v2971_v4, %v2970_v26 }
 0xc29   : > { %v9478_v1 = vpop.eup %9477  ;;  %9487 = vrcp.f32 %v3369_v14 }
 0xc2a   : > { %8607 = vmatprep.mubr.msk.bf16.mxu1 %vm2598_vm11, %v2973_v16  ;;  %v2974_v60 = vpack.c.bf16 %v2972_v56, %v2972_v56  ;;  %v3174_v49 = vmul.f32 %v9478_v1, %v9460_v2 }
 0xc2b   : > { %v9480_v45 = vpop.eup %9479 }
 0xc2c   : > { %8608 = vmatmul.mubr.msk.bf16.vlgmr.msra.gmra.mrb[16].mxu1 %vm2598_vm11, %v2974_v60  ;;  %v3175_v32 = vmul.f32 %v9480_v45, %v9462_v34 }
 0xc2d   : > { %v9482_v17 = vpop.eup %9481  ;;  %8620 = vmatpush3.bf16.msra.mxu1 %v11666_v28 }
 0xc2e   : > { %v3176_v27 = vmul.f32 %v9482_v17, %v9464_v62  ;;  %8621 = vmatprep.subr.bf16.mxu1 %v11660_v58  ;;  %v3177_v9 = vpack.c.bf16 %v3175_v32, %v3174_v49 }
 0xc2f   : > { %v9484_v5 = vpop.eup %9483 }
 0xc30   : > { %8623 = vmatprep.mubr.msk.bf16.mxu1 %vm2598_vm11, %v3177_v9  ;;  %v3178_v54 = vpack.c.bf16 %v3176_v27, %v3176_v27  ;;  %v3373_v46 = vmul.f32 %v9484_v5, %v9466_v15 }
 0xc31   : > { %v9486_v21 = vpop.eup %9485  ;;  %8622 = vmatpush3.bf16.msra.mxu1 %v11660_v58 }
 0xc32   : > { %8635 = vmatprep.subr.bf16.mxu1 %v11669_v18  ;;  %v3374_v33 = vmul.f32 %v9486_v21, %v9468_v63 }
 0xc33   : > { %v9488_v2 = vpop.eup %9487 }
 0xc34   : > { %8624 = vmatmul.mubr.msk.bf16.vlgmr.msra.gmra.mrb[20].mxu1 %vm2598_vm11, %v3178_v54  ;;  %v3376_v34 = vpack.c.bf16 %v3374_v33, %v3373_v46  ;;  %v3375_v28 = vmul.f32 %v9488_v2, %v9470_v37 }
 0xc35   : > { %8636 = vmatpush3.bf16.msra.mxu1 %v11669_v18 }
 0xc36   : > { %8637 = vmatprep.subr.bf16.mxu1 %v11672_v12  ;;  %8639 = vmatprep.mubr.msk.bf16.mxu1 %vm2598_vm11, %v3376_v34  ;;  %v3377_v58 = vpack.c.bf16 %v3375_v28, %v3375_v28 }
 0xc39   : > { %8638 = vmatpush3.bf16.msra.mxu1 %v11672_v12 }
 0xc3a   : > { %8643 = vmatprep.subr.bf16.mxu1 %v11629_v0 }
 0xc3c   : > { %8640 = vmatmul.mubr.msk.bf16.vlgmr.msra.gmra.mrb[24].mxu1 %vm2598_vm11, %v3377_v58 }
 0xc3d   : > { %8647 = vmatprep.mubr.bf16.mxu1 %v11595_v8 }
 0xc42   : > { %8644 = vmatpush3.bf16.xpose.msra.mxu1 %v11629_v0 }
 0xc43   : > { %8645 = vmatprep.subr.bf16.mxu1 %v11624_v61 }
 0xc4a   : > { %8646 = vmatpush3.bf16.xpose.msra.mxu1 %v11624_v61 }
 0xc4b   : > { %8667 = vmatprep.subr.bf16.mxu1 %v11684_v41 }
 0xc51   : > { %8648 = vmatmul.mubr.bf16.vlgmr.msra.gmra.mrb[28].mxu1 %v11587_v30 }
 0xc52   : > { %8668 = vmatpush3.bf16.msra.mxu1 %v11684_v41 }
 0xc53   : > { %8669 = vmatprep.subr.bf16.mxu1 %v11678_v6 }
 0xc56   : > { %8670 = vmatpush3.bf16.msra.mxu1 %v11678_v6 }
 0xc57   : > { %8675 = vmatprep.subr.bf16.mxu1 %v11643_v43 }
 0xcff   : > { %v8609_v18 = vpop.f32.mrb[16].mxu1 }
 0xd00   : > { %v3033_v8 = vpop.f32.mrb[17].mxu1  ;;  %v3053_v15 = vrot.slane %v8609_v18, 7 }
 0xd01   : > { %v3050_v12 = vrot.slane %v3033_v8, 7  ;;  %v8610_v0 = vpop.f32.mrb[18].mxu1 }
 0xd02   : > { %v3036_v62 = vpop.f32.mrb[19].mxu1 }
 0xd03   : > { %3058 = vst [vmem:[#allocation3 + $0x20] sm:$0xfe] %v3050_v12  ;;  %v3051_v61 = vrot.slane %v3036_v62, 7 }
 0xd05   : > { %v11794_v63 = vsel %vm2641_vm10, %v3050_v12, %v3051_v61  ;;  %v3054_v30 = vsel %vm2641_vm10, %v3051_v61, %v3053_v15 }
 0xd06   : > { %3060 = vst [vmem:[#allocation3 + $0x40] sm:$0x3] %v3054_v30 }
 0xd07   : > { %v8625_v41 = vpop.f32.mrb[20].mxu1 }
 0xd08   : > { %v3237_v59 = vpop.f32.mrb[21].mxu1  ;;  %v3257_v53 = vrot.slane %v8625_v41, 7 }
 0xd09   : > { %v3254_v37 = vrot.slane %v3237_v59, 7  ;;  %v8626_v6 = vpop.f32.mrb[22].mxu1 }
 0xd0a   : > { %v3240_v38 = vpop.f32.mrb[23].mxu1 }
 0xd0b   : > { %3262 = vst [vmem:[#allocation3 + $0x28] sm:$0xfe] %v3254_v37  ;;  %v3255_v23 = vrot.slane %v3240_v38, 7 }
 0xd0d   : > { %v11798_v11 = vsel %vm2641_vm10, %v3254_v37, %v3255_v23  ;;  %v3258_v42 = vsel %vm2641_vm10, %v3255_v23, %v3257_v53 }
 0xd0e   : > { %3264 = vst [vmem:[#allocation3 + $0x48] sm:$0x3] %v3258_v42 }
 0xd0f   : > { %v8641_v13 = vpop.f32.mrb[24].mxu1 }
 0xd10   : > { %v3427_v25 = vpop.f32.mrb[25].mxu1  ;;  %v3448_v55 = vrot.slane %v8641_v13, 6 }
 0xd11   : > { %v3445_v3 = vrot.slane %v3427_v25, 6  ;;  %v8642_v24 = vpop.f32.mrb[26].mxu1 }
 0xd12   : > { %v3430_v39 = vpop.f32.mrb[27].mxu1 }
 0xd13   : > { %3453 = vst [vmem:[#allocation3 + $0x40] sm:$0xfc] %v3445_v3  ;;  %v3446_v26 = vrot.slane %v3430_v39, 6 }
 0xd15   : > { %v11802_v4 = vsel %vm3444_vm13, %v3445_v3, %v3446_v26  ;;  %v3449_v51 = vsel %vm3444_vm13, %v3446_v26, %v3448_v55 }
 0xd16   : > { %3455 = vst [vmem:[#allocation3 + $0x60] sm:$0x7] %v3449_v51 }
 0xd24   : > { %v8649_v56 = vpop.f32.mrb[28].mxu1 }
 0xd25   : > { %v3504_v14 = vpop.f32.mrb[29].mxu1  ;;  %v3520_v45 = vmul.f32 0.088388346, %v8649_v56 }
 0xd26   : > { %v3518_v16 = vmul.f32 0.088388346, %v3504_v14  ;;  %v8650_v1 = vpop.f32.mrb[30].mxu1 }
 0xd27   : > { %v3507_v60 = vpop.f32.mrb[31].mxu1  ;;  %v3527_v27 = vsel %vm2605_vm12, %v3520_v45, -inf }
 0xd28   : > { %v3519_v49 = vmul.f32 0.088388346, %v3507_v60  ;;  %v3521_v32 = vsel %vm2598_vm11, %v3518_v16, -inf }
 0xd29   : > { %3522 = vmax.xlane.f32.xlu0 %v3521_v32 }
 0xd2a   : > { %v3524_v17 = vsel %vm2598_vm11, %v3519_v49, -inf }
 0xd2b   : > { %3525 = vmax.xlane.f32.xlu1 %v3524_v17 }
 0xd2d   : > { %3528 = vmax.xlane.f32.xlu0 %v3527_v27 }
 0xdb6   : > { %v3523_v9 = vpop.xlane.xlu0 %3522 }
 0xdb7   : > { %v3530_v5 = vsub.f32 %v3518_v16, %v3523_v9 }
 0xdb8   : > { %v3526_v21 = vpop.xlane.xlu1 %3525 }
 0xdb9   : > { %v3533_v54 = vmul.f32 1.442695, %v3530_v5  ;;  %v3531_v46 = vsub.f32 %v3519_v49, %v3526_v21 }
 0xdba   : > { %v3529_v33 = vpop.xlane.xlu0 %3528 }
 0xdbb   : > { %9489 = vpow2.f32 %v3533_v54  ;;  %v3535_v2 = vmul.f32 1.442695, %v3531_v46  ;;  %v3532_v34 = vsub.f32 %v3520_v45, %v3529_v33 }
 0xdbd   : > { %9491 = vpow2.f32 %v3535_v2  ;;  %v3537_v28 = vmul.f32 1.442695, %v3532_v34 }
 0xdbf   : > { %9493 = vpow2.f32 %v3537_v28 }
 0xdc5   : > { %v9490_v58 = vpop.eup %9489 }
 0xdc6   : > { %v3539_v18 = vsel %vm2598_vm11, %v9490_v58, 0.0 }
 0xdc7   : > { %v9492_v8 = vpop.eup %9491  ;;  %3540 = vadd.xlane.f32.xlu1 %v3539_v18 }
 0xdc8   : > { %v3542_v12 = vsel %vm2598_vm11, %v9492_v8, 0.0 }
 0xdc9   : > { %v9494_v0 = vpop.eup %9493  ;;  %3543 = vadd.xlane.f32.xlu0 %v3542_v12 }
 0xdca   : > { %v3545_v62 = vsel %vm2605_vm12, %v9494_v0, 0.0 }
 0xdcb   : > { %3546 = vadd.xlane.f32.xlu1 %v3545_v62 }
 0xe54   : > { %v3541_v15 = vpop.xlane.xlu1 %3540 }
 0xe55   : > { %9495 = vrcp.f32 %v3541_v15 }
 0xe56   : > { %v3544_v61 = vpop.xlane.xlu0 %3543 }
 0xe57   : > { %9497 = vrcp.f32 %v3544_v61 }
 0xe58   : > { %v3547_v30 = vpop.xlane.xlu1 %3546 }
 0xe59   : > { %9499 = vrcp.f32 %v3547_v30 }
 0xe5f   : > { %v9496_v41 = vpop.eup %9495 }
 0xe60   : > { %v3551_v37 = vmul.f32 %v9496_v41, %v9490_v58 }
 0xe61   : > { %v9498_v59 = vpop.eup %9497 }
 0xe62   : > { %v3552_v6 = vmul.f32 %v9498_v59, %v9492_v8 }
 0xe63   : > { %v9500_v38 = vpop.eup %9499 }
 0xe64   : > { %v3553_v53 = vmul.f32 %v9500_v38, %v9494_v0  ;;  %v3554_v23 = vpack.c.bf16 %v3552_v6, %v3551_v37 }
 0xe66   : > { %8655 = vmatprep.mubr.msk.bf16.mxu0 %vm2598_vm11, %v3554_v23  ;;  %v3555_v42 = vpack.c.bf16 %v3553_v53, %v3553_v53 }
 0xe68   : > { %8656 = vmatmul.mubr.msk.bf16.vlgmr.msra.gmra.mrb[72].mxu0 %vm2598_vm11, %v3555_v42 }
 0xe69   : > { %8660 = vmatpush3.bf16.xpose.msra.mxu0 %v11639_v57  ;;  %8663 = vmatprep.mubr.bf16.mxu0 %v11604_v52 }
 0xe6a   : > { %8661 = vmatprep.subr.bf16.mxu0 %v11631_v20 }
 0xe71   : > { %8662 = vmatpush3.bf16.xpose.msra.mxu0 %v11631_v20 }
 0xe72   : > { %8683 = vmatprep.subr.bf16.mxu0 %v11687_v50 }
 0xe78   : > { %8664 = vmatmul.mubr.bf16.vlgmr.msra.gmra.mrb[76].mxu0 %v11597_v10 }
 0xe79   : > { %8684 = vmatpush3.bf16.msra.mxu0 %v11687_v50 }
 0xe7a   : > { %8685 = vmatprep.subr.bf16.mxu0 %v11681_v44 }
 0xe7d   : > { %8686 = vmatpush3.bf16.msra.mxu0 %v11681_v44 }
 0xf3b   : > { %v8657_v13 = vpop.f32.mrb[72].mxu0 }
 0xf3c   : > { %v3605_v25 = vpop.f32.mrb[73].mxu0  ;;  %v3625_v52 = vrot.slane %v8657_v13, 6 }
 0xf3d   : > { %v3622_v3 = vrot.slane %v3605_v25, 6  ;;  %v8658_v57 = vpop.f32.mrb[74].mxu0 }
 0xf3e   : > { %v3608_v24 = vpop.f32.mrb[75].mxu0 }
 0xf3f   : > { %3630 = vst [vmem:[#allocation3 + $0x48] sm:$0xfc] %v3622_v3  ;;  %v3623_v39 = vrot.slane %v3608_v24, 6 }
 0xf41   : > { %v11823_v20 = vsel %vm3444_vm13, %v3622_v3, %v3623_v39  ;;  %v3626_v55 = vsel %vm3444_vm13, %v3623_v39, %v3625_v52 }
 0xf42   : > { %3632 = vst [vmem:[#allocation3 + $0x68] sm:$0x7] %v3626_v55 }
 0xf4b   : > { %v8665_v10 = vpop.f32.mrb[76].mxu0 }
 0xf4c   : > { %v3718_v50 = vpop.f32.mrb[77].mxu0  ;;  %v3734_v44 = vmul.f32 0.088388346, %v8665_v10 }
 0xf4d   : > { %v3732_v26 = vmul.f32 0.088388346, %v3718_v50  ;;  %v8666_v51 = vpop.f32.mrb[78].mxu0 }
 0xf4e   : > { %v3721_v56 = vpop.f32.mrb[79].mxu0  ;;  %v3741_v60 = vsel %vm2605_vm12, %v3734_v44, -inf }
 0xf4f   : > { %v3733_v14 = vmul.f32 0.088388346, %v3721_v56  ;;  %v3735_v16 = vsel %vm2598_vm11, %v3732_v26, -inf }
 0xf50   : > { %3736 = vmax.xlane.f32.xlu0 %v3735_v16 }
 0xf51   : > { %v3738_v1 = vsel %vm2598_vm11, %v3733_v14, -inf }
 0xf52   : > { %3739 = vmax.xlane.f32.xlu1 %v3738_v1 }
 0xf54   : > { %3742 = vmax.xlane.f32.xlu0 %v3741_v60 }
 0xfdd   : > { %v3737_v45 = vpop.xlane.xlu0 %3736 }
 0xfde   : > { %v3744_v49 = vsub.f32 %v3732_v26, %v3737_v45 }
 0xfdf   : > { %v3740_v32 = vpop.xlane.xlu1 %3739 }
 0xfe0   : > { %v3747_v17 = vmul.f32 1.442695, %v3744_v49  ;;  %v3745_v27 = vsub.f32 %v3733_v14, %v3740_v32 }
 0xfe1   : > { %v3743_v9 = vpop.xlane.xlu0 %3742 }
 0xfe2   : > { %9501 = vpow2.f32 %v3747_v17  ;;  %v3749_v5 = vmul.f32 1.442695, %v3745_v27  ;;  %v3746_v21 = vsub.f32 %v3734_v44, %v3743_v9 }
 0xfe4   : > { %9503 = vpow2.f32 %v3749_v5  ;;  %v3751_v54 = vmul.f32 1.442695, %v3746_v21  ;;  %v9173_v21 = vld [vmem:[%s11084_s2 + $0x4] ss:$8 sps:$4 sm:$0xff]  }
 0xfe5   : > { %4293 = vmatprep.subr.bf16.mxu0 %v9173_v21 }
 0xfe6   : > { %9505 = vpow2.f32 %v3751_v54 }
 0xfec   : > { %v9502_v46 = vpop.eup %9501 }
 0xfed   : > { %v3753_v33 = vsel %vm2598_vm11, %v9502_v46, 0.0 }
 0xfee   : > { %v9504_v2 = vpop.eup %9503  ;;  %3754 = vadd.xlane.f32.xlu1 %v3753_v33 }
 0xfef   : > { %v3756_v34 = vsel %vm2598_vm11, %v9504_v2, 0.0 }
 0xff0   : > { %v9506_v28 = vpop.eup %9505  ;;  %3757 = vadd.xlane.f32.xlu0 %v3756_v34 }
 0xff1   : > { %v3759_v58 = vsel %vm2605_vm12, %v9506_v28, 0.0 }
 0xff2   : > { %3760 = vadd.xlane.f32.xlu1 %v3759_v58 }
0x107b   : > { %v3755_v18 = vpop.xlane.xlu1 %3754 }
0x107c   : > { %9507 = vrcp.f32 %v3755_v18 }
0x107d   : > { %v3758_v8 = vpop.xlane.xlu0 %3757 }
0x107e   : > { %9509 = vrcp.f32 %v3758_v8 }
0x107f   : > { %v3761_v12 = vpop.xlane.xlu1 %3760 }
0x1080   : > { %9511 = vrcp.f32 %v3761_v12 }
0x1086   : > { %v9508_v0 = vpop.eup %9507 }
0x1087   : > { %v3765_v15 = vmul.f32 %v9508_v0, %v9502_v46  ;;  %v9171_v0 = vld [vmem:[%s11084_s2] ss:$8 sps:$4 sm:$0xff]  }
0x1088   : > { %v9510_v62 = vpop.eup %9509 }
0x1089   : > { %v3766_v61 = vmul.f32 %v9510_v62, %v9504_v2 }
0x108a   : > { %v9512_v30 = vpop.eup %9511 }
0x108b   : > { %v3767_v41 = vmul.f32 %v9512_v30, %v9506_v28  ;;  %v3768_v59 = vpack.c.bf16 %v3766_v61, %v3765_v15  ;;  %v9176_v15 = vld [vmem:[%s11084_s2 + $0x14] ss:$8 sps:$4 sm:$0xff]   ;;  %v9174_v61 = vld [vmem:[%s11084_s2 + $0x10] ss:$8 sps:$4 sm:$0xff]   ;;  %v9179_v30 = vld [vmem:[%s11084_s2 + $0x24] ss:$8 sps:$4 sm:$0xff]  }
0x108d   : > { %8671 = vmatprep.mubr.msk.bf16.mxu1 %vm2598_vm11, %v3768_v59  ;;  %v3769_v37 = vpack.c.bf16 %v3767_v41, %v3767_v41  ;;  %v9177_v41 = vld [vmem:[%s11084_s2 + $0x20] ss:$8 sps:$4 sm:$0xff]   ;;  %v9182_v59 = vld [vmem:[%s11084_s2 + $0x34] ss:$8 sps:$4 sm:$0xff]  }
0x108f   : > { %8672 = vmatmul.mubr.msk.bf16.vlgmr.msra.gmra.mrb[32].mxu1 %vm2598_vm11, %v3769_v37  ;;  %v9180_v37 = vld [vmem:[%s11084_s2 + $0x30] ss:$8 sps:$4 sm:$0xff]  }
0x1090   : > { %8676 = vmatpush3.bf16.xpose.msra.mxu1 %v11643_v43  ;;  %8679 = vmatprep.mubr.bf16.mxu1 %v11607_v35 }
0x1091   : > { %8677 = vmatprep.subr.bf16.mxu1 %v11633_v40 }
0x1098   : > { %8678 = vmatpush3.bf16.xpose.msra.mxu1 %v11633_v40 }
0x109f   : > { %8680 = vmatmul.mubr.bf16.vlgmr.msra.gmra.mrb[36].mxu1 %v11599_v29 }
0x1162   : > { %v8673_v6 = vpop.f32.mrb[32].mxu1 }
0x1163   : > { %v3831_v38 = vpop.f32.mrb[33].mxu1  ;;  %v3852_v13 = vrot.slane %v8673_v6, 5  ;;  %v9185_v6 = vld [vmem:[%s11084_s2 + $0x44] ss:$8 sps:$4 sm:$0xff]  }
0x1164   : > { %v3849_v53 = vrot.slane %v3831_v38, 5  ;;  %v8674_v23 = vpop.f32.mrb[34].mxu1  ;;  %v9191_v38 = vld [vmem:[%s11084_s2 + $0x64] ss:$8 sps:$4 sm:$0xff]  }
0x1165   : > { %v3834_v42 = vpop.f32.mrb[35].mxu1  ;;  %v9194_v23 = vld [vmem:[%s11084_s2 + $0x74] ss:$8 sps:$4 sm:$0xff]  }
0x1166   : > { %3857 = vst [vmem:[#allocation3 + $0x60] sm:$0xf8] %v3849_v53  ;;  %v3850_v25 = vrot.slane %v3834_v42, 5  ;;  %v9192_v42 = vld [vmem:[%s11084_s2 + $0x70] ss:$8 sps:$4 sm:$0xff]  }
0x1168   : > { %v11840_v3 = vsel %vm3848_vm14, %v3849_v53, %v3850_v25  ;;  %v3853_v35 = vsel %vm3848_vm14, %v3850_v25, %v3852_v13  ;;  %v9189_v53 = vld [vmem:[%s11084_s2 + $0x60] ss:$8 sps:$4 sm:$0xff]   ;;  %v9197_v13 = vld [vmem:[%s11084_s2 + $0x84] ss:$8 sps:$4 sm:$0xff]  }
0x1169   : > { %3859 = vst [vmem:[#allocation3 + $0x80] sm:$0xf] %v3853_v35  ;;  %v9195_v25 = vld [vmem:[%s11084_s2 + $0x80] ss:$8 sps:$4 sm:$0xff]   ;;  %v9200_v35 = vld [vmem:[%s11084_s2 + $0x94] ss:$8 sps:$4 sm:$0xff]  }
0x1172   : > { %v8681_v43 = vpop.f32.mrb[36].mxu1 }
0x1173   : > { %v3932_v57 = vpop.f32.mrb[37].mxu1  ;;  %v3948_v52 = vmul.f32 0.088388346, %v8681_v43  ;;  %v9198_v43 = vld [vmem:[%s11084_s2 + $0x90] ss:$8 sps:$4 sm:$0xff]  }
0x1174   : > { %v3946_v40 = vmul.f32 0.088388346, %v3932_v57  ;;  %v8682_v24 = vpop.f32.mrb[38].mxu1  ;;  %v9203_v57 = vld [vmem:[%s11084_s2 + $0xa4] ss:$8 sps:$4 sm:$0xff]  }
0x1175   : > { %v3935_v29 = vpop.f32.mrb[39].mxu1  ;;  %v3955_v50 = vsel %vm2605_vm12, %v3948_v52, -inf  ;;  %v9206_v24 = vld [vmem:[%s11084_s2 + $0xb4] ss:$8 sps:$4 sm:$0xff]  }
0x1176   : > { %v3947_v39 = vmul.f32 0.088388346, %v3935_v29  ;;  %v3949_v55 = vsel %vm2598_vm11, %v3946_v40, -inf  ;;  %v9204_v29 = vld [vmem:[%s11084_s2 + $0xb0] ss:$8 sps:$4 sm:$0xff]  }
0x1177   : > { %3950 = vmax.xlane.f32.xlu0 %v3949_v55  ;;  %v9212_v55 = vld [vmem:[%s11084_s2 + $0xd4] ss:$8 sps:$4 sm:$0xff]  }
0x1178   : > { %v3952_v10 = vsel %vm2598_vm11, %v3947_v39, -inf }
0x1179   : > { %3953 = vmax.xlane.f32.xlu1 %v3952_v10  ;;  %v9210_v10 = vld [vmem:[%s11084_s2 + $0xd0] ss:$8 sps:$4 sm:$0xff]  }
0x117b   : > { %3956 = vmax.xlane.f32.xlu0 %v3955_v50  ;;  %v9215_v50 = vld [vmem:[%s11084_s2 + $0xe4] ss:$8 sps:$4 sm:$0xff]  }
0x1204   : > { %v3951_v26 = vpop.xlane.xlu0 %3950 }
0x1205   : > { %v3958_v51 = vsub.f32 %v3946_v40, %v3951_v26  ;;  %v9201_v40 = vld [vmem:[%s11084_s2 + $0xa0] ss:$8 sps:$4 sm:$0xff]  }
0x1206   : > { %v3954_v56 = vpop.xlane.xlu1 %3953  ;;  %v9213_v26 = vld [vmem:[%s11084_s2 + $0xe0] ss:$8 sps:$4 sm:$0xff]  }
0x1207   : > { %v3961_v44 = vmul.f32 1.442695, %v3958_v51  ;;  %v3959_v14 = vsub.f32 %v3947_v39, %v3954_v56  ;;  %v9207_v39 = vld [vmem:[%s11084_s2 + $0xc0] ss:$8 sps:$4 sm:$0xff]   ;;  %v9218_v51 = vld [vmem:[%s11084_s2 + $0xf4] ss:$8 sps:$4 sm:$0xff]  }
0x1208   : > { %v3957_v16 = vpop.xlane.xlu0 %3956  ;;  %v9216_v56 = vld [vmem:[%s11084_s2 + $0xf0] ss:$8 sps:$4 sm:$0xff]  }
0x1209   : > { %9513 = vpow2.f32 %v3961_v44  ;;  %v3963_v1 = vmul.f32 1.442695, %v3959_v14  ;;  %v3960_v60 = vsub.f32 %v3948_v52, %v3957_v16  ;;  %v9209_v52 = vld [vmem:[%s11084_s2 + $0xc4] ss:$8 sps:$4 sm:$0xff]   ;;  %v4075_v44 = vld [vmem:[#allocation3 + $0x10] sm:$0xff] }
0x120a   : > { %v4078_v14 = vld [vmem:[#allocation3 + $0x28] sm:$0xff]  ;;  %v4073_v16 = vld [vmem:[#allocation3] sm:$0xff] }
0x120b   : > { %9515 = vpow2.f32 %v3963_v1  ;;  %v3965_v45 = vmul.f32 1.442695, %v3960_v60  ;;  %v4123_v1 = vpack.c.bf16 %v4075_v44, %v4073_v16  ;;  %v4126_v60 = vpack.c.bf16 %v11798_v11, %v4078_v14  ;;  %v9694_v14 = vld [vmem:[#allocation2 + $0x38] sm:$0xff] }
0x120d   : > { %9517 = vpow2.f32 %v3965_v45  ;;  %v4077_v45 = vld [vmem:[#allocation3 + $0x20] sm:$0xff] }
0x1213   : > { %v9514_v49 = vpop.eup %9513 }
0x1214   : > { %v3967_v32 = vsel %vm2598_vm11, %v9514_v49, 0.0 }
0x1215   : > { %v9516_v17 = vpop.eup %9515  ;;  %3968 = vadd.xlane.f32.xlu1 %v3967_v32  ;;  %v4125_v32 = vpack.c.bf16 %v11794_v63, %v4077_v45 }
0x1216   : > { %v3970_v27 = vsel %vm2598_vm11, %v9516_v17, 0.0 }
0x1217   : > { %v9518_v9 = vpop.eup %9517  ;;  %3971 = vadd.xlane.f32.xlu0 %v3970_v27  ;;  %v4081_v27 = vld [vmem:[#allocation3 + $0x40] sm:$0xff] }
0x1218   : > { %v3973_v5 = vsel %vm2605_vm12, %v9518_v9, 0.0 }
0x1219   : > { %3974 = vadd.xlane.f32.xlu1 %v3973_v5 }
0x12a2   : > { %v3969_v54 = vpop.xlane.xlu1 %3968 }
0x12a3   : > { %9519 = vrcp.f32 %v3969_v54 }
0x12a4   : > { %v3972_v46 = vpop.xlane.xlu0 %3971 }
0x12a5   : > { %9521 = vrcp.f32 %v3972_v46 }
0x12a6   : > { %v3975_v33 = vpop.xlane.xlu1 %3974 }
0x12a7   : > { %9523 = vrcp.f32 %v3975_v33 }
0x12ad   : > { %v9520_v2 = vpop.eup %9519 }
0x12ae   : > { %v3979_v28 = vmul.f32 %v9520_v2, %v9514_v49  ;;  %v4082_v49 = vld [vmem:[#allocation3 + $0x48] sm:$0xff] }
0x12af   : > { %v9522_v34 = vpop.eup %9521 }
0x12b0   : > { %v3980_v58 = vmul.f32 %v9522_v34, %v9516_v17  ;;  %v4128_v17 = vpack.c.bf16 %v11823_v20, %v4082_v49  ;;  %v4085_v20 = vld [vmem:[#allocation3 + $0x60] sm:$0xff] }
0x12b1   : > { %v9524_v18 = vpop.eup %9523 }
0x12b2   : > { %v3981_v8 = vmul.f32 %v9524_v18, %v9518_v9  ;;  %v3982_v12 = vpack.c.bf16 %v3980_v58, %v3979_v28  ;;  %v4127_v9 = vpack.c.bf16 %v11802_v4, %v4081_v27  ;;  %v4129_v4 = vpack.c.bf16 %v11840_v3, %v4085_v20 }
0x12b4   : > { %8687 = vmatprep.mubr.msk.bf16.mxu0 %vm2598_vm11, %v3982_v12  ;;  %v3983_v62 = vpack.c.bf16 %v3981_v8, %v3981_v8  ;;  %v4089_v12 = vld [vmem:[#allocation3 + $0x80] sm:$0xf] }
0x12b6   : > { %8688 = vmatmul.mubr.msk.bf16.vlgmr.msra.gmra.mrb[80].mxu0 %vm2598_vm11, %v3983_v62  ;;  %v4392_v62 = vld [vmem:[%s885_s19] sm:$0x3] }
0x12b7   : > { %4294 = vmatpush1.bf16.msra.mxu0 %v9171_v0  ;;  %4325 = vmatprep.mubr.bf16.mxu0 %v4124_v22  ;;  %v9186_v22 = vld [vmem:[%s11084_s2 + $0x50] ss:$8 sps:$4 sm:$0xff]   ;;  %v4131_v0 = vpack.c.bf16 %v4089_v12, %v4089_v12 }
0x12b8   : > { %4295 = vmatprep.subr.bf16.mxu0 %v9176_v15  ;;  %v11896_v15 = vrot.slane %v4392_v62, %v11376_v48  ;;  %v4634_v12 = vld [vmem:[%s11089_s14 + $0x20] sm:$0xff] }
0x12bb   : > { %4296 = vmatpush1.bf16.msra.mxu0 %v9174_v61 }
0x12bc   : > { %4297 = vmatprep.subr.bf16.mxu0 %v9179_v30  ;;  %v11899_v30 = vrot.slane %v4392_v62, %v11373_v47 }
0x12bf   : > { %4298 = vmatpush1.bf16.msra.mxu0 %v9177_v41  ;;  %v9687_v41 = vld [vmem:[#allocation2] sm:$0xff] }
0x12c0   : > { %4299 = vmatprep.subr.bf16.mxu0 %v9182_v59 }
0x12c3   : > { %4300 = vmatpush1.bf16.msra.mxu0 %v9180_v37  ;;  %v9688_v37 = vld [vmem:[#allocation2 + $0x8] sm:$0xff] }
0x12c4   : > { %4301 = vmatprep.subr.bf16.mxu0 %v9185_v6 }
0x12c7   : > { %4302 = vmatpush1.bf16.msra.mxu0 %v9183_v7 }
0x12c8   : > { %4303 = vmatprep.subr.bf16.mxu0 %v9188_v36 }
0x12cb   : > { %4304 = vmatpush1.bf16.msra.mxu0 %v9186_v22  ;;  %v9689_v22 = vld [vmem:[#allocation2 + $0x10] sm:$0xff] }
0x12cc   : > { %4305 = vmatprep.subr.bf16.mxu0 %v9191_v38 }
0x12cf   : > { %4306 = vmatpush1.bf16.msra.mxu0 %v9189_v53 }
0x12d0   : > { %4307 = vmatprep.subr.bf16.mxu0 %v9194_v23 }
0x12d3   : > { %4308 = vmatpush1.bf16.msra.mxu0 %v9192_v42  ;;  %v9690_v42 = vld [vmem:[#allocation2 + $0x18] sm:$0xff] }
0x12d4   : > { %4309 = vmatprep.subr.bf16.mxu0 %v9197_v13 }
0x12d7   : > { %4310 = vmatpush1.bf16.msra.mxu0 %v9195_v25 }
0x12d8   : > { %4311 = vmatprep.subr.bf16.mxu0 %v9200_v35 }
0x12db   : > { %4312 = vmatpush1.bf16.msra.mxu0 %v9198_v43 }
0x12dc   : > { %4313 = vmatprep.subr.bf16.mxu0 %v9203_v57 }
0x12df   : > { %4314 = vmatpush1.bf16.msra.mxu0 %v9201_v40 }
0x12e0   : > { %4315 = vmatprep.subr.bf16.mxu0 %v9206_v24  ;;  %v9691_v24 = vld [vmem:[#allocation2 + $0x20] sm:$0xff] }
0x12e3   : > { %4316 = vmatpush1.bf16.msra.mxu0 %v9204_v29 }
0x12e4   : > { %4317 = vmatprep.subr.bf16.mxu0 %v9209_v52 }
0x12e7   : > { %4318 = vmatpush1.bf16.msra.mxu0 %v9207_v39  ;;  %v9692_v39 = vld [vmem:[#allocation2 + $0x28] sm:$0xff] }
0x12e8   : > { %4319 = vmatprep.subr.bf16.mxu0 %v9212_v55 }
0x12eb   : > { %4320 = vmatpush1.bf16.msra.mxu0 %v9210_v10 }
0x12ec   : > { %4321 = vmatprep.subr.bf16.mxu0 %v9215_v50 }
0x12ef   : > { %4322 = vmatpush1.bf16.msra.mxu0 %v9213_v26  ;;  %v9693_v26 = vld [vmem:[#allocation2 + $0x30] sm:$0xff] }
0x12f0   : > { %4323 = vmatprep.subr.bf16.mxu0 %v9218_v51 }
0x12f3   : > { %4324 = vmatpush1.bf16.msra.mxu0 %v9216_v56 }
0x12f6   : > { %4326 = vmatmul.mubr.bf16.vlgmr.msra.gmra.mrb[84].mxu0 %v4123_v1 }
0x12f7   : > { %4335 = vmatprep.mubr.bf16.mxu0 %v4126_v60 }
0x12fe   : > { %4336 = vmatmul.mubr.bf16.gmra.mrb[88].mxu0 %v4125_v32 }
0x12ff   : > { %4345 = vmatprep.mubr.bf16.mxu0 %v4128_v17  ;;  %v9695_v17 = vld [vmem:[#allocation2 + $0x40] sm:$0xff] }
0x1306   : > { %4346 = vmatmul.mubr.bf16.gmra.mrb[92].mxu0 %v4127_v9 }
0x1389   : > { %v8689_v5 = vpop.f32.mrb[80].mxu0 }
0x138a   : > { %v4045_v21 = vpop.f32.mrb[81].mxu0  ;;  %v4065_v11 = vrot.slane %v8689_v5, 5  ;;  %v9696_v5 = vld [vmem:[#allocation2 + $0x48] sm:$0xff] }
0x138b   : > { %v4062_v54 = vrot.slane %v4045_v21, 5  ;;  %v8690_v46 = vpop.f32.mrb[82].mxu0 }
0x138c   : > { %v4048_v33 = vpop.f32.mrb[83].mxu0 }
0x138d   : > { %4070 = vst [vmem:[#allocation3 + $0x68] sm:$0xf8] %v4062_v54  ;;  %v4063_v2 = vrot.slane %v4048_v33, 5  ;;  %v9697_v33 = vld [vmem:[#allocation2 + $0x50] sm:$0xff] }
0x138f   : > { %v4064_v34 = vsel %vm3848_vm14, %v4062_v54, %v4063_v2  ;;  %v4066_v63 = vsel %vm3848_vm14, %v4063_v2, %v4065_v11 }
0x1390   : > { %4072 = vst [vmem:[#allocation3 + $0x88] sm:$0xf] %v4066_v63  ;;  %v9698_v63 = vld [vmem:[#allocation2 + $0x58] sm:$0xff] }
0x1394   : > { %v4086_v28 = vld [vmem:[#allocation3 + $0x68] sm:$0xff] }
0x1395   : > { %v4130_v58 = vpack.c.bf16 %v4064_v34, %v4086_v28 }
0x1397   : > { %4355 = vmatprep.mubr.bf16.mxu0 %v4130_v58  ;;  %v4090_v18 = vld [vmem:[#allocation3 + $0x88] sm:$0xf] }
0x1398   : > { %4356 = vmatmul.mubr.bf16.gmra.mrb[96].mxu0 %v4129_v4  ;;  %v4132_v8 = vpack.c.bf16 %v4090_v18, %v4090_v18 }
0x139a   : > { %4365 = vmatprep.mubr.bf16.mxu0 %v4132_v8  ;;  %v4630_v8 = vld [vmem:[%s11089_s14] sm:$0xff] }
0x139b   : > { %v8220_v62 = vcombine.low %v4630_v8, %v4634_v12 }
0x13a0   : > { %4366 = vmatmul.mubr.bf16.gmra.mrb[100].mxu0 %v4131_v0  ;;  %v4631_v0 = vld [vmem:[%s11089_s14 + $0x8] sm:$0xff] }
0x13c9   : > { %v4327_v61 = vpop.f32.mrb[84].mxu0 }
0x13ca   : > { %v4374_v59 = vadd.f32 %v9687_v41, %v4327_v61  ;;  %v4329_v3 = vpop.f32.mrb[85].mxu0  ;;  %v8221_v61 = vcombine.high %v4630_v8, %v4634_v12  ;;  %v4635_v41 = vld [vmem:[%s11089_s14 + $0x28] sm:$0xff]  ;;  %v4678_v8 = vld [vmem:[%s11089_s14 + $0x180] sm:$0xff] }
0x13cb   : > { %v4375_v6 = vadd.f32 %v9688_v37, %v4329_v3  ;;  %v4331_v7 = vpop.f32.mrb[86].mxu0  ;;  %v4642_v3 = vld [vmem:[%s11089_s14 + $0x60] sm:$0xff]  ;;  %v8222_v37 = vcombine.low %v4631_v0, %v4635_v41 }
0x13cc   : > { %v11902_v36 = vadd.f32 %v11896_v15, %v4374_v59  ;;  %v4376_v38 = vadd.f32 %v9689_v22, %v4331_v7  ;;  %v4333_v53 = vpop.f32.mrb[87].mxu0  ;;  %v4638_v59 = vld [vmem:[%s11089_s14 + $0x40] sm:$0xff]  ;;  %v4639_v22 = vld [vmem:[%s11089_s14 + $0x48] sm:$0xff]  ;;  %5450 = vmatprep.subr.bf16.mxu1 %v8221_v61 }
0x13cd   : > { %v11905_v23 = vadd.f32 %v11899_v30, %v4375_v6  ;;  %v4377_v13 = vadd.f32 %v9690_v42, %v4333_v53  ;;  %v8223_v6 = vcombine.high %v4631_v0, %v4635_v41  ;;  %v8229_v7 = vcombine.high %v4638_v59, %v4642_v3  ;;  %v4646_v53 = vld [vmem:[%s11089_s14 + $0x80] sm:$0xff]  ;;  %5451 = vmatpush1.bf16.msra.mxu1 %v8220_v62  ;;  %v4679_v0 = vld [vmem:[%s11089_s14 + $0x188] sm:$0xff] }
0x13ce   : > { %13487 = vst [vmem:[#allocation54_spill] sm:$0xff] %v11902_v36  ;;  %v11908_v25 = vadd.f32 %v11896_v15, %v4376_v38  ;;  %v4643_v38 = vld [vmem:[%s11089_s14 + $0x68] sm:$0xff]  ;;  %v4682_v12 = vld [vmem:[%s11089_s14 + $0x1a0] sm:$0xff] }
0x13cf   : > { %13488 = vst [vmem:[#allocation55_spill] sm:$0xff] %v11905_v23  ;;  %v11911_v35 = vadd.f32 %v11899_v30, %v4377_v13  ;;  %v4424_v43 = vadd.f32 %v11905_v23, %v11902_v36  ;;  %v8231_v42 = vcombine.high %v4639_v22, %v4643_v38  ;;  %v4650_v13 = vld [vmem:[%s11089_s14 + $0xa0] sm:$0xff]  ;;  %5531 = vmatprep.subr.bf16.mxu0 %v8223_v6  ;;  %v4683_v62 = vld [vmem:[%s11089_s14 + $0x1a8] sm:$0xff] }
0x13d0   : > { %13489 = vst [vmem:[#allocation56_spill] sm:$0xff] %v11908_v25  ;;  %5532 = vmatpush1.bf16.msra.mxu0 %v8222_v37  ;;  %5452 = vmatprep.subr.bf16.mxu1 %v8229_v7  ;;  %v8268_v37 = vcombine.low %v4678_v8, %v4682_v12  ;;  %v8270_v6 = vcombine.low %v4679_v0, %v4683_v62 }
0x13d1   : > { %13490 = vst [vmem:[#allocation57_spill] sm:$0xff] %v11911_v35  ;;  %4425 = vadd.xlane.f32.xlu0 %v4424_v43  ;;  %v4337_v57 = vpop.f32.mrb[88].mxu0  ;;  %v4427_v40 = vadd.f32 %v11911_v35, %v11908_v25  ;;  %v4647_v43 = vld [vmem:[%s11089_s14 + $0x88] sm:$0xff]  ;;  %5533 = vmatprep.subr.bf16.mxu0 %v8231_v42 }
0x13d2   : > { %v4378_v29 = vadd.f32 %v9691_v24, %v4337_v57  ;;  %v4339_v52 = vpop.f32.mrb[89].mxu0  ;;  %v4651_v57 = vld [vmem:[%s11089_s14 + $0xa8] sm:$0xff]  ;;  %v8230_v24 = vcombine.low %v4639_v22, %v4643_v38 }
0x13d3   : > { %v4379_v55 = vadd.f32 %v9692_v39, %v4339_v52  ;;  %4428 = vadd.xlane.f32.xlu1 %v4427_v40  ;;  %v4341_v10 = vpop.f32.mrb[90].mxu0  ;;  %v8228_v40 = vcombine.low %v4638_v59, %v4642_v3  ;;  %v8239_v52 = vcombine.high %v4647_v43, %v4651_v57  ;;  %v4654_v39 = vld [vmem:[%s11089_s14 + $0xc0] sm:$0xff]  ;;  %v8269_v59 = vcombine.high %v4678_v8, %v4682_v12  ;;  %v9699_v42 = vld [vmem:[#allocation2 + $0x60] sm:$0xff] }
0x13d4   : > { %v11918_v50 = vadd.f32 %v11896_v15, %v4378_v29  ;;  %v4380_v51 = vadd.f32 %v9693_v26, %v4341_v10  ;;  %v4343_v56 = vpop.f32.mrb[91].mxu0  ;;  %v8237_v29 = vcombine.high %v4646_v53, %v4650_v13  ;;  %v4655_v10 = vld [vmem:[%s11089_s14 + $0xc8] sm:$0xff]  ;;  %5534 = vmatpush1.bf16.msra.mxu0 %v8230_v24  ;;  %v8271_v3 = vcombine.high %v4679_v0, %v4683_v62  ;;  %v9704_v62 = vld [vmem:[#allocation2 + $0x88] sm:$0xf] }
0x13d5   : > { %v11921_v44 = vadd.f32 %v11899_v30, %v4379_v55  ;;  %v4381_v16 = vadd.f32 %v9694_v14, %v4343_v56  ;;  %v4658_v55 = vld [vmem:[%s11089_s14 + $0xe0] sm:$0xff]  ;;  %v4659_v26 = vld [vmem:[%s11089_s14 + $0xe8] sm:$0xff]  ;;  %5453 = vmatpush1.bf16.msra.mxu1 %v8228_v40  ;;  %v8238_v56 = vcombine.low %v4647_v43, %v4651_v57  ;;  %5535 = vmatprep.subr.bf16.mxu0 %v8239_v52  ;;  %v9700_v40 = vld [vmem:[#allocation2 + $0x68] sm:$0xff] }
0x13d6   : > { %13491 = vst [vmem:[#allocation58_spill] sm:$0xff] %v11918_v50  ;;  %v11924_v1 = vadd.f32 %v11896_v15, %v4380_v51  ;;  %v8236_v51 = vcombine.low %v4646_v53, %v4650_v13  ;;  %5454 = vmatprep.subr.bf16.mxu1 %v8237_v29  ;;  %v8245_v14 = vcombine.high %v4654_v39, %v4658_v55 }
0x13d7   : > { %13492 = vst [vmem:[#allocation59_spill] sm:$0xff] %v11921_v44  ;;  %v11927_v60 = vadd.f32 %v11899_v30, %v4381_v16  ;;  %v4430_v45 = vadd.f32 %v11921_v44, %v11918_v50  ;;  %v8247_v16 = vcombine.high %v4655_v10, %v4659_v26 }
0x13d8   : > { %13493 = vst [vmem:[#allocation60_spill] sm:$0xff] %v11924_v1  ;;  %5536 = vmatpush1.bf16.msra.mxu0 %v8238_v56 }
0x13d9   : > { %13494 = vst [vmem:[#allocation61_spill] sm:$0xff] %v11927_v60  ;;  %4431 = vadd.xlane.f32.xlu0 %v4430_v45  ;;  %v4347_v49 = vpop.f32.mrb[92].mxu0  ;;  %v4433_v32 = vadd.f32 %v11927_v60, %v11924_v1  ;;  %v4662_v45 = vld [vmem:[%s11089_s14 + $0x100] sm:$0xff]  ;;  %5455 = vmatpush1.bf16.msra.mxu1 %v8236_v51 }
0x13da   : > { %v4382_v27 = vadd.f32 %v9695_v17, %v4347_v49  ;;  %v4349_v9 = vpop.f32.mrb[93].mxu0  ;;  %v4666_v49 = vld [vmem:[%s11089_s14 + $0x120] sm:$0xff]  ;;  %v4667_v17 = vld [vmem:[%s11089_s14 + $0x128] sm:$0xff]  ;;  %5456 = vmatprep.subr.bf16.mxu1 %v8245_v14  ;;  %5537 = vmatprep.subr.bf16.mxu0 %v8247_v16 }
0x13db   : > { %v4383_v21 = vadd.f32 %v9696_v5, %v4349_v9  ;;  %4434 = vadd.xlane.f32.xlu1 %v4433_v32  ;;  %v4351_v54 = vpop.f32.mrb[94].mxu0  ;;  %v4663_v32 = vld [vmem:[%s11089_s14 + $0x108] sm:$0xff]  ;;  %v8246_v9 = vcombine.low %v4655_v10, %v4659_v26  ;;  %v8253_v5 = vcombine.high %v4662_v45, %v4666_v49  ;;  %v9701_v26 = vld [vmem:[#allocation2 + $0x70] sm:$0xff]  ;;  %v9702_v16 = vld [vmem:[#allocation2 + $0x78] sm:$0xff] }
0x13dc   : > { %v11934_v46 = vadd.f32 %v11896_v15, %v4382_v27  ;;  %v4384_v11 = vadd.f32 %v9697_v33, %v4351_v54  ;;  %v4353_v2 = vpop.f32.mrb[95].mxu0  ;;  %v8244_v27 = vcombine.low %v4654_v39, %v4658_v55  ;;  %v4670_v54 = vld [vmem:[%s11089_s14 + $0x140] sm:$0xff] }
0x13dd   : > { %v11937_v34 = vadd.f32 %v11899_v30, %v4383_v21  ;;  %v4385_v20 = vadd.f32 %v9698_v63, %v4353_v2  ;;  %v8255_v21 = vcombine.high %v4663_v32, %v4667_v17  ;;  %v4674_v33 = vld [vmem:[%s11089_s14 + $0x160] sm:$0xff]  ;;  %v4675_v2 = vld [vmem:[%s11089_s14 + $0x168] sm:$0xff]  ;;  %v8252_v63 = vcombine.low %v4662_v45, %v4666_v49  ;;  %5538 = vmatpush1.bf16.msra.mxu0 %v8246_v9 }
0x13de   : > { %13495 = vst [vmem:[#allocation62_spill] sm:$0xff] %v11934_v46  ;;  %v11940_v28 = vadd.f32 %v11896_v15, %v4384_v11  ;;  %v4671_v11 = vld [vmem:[%s11089_s14 + $0x148] sm:$0xff]  ;;  %5457 = vmatpush1.bf16.msra.mxu1 %v8244_v27  ;;  %v8260_v61 = vcombine.low %v4670_v54, %v4674_v33 }
0x13df   : > { %13496 = vst [vmem:[#allocation63_spill] sm:$0xff] %v11937_v34  ;;  %v11943_v58 = vadd.f32 %v11899_v30, %v4385_v20  ;;  %v4436_v4 = vadd.f32 %v11937_v34, %v11934_v46  ;;  %5458 = vmatprep.subr.bf16.mxu1 %v8253_v5  ;;  %v8254_v20 = vcombine.low %v4663_v32, %v4667_v17 }
0x13e0   : > { %13497 = vst [vmem:[#allocation64_spill] sm:$0xff] %v11940_v28  ;;  %5539 = vmatprep.subr.bf16.mxu0 %v8255_v21  ;;  %v8262_v41 = vcombine.low %v4671_v11, %v4675_v2 }
0x13e1   : > { %13498 = vst [vmem:[#allocation65_spill] sm:$0xff] %v11943_v58  ;;  %4437 = vadd.xlane.f32.xlu0 %v4436_v4  ;;  %v4439_v18 = vadd.f32 %v11943_v58, %v11940_v28  ;;  %v8261_v4 = vcombine.high %v4670_v54, %v4674_v33  ;;  %5540 = vmatpush1.bf16.msra.mxu0 %v8254_v20 }
0x13e2   : > { %5459 = vmatpush1.bf16.msra.mxu1 %v8252_v63 }
0x13e3   : > { %4440 = vadd.xlane.f32.xlu1 %v4439_v18  ;;  %v8263_v18 = vcombine.high %v4671_v11, %v4675_v2  ;;  %5460 = vmatprep.subr.bf16.mxu1 %v8261_v4  ;;  %v9703_v4 = vld [vmem:[#allocation2 + $0x80] sm:$0xf] }
0x13e5   : > { %5541 = vmatprep.subr.bf16.mxu0 %v8263_v18 }
0x13e6   : > { %5461 = vmatpush1.bf16.msra.mxu1 %v8260_v61  ;;  %5542 = vmatpush1.bf16.msra.mxu0 %v8262_v41 }
0x13e7   : > { %5462 = vmatprep.subr.bf16.mxu1 %v8269_v59  ;;  %5543 = vmatprep.subr.bf16.mxu0 %v8271_v3 }
0x13ea   : > { %5463 = vmatpush1.bf16.msra.mxu1 %v8268_v37  ;;  %5544 = vmatpush1.bf16.msra.mxu0 %v8270_v6 }
0x145e   : > { %v4426_v7 = vpop.xlane.xlu0 %4425 }
0x145f   : > { %v4453_v22 = vmul.f32 0.00390625, %v4426_v7 }
0x1460   : > { %v4429_v39 = vpop.xlane.xlu1 %4428 }
0x1461   : > { %v11978_v57 = vsub.f32 %v11902_v36, %v4453_v22  ;;  %v11981_v52 = vsub.f32 %v11905_v23, %v4453_v22  ;;  %v4454_v17 = vmul.f32 0.00390625, %v4429_v39 }
0x1463   : > { %v4480_v21 = vmul.f32 %v11978_v57, %v11978_v57  ;;  %v4481_v54 = vmul.f32 %v11981_v52, %v11981_v52  ;;  %v12010_v12 = vsub.f32 %v11908_v25, %v4454_v17  ;;  %v12013_v0 = vsub.f32 %v11911_v35, %v4454_v17 }
0x1465   : > { %v4498_v6 = vadd.f32 %v4481_v54, %v4480_v21  ;;  %v4686_v54 = vld [vmem:[%s11089_s14 + $0x1c0] sm:$0xff] }
0x1466   : > { %v4432_v38 = vpop.xlane.xlu0 %4431 }
0x1467   : > { %v4455_v55 = vmul.f32 0.00390625, %v4432_v38 }
0x1468   : > { %v4435_v11 = vpop.xlane.xlu1 %4434 }
0x1469   : > { %v11996_v9 = vsub.f32 %v11918_v50, %v4455_v55  ;;  %v12005_v33 = vsub.f32 %v11921_v44, %v4455_v55  ;;  %v4456_v59 = vmul.f32 0.00390625, %v4435_v11  ;;  %v4690_v11 = vld [vmem:[%s11089_s14 + $0x1e0] sm:$0xff] }
0x146b   : > { %v4357_v53 = vpop.f32.mrb[96].mxu0  ;;  %v4484_v7 = vmul.f32 %v11996_v9, %v11996_v9 }
0x146c   : > { %v4386_v13 = vadd.f32 %v9699_v42, %v4357_v53  ;;  %v4359_v43 = vpop.f32.mrb[97].mxu0 }
0x146d   : > { %v4387_v24 = vadd.f32 %v9700_v40, %v4359_v43  ;;  %v4361_v29 = vpop.f32.mrb[98].mxu0  ;;  %v4482_v40 = vmul.f32 %v12010_v12, %v12010_v12 }
0x146e   : > { %v11984_v10 = vadd.f32 %v11896_v15, %v4386_v13  ;;  %v4388_v51 = vadd.f32 %v9701_v26, %v4361_v29  ;;  %v4363_v56 = vpop.f32.mrb[99].mxu0  ;;  %v4438_v49 = vpop.xlane.xlu0 %4437  ;;  %v4485_v13 = vmul.f32 %v12005_v33, %v12005_v33  ;;  %v12040_v29 = vsub.f32 %v11924_v1, %v4456_v59 }
0x146f   : > { %v11987_v14 = vadd.f32 %v11899_v30, %v4387_v24  ;;  %v4389_v45 = vadd.f32 %v9702_v16, %v4363_v56  ;;  %v4457_v2 = vmul.f32 0.00390625, %v4438_v49  ;;  %v4483_v24 = vmul.f32 %v12013_v0, %v12013_v0 }
0x1470   : > { %13499 = vst [vmem:[#allocation66_spill] sm:$0xff] %v11984_v10  ;;  %v11990_v32 = vadd.f32 %v11896_v15, %v4388_v51  ;;  %v4441_v53 = vpop.xlane.xlu1 %4440  ;;  %v4504_v26 = vadd.f32 %v4485_v13, %v4484_v7  ;;  %v4486_v17 = vmul.f32 %v12040_v29, %v12040_v29 }
0x1471   : > { %13500 = vst [vmem:[#allocation67_spill] sm:$0xff] %v11987_v14  ;;  %v11993_v27 = vadd.f32 %v11899_v30, %v4389_v45  ;;  %v4442_v5 = vadd.f32 %v11987_v14, %v11984_v10  ;;  %v12021_v22 = vsub.f32 %v11934_v46, %v4457_v2  ;;  %v12024_v38 = vsub.f32 %v11937_v34, %v4457_v2  ;;  %v4687_v2 = vld [vmem:[%s11089_s14 + $0x1c8] sm:$0xff] }
0x1472   : > { %13501 = vst [vmem:[#allocation68_spill] sm:$0xff] %v11990_v32  ;;  %v4458_v39 = vmul.f32 0.00390625, %v4441_v53  ;;  %v4501_v16 = vadd.f32 %v4483_v24, %v4482_v40  ;;  %v4702_v24 = vld [vmem:[%s11089_s14 + $0x240] sm:$0xff] }
0x1473   : > { %13502 = vst [vmem:[#allocation69_spill] sm:$0xff] %v11993_v27  ;;  %v4367_v63 = vpop.f32.mrb[100].mxu0  ;;  %v4445_v20 = vadd.f32 %v11993_v27, %v11990_v32  ;;  %4443 = vadd.xlane.f32.xlu0 %v4442_v5  ;;  %v4488_v51 = vmul.f32 %v12021_v22, %v12021_v22  ;;  %v4489_v56 = vmul.f32 %v12024_v38, %v12024_v38 }
0x1474   : > { %v4390_v18 = vadd.f32 %v9703_v4, %v4367_v63  ;;  %v4369_v8 = vpop.f32.mrb[101].mxu0  ;;  %v12050_v45 = vsub.f32 %v11940_v28, %v4458_v39  ;;  %v12053_v49 = vsub.f32 %v11943_v58, %v4458_v39  ;;  %v4706_v39 = vld [vmem:[%s11089_s14 + $0x260] sm:$0xff] }
0x1475   : > { %v4391_v61 = vadd.f32 %v9704_v62, %v4369_v8  ;;  %4446 = vadd.xlane.f32.xlu1 %v4445_v20  ;;  %v4371_v41 = vpop.f32.mrb[102].mxu0  ;;  %v4510_v21 = vadd.f32 %v4489_v56, %v4488_v51  ;;  %v4691_v8 = vld [vmem:[%s11089_s14 + $0x1e8] sm:$0xff]  ;;  %v8276_v62 = vcombine.low %v4686_v54, %v4690_v11  ;;  %v8292_v56 = vcombine.low %v4702_v24, %v4706_v39 }
0x1476   : > { %v12016_v3 = vadd.f32 %v11896_v15, %v4390_v18  ;;  %v4372_v37 = vpop.f32.mrb[103].mxu0  ;;  %v4490_v20 = vmul.f32 %v12050_v45, %v12050_v45  ;;  %v4491_v4 = vmul.f32 %v12053_v49, %v12053_v49  ;;  %v8277_v18 = vcombine.high %v4686_v54, %v4690_v11  ;;  %v4707_v51 = vld [vmem:[%s11089_s14 + $0x268] sm:$0xff] }
0x1477   : > { %v12027_v42 = vadd.f32 %v11899_v30, %v4391_v61  ;;  %v12043_v30 = vsub.f32 %v11927_v60, %v4456_v59  ;;  %v8278_v61 = vcombine.low %v4687_v2, %v4691_v8  ;;  %v8279_v41 = vcombine.high %v4687_v2, %v4691_v8  ;;  %v4694_v59 = vld [vmem:[%s11089_s14 + $0x200] sm:$0xff]  ;;  %v4711_v54 = vld [vmem:[%s11089_s14 + $0x288] sm:$0xff] }
0x1478   : > { %13503 = vst [vmem:[#allocation70_spill] sm:$0xff] %v12016_v3  ;;  %v4448_v15 = vsel %vm1522_vm6, %v12016_v3, 0.0  ;;  %5464 = vmatprep.subr.bf16.mxu1 %v8277_v18  ;;  %v4698_v37 = vld [vmem:[%s11089_s14 + $0x220] sm:$0xff]  ;;  %v4513_v7 = vadd.f32 %v4491_v4, %v4490_v20  ;;  %v4715_v2 = vld [vmem:[%s11089_s14 + $0x2a8] sm:$0xff] }
0x1479   : > { %13504 = vst [vmem:[#allocation71_spill] sm:$0xff] %v12027_v42  ;;  %4499 = vadd.xlane.f32.xlu1 %v4498_v6  ;;  %v4449_v43 = vsel %vm1522_vm6, %v12027_v42, 0.0  ;;  %v4487_v5 = vmul.f32 %v12043_v30, %v12043_v30  ;;  %5545 = vmatprep.subr.bf16.mxu0 %v8279_v41  ;;  %v4695_v6 = vld [vmem:[%s11089_s14 + $0x208] sm:$0xff]  ;;  %v8284_v53 = vcombine.low %v4694_v59, %v4698_v37  ;;  %v4718_v18 = vld [vmem:[%s11089_s14 + $0x2c0] sm:$0xff] }
0x147a   : > { %v4450_v55 = vadd.f32 %v4449_v43, %v4448_v15  ;;  %5465 = vmatpush1.bf16.msra.mxu1 %v8276_v62  ;;  %5546 = vmatpush1.bf16.msra.mxu0 %v8278_v61  ;;  %v8285_v13 = vcombine.high %v4694_v59, %v4698_v37  ;;  %v4699_v15 = vld [vmem:[%s11089_s14 + $0x228] sm:$0xff]  ;;  %v8302_v20 = vcombine.low %v4711_v54, %v4715_v2  ;;  %v4722_v8 = vld [vmem:[%s11089_s14 + $0x2e0] sm:$0xff] }
0x147b   : > { %v4507_v63 = vadd.f32 %v4487_v5, %v4486_v17  ;;  %v8286_v43 = vcombine.low %v4695_v6, %v4699_v15  ;;  %v8287_v40 = vcombine.high %v4695_v6, %v4699_v15  ;;  %v4710_v5 = vld [vmem:[%s11089_s14 + $0x280] sm:$0xff]  ;;  %v8303_v4 = vcombine.high %v4711_v54, %v4715_v2  ;;  %v4719_v62 = vld [vmem:[%s11089_s14 + $0x2c8] sm:$0xff] }
0x147c   : > { %4451 = vadd.xlane.f32.xlu0 %v4450_v55  ;;  %5466 = vmatprep.subr.bf16.mxu1 %v8285_v13  ;;  %v4703_v55 = vld [vmem:[%s11089_s14 + $0x248] sm:$0xff]  ;;  %v8309_v61 = vcombine.high %v4718_v18, %v4722_v8  ;;  %v8308_v59 = vcombine.low %v4718_v18, %v4722_v8  ;;  %v4742_v54 = vld [vmem:[%s11089_s14 + $0x380] sm:$0xff] }
0x147d   : > { %4505 = vadd.xlane.f32.xlu1 %v4504_v26  ;;  %5547 = vmatprep.subr.bf16.mxu0 %v8287_v40  ;;  %v8293_v26 = vcombine.high %v4702_v24, %v4706_v39  ;;  %v8295_v17 = vcombine.high %v4703_v55, %v4707_v51  ;;  %v4723_v41 = vld [vmem:[%s11089_s14 + $0x2e8] sm:$0xff] }
0x147e   : > { %5467 = vmatpush1.bf16.msra.mxu1 %v8284_v53  ;;  %5548 = vmatpush1.bf16.msra.mxu0 %v8286_v43  ;;  %v8310_v37 = vcombine.low %v4719_v62, %v4723_v41  ;;  %v8311_v6 = vcombine.high %v4719_v62, %v4723_v41  ;;  %v4730_v53 = vld [vmem:[%s11089_s14 + $0x320] sm:$0xff]  ;;  %v4727_v13 = vld [vmem:[%s11089_s14 + $0x308] sm:$0xff] }
0x147f   : > { %5468 = vmatprep.subr.bf16.mxu1 %v8293_v26  ;;  %5549 = vmatprep.subr.bf16.mxu0 %v8295_v17  ;;  %v4731_v43 = vld [vmem:[%s11089_s14 + $0x328] sm:$0xff]  ;;  %v4738_v26 = vld [vmem:[%s11089_s14 + $0x360] sm:$0xff] }
0x1480   : > { %4502 = vadd.xlane.f32.xlu0 %v4501_v16  ;;  %v8294_v16 = vcombine.low %v4703_v55, %v4707_v51  ;;  %v8318_v24 = vcombine.low %v4727_v13, %v4731_v43  ;;  %v8319_v39 = vcombine.high %v4727_v13, %v4731_v43  ;;  %v4734_v55 = vld [vmem:[%s11089_s14 + $0x340] sm:$0xff]  ;;  %v4735_v51 = vld [vmem:[%s11089_s14 + $0x348] sm:$0xff]  ;;  %v12100_v13 = vld [vmem:[%s11089_s14 + $0x10] sm:$0xff] }
0x1481   : > { %4511 = vadd.xlane.f32.xlu1 %v4510_v21  ;;  %v4714_v21 = vld [vmem:[%s11089_s14 + $0x2a0] sm:$0xff]  ;;  %v8324_v17 = vcombine.low %v4734_v55, %v4738_v26  ;;  %v4743_v2 = vld [vmem:[%s11089_s14 + $0x388] sm:$0xff]  ;;  %v12106_v43 = vld [vmem:[%s11089_s14 + $0x18] sm:$0xff] }
0x1482   : > { %5469 = vmatpush1.bf16.msra.mxu1 %v8292_v56  ;;  %5550 = vmatpush1.bf16.msra.mxu0 %v8294_v16  ;;  %v8301_v11 = vcombine.high %v4710_v5, %v4714_v21  ;;  %v8325_v56 = vcombine.high %v4734_v55, %v4738_v26  ;;  %v4739_v16 = vld [vmem:[%s11089_s14 + $0x368] sm:$0xff]  ;;  %v4750_v62 = vld [vmem:[%s11089_s14 + $0x3c0] sm:$0xff] }
0x1483   : > { %5551 = vmatprep.subr.bf16.mxu0 %v8303_v4  ;;  %v4751_v41 = vld [vmem:[%s11089_s14 + $0x3c8] sm:$0xff] }
0x1484   : > { %4508 = vadd.xlane.f32.xlu0 %v4507_v63  ;;  %v8300_v63 = vcombine.low %v4710_v5, %v4714_v21  ;;  %5470 = vmatprep.subr.bf16.mxu1 %v8301_v11  ;;  %v8326_v5 = vcombine.low %v4735_v51, %v4739_v16  ;;  %v8327_v21 = vcombine.high %v4735_v51, %v4739_v16  ;;  %v4746_v11 = vld [vmem:[%s11089_s14 + $0x3a0] sm:$0xff] }
0x1485   : > { %v8332_v4 = vcombine.low %v4742_v54, %v4746_v11 }
0x1486   : > { %5471 = vmatpush1.bf16.msra.mxu1 %v8300_v63  ;;  %5552 = vmatpush1.bf16.msra.mxu0 %v8302_v20  ;;  %v8333_v63 = vcombine.high %v4742_v54, %v4746_v11  ;;  %v4747_v20 = vld [vmem:[%s11089_s14 + $0x3a8] sm:$0xff] }
0x1487   : > { %5472 = vmatprep.subr.bf16.mxu1 %v8309_v61  ;;  %5553 = vmatprep.subr.bf16.mxu0 %v8311_v6  ;;  %v8334_v18 = vcombine.low %v4743_v2, %v4747_v20  ;;  %v8335_v8 = vcombine.high %v4743_v2, %v4747_v20  ;;  %v4754_v61 = vld [vmem:[%s11089_s14 + $0x3e0] sm:$0xff] }
0x1488   : > { %4514 = vadd.xlane.f32.xlu0 %v4513_v7  ;;  %v4726_v7 = vld [vmem:[%s11089_s14 + $0x300] sm:$0xff]  ;;  %v8340_v6 = vcombine.low %v4750_v62, %v4754_v61 }
0x1489   : > { %v8317_v15 = vcombine.high %v4726_v7, %v4730_v53  ;;  %v8316_v40 = vcombine.low %v4726_v7, %v4730_v53 }
0x148a   : > { %5473 = vmatpush1.bf16.msra.mxu1 %v8308_v59  ;;  %5554 = vmatpush1.bf16.msra.mxu0 %v8310_v37  ;;  %v8341_v59 = vcombine.high %v4750_v62, %v4754_v61  ;;  %v4755_v37 = vld [vmem:[%s11089_s14 + $0x3e8] sm:$0xff] }
0x148b   : > { %5474 = vmatprep.subr.bf16.mxu1 %v8317_v15  ;;  %5555 = vmatprep.subr.bf16.mxu0 %v8319_v39  ;;  %v8342_v7 = vcombine.low %v4751_v41, %v4755_v37  ;;  %v8343_v53 = vcombine.high %v4751_v41, %v4755_v37  ;;  %v12103_v15 = vld [vmem:[%s11089_s14 + $0x30] sm:$0xff]  ;;  %v12113_v39 = vld [vmem:[%s11089_s14 + $0x38] sm:$0xff] }
0x148c   : > { %v8227_v26 = vcombine.high %v12106_v43, %v12113_v39 }
0x148e   : > { %5475 = vmatpush1.bf16.msra.mxu1 %v8316_v40  ;;  %5556 = vmatpush1.bf16.msra.mxu0 %v8318_v24  ;;  %v8225_v24 = vcombine.high %v12100_v13, %v12103_v15 }
0x148f   : > { %5476 = vmatprep.subr.bf16.mxu1 %v8325_v56  ;;  %5557 = vmatprep.subr.bf16.mxu0 %v8327_v21 }
0x1492   : > { %5477 = vmatpush1.bf16.msra.mxu1 %v8324_v17  ;;  %5558 = vmatpush1.bf16.msra.mxu0 %v8326_v5 }
0x1493   : > { %5478 = vmatprep.subr.bf16.mxu1 %v8333_v63  ;;  %5559 = vmatprep.subr.bf16.mxu0 %v8335_v8 }
0x1496   : > { %5479 = vmatpush1.bf16.msra.mxu1 %v8332_v4  ;;  %5560 = vmatpush1.bf16.msra.mxu0 %v8334_v18 }
0x1497   : > { %5480 = vmatprep.subr.bf16.mxu1 %v8341_v59  ;;  %5561 = vmatprep.subr.bf16.mxu0 %v8343_v53 }
0x149a   : > { %5481 = vmatpush1.bf16.msra.mxu1 %v8340_v6  ;;  %5562 = vmatpush1.bf16.msra.mxu0 %v8342_v7 }
0x149b   : > { %5612 = vmatprep.subr.bf16.mxu1 %v8225_v24  ;;  %5693 = vmatprep.subr.bf16.mxu0 %v8227_v26 }
0x1500   : > { %v4444_v51 = vpop.xlane.xlu0 %4443 }
0x1501   : > { %v4459_v56 = vmul.f32 0.00390625, %v4444_v51 }
0x1502   : > { %v4447_v16 = vpop.xlane.xlu1 %4446 }
0x1503   : > { %v4460_v17 = vmul.f32 0.00390625, %v4447_v16  ;;  %v12120_v5 = vsub.f32 %v11984_v10, %v4459_v56  ;;  %v12123_v21 = vsub.f32 %v11987_v14, %v4459_v56 }
0x1505   : > { %v12126_v54 = vsub.f32 %v11990_v32, %v4460_v17  ;;  %v12129_v11 = vsub.f32 %v11993_v27, %v4460_v17  ;;  %v4492_v63 = vmul.f32 %v12120_v5, %v12120_v5  ;;  %v4493_v20 = vmul.f32 %v12123_v21, %v12123_v21 }
0x1506   : > { %v4500_v2 = vpop.xlane.xlu1 %4499 }
0x1507   : > { %v4527_v4 = vmul.f32 0.00390625, %v4500_v2  ;;  %v4494_v18 = vmul.f32 %v12126_v54, %v12126_v54  ;;  %v4495_v8 = vmul.f32 %v12129_v11, %v12129_v11  ;;  %v4516_v62 = vadd.f32 %v4493_v20, %v4492_v63 }
0x1509   : > { %v4536_v61 = vadd.f32 1e-05, %v4527_v4  ;;  %v4452_v41 = vpop.xlane.xlu0 %4451  ;;  %v4519_v59 = vadd.f32 %v4495_v8, %v4494_v18  ;;  %4517 = vadd.xlane.f32.xlu1 %v4516_v62 }
0x150a   : > { %v4461_v37 = vmul.f32 0.00390625, %v4452_v41  ;;  %v4506_v6 = vpop.xlane.xlu1 %4505 }
0x150b   : > { %9525 = vrsqrt.f32 %v4536_v61  ;;  %v4529_v7 = vmul.f32 0.00390625, %v4506_v6  ;;  %4520 = vadd.xlane.f32.xlu0 %v4519_v59 }
0x150c   : > { %v12140_v53 = vsub.f32 %v12016_v3, %v4461_v37  ;;  %v12143_v24 = vsub.f32 %v12027_v42, %v4461_v37  ;;  %v4422_v37 = vld [vmem:[%s13505_s16] sm:$0x3] }
0x150d   : > { %v4538_v26 = vadd.f32 1e-05, %v4529_v7  ;;  %v4503_v51 = vpop.xlane.xlu0 %4502 }
0x150e   : > { %v4528_v56 = vmul.f32 0.00390625, %v4503_v51  ;;  %v4512_v16 = vpop.xlane.xlu1 %4511  ;;  %v4496_v17 = vmul.f32 %v12140_v53, %v12140_v53  ;;  %v4497_v2 = vmul.f32 %v12143_v24, %v12143_v24  ;;  %v12154_v51 = vrot.slane %v4422_v37, %v11373_v47 }
0x150f   : > { %9527 = vrsqrt.f32 %v4538_v26  ;;  %v4531_v63 = vmul.f32 0.00390625, %v4512_v16 }
0x1510   : > { %v4537_v20 = vadd.f32 1e-05, %v4528_v56  ;;  %v4522_v4 = vsel %vm1522_vm6, %v4496_v17, 0.0  ;;  %v4523_v18 = vsel %vm1522_vm6, %v4497_v2, 0.0  ;;  %v4423_v2 = vld [vmem:[%s13506_s17] sm:$0x3] }
0x1511   : > { %v4540_v8 = vadd.f32 1e-05, %v4531_v63  ;;  %v4509_v62 = vpop.xlane.xlu0 %4508  ;;  %v4524_v61 = vadd.f32 %v4523_v18, %v4522_v4  ;;  %v12161_v63 = vrot.slane %v4422_v37, %v11376_v48  ;;  %v12164_v4 = vrot.slane %v4423_v2, %v11373_v47 }
0x1512   : > { %9529 = vrsqrt.f32 %v4537_v20  ;;  %v4530_v41 = vmul.f32 0.00390625, %v4509_v62 }
0x1513   : > { %4525 = vadd.xlane.f32.xlu1 %v4524_v61  ;;  %9531 = vrsqrt.f32 %v4540_v8 }
0x1514   : > { %v4539_v59 = vadd.f32 1e-05, %v4530_v41 }
0x1515   : > { %v9526_v6 = vpop.eup %9525  ;;  %v4515_v7 = vpop.xlane.xlu0 %4514 }
0x1516   : > { %9533 = vrsqrt.f32 %v4539_v59  ;;  %v4532_v26 = vmul.f32 0.00390625, %v4515_v7  ;;  %v4554_v56 = vmul.f32 %v9526_v6, %v11978_v57  ;;  %v4555_v16 = vmul.f32 %v9526_v6, %v11981_v52 }
0x1517   : > { %v12170_v52 = vrot.slane %v4423_v2, %v11376_v48 }
0x1518   : > { %v4541_v17 = vadd.f32 1e-05, %v4532_v26  ;;  %v4584_v62 = vmul.f32 %v12154_v51, %v4555_v16  ;;  %v4583_v57 = vmul.f32 %v12161_v63, %v4554_v56  ;;  %v4640_v16 = vld [vmem:[%s11089_s14 + $0x50] sm:$0xff] }
0x1519   : > { %v9528_v20 = vpop.eup %9527 }
0x151a   : > { %9535 = vrsqrt.f32 %v4541_v17  ;;  %v4559_v8 = vmul.f32 %v9528_v20, %v12005_v33  ;;  %v4613_v7 = vadd.f32 %v12164_v4, %v4584_v62  ;;  %v4612_v26 = vadd.f32 %v12170_v52, %v4583_v57 }
0x151b   : > { %v4558_v62 = vmul.f32 %v9528_v20, %v11996_v9 }
0x151c   : > { %v9530_v18 = vpop.eup %9529  ;;  %v4588_v56 = vmul.f32 %v12154_v51, %v4559_v8 }
0x151d   : > { %v4556_v61 = vmul.f32 %v9530_v18, %v12010_v12  ;;  %v4557_v41 = vmul.f32 %v9530_v18, %v12013_v0  ;;  %v9532_v59 = vpop.eup %9531  ;;  %v4644_v18 = vld [vmem:[%s11089_s14 + $0x70] sm:$0xff] }
0x151e   : > { %v4563_v31 = vmul.f32 %v9532_v59, %v12024_v38  ;;  %v8232_v55 = vcombine.low %v4640_v16, %v4644_v18  ;;  %v8233_v40 = vcombine.high %v4640_v16, %v4644_v18  ;;  %v4617_v38 = vadd.f32 %v12164_v4, %v4588_v56 }
0x151f   : > { %v4586_v37 = vmul.f32 %v12154_v51, %v4557_v41  ;;  %v4585_v6 = vmul.f32 %v12161_v63, %v4556_v61  ;;  %v4641_v61 = vld [vmem:[%s11089_s14 + $0x58] sm:$0xff]  ;;  %v13508_v18 = vcombine.low %v12106_v43, %v12113_v39  ;;  %v4660_v43 = vld [vmem:[%s11089_s14 + $0xf0] sm:$0xff] }
0x1520   : > { %v9534_v33 = vpop.eup %9533  ;;  %v4645_v41 = vld [vmem:[%s11089_s14 + $0x78] sm:$0xff] }
0x1521   : > { %v4560_v12 = vmul.f32 %v9534_v33, %v12040_v29  ;;  %v4561_v17 = vmul.f32 %v9534_v33, %v12043_v30  ;;  %v4615_v0 = vadd.f32 %v12164_v4, %v4586_v37  ;;  %v4614_v2 = vadd.f32 %v12170_v52, %v4585_v6  ;;  %v4648_v30 = vld [vmem:[%s11089_s14 + $0x90] sm:$0xff]  ;;  %v4657_v39 = vld [vmem:[%s11089_s14 + $0xd8] sm:$0xff] }
0x1522   : > { %v4652_v33 = vld [vmem:[%s11089_s14 + $0xb0] sm:$0xff]  ;;  %v8235_v42 = vcombine.high %v4641_v61, %v4645_v41  ;;  %v8234_v16 = vcombine.low %v4641_v61, %v4645_v41 }
0x1523   : > { %v12189_v57 = vpack.c.bf16 %v4615_v0, %v4613_v7  ;;  %v12191_v8 = vpack.c.bf16 %v4614_v2, %v4612_v26  ;;  %v4590_v29 = vmul.f32 %v12154_v51, %v4561_v17  ;;  %v4589_v6 = vmul.f32 %v12161_v63, %v4560_v12  ;;  %v4649_v7 = vld [vmem:[%s11089_s14 + $0x98] sm:$0xff] }
0x1524   : > { %v9536_v37 = vpop.eup %9535  ;;  %v4653_v26 = vld [vmem:[%s11089_s14 + $0xb8] sm:$0xff]  ;;  %v4587_v12 = vmul.f32 %v12161_v63, %v4558_v62  ;;  %v8241_v17 = vcombine.high %v4648_v30, %v4652_v33  ;;  %v4592_v0 = vmul.f32 %v12154_v51, %v4563_v31  ;;  %v13507_v2 = vcombine.low %v12100_v13, %v12103_v15  ;;  %v4656_v13 = vld [vmem:[%s11089_s14 + $0xd0] sm:$0xff] }
0x1525   : > { %v4565_v9 = vmul.f32 %v9536_v37, %v12053_v49  ;;  %5482 = vmatprep.mubr.bf16.mxu1 %v12189_v57  ;;  %5563 = vmatprep.mubr.bf16.mxu0 %v12189_v57  ;;  %v4619_v20 = vadd.f32 %v12164_v4, %v4590_v29  ;;  %v4564_v61 = vmul.f32 %v9536_v37, %v12050_v45  ;;  %v4661_v45 = vld [vmem:[%s11089_s14 + $0xf8] sm:$0xff] }
0x1526   : > { %5483 = vmatmul.mubr.bf16.vlgmr.msra.gmra.mrb[40].mxu1 %v12191_v8  ;;  %5564 = vmatmul.mubr.bf16.vlgmr.msra.gmra.mrb[104].mxu0 %v12191_v8  ;;  %v4618_v41 = vadd.f32 %v12170_v52, %v4589_v6  ;;  %v8243_v62 = vcombine.high %v4649_v7, %v4653_v26  ;;  %v4562_v15 = vmul.f32 %v9532_v59, %v12021_v22 }
0x1527   : > { %v12207_v49 = vpack.c.bf16 %v4619_v20, %v4617_v38  ;;  %v4594_v56 = vmul.f32 %v12154_v51, %v4565_v9  ;;  %5613 = vmatpush1.bf16.msra.mxu1 %v13507_v2  ;;  %5694 = vmatpush1.bf16.msra.mxu0 %v13508_v18  ;;  %v4616_v29 = vadd.f32 %v12170_v52, %v4587_v12  ;;  %v4664_v20 = vld [vmem:[%s11089_s14 + $0x110] sm:$0xff]  ;;  %v4669_v12 = vld [vmem:[%s11089_s14 + $0x138] sm:$0xff] }
0x1528   : > { %5614 = vmatprep.subr.bf16.mxu1 %v8233_v40  ;;  %5695 = vmatprep.subr.bf16.mxu0 %v8235_v42  ;;  %v4621_v37 = vadd.f32 %v12164_v4, %v4592_v0  ;;  %v8240_v42 = vcombine.low %v4648_v30, %v4652_v33  ;;  %v4593_v6 = vmul.f32 %v12161_v63, %v4564_v61  ;;  %v4668_v30 = vld [vmem:[%s11089_s14 + $0x130] sm:$0xff]  ;;  %v4665_v33 = vld [vmem:[%s11089_s14 + $0x118] sm:$0xff] }
0x1529   : > { %5492 = vmatprep.mubr.bf16.mxu1 %v12207_v49  ;;  %5573 = vmatprep.mubr.bf16.mxu0 %v12207_v49  ;;  %v4623_v31 = vadd.f32 %v12164_v4, %v4594_v56  ;;  %v12229_v40 = vpack.c.bf16 %v4618_v41, %v4616_v29  ;;  %v8242_v22 = vcombine.low %v4649_v7, %v4653_v26  ;;  %v4672_v56 = vld [vmem:[%s11089_s14 + $0x150] sm:$0xff]  ;;  %v4673_v61 = vld [vmem:[%s11089_s14 + $0x158] sm:$0xff] }
0x152a   : > { %v8249_v9 = vcombine.high %v4656_v13, %v4660_v43  ;;  %v8251_v38 = vcombine.high %v4657_v39, %v4661_v45  ;;  %v4622_v7 = vadd.f32 %v12170_v52, %v4593_v6  ;;  %v8248_v26 = vcombine.low %v4656_v13, %v4660_v43  ;;  %v4676_v18 = vld [vmem:[%s11089_s14 + $0x170] sm:$0xff]  ;;  %v4677_v41 = vld [vmem:[%s11089_s14 + $0x178] sm:$0xff] }
0x152b   : > { %5615 = vmatpush1.bf16.msra.mxu1 %v8232_v55  ;;  %5696 = vmatpush1.bf16.msra.mxu0 %v8234_v16  ;;  %v12232_v59 = vpack.c.bf16 %v4623_v31, %v4621_v37  ;;  %v4591_v55 = vmul.f32 %v12161_v63, %v4562_v15  ;;  %v8250_v16 = vcombine.low %v4657_v39, %v4661_v45  ;;  %v4680_v43 = vld [vmem:[%s11089_s14 + $0x190] sm:$0xff]  ;;  %v4681_v45 = vld [vmem:[%s11089_s14 + $0x198] sm:$0xff] }
0x152c   : > { %5616 = vmatprep.subr.bf16.mxu1 %v8241_v17  ;;  %5697 = vmatprep.subr.bf16.mxu0 %v8243_v62  ;;  %v8257_v17 = vcombine.high %v4664_v20, %v4668_v30  ;;  %v8259_v0 = vcombine.high %v4665_v33, %v4669_v12  ;;  %v8256_v31 = vcombine.low %v4664_v20, %v4668_v30  ;;  %v4684_v39 = vld [vmem:[%s11089_s14 + $0x1b0] sm:$0xff]  ;;  %v4685_v37 = vld [vmem:[%s11089_s14 + $0x1b8] sm:$0xff] }
0x152d   : > { %v4620_v2 = vadd.f32 %v12170_v52, %v4591_v55  ;;  %v8258_v13 = vcombine.low %v4665_v33, %v4669_v12  ;;  %v8265_v15 = vcombine.high %v4672_v56, %v4676_v18  ;;  %v8267_v29 = vcombine.high %v4673_v61, %v4677_v41  ;;  %v4692_v20 = vld [vmem:[%s11089_s14 + $0x1f0] sm:$0xff]  ;;  %v4689_v55 = vld [vmem:[%s11089_s14 + $0x1d8] sm:$0xff] }
0x152e   : > { %5493 = vmatmul.mubr.bf16.gmra.mrb[44].mxu1 %v12229_v40  ;;  %5574 = vmatmul.mubr.bf16.gmra.mrb[108].mxu0 %v12229_v40  ;;  %v8266_v6 = vcombine.low %v4673_v61, %v4677_v41  ;;  %v4693_v30 = vld [vmem:[%s11089_s14 + $0x1f8] sm:$0xff]  ;;  %v8272_v33 = vcombine.low %v4680_v43, %v4684_v39  ;;  %v8274_v12 = vcombine.low %v4681_v45, %v4685_v37 }
0x152f   : > { %5502 = vmatprep.mubr.bf16.mxu1 %v12232_v59  ;;  %5583 = vmatprep.mubr.bf16.mxu0 %v12232_v59  ;;  %v12249_v62 = vpack.c.bf16 %v4622_v7, %v4620_v2 }
0x1530   : > { %5617 = vmatpush1.bf16.msra.mxu1 %v8240_v42  ;;  %5698 = vmatpush1.bf16.msra.mxu0 %v8242_v22  ;;  %v8264_v42 = vcombine.low %v4672_v56, %v4676_v18  ;;  %v8273_v22 = vcombine.high %v4680_v43, %v4684_v39  ;;  %v4701_v56 = vld [vmem:[%s11089_s14 + $0x238] sm:$0xff]  ;;  %v8282_v18 = vcombine.low %v4689_v55, %v4693_v30 }
0x1531   : > { %5618 = vmatprep.subr.bf16.mxu1 %v8249_v9  ;;  %5699 = vmatprep.subr.bf16.mxu0 %v8251_v38  ;;  %v8275_v9 = vcombine.high %v4681_v45, %v4685_v37  ;;  %v4688_v38 = vld [vmem:[%s11089_s14 + $0x1d0] sm:$0xff] }
0x1532   : > { %v8281_v7 = vcombine.high %v4688_v38, %v4692_v20  ;;  %v8280_v2 = vcombine.low %v4688_v38, %v4692_v20 }
0x1534   : > { %5619 = vmatpush1.bf16.msra.mxu1 %v8248_v26  ;;  %5700 = vmatpush1.bf16.msra.mxu0 %v8250_v16  ;;  %v8283_v26 = vcombine.high %v4689_v55, %v4693_v30  ;;  %v4696_v16 = vld [vmem:[%s11089_s14 + $0x210] sm:$0xff] }
0x1535   : > { %5620 = vmatprep.subr.bf16.mxu1 %v8257_v17  ;;  %5701 = vmatprep.subr.bf16.mxu0 %v8259_v0  ;;  %v4700_v17 = vld [vmem:[%s11089_s14 + $0x230] sm:$0xff]  ;;  %v4697_v0 = vld [vmem:[%s11089_s14 + $0x218] sm:$0xff] }
0x1536   : > { %5503 = vmatmul.mubr.bf16.gmra.mrb[48].mxu1 %v12249_v62  ;;  %5584 = vmatmul.mubr.bf16.gmra.mrb[112].mxu0 %v12249_v62  ;;  %v8289_v61 = vcombine.high %v4696_v16, %v4700_v17  ;;  %v8291_v41 = vcombine.high %v4697_v0, %v4701_v56  ;;  %v8288_v43 = vcombine.low %v4696_v16, %v4700_v17 }
0x1537   : > { %v8290_v39 = vcombine.low %v4697_v0, %v4701_v56 }
0x1538   : > { %5621 = vmatpush1.bf16.msra.mxu1 %v8256_v31  ;;  %5702 = vmatpush1.bf16.msra.mxu0 %v8258_v13  ;;  %v4704_v31 = vld [vmem:[%s11089_s14 + $0x250] sm:$0xff] }
0x1539   : > { %5622 = vmatprep.subr.bf16.mxu1 %v8265_v15  ;;  %5703 = vmatprep.subr.bf16.mxu0 %v8267_v29  ;;  %v4708_v13 = vld [vmem:[%s11089_s14 + $0x270] sm:$0xff]  ;;  %v4705_v15 = vld [vmem:[%s11089_s14 + $0x258] sm:$0xff] }
0x153a   : > { %v4709_v29 = vld [vmem:[%s11089_s14 + $0x278] sm:$0xff]  ;;  %v8297_v45 = vcombine.high %v4704_v31, %v4708_v13  ;;  %v8296_v38 = vcombine.low %v4704_v31, %v4708_v13 }
0x153b   : > { %v8299_v37 = vcombine.high %v4705_v15, %v4709_v29  ;;  %v8298_v20 = vcombine.low %v4705_v15, %v4709_v29 }
0x153c   : > { %5623 = vmatpush1.bf16.msra.mxu1 %v8264_v42  ;;  %5704 = vmatpush1.bf16.msra.mxu0 %v8266_v6  ;;  %v4712_v42 = vld [vmem:[%s11089_s14 + $0x290] sm:$0xff] }
0x153d   : > { %5624 = vmatprep.subr.bf16.mxu1 %v8273_v22  ;;  %5705 = vmatprep.subr.bf16.mxu0 %v8275_v9  ;;  %v4716_v6 = vld [vmem:[%s11089_s14 + $0x2b0] sm:$0xff]  ;;  %v4713_v22 = vld [vmem:[%s11089_s14 + $0x298] sm:$0xff] }
0x153e   : > { %v4717_v9 = vld [vmem:[%s11089_s14 + $0x2b8] sm:$0xff]  ;;  %v8305_v55 = vcombine.high %v4712_v42, %v4716_v6  ;;  %v8304_v16 = vcombine.low %v4712_v42, %v4716_v6 }
0x153f   : > { %v8307_v30 = vcombine.high %v4713_v22, %v4717_v9  ;;  %v8306_v17 = vcombine.low %v4713_v22, %v4717_v9 }
0x1540   : > { %5625 = vmatpush1.bf16.msra.mxu1 %v8272_v33  ;;  %5706 = vmatpush1.bf16.msra.mxu0 %v8274_v12  ;;  %v4720_v33 = vld [vmem:[%s11089_s14 + $0x2d0] sm:$0xff] }
0x1541   : > { %5626 = vmatprep.subr.bf16.mxu1 %v8281_v7  ;;  %5707 = vmatprep.subr.bf16.mxu0 %v8283_v26  ;;  %v4724_v12 = vld [vmem:[%s11089_s14 + $0x2f0] sm:$0xff]  ;;  %v4721_v7 = vld [vmem:[%s11089_s14 + $0x2d8] sm:$0xff] }
0x1542   : > { %v4725_v26 = vld [vmem:[%s11089_s14 + $0x2f8] sm:$0xff]  ;;  %v8313_v0 = vcombine.high %v4720_v33, %v4724_v12  ;;  %v8312_v31 = vcombine.low %v4720_v33, %v4724_v12 }
0x1543   : > { %v8315_v56 = vcombine.high %v4721_v7, %v4725_v26  ;;  %v8314_v13 = vcombine.low %v4721_v7, %v4725_v26 }
0x1544   : > { %5627 = vmatpush1.bf16.msra.mxu1 %v8280_v2  ;;  %5708 = vmatpush1.bf16.msra.mxu0 %v8282_v18  ;;  %v4728_v2 = vld [vmem:[%s11089_s14 + $0x310] sm:$0xff] }
0x1545   : > { %5628 = vmatprep.subr.bf16.mxu1 %v8289_v61  ;;  %5709 = vmatprep.subr.bf16.mxu0 %v8291_v41  ;;  %v4732_v18 = vld [vmem:[%s11089_s14 + $0x330] sm:$0xff]  ;;  %v4729_v61 = vld [vmem:[%s11089_s14 + $0x318] sm:$0xff] }
0x1546   : > { %v4733_v41 = vld [vmem:[%s11089_s14 + $0x338] sm:$0xff]  ;;  %v8321_v15 = vcombine.high %v4728_v2, %v4732_v18  ;;  %v8320_v42 = vcombine.low %v4728_v2, %v4732_v18 }
0x1547   : > { %v8323_v29 = vcombine.high %v4729_v61, %v4733_v41  ;;  %v8322_v6 = vcombine.low %v4729_v61, %v4733_v41 }
0x1548   : > { %5629 = vmatpush1.bf16.msra.mxu1 %v8288_v43  ;;  %5710 = vmatpush1.bf16.msra.mxu0 %v8290_v39  ;;  %v4736_v43 = vld [vmem:[%s11089_s14 + $0x350] sm:$0xff] }
0x1549   : > { %5630 = vmatprep.subr.bf16.mxu1 %v8297_v45  ;;  %5711 = vmatprep.subr.bf16.mxu0 %v8299_v37  ;;  %v4740_v39 = vld [vmem:[%s11089_s14 + $0x370] sm:$0xff]  ;;  %v4737_v45 = vld [vmem:[%s11089_s14 + $0x358] sm:$0xff] }
0x154a   : > { %v4741_v37 = vld [vmem:[%s11089_s14 + $0x378] sm:$0xff]  ;;  %v8329_v22 = vcombine.high %v4736_v43, %v4740_v39  ;;  %v8328_v33 = vcombine.low %v4736_v43, %v4740_v39 }
0x154b   : > { %v8331_v9 = vcombine.high %v4737_v45, %v4741_v37  ;;  %v8330_v12 = vcombine.low %v4737_v45, %v4741_v37 }
0x154c   : > { %5631 = vmatpush1.bf16.msra.mxu1 %v8296_v38  ;;  %5712 = vmatpush1.bf16.msra.mxu0 %v8298_v20  ;;  %v4744_v38 = vld [vmem:[%s11089_s14 + $0x390] sm:$0xff] }
0x154d   : > { %5632 = vmatprep.subr.bf16.mxu1 %v8305_v55  ;;  %5713 = vmatprep.subr.bf16.mxu0 %v8307_v30  ;;  %v4748_v20 = vld [vmem:[%s11089_s14 + $0x3b0] sm:$0xff]  ;;  %v4745_v55 = vld [vmem:[%s11089_s14 + $0x398] sm:$0xff] }
0x154e   : > { %v4749_v30 = vld [vmem:[%s11089_s14 + $0x3b8] sm:$0xff]  ;;  %v8337_v7 = vcombine.high %v4744_v38, %v4748_v20  ;;  %v8336_v2 = vcombine.low %v4744_v38, %v4748_v20 }
0x154f   : > { %v8339_v26 = vcombine.high %v4745_v55, %v4749_v30  ;;  %v8338_v18 = vcombine.low %v4745_v55, %v4749_v30 }
0x1550   : > { %5633 = vmatpush1.bf16.msra.mxu1 %v8304_v16  ;;  %5714 = vmatpush1.bf16.msra.mxu0 %v8306_v17  ;;  %v4752_v16 = vld [vmem:[%s11089_s14 + $0x3d0] sm:$0xff] }
0x1551   : > { %5634 = vmatprep.subr.bf16.mxu1 %v8313_v0  ;;  %5715 = vmatprep.subr.bf16.mxu0 %v8315_v56  ;;  %v4756_v17 = vld [vmem:[%s11089_s14 + $0x3f0] sm:$0xff]  ;;  %v4753_v0 = vld [vmem:[%s11089_s14 + $0x3d8] sm:$0xff] }
0x1552   : > { %v4757_v56 = vld [vmem:[%s11089_s14 + $0x3f8] sm:$0xff]  ;;  %v8345_v61 = vcombine.high %v4752_v16, %v4756_v17 }
0x1553   : > { %v8347_v41 = vcombine.high %v4753_v0, %v4757_v56 }
0x1554   : > { %5635 = vmatpush1.bf16.msra.mxu1 %v8312_v31  ;;  %5716 = vmatpush1.bf16.msra.mxu0 %v8314_v13  ;;  %v8344_v31 = vcombine.low %v4752_v16, %v4756_v17  ;;  %v8346_v13 = vcombine.low %v4753_v0, %v4757_v56 }
0x1555   : > { %5636 = vmatprep.subr.bf16.mxu1 %v8321_v15  ;;  %5717 = vmatprep.subr.bf16.mxu0 %v8323_v29  ;;  %v9221_v15 = vld [vmem:[%s11093_s9 + $0x4] ss:$8 sps:$4 sm:$0xff]  }
0x1558   : > { %5637 = vmatpush1.bf16.msra.mxu1 %v8320_v42  ;;  %5718 = vmatpush1.bf16.msra.mxu0 %v8322_v6 }
0x1559   : > { %5638 = vmatprep.subr.bf16.mxu1 %v8329_v22  ;;  %5719 = vmatprep.subr.bf16.mxu0 %v8331_v9 }
0x155c   : > { %5639 = vmatpush1.bf16.msra.mxu1 %v8328_v33  ;;  %5720 = vmatpush1.bf16.msra.mxu0 %v8330_v12 }
0x155d   : > { %5640 = vmatprep.subr.bf16.mxu1 %v8337_v7  ;;  %5721 = vmatprep.subr.bf16.mxu0 %v8339_v26 }
0x1560   : > { %5641 = vmatpush1.bf16.msra.mxu1 %v8336_v2  ;;  %5722 = vmatpush1.bf16.msra.mxu0 %v8338_v18 }
0x1561   : > { %5642 = vmatprep.subr.bf16.mxu1 %v8345_v61  ;;  %5723 = vmatprep.subr.bf16.mxu0 %v8347_v41 }
0x1564   : > { %5643 = vmatpush1.bf16.msra.mxu1 %v8344_v31  ;;  %5724 = vmatpush1.bf16.msra.mxu0 %v8346_v13 }
0x1565   : > { %6942 = vmatprep.subr.bf16.mxu1 %v9221_v15 }
0x1596   : > { %v4518_v29 = vpop.xlane.xlu1 %4517 }
0x1597   : > { %v4533_v43 = vmul.f32 0.00390625, %v4518_v29 }
0x1598   : > { %v4521_v39 = vpop.xlane.xlu0 %4520 }
0x1599   : > { %v4534_v45 = vmul.f32 0.00390625, %v4521_v39  ;;  %v4542_v37 = vadd.f32 1e-05, %v4533_v43  ;;  %v9236_v39 = vld [vmem:[%s11093_s9 + $0x54] ss:$8 sps:$4 sm:$0xff]  }
0x159b   : > { %v4543_v42 = vadd.f32 1e-05, %v4534_v45  ;;  %9537 = vrsqrt.f32 %v4542_v37  ;;  %v9237_v45 = vld [vmem:[%s11093_s9 + $0x60] ss:$8 sps:$4 sm:$0xff]   ;;  %v9242_v37 = vld [vmem:[%s11093_s9 + $0x74] ss:$8 sps:$4 sm:$0xff]  }
0x159d   : > { %9539 = vrsqrt.f32 %v4543_v42  ;;  %v9245_v42 = vld [vmem:[%s11093_s9 + $0x84] ss:$8 sps:$4 sm:$0xff]  }
0x15a0   : > { %v4526_v6 = vpop.xlane.xlu1 %4525 }
0x15a1   : > { %v4535_v22 = vmul.f32 0.00390625, %v4526_v6  ;;  %v9243_v6 = vld [vmem:[%s11093_s9 + $0x80] ss:$8 sps:$4 sm:$0xff]  }
0x15a3   : > { %v4544_v9 = vadd.f32 1e-05, %v4535_v22  ;;  %v9248_v22 = vld [vmem:[%s11093_s9 + $0x94] ss:$8 sps:$4 sm:$0xff]  }
0x15a5   : > { %9541 = vrsqrt.f32 %v4544_v9  ;;  %v9538_v38 = vpop.eup %9537  ;;  %v9246_v9 = vld [vmem:[%s11093_s9 + $0x90] ss:$8 sps:$4 sm:$0xff]  }
0x15a6   : > { %v4566_v55 = vmul.f32 %v9538_v38, %v12120_v5  ;;  %v4567_v30 = vmul.f32 %v9538_v38, %v12123_v21  ;;  %v9251_v38 = vld [vmem:[%s11093_s9 + $0xa4] ss:$8 sps:$4 sm:$0xff]  }
0x15a7   : > { %v9540_v20 = vpop.eup %9539 }
0x15a8   : > { %v4568_v33 = vmul.f32 %v9540_v20, %v12126_v54  ;;  %v4569_v12 = vmul.f32 %v9540_v20, %v12129_v11  ;;  %v4596_v7 = vmul.f32 %v12154_v51, %v4567_v30  ;;  %v4595_v26 = vmul.f32 %v12161_v63, %v4566_v55  ;;  %v9249_v20 = vld [vmem:[%s11093_s9 + $0xa0] ss:$8 sps:$4 sm:$0xff]   ;;  %v9254_v55 = vld [vmem:[%s11093_s9 + $0xb4] ss:$8 sps:$4 sm:$0xff]   ;;  %v9252_v30 = vld [vmem:[%s11093_s9 + $0xb0] ss:$8 sps:$4 sm:$0xff]  }
0x15aa   : > { %v4598_v16 = vmul.f32 %v12154_v51, %v4569_v12  ;;  %v4597_v17 = vmul.f32 %v12161_v63, %v4568_v33  ;;  %v4625_v0 = vadd.f32 %v12164_v4, %v4596_v7  ;;  %v4624_v5 = vadd.f32 %v12170_v52, %v4595_v26  ;;  %v9257_v33 = vld [vmem:[%s11093_s9 + $0xc4] ss:$8 sps:$4 sm:$0xff]   ;;  %v9255_v12 = vld [vmem:[%s11093_s9 + $0xc0] ss:$8 sps:$4 sm:$0xff]   ;;  %v9260_v7 = vld [vmem:[%s11093_s9 + $0xd4] ss:$8 sps:$4 sm:$0xff]  }
0x15ab   : > { %v4780_v26 = vsub.s32 2, %v11370_v19 }
0x15ac   : > { %v4627_v56 = vadd.f32 %v12164_v4, %v4598_v16  ;;  %v4626_v21 = vadd.f32 %v12170_v52, %v4597_v17  ;;  %v12352_v16 = vld [vmem:[%s11091_s29] sm:$0xff]  ;;  %v4784_v17 = vsub.s32 3, %v11370_v19 }
0x15ae   : > { %v4765_v2 = vpack.c.bf16 %v4627_v56, %v4625_v0  ;;  %v4764_v54 = vpack.c.bf16 %v4626_v21, %v4624_v5  ;;  %v9258_v0 = vld [vmem:[%s11093_s9 + $0xd0] ss:$8 sps:$4 sm:$0xff]   ;;  %v9263_v56 = vld [vmem:[%s11093_s9 + $0xe4] ss:$8 sps:$4 sm:$0xff]   ;;  %v12359_v5 = vrot.slane %v12352_v16, %v11376_v48  ;;  %v12362_v21 = vrot.slane %v12352_v16, %v4780_v26 }
0x15af   : > { %v9542_v18 = vpop.eup %9541 }
0x15b0   : > { %v4570_v11 = vmul.f32 %v9542_v18, %v12140_v53  ;;  %v4571_v61 = vmul.f32 %v9542_v18, %v12143_v24  ;;  %5512 = vmatprep.mubr.bf16.mxu1 %v4765_v2  ;;  %5593 = vmatprep.mubr.bf16.mxu0 %v4765_v2  ;;  %v9219_v53 = vld [vmem:[%s11093_s9] ss:$8 sps:$4 sm:$0xff]   ;;  %v9224_v24 = vld [vmem:[%s11093_s9 + $0x14] ss:$8 sps:$4 sm:$0xff]  }
0x15b1   : > { %5513 = vmatmul.mubr.bf16.gmra.mrb[52].mxu1 %v4764_v54  ;;  %5594 = vmatmul.mubr.bf16.gmra.mrb[116].mxu0 %v4764_v54  ;;  %v9261_v18 = vld [vmem:[%s11093_s9 + $0xe0] ss:$8 sps:$4 sm:$0xff]  }
0x15b2   : > { %v4600_v41 = vmul.f32 %v12154_v51, %v4571_v61  ;;  %v4599_v31 = vmul.f32 %v12161_v63, %v4570_v11  ;;  %v9222_v51 = vld [vmem:[%s11093_s9 + $0x10] ss:$8 sps:$4 sm:$0xff]   ;;  %v9227_v63 = vld [vmem:[%s11093_s9 + $0x24] ss:$8 sps:$4 sm:$0xff]   ;;  %v9266_v11 = vld [vmem:[%s11093_s9 + $0xf4] ss:$8 sps:$4 sm:$0xff]  }
0x15b4   : > { %v4629_v13 = vadd.f32 %v12164_v4, %v4600_v41  ;;  %v4628_v15 = vadd.f32 %v12170_v52, %v4599_v31  ;;  %v9225_v4 = vld [vmem:[%s11093_s9 + $0x20] ss:$8 sps:$4 sm:$0xff]   ;;  %v9230_v52 = vld [vmem:[%s11093_s9 + $0x34] ss:$8 sps:$4 sm:$0xff]  }
0x15b6   : > { %v4767_v29 = vpack.c.bf16 %v4629_v13, %v4629_v13  ;;  %v4766_v43 = vpack.c.bf16 %v4628_v15, %v4628_v15 }
0x15b8   : > { %5522 = vmatprep.mubr.bf16.mxu1 %v4767_v29  ;;  %5603 = vmatprep.mubr.bf16.mxu0 %v4767_v29 }
0x15b9   : > { %5523 = vmatmul.mubr.bf16.gmra.mrb[56].mxu1 %v4766_v43  ;;  %5604 = vmatmul.mubr.bf16.gmra.mrb[120].mxu0 %v4766_v43 }
0x15ba   : > { %5644 = vmatprep.mubr.bf16.mxu1 %v12189_v57  ;;  %5725 = vmatprep.mubr.bf16.mxu0 %v12189_v57  ;;  %v9228_v57 = vld [vmem:[%s11093_s9 + $0x30] ss:$8 sps:$4 sm:$0xff]  }
0x15c1   : > { %5645 = vmatmul.mubr.bf16.vlgmr.msra.gmra.mrb[60].mxu1 %v12191_v8  ;;  %5726 = vmatmul.mubr.bf16.vlgmr.msra.gmra.mrb[124].mxu0 %v12191_v8  ;;  %v9233_v8 = vld [vmem:[%s11093_s9 + $0x44] ss:$8 sps:$4 sm:$0xff]  }
0x15c2   : > { %5654 = vmatprep.mubr.bf16.mxu1 %v12207_v49  ;;  %5735 = vmatprep.mubr.bf16.mxu0 %v12207_v49  ;;  %v9231_v49 = vld [vmem:[%s11093_s9 + $0x40] ss:$8 sps:$4 sm:$0xff]  }
0x15c3   : > { %6943 = vmatpush1.bf16.msra.mxu1 %v9219_v53 }
0x15c4   : > { %6944 = vmatprep.subr.bf16.mxu1 %v9224_v24 }
0x15c7   : > { %6945 = vmatpush1.bf16.msra.mxu1 %v9222_v51 }
0x15c8   : > { %6946 = vmatprep.subr.bf16.mxu1 %v9227_v63  ;;  %v9264_v63 = vld [vmem:[%s11093_s9 + $0xf0] ss:$8 sps:$4 sm:$0xff]  }
0x15c9   : > { %5655 = vmatmul.mubr.bf16.gmra.mrb[64].mxu1 %v12229_v40  ;;  %5736 = vmatmul.mubr.bf16.gmra.mrb[128].mxu0 %v12229_v40  ;;  %v9234_v40 = vld [vmem:[%s11093_s9 + $0x50] ss:$8 sps:$4 sm:$0xff]  }
0x15ca   : > { %5664 = vmatprep.mubr.bf16.mxu1 %v12232_v59  ;;  %5745 = vmatprep.mubr.bf16.mxu0 %v12232_v59  ;;  %v9239_v59 = vld [vmem:[%s11093_s9 + $0x64] ss:$8 sps:$4 sm:$0xff]  }
0x15cb   : > { %6947 = vmatpush1.bf16.msra.mxu1 %v9225_v4 }
0x15cc   : > { %6948 = vmatprep.subr.bf16.mxu1 %v9230_v52 }
0x15cf   : > { %6949 = vmatpush1.bf16.msra.mxu1 %v9228_v57  ;;  %v9269_v57 = vld [vmem:[%s11093_s9 + $0x104] ss:$8 sps:$4 sm:$0xff]  }
0x15d0   : > { %6950 = vmatprep.subr.bf16.mxu1 %v9233_v8 }
0x15d1   : > { %5665 = vmatmul.mubr.bf16.gmra.mrb[68].mxu1 %v12249_v62  ;;  %5746 = vmatmul.mubr.bf16.gmra.mrb[132].mxu0 %v12249_v62  ;;  %v9240_v62 = vld [vmem:[%s11093_s9 + $0x70] ss:$8 sps:$4 sm:$0xff]  }
0x15d2   : > { %5674 = vmatprep.mubr.bf16.mxu1 %v4765_v2  ;;  %5755 = vmatprep.mubr.bf16.mxu0 %v4765_v2  ;;  %v12366_v2 = vrot.slane %v12352_v16, %v11373_v47 }
0x15d3   : > { %6951 = vmatpush1.bf16.msra.mxu1 %v9231_v49 }
0x15d4   : > { %6952 = vmatprep.subr.bf16.mxu1 %v9236_v39 }
0x15d7   : > { %6953 = vmatpush1.bf16.msra.mxu1 %v9234_v40 }
0x15d8   : > { %6954 = vmatprep.subr.bf16.mxu1 %v9239_v59 }
0x15d9   : > { %5675 = vmatmul.mubr.bf16.gmra.mrb[72].mxu1 %v4764_v54  ;;  %5756 = vmatmul.mubr.bf16.gmra.mrb[136].mxu0 %v4764_v54  ;;  %v12369_v54 = vrot.slane %v12352_v16, %v4784_v17 }
0x15da   : > { %5684 = vmatprep.mubr.bf16.mxu1 %v4767_v29  ;;  %5765 = vmatprep.mubr.bf16.mxu0 %v4767_v29 }
0x15db   : > { %6955 = vmatpush1.bf16.msra.mxu1 %v9237_v45 }
0x15dc   : > { %6956 = vmatprep.subr.bf16.mxu1 %v9242_v37 }
0x15df   : > { %6957 = vmatpush1.bf16.msra.mxu1 %v9240_v62 }
0x15e0   : > { %6958 = vmatprep.subr.bf16.mxu1 %v9245_v42 }
0x15e1   : > { %5685 = vmatmul.mubr.bf16.gmra.mrb[76].mxu1 %v4766_v43  ;;  %5766 = vmatmul.mubr.bf16.gmra.mrb[140].mxu0 %v4766_v43 }
0x15e3   : > { %6959 = vmatpush1.bf16.msra.mxu1 %v9243_v6 }
0x15e4   : > { %6960 = vmatprep.subr.bf16.mxu1 %v9248_v22 }
0x15e7   : > { %6961 = vmatpush1.bf16.msra.mxu1 %v9246_v9 }
0x15e8   : > { %6962 = vmatprep.subr.bf16.mxu1 %v9251_v38 }
0x15eb   : > { %6963 = vmatpush1.bf16.msra.mxu1 %v9249_v20 }
0x15ec   : > { %6964 = vmatprep.subr.bf16.mxu1 %v9254_v55 }
0x15ef   : > { %6965 = vmatpush1.bf16.msra.mxu1 %v9252_v30 }
0x15f0   : > { %6966 = vmatprep.subr.bf16.mxu1 %v9257_v33 }
0x15f3   : > { %6967 = vmatpush1.bf16.msra.mxu1 %v9255_v12 }
0x15f4   : > { %6968 = vmatprep.subr.bf16.mxu1 %v9260_v7 }
0x15f7   : > { %6969 = vmatpush1.bf16.msra.mxu1 %v9258_v0 }
0x15f8   : > { %6970 = vmatprep.subr.bf16.mxu1 %v9263_v56 }
0x15f9   : > { %v5484_v61 = vpop.f32.mrb[40].mxu1  ;;  %v5565_v41 = vpop.f32.mrb[104].mxu0 }
0x15fa   : > { %v5485_v31 = vadd.f32 %v5484_v61, %v12359_v5  ;;  %v5566_v13 = vadd.f32 %v5565_v41, %v12362_v21  ;;  %v5486_v15 = vpop.f32.mrb[41].mxu1  ;;  %v5567_v29 = vpop.f32.mrb[105].mxu0 }
0x15fb   : > { %v5487_v43 = vadd.f32 %v5486_v15, %v12366_v2  ;;  %v5568_v53 = vadd.f32 %v5567_v29, %v12369_v54  ;;  %v5488_v24 = vpop.f32.mrb[42].mxu1  ;;  %v5569_v51 = vpop.f32.mrb[106].mxu0  ;;  %6971 = vmatpush1.bf16.msra.mxu1 %v9261_v18 }
0x15fc   : > { %v5846_v4 = vmul.f32 0.70710677, %v5485_v31  ;;  %v5848_v52 = vmul.f32 0.70710677, %v5566_v13  ;;  %6972 = vmatprep.subr.bf16.mxu1 %v9266_v11  ;;  %v5489_v39 = vadd.f32 %v5488_v24, %v12359_v5  ;;  %v5570_v40 = vadd.f32 %v5569_v51, %v12362_v21  ;;  %v5490_v59 = vpop.f32.mrb[43].mxu1  ;;  %v5571_v45 = vpop.f32.mrb[107].mxu0 }
0x15fd   : > { %v5847_v8 = vmul.f32 0.70710677, %v5487_v43  ;;  %v5849_v49 = vmul.f32 0.70710677, %v5568_v53  ;;  %v5491_v37 = vadd.f32 %v5490_v59, %v12366_v2  ;;  %v5572_v62 = vadd.f32 %v5571_v45, %v12369_v54 }
0x15fe   : > { %9543 = verf.f32 %v5846_v4  ;;  %v5854_v42 = vmul.f32 0.70710677, %v5489_v39  ;;  %v5856_v6 = vmul.f32 0.70710677, %v5570_v40  ;;  %v5774_v11 = vmul.f32 0.5, %v5485_v31 }
0x15ff   : > { %9545 = verf.f32 %v5848_v52  ;;  %6973 = vmatpush1.bf16.msra.mxu1 %v9264_v63  ;;  %v5855_v22 = vmul.f32 0.70710677, %v5491_v37  ;;  %v5857_v38 = vmul.f32 0.70710677, %v5572_v62  ;;  %v5776_v15 = vmul.f32 0.5, %v5566_v13 }
0x1600   : > { %9547 = verf.f32 %v5847_v8  ;;  %7023 = vmatprep.subr.bf16.mxu1 %v9269_v57  ;;  %v12390_v57 = vmul.f32 0.5, %v5487_v43  ;;  %v12392_v8 = vmul.f32 0.5, %v5568_v53  ;;  %v5782_v31 = vmul.f32 0.5, %v5489_v39 }
0x1601   : > { %9549 = verf.f32 %v5849_v49  ;;  %v5494_v9 = vpop.f32.mrb[44].mxu1  ;;  %v5575_v55 = vpop.f32.mrb[108].mxu0 }
0x1602   : > { %9551 = verf.f32 %v5854_v42  ;;  %v5495_v20 = vadd.f32 %v5494_v9, %v12359_v5  ;;  %v5496_v30 = vpop.f32.mrb[45].mxu1  ;;  %v5576_v33 = vadd.f32 %v5575_v55, %v12362_v21  ;;  %v5577_v7 = vpop.f32.mrb[109].mxu0  ;;  %v5783_v55 = vmul.f32 0.5, %v5491_v37 }
0x1603   : > { %9553 = verf.f32 %v5856_v6  ;;  %v5497_v12 = vadd.f32 %v5496_v30, %v12366_v2  ;;  %v5498_v26 = vpop.f32.mrb[46].mxu1  ;;  %v5578_v0 = vadd.f32 %v5577_v7, %v12369_v54  ;;  %v5579_v56 = vpop.f32.mrb[110].mxu0 }
0x1604   : > { %9555 = verf.f32 %v5855_v22  ;;  %v5862_v17 = vmul.f32 0.70710677, %v5495_v20  ;;  %v5500_v18 = vpop.f32.mrb[47].mxu1  ;;  %v5864_v61 = vmul.f32 0.70710677, %v5576_v33  ;;  %v5581_v41 = vpop.f32.mrb[111].mxu0  ;;  %v5499_v51 = vadd.f32 %v5498_v26, %v12359_v5 }
0x1605   : > { %9557 = verf.f32 %v5857_v38  ;;  %v5863_v29 = vmul.f32 0.70710677, %v5497_v12  ;;  %v5865_v24 = vmul.f32 0.70710677, %v5578_v0  ;;  %v5580_v63 = vadd.f32 %v5579_v56, %v12362_v21 }
0x1606   : > { %9559 = verf.f32 %v5862_v17  ;;  %v5501_v4 = vadd.f32 %v5500_v18, %v12366_v2  ;;  %v5870_v13 = vmul.f32 0.70710677, %v5499_v51  ;;  %v5582_v45 = vadd.f32 %v5581_v41, %v12369_v54 }
0x1607   : > { %9561 = verf.f32 %v5864_v61  ;;  %v5784_v38 = vmul.f32 0.5, %v5570_v40  ;;  %v5872_v30 = vmul.f32 0.70710677, %v5580_v63  ;;  %v5785_v26 = vmul.f32 0.5, %v5572_v62 }
0x1608   : > { %v9544_v52 = vpop.eup %9543  ;;  %9563 = verf.f32 %v5863_v29  ;;  %v5790_v53 = vmul.f32 0.5, %v5495_v20  ;;  %v5871_v39 = vmul.f32 0.70710677, %v5501_v4  ;;  %v12395_v61 = vmul.f32 0.5, %v5576_v33 }
0x1609   : > { %v9546_v49 = vpop.eup %9545  ;;  %v5990_v59 = vadd.f32 1.0, %v9544_v52  ;;  %9565 = verf.f32 %v5865_v24  ;;  %v5504_v42 = vpop.f32.mrb[48].mxu1  ;;  %v5791_v29 = vmul.f32 0.5, %v5497_v12  ;;  %v12397_v41 = vmul.f32 0.5, %v5578_v0 }
0x160a   : > { %v5585_v6 = vpop.f32.mrb[112].mxu0  ;;  %v9548_v22 = vpop.eup %9547  ;;  %v5992_v9 = vadd.f32 1.0, %v9546_v49  ;;  %9567 = verf.f32 %v5870_v13  ;;  %v5873_v62 = vmul.f32 0.70710677, %v5582_v45  ;;  %v12406_v12 = vadd.f32 %v5504_v42, %v12359_v5 }
0x160b   : > { %v5506_v7 = vpop.f32.mrb[49].mxu1  ;;  %v9550_v43 = vpop.eup %9549  ;;  %9569 = verf.f32 %v5872_v30  ;;  %v12401_v37 = vmul.f32 %v5990_v59, %v5774_v11  ;;  %v5991_v27 = vadd.f32 1.0, %v9548_v22  ;;  %v12411_v11 = vadd.f32 %v5585_v6, %v12362_v21 }
0x160c   : > { %v5587_v17 = vpop.f32.mrb[113].mxu0  ;;  %v5508_v56 = vpop.f32.mrb[50].mxu1  ;;  %9571 = verf.f32 %v5871_v39  ;;  %v12403_v3 = vmul.f32 %v5992_v9, %v5776_v15  ;;  %v5993_v30 = vadd.f32 1.0, %v9550_v43  ;;  %v12416_v15 = vadd.f32 %v5506_v7, %v12366_v2 }
0x160d   : > { %v9552_v18 = vpop.eup %9551  ;;  %v5589_v24 = vpop.f32.mrb[114].mxu0  ;;  %9573 = verf.f32 %v5873_v62  ;;  %v5798_v9 = vmul.f32 0.5, %v5499_v51  ;;  %v5800_v43 = vmul.f32 0.5, %v5580_v63  ;;  %v5801_v62 = vmul.f32 0.5, %v5582_v45 }
0x160e   : > { %v12399_v52 = vpop.f32.mrb[51].mxu1  ;;  %v9554_v40 = vpop.eup %9553  ;;  %v5998_v49 = vadd.f32 1.0, %v9552_v18  ;;  %v12425_v7 = vmul.f32 %v5993_v30, %v12392_v8  ;;  %v12432_v10 = vadd.f32 %v5587_v17, %v12369_v54  ;;  %v5509_v45 = vadd.f32 %v5508_v56, %v12359_v5 }
0x160f   : > { %v5591_v20 = vpop.f32.mrb[115].mxu0  ;;  %v9556_v13 = vpop.eup %9555  ;;  %v6000_v33 = vadd.f32 1.0, %v9554_v40 }
0x1610   : > { %v9558_v0 = vpop.eup %9557  ;;  %v12408_v32 = vmul.f32 %v5998_v49, %v5782_v31  ;;  %v5999_v18 = vadd.f32 1.0, %v9556_v13  ;;  %v5878_v31 = vmul.f32 0.70710677, %v12406_v12  ;;  %v5881_v17 = vmul.f32 0.70710677, %v12432_v10 }
0x1611   : > { %v9560_v59 = vpop.eup %9559  ;;  %v12413_v39 = vmul.f32 %v6000_v33, %v5784_v38  ;;  %v6001_v14 = vadd.f32 1.0, %v9558_v0  ;;  %v5799_v38 = vmul.f32 0.5, %v5501_v4  ;;  %v6063_v33 = vmul.f32 %v5991_v27, %v12390_v57 }
0x1612   : > { %v9562_v22 = vpop.eup %9561  ;;  %v6262_v42 = vpack.c.bf16 %v12408_v32, %v12401_v37  ;;  %v6006_v49 = vadd.f32 1.0, %v9560_v59  ;;  %v5880_v32 = vmul.f32 0.70710677, %v12411_v11  ;;  %v6071_v51 = vmul.f32 %v5999_v18, %v5783_v55 }
0x1613   : > { %v9564_v40 = vpop.eup %9563  ;;  %v12428_v63 = vmul.f32 %v6001_v14, %v5785_v26  ;;  %v5879_v37 = vmul.f32 0.70710677, %v12416_v15  ;;  %v6008_v4 = vadd.f32 1.0, %v9562_v22  ;;  %9575 = verf.f32 %v5878_v31 }
0x1614   : > { %v9566_v13 = vpop.eup %9565  ;;  %v6007_v0 = vadd.f32 1.0, %v9564_v40  ;;  %v12436_v27 = vadd.f32 %v5589_v24, %v12362_v21  ;;  %v6078_v8 = vmul.f32 %v6006_v49, %v5790_v53  ;;  %9577 = verf.f32 %v5880_v32  ;;  %v9267_v32 = vld [vmem:[%s11093_s9 + $0x100] ss:$8 sps:$4 sm:$0xff]  }
0x1615   : > { %v9568_v59 = vpop.eup %9567  ;;  %v6009_v40 = vadd.f32 1.0, %v9566_v13  ;;  %v5886_v18 = vmul.f32 0.70710677, %v5509_v45  ;;  %9579 = verf.f32 %v5879_v37  ;;  %v5511_v53 = vadd.f32 %v12399_v52, %v12366_v2 }
0x1616   : > { %v9570_v57 = vpop.eup %9569  ;;  %v6079_v30 = vmul.f32 %v6007_v0, %v5791_v29  ;;  %v6014_v55 = vadd.f32 1.0, %v9568_v59  ;;  %v5888_v56 = vmul.f32 0.70710677, %v12436_v27  ;;  %9581 = verf.f32 %v5881_v17  ;;  %v9272_v59 = vld [vmem:[%s11093_s9 + $0x114] ss:$8 sps:$4 sm:$0xff]  }
0x1617   : > { %v9572_v14 = vpop.eup %9571  ;;  %v6016_v26 = vadd.f32 1.0, %v9570_v57  ;;  %v5592_v29 = vadd.f32 %v5591_v20, %v12369_v54  ;;  %9583 = verf.f32 %v5886_v18  ;;  %v6263_v0 = vpack.c.bf16 %v6071_v51, %v6063_v33 }
0x1618   : > { %v6086_v6 = vmul.f32 %v6014_v55, %v5798_v9  ;;  %v6015_v22 = vadd.f32 1.0, %v9572_v14  ;;  %v9574_v24 = vpop.eup %9573  ;;  %v12447_v9 = vmul.f32 %v6008_v4, %v12395_v61  ;;  %v12450_v37 = vmul.f32 %v6009_v40, %v12397_v41  ;;  %v9278_v55 = vld [vmem:[%s11093_s9 + $0x134] ss:$8 sps:$4 sm:$0xff]  }
0x1619   : > { %v12440_v31 = vmul.f32 %v6016_v26, %v5800_v43  ;;  %v6017_v13 = vadd.f32 1.0, %v9574_v24  ;;  %9585 = verf.f32 %v5888_v56  ;;  %v5887_v43 = vmul.f32 0.70710677, %v5511_v53  ;;  %6974 = vmatprep.mubr.bf16.mxu1 %v6263_v0 }
0x161a   : > { %v6087_v49 = vmul.f32 %v6015_v22, %v5799_v38  ;;  %v5889_v52 = vmul.f32 0.70710677, %v5592_v29  ;;  %v6270_v38 = vpack.c.bf16 %v6086_v6, %v6078_v8  ;;  %6975 = vmatmul.mubr.bf16.vlgmr.msra.gmra.mrb[80].mxu1 %v6262_v42  ;;  %v9275_v6 = vld [vmem:[%s11093_s9 + $0x124] ss:$8 sps:$4 sm:$0xff]   ;;  %v9273_v42 = vld [vmem:[%s11093_s9 + $0x120] ss:$8 sps:$4 sm:$0xff]  }
0x161b   : > { %v12453_v57 = vmul.f32 %v6017_v13, %v5801_v62  ;;  %9587 = verf.f32 %v5887_v43  ;;  %7024 = vmatpush1.bf16.msra.mxu1 %v9267_v32  ;;  %v9270_v62 = vld [vmem:[%s11093_s9 + $0x110] ss:$8 sps:$4 sm:$0xff]   ;;  %v5806_v18 = vmul.f32 0.5, %v12406_v12  ;;  %v5814_v22 = vmul.f32 0.5, %v5509_v45  ;;  %v9281_v12 = vld [vmem:[%s11093_s9 + $0x144] ss:$8 sps:$4 sm:$0xff]  }
0x161c   : > { %v6271_v20 = vpack.c.bf16 %v6087_v49, %v6079_v30  ;;  %9589 = verf.f32 %v5889_v52  ;;  %7025 = vmatprep.subr.bf16.mxu1 %v9272_v59  ;;  %v5808_v24 = vmul.f32 0.5, %v12411_v11  ;;  %v5816_v13 = vmul.f32 0.5, %v12436_v27  ;;  %v9276_v32 = vld [vmem:[%s11093_s9 + $0x130] ss:$8 sps:$4 sm:$0xff]  }
0x161d   : > { %v9576_v51 = vpop.eup %9575  ;;  %v5807_v52 = vmul.f32 0.5, %v12416_v15 }
0x161e   : > { %6984 = vmatprep.mubr.bf16.mxu1 %v6271_v20  ;;  %v9578_v4 = vpop.eup %9577  ;;  %v6022_v40 = vadd.f32 1.0, %v9576_v51 }
0x161f   : > { %v9580_v8 = vpop.eup %9579  ;;  %7026 = vmatpush1.bf16.msra.mxu1 %v9270_v62  ;;  %v6024_v26 = vadd.f32 1.0, %v9578_v4  ;;  %v5817_v4 = vmul.f32 0.5, %v5592_v29 }
0x1620   : > { %v9582_v30 = vpop.eup %9581  ;;  %7027 = vmatprep.subr.bf16.mxu1 %v9275_v6  ;;  %v6023_v49 = vadd.f32 1.0, %v9580_v8  ;;  %v6094_v59 = vmul.f32 %v6022_v40, %v5806_v18  ;;  %v5809_v6 = vmul.f32 0.5, %v12432_v10  ;;  %v9279_v40 = vld [vmem:[%s11093_s9 + $0x140] ss:$8 sps:$4 sm:$0xff]   ;;  %v9284_v10 = vld [vmem:[%s11093_s9 + $0x154] ss:$8 sps:$4 sm:$0xff]  }
0x1621   : > { %v9584_v14 = vpop.eup %9583  ;;  %v6025_v20 = vadd.f32 1.0, %v9582_v30  ;;  %v12471_v51 = vmul.f32 %v6024_v26, %v5808_v24  ;;  %v9287_v18 = vld [vmem:[%s11093_s9 + $0x164] ss:$8 sps:$4 sm:$0xff]   ;;  %v9288_v24 = vld [vmem:[%s11093_s9 + $0x170] ss:$8 sps:$4 sm:$0xff]  }
0x1622   : > { %v6030_v56 = vadd.f32 1.0, %v9584_v14  ;;  %6985 = vmatmul.mubr.bf16.gmra.mrb[84].mxu1 %v6270_v38  ;;  %v5815_v38 = vmul.f32 0.5, %v5511_v53  ;;  %v6095_v15 = vmul.f32 %v6023_v49, %v5807_v52  ;;  %v9293_v49 = vld [vmem:[%s11093_s9 + $0x184] ss:$8 sps:$4 sm:$0xff]   ;;  %v9302_v52 = vld [vmem:[%s11093_s9 + $0x1b4] ss:$8 sps:$4 sm:$0xff]  }
0x1623   : > { %v9586_v17 = vpop.eup %9585  ;;  %7028 = vmatpush1.bf16.msra.mxu1 %v9273_v42  ;;  %13509 = vst [vmem:[#allocation72_spill] sm:$0xff] %v12471_v51  ;;  %v12479_v14 = vmul.f32 %v6025_v20, %v5809_v6  ;;  %v9300_v20 = vld [vmem:[%s11093_s9 + $0x1b0] ss:$8 sps:$4 sm:$0xff]   ;;  %v9309_v6 = vld [vmem:[%s11093_s9 + $0x1e0] ss:$8 sps:$4 sm:$0xff]  }
0x1624   : > { %v6032_v0 = vadd.f32 1.0, %v9586_v17  ;;  %v6102_v62 = vmul.f32 %v6030_v56, %v5814_v22  ;;  %7029 = vmatprep.subr.bf16.mxu1 %v9278_v55  ;;  %v9282_v17 = vld [vmem:[%s11093_s9 + $0x150] ss:$8 sps:$4 sm:$0xff]   ;;  %v9285_v22 = vld [vmem:[%s11093_s9 + $0x160] ss:$8 sps:$4 sm:$0xff]  }
0x1625   : > { %v9588_v43 = vpop.eup %9587  ;;  %v9290_v56 = vld [vmem:[%s11093_s9 + $0x174] ss:$8 sps:$4 sm:$0xff]  }
0x1626   : > { %v9590_v45 = vpop.eup %9589  ;;  %v12473_v11 = vmul.f32 %v6032_v0, %v5816_v13  ;;  %v6031_v27 = vadd.f32 1.0, %v9588_v43  ;;  %v6278_v42 = vpack.c.bf16 %v6102_v62, %v6094_v59  ;;  %v9291_v13 = vld [vmem:[%s11093_s9 + $0x180] ss:$8 sps:$4 sm:$0xff]   ;;  %v9296_v0 = vld [vmem:[%s11093_s9 + $0x194] ss:$8 sps:$4 sm:$0xff]  }
0x1627   : > { %v6033_v8 = vadd.f32 1.0, %v9590_v45  ;;  %7030 = vmatpush1.bf16.msra.mxu1 %v9276_v32  ;;  %v9294_v32 = vld [vmem:[%s11093_s9 + $0x190] ss:$8 sps:$4 sm:$0xff]   ;;  %v9299_v43 = vld [vmem:[%s11093_s9 + $0x1a4] ss:$8 sps:$4 sm:$0xff]  }
0x1628   : > { %13510 = vst [vmem:[#allocation73_spill] sm:$0xff] %v12473_v11  ;;  %v6103_v30 = vmul.f32 %v6031_v27, %v5815_v38  ;;  %7031 = vmatprep.subr.bf16.mxu1 %v9281_v12  ;;  %v9297_v59 = vld [vmem:[%s11093_s9 + $0x1a0] ss:$8 sps:$4 sm:$0xff]   ;;  %v9305_v62 = vld [vmem:[%s11093_s9 + $0x1c4] ss:$8 sps:$4 sm:$0xff]  }
0x1629   : > { %v12481_v53 = vmul.f32 %v6033_v8, %v5817_v4  ;;  %v9303_v12 = vld [vmem:[%s11093_s9 + $0x1c0] ss:$8 sps:$4 sm:$0xff]   ;;  %v9308_v45 = vld [vmem:[%s11093_s9 + $0x1d4] ss:$8 sps:$4 sm:$0xff]   ;;  %v9306_v38 = vld [vmem:[%s11093_s9 + $0x1d0] ss:$8 sps:$4 sm:$0xff]  }
0x162a   : > { %v6279_v29 = vpack.c.bf16 %v6103_v30, %v6095_v15  ;;  %v9311_v27 = vld [vmem:[%s11093_s9 + $0x1e4] ss:$8 sps:$4 sm:$0xff]   ;;  %v9314_v4 = vld [vmem:[%s11093_s9 + $0x1f4] ss:$8 sps:$4 sm:$0xff]   ;;  %v9312_v8 = vld [vmem:[%s11093_s9 + $0x1f0] ss:$8 sps:$4 sm:$0xff]  }
0x162b   : > { %7032 = vmatpush1.bf16.msra.mxu1 %v9279_v40 }
0x162c   : > { %6994 = vmatprep.mubr.bf16.mxu1 %v6279_v29  ;;  %7033 = vmatprep.subr.bf16.mxu1 %v9284_v10 }
0x162d   : > { %6995 = vmatmul.mubr.bf16.gmra.mrb[88].mxu1 %v6278_v42  ;;  %v9317_v42 = vld [vmem:[%s11093_s9 + $0x204] ss:$8 sps:$4 sm:$0xff]  }
0x162f   : > { %7034 = vmatpush1.bf16.msra.mxu1 %v9282_v17 }
0x1630   : > { %7035 = vmatprep.subr.bf16.mxu1 %v9287_v18 }
0x1633   : > { %7036 = vmatpush1.bf16.msra.mxu1 %v9285_v22 }
0x1634   : > { %7037 = vmatprep.subr.bf16.mxu1 %v9290_v56 }
0x1637   : > { %7038 = vmatpush1.bf16.msra.mxu1 %v9288_v24 }
0x1638   : > { %7039 = vmatprep.subr.bf16.mxu1 %v9293_v49 }
0x163b   : > { %7040 = vmatpush1.bf16.msra.mxu1 %v9291_v13 }
0x163c   : > { %7041 = vmatprep.subr.bf16.mxu1 %v9296_v0 }
0x163f   : > { %7042 = vmatpush1.bf16.msra.mxu1 %v9294_v32 }
0x1640   : > { %7043 = vmatprep.subr.bf16.mxu1 %v9299_v43 }
0x1643   : > { %7044 = vmatpush1.bf16.msra.mxu1 %v9297_v59 }
0x1644   : > { %7045 = vmatprep.subr.bf16.mxu1 %v9302_v52 }
0x1647   : > { %7046 = vmatpush1.bf16.msra.mxu1 %v9300_v20 }
0x1648   : > { %7047 = vmatprep.subr.bf16.mxu1 %v9305_v62 }
0x164b   : > { %7048 = vmatpush1.bf16.msra.mxu1 %v9303_v12 }
0x164c   : > { %7049 = vmatprep.subr.bf16.mxu1 %v9308_v45 }
0x164f   : > { %7050 = vmatpush1.bf16.msra.mxu1 %v9306_v38 }
0x1650   : > { %7051 = vmatprep.subr.bf16.mxu1 %v9311_v27 }
0x1653   : > { %7052 = vmatpush1.bf16.msra.mxu1 %v9309_v6 }
0x1654   : > { %7053 = vmatprep.subr.bf16.mxu1 %v9314_v4  ;;  %v4788_v4 = vsub.s32 4, %v11370_v19 }
0x1656   : > { %v12530_v55 = vrot.slane %v12352_v16, %v4788_v4 }
0x1657   : > { %7054 = vmatpush1.bf16.msra.mxu1 %v9312_v8  ;;  %v4796_v8 = vsub.s32 6, %v11370_v19 }
0x1658   : > { %7104 = vmatprep.subr.bf16.mxu1 %v9317_v42 }
0x1684   : > { %v5514_v15 = vpop.f32.mrb[52].mxu1  ;;  %v5595_v30 = vpop.f32.mrb[116].mxu0 }
0x1685   : > { %v5515_v40 = vadd.f32 %v5514_v15, %v12359_v5  ;;  %v5516_v10 = vpop.f32.mrb[53].mxu1  ;;  %v5597_v29 = vpop.f32.mrb[117].mxu0  ;;  %v5596_v17 = vadd.f32 %v5595_v30, %v12362_v21 }
0x1686   : > { %v5518_v18 = vpop.f32.mrb[54].mxu1  ;;  %v5599_v22 = vpop.f32.mrb[118].mxu0  ;;  %v5517_v56 = vadd.f32 %v5516_v10, %v12366_v2  ;;  %v12512_v24 = vadd.f32 %v5597_v29, %v12369_v54 }
0x1687   : > { %v5894_v49 = vmul.f32 0.70710677, %v5515_v40  ;;  %v5520_v13 = vpop.f32.mrb[55].mxu1  ;;  %v5601_v0 = vpop.f32.mrb[119].mxu0  ;;  %v5896_v32 = vmul.f32 0.70710677, %v5596_v17  ;;  %v5519_v43 = vadd.f32 %v5518_v18, %v12359_v5  ;;  %v5600_v20 = vadd.f32 %v5599_v22, %v12362_v21 }
0x1688   : > { %v12516_v59 = vadd.f32 %v5520_v13, %v12366_v2  ;;  %v5895_v52 = vmul.f32 0.70710677, %v5517_v56  ;;  %v5897_v62 = vmul.f32 0.70710677, %v12512_v24  ;;  %v12521_v12 = vadd.f32 %v5601_v0, %v12369_v54 }
0x1689   : > { %9591 = verf.f32 %v5894_v49  ;;  %v5902_v42 = vmul.f32 0.70710677, %v5519_v43  ;;  %v5904_v10 = vmul.f32 0.70710677, %v5600_v20  ;;  %v5824_v33 = vmul.f32 0.5, %v5596_v17 }
0x168a   : > { %v5903_v38 = vmul.f32 0.70710677, %v12516_v59  ;;  %9593 = verf.f32 %v5896_v32  ;;  %v5905_v22 = vmul.f32 0.70710677, %v12521_v12  ;;  %v12533_v32 = vrot.slane %v12352_v16, %v4796_v8 }
0x168b   : > { %9595 = verf.f32 %v5895_v52  ;;  %v5823_v61 = vmul.f32 0.5, %v5517_v56  ;;  %v5830_v58 = vmul.f32 0.5, %v5519_v43  ;;  %v5832_v28 = vmul.f32 0.5, %v5600_v20 }
0x168c   : > { %v5524_v45 = vpop.f32.mrb[56].mxu1  ;;  %v5605_v27 = vpop.f32.mrb[120].mxu0  ;;  %9597 = verf.f32 %v5897_v62  ;;  %13511 = vst [vmem:[#allocation74_spill] sm:$0xff] %v12533_v32  ;;  %v4792_v62 = vsub.s32 5, %v11370_v19 }
0x168d   : > { %v5526_v6 = vpop.f32.mrb[57].mxu1  ;;  %v5607_v15 = vpop.f32.mrb[121].mxu0  ;;  %v5525_v49 = vadd.f32 %v5524_v45, %v12359_v5  ;;  %9599 = verf.f32 %v5903_v38 }
0x168e   : > { %v5528_v30 = vpop.f32.mrb[58].mxu1  ;;  %v5609_v29 = vpop.f32.mrb[122].mxu0  ;;  %v5527_v0 = vadd.f32 %v5526_v6, %v12366_v2  ;;  %9601 = verf.f32 %v5902_v42  ;;  %v5608_v52 = vadd.f32 %v5607_v15, %v12369_v54  ;;  %v12545_v54 = vadd.f32 %v5605_v27, %v12362_v21 }
0x168f   : > { %v5529_v18 = vpop.f32.mrb[59].mxu1  ;;  %v5610_v13 = vpop.f32.mrb[123].mxu0  ;;  %9603 = verf.f32 %v5904_v10  ;;  %v4800_v30 = vsub.s32 7, %v11370_v19  ;;  %v5910_v5 = vmul.f32 0.70710677, %v5525_v49  ;;  %v5825_v19 = vmul.f32 0.5, %v12512_v24 }
0x1690   : > { %9605 = verf.f32 %v5905_v22  ;;  %v5911_v29 = vmul.f32 0.70710677, %v5527_v0  ;;  %13512 = vst [vmem:[#allocation75_spill] sm:$0xff] %v12545_v54  ;;  %v5913_v42 = vmul.f32 0.70710677, %v5608_v52  ;;  %v5822_v22 = vmul.f32 0.5, %v5515_v40 }
0x1691   : > { %v12548_v13 = vrot.slane %v12352_v16, %v4792_v62  ;;  %v12551_v26 = vrot.slane %v12352_v16, %v4800_v30  ;;  %9607 = verf.f32 %v5910_v5  ;;  %v5831_v16 = vmul.f32 0.5, %v12516_v59 }
0x1692   : > { %9609 = verf.f32 %v5911_v29  ;;  %v5912_v30 = vmul.f32 0.70710677, %v12545_v54  ;;  %v5833_v5 = vmul.f32 0.5, %v12521_v12  ;;  %v12559_v46 = vmul.f32 0.5, %v5525_v49 }
0x1693   : > { %v9592_v18 = vpop.eup %9591  ;;  %9611 = verf.f32 %v5913_v42  ;;  %v12561_v24 = vmul.f32 0.5, %v5527_v0  ;;  %v12567_v42 = vmul.f32 0.5, %v5608_v52 }
0x1694   : > { %v5646_v45 = vpop.f32.mrb[60].mxu1  ;;  %v5727_v38 = vpop.f32.mrb[124].mxu0  ;;  %v6038_v17 = vadd.f32 1.0, %v9592_v18 }
0x1695   : > { %v12539_v2 = vadd.f32 %v5646_v45, %v12530_v55  ;;  %v12542_v6 = vadd.f32 %v5727_v38, %v12533_v32  ;;  %v5648_v4 = vpop.f32.mrb[61].mxu1  ;;  %v5729_v8 = vpop.f32.mrb[125].mxu0  ;;  %13513 = vst [vmem:[#allocation76_spill] sm:$0xff] %v12567_v42 }
0x1696   : > { %v5650_v15 = vpop.f32.mrb[62].mxu1  ;;  %v5731_v10 = vpop.f32.mrb[126].mxu0  ;;  %v5649_v43 = vadd.f32 %v5648_v4, %v12548_v13  ;;  %v5730_v18 = vadd.f32 %v5729_v8, %v12551_v26  ;;  %v12579_v52 = vmul.f32 %v6038_v17, %v5822_v22 }
0x1697   : > { %v5652_v45 = vpop.f32.mrb[63].mxu1  ;;  %v5733_v41 = vpop.f32.mrb[127].mxu0  ;;  %v5850_v21 = vmul.f32 0.70710677, %v12539_v2  ;;  %v5852_v40 = vmul.f32 0.70710677, %v12542_v6  ;;  %v5651_v20 = vadd.f32 %v5650_v15, %v12530_v55  ;;  %v5732_v12 = vadd.f32 %v5731_v10, %v12533_v32 }
0x1698   : > { %v9594_v38 = vpop.eup %9593  ;;  %v5653_v47 = vadd.f32 %v5652_v45, %v12548_v13 }
0x1699   : > { %v9596_v27 = vpop.eup %9595  ;;  %v6040_v56 = vadd.f32 1.0, %v9594_v38  ;;  %9613 = verf.f32 %v5850_v21  ;;  %v5858_v15 = vmul.f32 0.70710677, %v5651_v20  ;;  %v5860_v35 = vmul.f32 0.70710677, %v5732_v12 }
0x169a   : > { %v9598_v62 = vpop.eup %9597  ;;  %9615 = verf.f32 %v5852_v40  ;;  %v6039_v21 = vadd.f32 1.0, %v9596_v27  ;;  %v5851_v27 = vmul.f32 0.70710677, %v5649_v43 }
0x169b   : > { %v9600_v34 = vpop.eup %9599  ;;  %9617 = verf.f32 %v5912_v30  ;;  %v12581_v40 = vmul.f32 %v6040_v56, %v5824_v33  ;;  %v6041_v8 = vadd.f32 1.0, %v9598_v62  ;;  %v5853_v30 = vmul.f32 0.70710677, %v5730_v18 }
0x169c   : > { %v9602_v60 = vpop.eup %9601  ;;  %v5656_v29 = vpop.f32.mrb[64].mxu1  ;;  %v6047_v4 = vadd.f32 1.0, %v9600_v34  ;;  %9619 = verf.f32 %v5858_v15  ;;  %v6111_v22 = vmul.f32 %v6039_v21, %v5823_v61  ;;  %v5778_v33 = vmul.f32 0.5, %v12539_v2 }
0x169d   : > { %v12565_v59 = vpop.f32.mrb[128].mxu0  ;;  %v9604_v1 = vpop.eup %9603  ;;  %13514 = vst [vmem:[#allocation77_spill] sm:$0xff] %v12581_v40  ;;  %v6046_v23 = vadd.f32 1.0, %v9602_v60  ;;  %9621 = verf.f32 %v5860_v35  ;;  %v5734_v62 = vadd.f32 %v5733_v41, %v12551_v26  ;;  %v12590_v54 = vmul.f32 %v6041_v8, %v5825_v19 }
0x169e   : > { %v12571_v49 = vpop.f32.mrb[65].mxu1  ;;  %v12573_v0 = vpop.f32.mrb[129].mxu0  ;;  %v6048_v36 = vadd.f32 1.0, %v9604_v1  ;;  %v6119_v17 = vmul.f32 %v6047_v4, %v5831_v16  ;;  %v12593_v60 = vmul.f32 0.5, %v12542_v6  ;;  %v12595_v1 = vmul.f32 0.5, %v5649_v43 }
0x169f   : > { %v9606_v38 = vpop.eup %9605  ;;  %v12575_v44 = vpop.f32.mrb[66].mxu1  ;;  %v6118_v15 = vmul.f32 %v6046_v23, %v5830_v58  ;;  %9623 = verf.f32 %v5851_v27  ;;  %v12600_v61 = vmul.f32 0.5, %v5730_v18  ;;  %v5859_v6 = vmul.f32 0.70710677, %v5653_v47 }
0x16a0   : > { %v12577_v50 = vpop.f32.mrb[130].mxu0  ;;  %v12583_v10 = vpop.f32.mrb[67].mxu1  ;;  %v6049_v34 = vadd.f32 1.0, %v9606_v38  ;;  %v5657_v38 = vadd.f32 %v5656_v29, %v12530_v55  ;;  %v12598_v45 = vmul.f32 %v6048_v36, %v5832_v28  ;;  %9625 = verf.f32 %v5853_v30 }
0x16a1   : > { %v12585_v25 = vpop.f32.mrb[131].mxu0  ;;  %v9608_v48 = vpop.eup %9607  ;;  %v5786_v36 = vmul.f32 0.5, %v5651_v20  ;;  %v5861_v28 = vmul.f32 0.70710677, %v5734_v62  ;;  %v6287_v58 = vpack.c.bf16 %v6119_v17, %v6111_v22  ;;  %v12626_v20 = vmul.f32 0.5, %v5653_v47 }
0x16a2   : > { %v9610_v56 = vpop.eup %9609  ;;  %13515 = vst [vmem:[#allocation78_spill] sm:$0xff] %v12598_v45  ;;  %v12604_v41 = vmul.f32 %v6049_v34, %v5833_v5  ;;  %v12606_v19 = vadd.f32 1.0, %v9608_v48  ;;  %v5788_v48 = vmul.f32 0.5, %v5732_v12  ;;  %v5866_v27 = vmul.f32 0.70710677, %v5657_v38 }
0x16a3   : > { %v9612_v35 = vpop.eup %9611  ;;  %v6055_v23 = vadd.f32 1.0, %v9610_v56  ;;  %v5738_v34 = vadd.f32 %v12565_v59, %v12533_v32  ;;  %v12628_v22 = vmul.f32 0.5, %v5734_v62  ;;  %v5659_v17 = vadd.f32 %v12571_v49, %v12548_v13  ;;  %7004 = vmatprep.mubr.bf16.mxu1 %v6287_v58 }
0x16a4   : > { %v5666_v2 = vpop.f32.mrb[68].mxu1  ;;  %v12602_v16 = vpop.f32.mrb[132].mxu0  ;;  %v12616_v5 = vadd.f32 1.0, %v9612_v35  ;;  %v6286_v12 = vpack.c.bf16 %v6118_v15, %v12579_v52  ;;  %9627 = verf.f32 %v5859_v6  ;;  %v5740_v59 = vadd.f32 %v12573_v0, %v12551_v26 }
0x16a5   : > { %v12608_v43 = vpop.f32.mrb[69].mxu1  ;;  %v12610_v21 = vpop.f32.mrb[133].mxu0  ;;  %9629 = verf.f32 %v5861_v28  ;;  %v5661_v47 = vadd.f32 %v12575_v44, %v12530_v55  ;;  %v6127_v62 = vmul.f32 %v6055_v23, %v12561_v24  ;;  %v5868_v52 = vmul.f32 0.70710677, %v5738_v34 }
0x16a6   : > { %v9614_v29 = vpop.eup %9613  ;;  %v12612_v18 = vpop.f32.mrb[70].mxu1  ;;  %13516 = vst [vmem:[#allocation79_spill] sm:$0xff] %v12616_v5  ;;  %v12633_v5 = vmul.f32 0.5, %v5657_v38  ;;  %7005 = vmatmul.mubr.bf16.gmra.mrb[92].mxu1 %v6286_v12  ;;  %9631 = verf.f32 %v5866_v27  ;;  %v5742_v38 = vadd.f32 %v12577_v50, %v12533_v32  ;;  %v5867_v6 = vmul.f32 0.70710677, %v5659_v17 }
0x16a7   : > { %v12614_v4 = vpop.f32.mrb[134].mxu0  ;;  %v9616_v8 = vpop.eup %9615  ;;  %v5994_v35 = vadd.f32 1.0, %v9614_v29  ;;  %v12644_v0 = vadd.f32 %v12583_v10, %v12548_v13  ;;  %v6295_v29 = vpack.c.bf16 %v6127_v62, %v6127_v62  ;;  %v5744_v23 = vadd.f32 %v12585_v25, %v12551_v26 }
0x16a8   : > { %v12620_v30 = vpop.f32.mrb[71].mxu1  ;;  %v12622_v42 = vpop.f32.mrb[135].mxu0  ;;  %v5996_v11 = vadd.f32 1.0, %v9616_v8  ;;  %9633 = verf.f32 %v5868_v52 }
0x16a9   : > { %v12624_v56 = vpop.eup %9617  ;;  %v12650_v8 = vmul.f32 %v5994_v35, %v5778_v33  ;;  %7014 = vmatprep.mubr.bf16.mxu1 %v6295_v29  ;;  %v12666_v33 = vadd.f32 %v5666_v2, %v12530_v55  ;;  %9635 = verf.f32 %v5867_v6  ;;  %v5875_v29 = vmul.f32 0.70710677, %v12644_v0 }
0x16aa   : > { %13517 = vst [vmem:[#allocation80_spill] sm:$0xff] %v12624_v56  ;;  %v9620_v51 = vpop.eup %9619  ;;  %v12661_v10 = vmul.f32 %v5996_v11, %v12593_v60  ;;  %v5876_v56 = vmul.f32 0.70710677, %v5742_v38  ;;  %v12676_v11 = vadd.f32 %v12602_v16, %v12533_v32  ;;  %v5877_v52 = vmul.f32 0.70710677, %v5744_v23 }
0x16ab   : > { %v9622_v49 = vpop.eup %9621  ;;  %v6002_v58 = vadd.f32 1.0, %v9620_v51  ;;  %13518 = vst [vmem:[#allocation81_spill] sm:$0xff] %v12650_v8  ;;  %v5869_v51 = vmul.f32 0.70710677, %v5740_v59  ;;  %v5882_v16 = vmul.f32 0.70710677, %v12666_v33  ;;  %v12697_v6 = vadd.f32 %v12610_v21, %v12551_v26 }
0x16ac   : > { %v6004_v15 = vadd.f32 1.0, %v9622_v49  ;;  %v12646_v28 = vpop.f32.mrb[72].mxu1  ;;  %v12648_v44 = vpop.f32.mrb[136].mxu0  ;;  %13520 = vst [vmem:[#allocation83_spill] sm:$0xff] %v12661_v10  ;;  %v5874_v49 = vmul.f32 0.70710677, %v5661_v47 }
0x16ad   : > { %v12652_v24 = vmul.f32 %v6002_v58, %v5786_v36  ;;  %v12656_v50 = vpop.f32.mrb[73].mxu1  ;;  %v12658_v27 = vpop.f32.mrb[137].mxu0  ;;  %v12687_v58 = vmul.f32 0.5, %v5659_v17  ;;  %9637 = verf.f32 %v5869_v51  ;;  %v12701_v17 = vadd.f32 %v12612_v18, %v12530_v55 }
0x16ae   : > { %v9624_v12 = vpop.eup %9623  ;;  %v12663_v62 = vmul.f32 %v6004_v15, %v5788_v48  ;;  %v12668_v36 = vpop.f32.mrb[74].mxu1  ;;  %v12684_v15 = vmul.f32 0.5, %v5738_v34  ;;  %9639 = verf.f32 %v5874_v49  ;;  %v5884_v34 = vmul.f32 0.70710677, %v12676_v11 }
0x16af   : > { %13519 = vst [vmem:[#allocation82_spill] sm:$0xff] %v12652_v24  ;;  %v12670_v35 = vpop.f32.mrb[138].mxu0  ;;  %v9626_v25 = vpop.eup %9625  ;;  %v5995_v45 = vadd.f32 1.0, %v9624_v12  ;;  %v12692_v24 = vadd.f32 %v12608_v43, %v12548_v13  ;;  %9641 = verf.f32 %v5876_v56  ;;  %v12703_v12 = vmul.f32 0.5, %v5740_v59 }
0x16b0   : > { %13521 = vst [vmem:[#allocation84_spill] sm:$0xff] %v12663_v62  ;;  %v12678_v60 = vpop.f32.mrb[75].mxu1  ;;  %v12680_v48 = vpop.f32.mrb[139].mxu0  ;;  %v5997_v8 = vadd.f32 1.0, %v9626_v25  ;;  %9643 = verf.f32 %v5875_v29  ;;  %v12708_v43 = vadd.f32 %v12614_v4, %v12533_v32  ;;  %v12717_v18 = vmul.f32 0.5, %v5661_v47 }
0x16b1   : > { %v9628_v40 = vpop.eup %9627  ;;  %v5883_v49 = vmul.f32 0.70710677, %v12692_v24  ;;  %v12715_v2 = vmul.f32 %v5995_v45, %v12595_v1  ;;  %9645 = verf.f32 %v5877_v52  ;;  %v5885_v59 = vmul.f32 0.70710677, %v12697_v6 }
0x16b2   : > { %v9630_v51 = vpop.eup %9629  ;;  %v12723_v10 = vmul.f32 %v5997_v8, %v12600_v61  ;;  %v12725_v4 = vmul.f32 0.5, %v5742_v38  ;;  %9647 = verf.f32 %v5882_v16  ;;  %v5890_v62 = vmul.f32 0.70710677, %v12701_v17 }
0x16b3   : > { %v9632_v21 = vpop.eup %9631  ;;  %v6003_v1 = vadd.f32 1.0, %v9628_v40  ;;  %9649 = verf.f32 %v5884_v34  ;;  %v5892_v45 = vmul.f32 0.70710677, %v12708_v43  ;;  %v6126_v47 = vmul.f32 %v12606_v19, %v12559_v46 }
0x16b4   : > { %v12710_v56 = vpop.f32.mrb[76].mxu1  ;;  %v12712_v25 = vpop.f32.mrb[140].mxu0  ;;  %v12734_v61 = vmul.f32 0.5, %v12644_v0  ;;  %v12736_v38 = vmul.f32 0.5, %v5744_v23  ;;  %9651 = verf.f32 %v5883_v49  ;;  %v12740_v8 = vadd.f32 %v12620_v30, %v12548_v13 }
0x16b5   : > { %13522 = vst [vmem:[#allocation85_spill] sm:$0xff] %v12710_v56  ;;  %13523 = vst [vmem:[#allocation86_spill] sm:$0xff] %v12712_v25  ;;  %v12720_v29 = vpop.f32.mrb[77].mxu1  ;;  %v12728_v25 = vpop.f32.mrb[141].mxu0  ;;  %v6005_v34 = vadd.f32 1.0, %v9630_v51  ;;  %9653 = verf.f32 %v5885_v59  ;;  %v12744_v46 = vadd.f32 %v12622_v42, %v12551_v26  ;;  %v12749_v23 = vadd.f32 %v12646_v28, %v12530_v55 }
0x16b6   : > { %13524 = vst [vmem:[#allocation87_spill] sm:$0xff] %v12720_v29  ;;  %v5690_v56 = vpop.f32.mrb[78].mxu1  ;;  %v5771_v52 = vpop.f32.mrb[142].mxu0  ;;  %9655 = verf.f32 %v5890_v62  ;;  %v5891_v0 = vmul.f32 0.70710677, %v12740_v8  ;;  %v12752_v49 = vmul.f32 %v6003_v1, %v12626_v20  ;;  %v12757_v42 = vadd.f32 %v12648_v44, %v12533_v32 }
0x16b7   : > { %v5691_v29 = vpop.f32.mrb[79].mxu1  ;;  %v5772_v16 = vpop.f32.mrb[143].mxu0  ;;  %v6294_v56 = vpack.c.bf16 %v6126_v47, %v6126_v47  ;;  %9657 = verf.f32 %v5892_v45  ;;  %v5893_v51 = vmul.f32 0.70710677, %v12744_v46  ;;  %v13525_v59 = vpack.c.bf16 %v12428_v63, %v12425_v7 }
0x16b8   : > { %v9634_v40 = vpop.eup %9633  ;;  %v6010_v29 = vadd.f32 1.0, %v9632_v21  ;;  %9659 = verf.f32 %v5891_v0  ;;  %v5898_v28 = vmul.f32 0.70710677, %v12749_v23  ;;  %v12765_v20 = vadd.f32 %v12656_v50, %v12548_v13 }
0x16b9   : > { %v9636_v19 = vpop.eup %9635  ;;  %7015 = vmatmul.mubr.bf16.gmra.mrb[96].mxu1 %v6294_v56  ;;  %v6012_v62 = vadd.f32 1.0, %v9634_v40  ;;  %v12768_v47 = vmul.f32 0.5, %v12666_v33  ;;  %9661 = verf.f32 %v5893_v51  ;;  %v5900_v44 = vmul.f32 0.70710677, %v12757_v42 }
0x16ba   : > { %v9638_v30 = vpop.eup %9637  ;;  %7055 = vmatprep.mubr.bf16.mxu1 %v13525_v59  ;;  %v6011_v45 = vadd.f32 1.0, %v9636_v19  ;;  %v12772_v16 = vmul.f32 %v6005_v34, %v12628_v22  ;;  %v12775_v7 = vmul.f32 %v6010_v29, %v12633_v5  ;;  %9663 = verf.f32 %v5898_v28  ;;  %v9315_v19 = vld [vmem:[%s11093_s9 + $0x200] ss:$8 sps:$4 sm:$0xff]  }
0x16bb   : > { %v9640_v21 = vpop.eup %9639  ;;  %v5899_v63 = vmul.f32 0.70710677, %v12765_v20  ;;  %v6013_v40 = vadd.f32 1.0, %v9638_v30  ;;  %9665 = verf.f32 %v5900_v44  ;;  %v12780_v33 = vadd.f32 %v12658_v27, %v12551_v26 }
0x16bc   : > { %v9642_v1 = vpop.eup %9641  ;;  %v12784_v56 = vadd.f32 %v12668_v36, %v12530_v55  ;;  %v12787_v34 = vmul.f32 %v6012_v62, %v12684_v15  ;;  %v12790_v5 = vmul.f32 0.5, %v12676_v11  ;;  %v12795_v29 = vadd.f32 %v12670_v35, %v12533_v32  ;;  %v9320_v62 = vld [vmem:[%s11093_s9 + $0x214] ss:$8 sps:$4 sm:$0xff]  }
0x16bd   : > { %v9644_v52 = vpop.eup %9643  ;;  %v12799_v27 = vadd.f32 %v12678_v60, %v12548_v13  ;;  %v12802_v36 = vmul.f32 %v6011_v45, %v12687_v58  ;;  %v6018_v30 = vadd.f32 1.0, %v9640_v21  ;;  %v6020_v51 = vadd.f32 1.0, %v9642_v1 }
0x16be   : > { %v9646_v50 = vpop.eup %9645  ;;  %v5901_v15 = vmul.f32 0.70710677, %v12780_v33  ;;  %v6019_v59 = vadd.f32 1.0, %v9644_v52  ;;  %9667 = verf.f32 %v5899_v63  ;;  %v5906_v35 = vmul.f32 0.70710677, %v12784_v56 }
0x16bf   : > { %v9648_v22 = vpop.eup %9647  ;;  %v5908_v28 = vmul.f32 0.70710677, %v12795_v29  ;;  %v12809_v60 = vmul.f32 %v6013_v40, %v12703_v12  ;;  %v6021_v32 = vadd.f32 1.0, %v9646_v50  ;;  %v5811_v58 = vmul.f32 0.5, %v12692_v24  ;;  %v9318_v24 = vld [vmem:[%s11093_s9 + $0x210] ss:$8 sps:$4 sm:$0xff]  }
0x16c0   : > { %v9650_v0 = vpop.eup %9649  ;;  %9669 = verf.f32 %v5901_v15  ;;  %v13526_v21 = vpack.c.bf16 %v12413_v39, %v12403_v3  ;;  %v5813_v45 = vmul.f32 0.5, %v12697_v6  ;;  %v5818_v52 = vmul.f32 0.5, %v12701_v17  ;;  %v9323_v6 = vld [vmem:[%s11093_s9 + $0x224] ss:$8 sps:$4 sm:$0xff]  }
0x16c1   : > { %v9652_v11 = vpop.eup %9651  ;;  %9671 = verf.f32 %v5906_v35  ;;  %v5907_v63 = vmul.f32 0.70710677, %v12799_v27  ;;  %v13527_v12 = vpack.c.bf16 %v12453_v57, %v12450_v37  ;;  %v12823_v40 = vmul.f32 %v6018_v30, %v12717_v18 }
0x16c2   : > { %v9654_v44 = vpop.eup %9653  ;;  %7056 = vmatmul.mubr.bf16.vlgmr.msra.gmra.mrb[80].mxu1 %v13526_v21  ;;  %v5820_v3 = vmul.f32 0.5, %v12708_v43  ;;  %9673 = verf.f32 %v5908_v28  ;;  %v12828_v39 = vadd.f32 %v12680_v48, %v12551_v26  ;;  %v12835_v37 = vmul.f32 %v6019_v59, %v12734_v61 }
0x16c3   : > { %v9656_v1 = vpop.eup %9655  ;;  %7105 = vmatpush1.bf16.msra.mxu1 %v9315_v19  ;;  %7065 = vmatprep.mubr.bf16.mxu1 %v13527_v12  ;;  %v12832_v19 = vmul.f32 %v6020_v51, %v12725_v4  ;;  %v6026_v57 = vadd.f32 1.0, %v9648_v22  ;;  %9675 = verf.f32 %v5907_v63  ;;  %v12838_v43 = vmul.f32 %v6021_v32, %v12736_v38  ;;  %v9321_v22 = vld [vmem:[%s11093_s9 + $0x220] ss:$8 sps:$4 sm:$0xff]  }
0x16c4   : > { %v9658_v50 = vpop.eup %9657  ;;  %7106 = vmatprep.subr.bf16.mxu1 %v9320_v62  ;;  %v6028_v30 = vadd.f32 1.0, %v9650_v0  ;;  %v5819_v48 = vmul.f32 0.5, %v12740_v8  ;;  %v5909_v15 = vmul.f32 0.70710677, %v12828_v39  ;;  %v5821_v4 = vmul.f32 0.5, %v12744_v46 }
0x16c5   : > { %v9660_v17 = vpop.eup %9659  ;;  %v5826_v51 = vmul.f32 0.5, %v12749_v23  ;;  %v5828_v61 = vmul.f32 0.5, %v12757_v42  ;;  %v6027_v28 = vadd.f32 1.0, %v9652_v11  ;;  %v6029_v32 = vadd.f32 1.0, %v9654_v44  ;;  %v9326_v8 = vld [vmem:[%s11093_s9 + $0x234] ss:$8 sps:$4 sm:$0xff]  }
0x16c6   : > { %v9662_v18 = vpop.eup %9661  ;;  %v6035_v35 = vadd.f32 1.0, %v9660_v17  ;;  %v6034_v38 = vadd.f32 1.0, %v9656_v1  ;;  %9677 = verf.f32 %v5909_v15  ;;  %v12848_v0 = vmul.f32 %v6026_v57, %v12768_v47 }
0x16c7   : > { %v9664_v62 = vpop.eup %9663  ;;  %7107 = vmatpush1.bf16.msra.mxu1 %v9318_v24  ;;  %v6036_v21 = vadd.f32 1.0, %v9658_v50  ;;  %v6037_v63 = vadd.f32 1.0, %v9662_v18  ;;  %v5827_v46 = vmul.f32 0.5, %v12765_v20  ;;  %v12852_v23 = vmul.f32 %v6028_v30, %v12790_v5  ;;  %v9324_v5 = vld [vmem:[%s11093_s9 + $0x230] ss:$8 sps:$4 sm:$0xff]   ;;  %v13530_v50 = vld [vmem:[#allocation77_spill] sm:$0xff] }
0x16c8   : > { %v9666_v59 = vpop.eup %9665  ;;  %7108 = vmatprep.subr.bf16.mxu1 %v9323_v6  ;;  %v6042_v42 = vadd.f32 1.0, %v9664_v62  ;;  %v5834_v12 = vmul.f32 0.5, %v12784_v56  ;;  %v5836_v11 = vmul.f32 0.5, %v12795_v29  ;;  %v13528_v44 = vpack.c.bf16 %v12440_v31, %v12447_v9  ;;  %v13531_v29 = vld [vmem:[#allocation78_spill] sm:$0xff]  ;;  %v9329_v30 = vld [vmem:[%s11093_s9 + $0x244] ss:$8 sps:$4 sm:$0xff]  }
0x16c9   : > { %v9668_v1 = vpop.eup %9667  ;;  %v12859_v47 = vmul.f32 %v6035_v35, %v5819_v48  ;;  %v6044_v24 = vadd.f32 1.0, %v9666_v59  ;;  %v13529_v20 = vpack.c.bf16 %v12481_v53, %v12479_v14  ;;  %v6289_v56 = vpack.c.bf16 %v12604_v41, %v12590_v54 }
0x16ca   : > { %7066 = vmatmul.mubr.bf16.gmra.mrb[84].mxu1 %v13528_v44  ;;  %v6288_v6 = vpack.c.bf16 %v13531_v29, %v13530_v50  ;;  %v9670_v17 = vpop.eup %9669  ;;  %v12869_v31 = vmul.f32 %v6027_v28, %v5811_v58  ;;  %v12871_v9 = vmul.f32 %v6029_v32, %v5813_v45  ;;  %v12873_v57 = vmul.f32 %v6034_v38, %v5818_v52 }
0x16cb   : > { %7109 = vmatpush1.bf16.msra.mxu1 %v9321_v22  ;;  %7075 = vmatprep.mubr.bf16.mxu1 %v13529_v20  ;;  %v5835_v18 = vmul.f32 0.5, %v12799_v27  ;;  %v9672_v14 = vpop.eup %9671  ;;  %v12877_v53 = vmul.f32 %v6036_v21, %v5820_v3  ;;  %v12879_v48 = vmul.f32 %v6037_v63, %v5821_v4  ;;  %v6267_v54 = vpack.c.bf16 %v12752_v49, %v12715_v2  ;;  %v9327_v22 = vld [vmem:[%s11093_s9 + $0x240] ss:$8 sps:$4 sm:$0xff]   ;;  %v9356_v49 = vld [vmem:[%s11093_s9 + $0x2d4] ss:$8 sps:$4 sm:$0xff]  }
0x16cc   : > { %7110 = vmatprep.subr.bf16.mxu1 %v9326_v8  ;;  %v6275_v41 = vpack.c.bf16 %v12835_v37, %v12802_v36  ;;  %v9674_v58 = vpop.eup %9673  ;;  %v12885_v45 = vmul.f32 %v6042_v42, %v5826_v51  ;;  %v6043_v52 = vadd.f32 1.0, %v9668_v1  ;;  %v6050_v27 = vadd.f32 1.0, %v9672_v14  ;;  %v9332_v51 = vld [vmem:[%s11093_s9 + $0x254] ss:$8 sps:$4 sm:$0xff]   ;;  %v13533_v20 = vld [vmem:[#allocation72_spill] sm:$0xff] }
0x16cd   : > { %v6274_v15 = vpack.c.bf16 %v12823_v40, %v12775_v7  ;;  %v9676_v62 = vpop.eup %9675  ;;  %v12889_v3 = vmul.f32 %v6044_v24, %v5828_v61  ;;  %v6045_v35 = vadd.f32 1.0, %v9670_v17  ;;  %v6052_v4 = vadd.f32 1.0, %v9674_v58  ;;  %v13532_v24 = vld [vmem:[#allocation73_spill] sm:$0xff] }
0x16ce   : > { %v6283_v59 = vpack.c.bf16 %v12859_v47, %v12869_v31  ;;  %v12894_v28 = vmul.f32 %v6050_v27, %v5834_v12  ;;  %v6051_v32 = vadd.f32 1.0, %v9676_v62  ;;  %v6282_v38 = vpack.c.bf16 %v12873_v57, %v12848_v0  ;;  %v9335_v14 = vld [vmem:[%s11093_s9 + $0x264] ss:$8 sps:$4 sm:$0xff]   ;;  %v13536_v27 = vld [vmem:[#allocation79_spill] sm:$0xff]  ;;  %v9351_v2 = vld [vmem:[%s11093_s9 + $0x2c0] ss:$8 sps:$4 sm:$0xff]  }
0x16cf   : > { %7111 = vmatpush1.bf16.msra.mxu1 %v9324_v5  ;;  %v6269_v8 = vpack.c.bf16 %v12772_v16, %v12723_v10  ;;  %v12901_v61 = vmul.f32 %v6052_v4, %v5836_v11  ;;  %v6277_v21 = vpack.c.bf16 %v12838_v43, %v12809_v60  ;;  %v6276_v63 = vpack.c.bf16 %v12832_v19, %v12787_v34  ;;  %v9377_v36 = vld [vmem:[%s11093_s9 + $0x344] ss:$8 sps:$4 sm:$0xff]   ;;  %v9378_v47 = vld [vmem:[%s11093_s9 + $0x350] ss:$8 sps:$4 sm:$0xff]   ;;  %v9386_v0 = vld [vmem:[%s11093_s9 + $0x374] ss:$8 sps:$4 sm:$0xff]  }
0x16d0   : > { %7112 = vmatprep.subr.bf16.mxu1 %v9329_v30  ;;  %v6285_v42 = vpack.c.bf16 %v12879_v48, %v12871_v9  ;;  %v9678_v12 = vpop.eup %9677  ;;  %v12909_v44 = vmul.f32 %v6043_v52, %v5827_v46  ;;  %v12911_v1 = vmul.f32 %v6051_v32, %v5835_v18  ;;  %v13534_v5 = vpack.c.bf16 %v13532_v24, %v13533_v20  ;;  %v9330_v46 = vld [vmem:[%s11093_s9 + $0x250] ss:$8 sps:$4 sm:$0xff]   ;;  %v9383_v31 = vld [vmem:[%s11093_s9 + $0x364] ss:$8 sps:$4 sm:$0xff]   ;;  %v9399_v10 = vld [vmem:[%s11093_s9 + $0x3c0] ss:$8 sps:$4 sm:$0xff]  }
0x16d1   : > { %v6290_v11 = vpack.c.bf16 %v12894_v28, %v12885_v45  ;;  %v6284_v50 = vpack.c.bf16 %v12877_v53, %v12852_v23  ;;  %v5829_v29 = vmul.f32 0.5, %v12780_v33  ;;  %v5837_v17 = vmul.f32 0.5, %v12828_v39  ;;  %v13535_v39 = vld [vmem:[#allocation76_spill] sm:$0xff]  ;;  %v9336_v20 = vld [vmem:[%s11093_s9 + $0x270] ss:$8 sps:$4 sm:$0xff]  }
0x16d2   : > { %7076 = vmatmul.mubr.bf16.gmra.mrb[88].mxu1 %v13534_v5  ;;  %v6053_v30 = vadd.f32 1.0, %v9678_v12  ;;  %v6292_v18 = vpack.c.bf16 %v12901_v61, %v12889_v3  ;;  %v6291_v58 = vpack.c.bf16 %v12911_v1, %v12909_v44  ;;  %v6129_v62 = vmul.f32 %v13536_v27, %v13535_v39  ;;  %v9341_v5 = vld [vmem:[%s11093_s9 + $0x284] ss:$8 sps:$4 sm:$0xff]   ;;  %v9345_v39 = vld [vmem:[%s11093_s9 + $0x2a0] ss:$8 sps:$4 sm:$0xff]  }
0x16d3   : > { %7113 = vmatpush1.bf16.msra.mxu1 %v9327_v22  ;;  %7085 = vmatprep.mubr.bf16.mxu1 %v6289_v56  ;;  %v12928_v52 = vmul.f32 %v6045_v35, %v5829_v29  ;;  %v9333_v56 = vld [vmem:[%s11093_s9 + $0x260] ss:$8 sps:$4 sm:$0xff]   ;;  %v13538_v35 = vld [vmem:[#allocation75_spill] sm:$0xff]  ;;  %v9395_v28 = vld [vmem:[%s11093_s9 + $0x3a4] ss:$8 sps:$4 sm:$0xff]  }
0x16d4   : > { %7114 = vmatprep.subr.bf16.mxu1 %v9332_v51  ;;  %v12930_v33 = vmul.f32 %v6053_v30, %v5837_v17  ;;  %v13537_v22 = vld [vmem:[#allocation80_spill] sm:$0xff]  ;;  %v9338_v51 = vld [vmem:[%s11093_s9 + $0x274] ss:$8 sps:$4 sm:$0xff]   ;;  %v6297_v12 = vpack.c.bf16 %v6129_v62, %v6129_v62  ;;  %v5840_v24 = vmul.f32 0.5, %v13538_v35  ;;  %v9348_v62 = vld [vmem:[%s11093_s9 + $0x2b0] ss:$8 sps:$4 sm:$0xff]  }
0x16d5   : > { %v6056_v32 = vadd.f32 1.0, %v13537_v22  ;;  %v9339_v17 = vld [vmem:[%s11093_s9 + $0x280] ss:$8 sps:$4 sm:$0xff]   ;;  %v9350_v27 = vld [vmem:[%s11093_s9 + $0x2b4] ss:$8 sps:$4 sm:$0xff]  }
0x16d6   : > { %v6293_v4 = vpack.c.bf16 %v12930_v33, %v12928_v52  ;;  %v9359_v22 = vld [vmem:[%s11093_s9 + $0x2e4] ss:$8 sps:$4 sm:$0xff]   ;;  %v13539_v35 = vld [vmem:[#allocation87_spill] sm:$0xff] }
0x16d7   : > { %7115 = vmatpush1.bf16.msra.mxu1 %v9330_v46  ;;  %v6128_v29 = vmul.f32 %v6056_v32, %v5840_v24  ;;  %v9344_v46 = vld [vmem:[%s11093_s9 + $0x294] ss:$8 sps:$4 sm:$0xff]   ;;  %v9357_v32 = vld [vmem:[%s11093_s9 + $0x2e0] ss:$8 sps:$4 sm:$0xff]   ;;  %v5689_v24 = vadd.f32 %v13539_v35, %v12548_v13  ;;  %v9366_v13 = vld [vmem:[%s11093_s9 + $0x310] ss:$8 sps:$4 sm:$0xff]  }
0x16d8   : > { %7116 = vmatprep.subr.bf16.mxu1 %v9335_v14  ;;  %v9347_v14 = vld [vmem:[%s11093_s9 + $0x2a4] ss:$8 sps:$4 sm:$0xff]   ;;  %v9384_v44 = vld [vmem:[%s11093_s9 + $0x370] ss:$8 sps:$4 sm:$0xff]   ;;  %v9398_v35 = vld [vmem:[%s11093_s9 + $0x3b4] ss:$8 sps:$4 sm:$0xff]  }
0x16d9   : > { %v6296_v30 = vpack.c.bf16 %v6128_v29, %v6128_v29  ;;  %v5915_v29 = vmul.f32 0.70710677, %v5689_v24  ;;  %v5843_v40 = vmul.f32 0.5, %v5689_v24  ;;  %v9390_v45 = vld [vmem:[%s11093_s9 + $0x390] ss:$8 sps:$4 sm:$0xff]  }
0x16da   : > { %7086 = vmatmul.mubr.bf16.gmra.mrb[92].mxu1 %v6288_v6  ;;  %v9342_v6 = vld [vmem:[%s11093_s9 + $0x290] ss:$8 sps:$4 sm:$0xff]   ;;  %v9404_v16 = vld [vmem:[%s11093_s9 + $0x3d4] ss:$8 sps:$4 sm:$0xff]  }
0x16db   : > { %7117 = vmatpush1.bf16.msra.mxu1 %v9333_v56  ;;  %7095 = vmatprep.mubr.bf16.mxu1 %v6297_v12  ;;  %v9353_v56 = vld [vmem:[%s11093_s9 + $0x2c4] ss:$8 sps:$4 sm:$0xff]   ;;  %v9360_v12 = vld [vmem:[%s11093_s9 + $0x2f0] ss:$8 sps:$4 sm:$0xff]   ;;  %9679 = verf.f32 %v5915_v29  ;;  %v9405_v29 = vld [vmem:[%s11093_s9 + $0x3e0] ss:$8 sps:$4 sm:$0xff]  }
0x16dc   : > { %7118 = vmatprep.subr.bf16.mxu1 %v9338_v51  ;;  %v9362_v51 = vld [vmem:[%s11093_s9 + $0x2f4] ss:$8 sps:$4 sm:$0xff]   ;;  %v9396_v24 = vld [vmem:[%s11093_s9 + $0x3b0] ss:$8 sps:$4 sm:$0xff]  }
0x16df   : > { %7119 = vmatpush1.bf16.msra.mxu1 %v9336_v20  ;;  %v9365_v20 = vld [vmem:[%s11093_s9 + $0x304] ss:$8 sps:$4 sm:$0xff]  }
0x16e0   : > { %7120 = vmatprep.subr.bf16.mxu1 %v9341_v5  ;;  %v9363_v5 = vld [vmem:[%s11093_s9 + $0x300] ss:$8 sps:$4 sm:$0xff]  }
0x16e2   : > { %7096 = vmatmul.mubr.bf16.gmra.mrb[100].mxu1 %v6296_v30  ;;  %v13540_v30 = vld [vmem:[#allocation82_spill] sm:$0xff] }
0x16e3   : > { %7121 = vmatpush1.bf16.msra.mxu1 %v9339_v17  ;;  %7136 = vmatprep.mubr.bf16.mxu1 %v6267_v54  ;;  %v9354_v54 = vld [vmem:[%s11093_s9 + $0x2d0] ss:$8 sps:$4 sm:$0xff]   ;;  %v9368_v17 = vld [vmem:[%s11093_s9 + $0x314] ss:$8 sps:$4 sm:$0xff]  }
0x16e4   : > { %7122 = vmatprep.subr.bf16.mxu1 %v9344_v46  ;;  %v13541_v46 = vld [vmem:[#allocation81_spill] sm:$0xff] }
0x16e5   : > { %v9680_v37 = vpop.eup %9679 }
0x16e6   : > { %v6059_v7 = vadd.f32 1.0, %v9680_v37 }
0x16e7   : > { %7123 = vmatpush1.bf16.msra.mxu1 %v9342_v6  ;;  %v13542_v6 = vpack.c.bf16 %v13540_v30, %v13541_v46  ;;  %v9408_v30 = vld [vmem:[%s11093_s9 + $0x3f0] ss:$8 sps:$4 sm:$0xff]   ;;  %v5770_v46 = vadd.f32 %v12728_v25, %v12551_v26 }
0x16e8   : > { %7124 = vmatprep.subr.bf16.mxu1 %v9347_v14  ;;  %v13543_v14 = vld [vmem:[#allocation85_spill] sm:$0xff] }
0x16eb   : > { %7125 = vmatpush1.bf16.msra.mxu1 %v9345_v39  ;;  %v5687_v39 = vadd.f32 %v13543_v14, %v12530_v55  ;;  %v9372_v55 = vld [vmem:[%s11093_s9 + $0x330] ss:$8 sps:$4 sm:$0xff]   ;;  %v13544_v14 = vld [vmem:[#allocation84_spill] sm:$0xff] }
0x16ec   : > { %7126 = vmatprep.subr.bf16.mxu1 %v9350_v27  ;;  %v9371_v27 = vld [vmem:[%s11093_s9 + $0x324] ss:$8 sps:$4 sm:$0xff]  }
0x16ef   : > { %7127 = vmatpush1.bf16.msra.mxu1 %v9348_v62  ;;  %v5914_v62 = vmul.f32 0.70710677, %v5687_v39 }
0x16f0   : > { %7128 = vmatprep.subr.bf16.mxu1 %v9353_v56  ;;  %v9369_v56 = vld [vmem:[%s11093_s9 + $0x320] ss:$8 sps:$4 sm:$0xff]  }
0x16f1   : > { %9681 = verf.f32 %v5914_v62  ;;  %v13548_v62 = vld [vmem:[#allocation86_spill] sm:$0xff] }
0x16f3   : > { %7129 = vmatpush1.bf16.msra.mxu1 %v9351_v2  ;;  %v9374_v2 = vld [vmem:[%s11093_s9 + $0x334] ss:$8 sps:$4 sm:$0xff]  }
0x16f4   : > { %7130 = vmatprep.subr.bf16.mxu1 %v9356_v49  ;;  %v9380_v49 = vld [vmem:[%s11093_s9 + $0x354] ss:$8 sps:$4 sm:$0xff]  }
0x16f7   : > { %7131 = vmatpush1.bf16.msra.mxu1 %v9354_v54  ;;  %v9381_v54 = vld [vmem:[%s11093_s9 + $0x360] ss:$8 sps:$4 sm:$0xff]  }
0x16f8   : > { %7132 = vmatprep.subr.bf16.mxu1 %v9359_v22 }
0x16fb   : > { %7133 = vmatpush1.bf16.msra.mxu1 %v9357_v32  ;;  %v9387_v32 = vld [vmem:[%s11093_s9 + $0x380] ss:$8 sps:$4 sm:$0xff]  }
0x16fc   : > { %7134 = vmatprep.subr.bf16.mxu1 %v9362_v51 }
0x16ff   : > { %7135 = vmatpush1.bf16.msra.mxu1 %v9360_v12  ;;  %v9392_v12 = vld [vmem:[%s11093_s9 + $0x394] ss:$8 sps:$4 sm:$0xff]  }
0x1700   : > { %7185 = vmatprep.subr.bf16.mxu1 %v9365_v20  ;;  %v9401_v20 = vld [vmem:[%s11093_s9 + $0x3c4] ss:$8 sps:$4 sm:$0xff]  }
0x1702   : > { %7137 = vmatmul.mubr.bf16.vlgmr.msra.gmra.mrb[80].mxu1 %v13542_v6  ;;  %v5917_v6 = vmul.f32 0.70710677, %v5770_v46 }
0x1703   : > { %7146 = vmatprep.mubr.bf16.mxu1 %v6275_v41  ;;  %7186 = vmatpush1.bf16.msra.mxu1 %v9363_v5  ;;  %v9375_v41 = vld [vmem:[%s11093_s9 + $0x340] ss:$8 sps:$4 sm:$0xff]   ;;  %v9407_v5 = vld [vmem:[%s11093_s9 + $0x3e4] ss:$8 sps:$4 sm:$0xff]  }
0x1704   : > { %7187 = vmatprep.subr.bf16.mxu1 %v9368_v17  ;;  %v9410_v17 = vld [vmem:[%s11093_s9 + $0x3f4] ss:$8 sps:$4 sm:$0xff]   ;;  %9683 = verf.f32 %v5917_v6 }
0x1707   : > { %7188 = vmatpush1.bf16.msra.mxu1 %v9366_v13 }
0x1708   : > { %7189 = vmatprep.subr.bf16.mxu1 %v9371_v27  ;;  %v13547_v27 = vld [vmem:[#allocation74_spill] sm:$0xff] }
0x170a   : > { %7147 = vmatmul.mubr.bf16.gmra.mrb[84].mxu1 %v6274_v15  ;;  %v9682_v15 = vpop.eup %9681 }
0x170b   : > { %7156 = vmatprep.mubr.bf16.mxu1 %v6283_v59  ;;  %7190 = vmatpush1.bf16.msra.mxu1 %v9369_v56  ;;  %v6131_v59 = vmul.f32 %v6059_v7, %v5843_v40  ;;  %v6058_v22 = vadd.f32 1.0, %v9682_v15  ;;  %v5768_v56 = vadd.f32 %v13548_v62, %v13547_v27  ;;  %v7284_v40 = vld [vmem:[%s13549_s1] sm:$0x3] }
0x170c   : > { %7191 = vmatprep.subr.bf16.mxu1 %v9374_v2 }
0x170d   : > { %v6299_v57 = vpack.c.bf16 %v6131_v59, %v6131_v59  ;;  %v5916_v2 = vmul.f32 0.70710677, %v5768_v56  ;;  %v13551_v59 = vld [vmem:[#allocation52_spill] sm:$0xff] }
0x170e   : > { %v9684_v26 = vpop.eup %9683 }
0x170f   : > { %7192 = vmatpush1.bf16.msra.mxu1 %v9372_v55  ;;  %9685 = verf.f32 %v5916_v2  ;;  %v6061_v25 = vadd.f32 1.0, %v9684_v26  ;;  %v5845_v55 = vmul.f32 0.5, %v5770_v46  ;;  %v13558_v46 = vld [vmem:[#allocation60_spill] sm:$0xff]  ;;  %v13560_v26 = vld [vmem:[#allocation62_spill] sm:$0xff] }
0x1710   : > { %7193 = vmatprep.subr.bf16.mxu1 %v9377_v36 }
0x1711   : > { %v6133_v43 = vmul.f32 %v6061_v25, %v5845_v55 }
0x1712   : > { %7157 = vmatmul.mubr.bf16.gmra.mrb[88].mxu1 %v6282_v38  ;;  %v5842_v38 = vmul.f32 0.5, %v5687_v39  ;;  %v13545_v39 = vld [vmem:[#allocation83_spill] sm:$0xff] }
0x1713   : > { %7166 = vmatprep.mubr.bf16.mxu1 %v6291_v58  ;;  %7194 = vmatpush1.bf16.msra.mxu1 %v9375_v41  ;;  %v9389_v58 = vld [vmem:[%s11093_s9 + $0x384] ss:$8 sps:$4 sm:$0xff]   ;;  %v13546_v13 = vpack.c.bf16 %v13544_v14, %v13545_v39  ;;  %v6301_v19 = vpack.c.bf16 %v6133_v43, %v6133_v43 }
0x1714   : > { %7195 = vmatprep.subr.bf16.mxu1 %v9380_v49  ;;  %v6130_v1 = vmul.f32 %v6058_v22, %v5842_v38  ;;  %v13552_v22 = vld [vmem:[#allocation54_spill] sm:$0xff]  ;;  %v13553_v38 = vld [vmem:[#allocation55_spill] sm:$0xff] }
0x1716   : > { %v6298_v51 = vpack.c.bf16 %v6130_v1, %v6130_v1 }
0x1717   : > { %7196 = vmatpush1.bf16.msra.mxu1 %v9378_v47  ;;  %v13550_v47 = vld [vmem:[#allocation53_spill] sm:$0xff] }
0x1718   : > { %7197 = vmatprep.subr.bf16.mxu1 %v9383_v31  ;;  %v13052_v31 = vrot.slane %v7284_v40, %v13550_v47 }
0x1719   : > { %v9686_v60 = vpop.eup %9685 }
0x171a   : > { %7167 = vmatmul.mubr.bf16.gmra.mrb[92].mxu1 %v6290_v11  ;;  %v9393_v11 = vld [vmem:[%s11093_s9 + $0x3a0] ss:$8 sps:$4 sm:$0xff]   ;;  %v6060_v34 = vadd.f32 1.0, %v9686_v60  ;;  %v13561_v60 = vld [vmem:[#allocation63_spill] sm:$0xff] }
0x171b   : > { %7176 = vmatprep.mubr.bf16.mxu1 %v6299_v57  ;;  %7198 = vmatpush1.bf16.msra.mxu1 %v9381_v54  ;;  %v13055_v54 = vrot.slane %v7284_v40, %v13551_v59  ;;  %v13567_v59 = vld [vmem:[#allocation69_spill] sm:$0xff] }
0x171c   : > { %7199 = vmatprep.subr.bf16.mxu1 %v9386_v0 }
0x171f   : > { %7200 = vmatpush1.bf16.msra.mxu1 %v9384_v44 }
0x1720   : > { %7201 = vmatprep.subr.bf16.mxu1 %v9389_v58 }
0x1722   : > { %7177 = vmatmul.mubr.bf16.gmra.mrb[104].mxu1 %v6298_v51 }
0x1723   : > { %7202 = vmatpush1.bf16.msra.mxu1 %v9387_v32  ;;  %7217 = vmatprep.mubr.bf16.mxu1 %v6269_v8  ;;  %v9402_v8 = vld [vmem:[%s11093_s9 + $0x3d0] ss:$8 sps:$4 sm:$0xff]   ;;  %v13554_v32 = vld [vmem:[#allocation56_spill] sm:$0xff] }
0x1724   : > { %7203 = vmatprep.subr.bf16.mxu1 %v9392_v12 }
0x1727   : > { %7204 = vmatpush1.bf16.msra.mxu1 %v9390_v45 }
0x1728   : > { %7205 = vmatprep.subr.bf16.mxu1 %v9395_v28  ;;  %v13555_v28 = vld [vmem:[#allocation57_spill] sm:$0xff] }
0x172b   : > { %7206 = vmatpush1.bf16.msra.mxu1 %v9393_v11 }
0x172c   : > { %7207 = vmatprep.subr.bf16.mxu1 %v9398_v35 }
0x172f   : > { %7208 = vmatpush1.bf16.msra.mxu1 %v9396_v24 }
0x1730   : > { %7209 = vmatprep.subr.bf16.mxu1 %v9401_v20 }
0x1733   : > { %7210 = vmatpush1.bf16.msra.mxu1 %v9399_v10  ;;  %v13556_v10 = vld [vmem:[#allocation58_spill] sm:$0xff] }
0x1734   : > { %7211 = vmatprep.subr.bf16.mxu1 %v9404_v16 }
0x1737   : > { %7212 = vmatpush1.bf16.msra.mxu1 %v9402_v8 }
0x1738   : > { %7213 = vmatprep.subr.bf16.mxu1 %v9407_v5  ;;  %v13557_v5 = vld [vmem:[#allocation59_spill] sm:$0xff] }
0x173b   : > { %7214 = vmatpush1.bf16.msra.mxu1 %v9405_v29 }
0x173c   : > { %7215 = vmatprep.subr.bf16.mxu1 %v9410_v17 }
0x173f   : > { %7216 = vmatpush1.bf16.msra.mxu1 %v9408_v30 }
0x1742   : > { %7218 = vmatmul.mubr.bf16.vlgmr.msra.gmra.mrb[80].mxu1 %v13546_v13  ;;  %v13559_v13 = vld [vmem:[#allocation61_spill] sm:$0xff] }
0x1743   : > { %7227 = vmatprep.mubr.bf16.mxu1 %v6277_v21  ;;  %v5844_v21 = vmul.f32 0.5, %v5768_v56 }
0x1745   : > { %v6132_v9 = vmul.f32 %v6060_v34, %v5844_v21  ;;  %v13562_v21 = vld [vmem:[#allocation64_spill] sm:$0xff] }
0x1747   : > { %v6300_v48 = vpack.c.bf16 %v6132_v9, %v6132_v9 }
0x174a   : > { %7228 = vmatmul.mubr.bf16.gmra.mrb[84].mxu1 %v6276_v63 }
0x174b   : > { %7237 = vmatprep.mubr.bf16.mxu1 %v6285_v42 }
0x1752   : > { %7238 = vmatmul.mubr.bf16.gmra.mrb[88].mxu1 %v6284_v50 }
0x1753   : > { %7247 = vmatprep.mubr.bf16.mxu1 %v6293_v4 }
0x175a   : > { %7248 = vmatmul.mubr.bf16.gmra.mrb[92].mxu1 %v6292_v18 }
0x175b   : > { %7257 = vmatprep.mubr.bf16.mxu1 %v6301_v19 }
0x1762   : > { %7258 = vmatmul.mubr.bf16.gmra.mrb[108].mxu1 %v6300_v48 }
0x178c   : > { %v7016_v23 = vpop.f32.mrb[96].mxu1 }
0x178d   : > { %v7018_v53 = vpop.f32.mrb[97].mxu1 }
0x178e   : > { %v7020_v63 = vpop.f32.mrb[98].mxu1 }
0x178f   : > { %v7021_v42 = vpop.f32.mrb[99].mxu1 }
0x17b5   : > { %v7097_v50 = vpop.f32.mrb[100].mxu1 }
0x17b6   : > { %v7098_v52 = vadd.f32 %v7097_v50, %v7016_v23  ;;  %v7099_v33 = vpop.f32.mrb[101].mxu1 }
0x17b7   : > { %v7100_v4 = vadd.f32 %v7099_v33, %v7018_v53  ;;  %v7101_v36 = vpop.f32.mrb[102].mxu1  ;;  %v13563_v53 = vld [vmem:[#allocation65_spill] sm:$0xff]  ;;  %v13564_v33 = vld [vmem:[#allocation66_spill] sm:$0xff] }
0x17b8   : > { %v7102_v37 = vpop.f32.mrb[103].mxu1 }
0x17b9   : > { %v13565_v37 = vld [vmem:[#allocation67_spill] sm:$0xff] }
0x17f5   : > { %v7178_v41 = vpop.f32.mrb[104].mxu1 }
0x17f6   : > { %v13045_v49 = vadd.f32 %v7178_v41, %v7098_v52  ;;  %v7180_v3 = vpop.f32.mrb[105].mxu1 }
0x17f7   : > { %v13047_v61 = vadd.f32 %v7180_v3, %v7100_v4  ;;  %v7182_v18 = vpop.f32.mrb[106].mxu1 }
0x17f8   : > { %v7183_v7 = vpop.f32.mrb[107].mxu1 }
0x17f9   : > { %v13566_v7 = vld [vmem:[#allocation68_spill] sm:$0xff] }
0x1815   : > { %v7219_v15 = vpop.f32.mrb[80].mxu1 }
0x1816   : > { %v7266_v0 = vadd.f32 %v7219_v15, %v13552_v22  ;;  %v7221_v57 = vpop.f32.mrb[81].mxu1 }
0x1817   : > { %v7267_v44 = vadd.f32 %v7221_v57, %v13553_v38  ;;  %v7223_v1 = vpop.f32.mrb[82].mxu1 }
0x1818   : > { %v13060_v58 = vadd.f32 %v13052_v31, %v7266_v0  ;;  %v7268_v51 = vadd.f32 %v7223_v1, %v13554_v32  ;;  %v7225_v12 = vpop.f32.mrb[83].mxu1 }
0x1819   : > { %v13064_v45 = vadd.f32 %v13055_v54, %v7267_v44  ;;  %v7269_v11 = vadd.f32 %v7225_v12, %v13555_v28  ;;  %v13568_v12 = vld [vmem:[#allocation70_spill] sm:$0xff] }
0x181a   : > { %7314 = vst [vmem:[#allocation2] sm:$0xff] %v13060_v58  ;;  %v7298_v35 = vadd.f32 %v13052_v31, %v7268_v51 }
0x181b   : > { %7315 = vst [vmem:[#allocation2 + $0x8] sm:$0xff] %v13064_v45  ;;  %v7299_v24 = vadd.f32 %v13055_v54, %v7269_v11 }
0x181c   : > { %7316 = vst [vmem:[#allocation2 + $0x10] sm:$0xff] %v7298_v35  ;;  %v13569_v35 = vld [vmem:[#allocation71_spill] sm:$0xff] }
0x181d   : > { %7317 = vst [vmem:[#allocation2 + $0x18] sm:$0xff] %v7299_v24  ;;  %v7229_v20 = vpop.f32.mrb[84].mxu1 }
0x181e   : > { %v7270_v16 = vadd.f32 %v7229_v20, %v13556_v10  ;;  %v7231_v8 = vpop.f32.mrb[85].mxu1 }
0x181f   : > { %v7271_v29 = vadd.f32 %v7231_v8, %v13557_v5  ;;  %v7233_v17 = vpop.f32.mrb[86].mxu1 }
0x1820   : > { %v13074_v30 = vadd.f32 %v13052_v31, %v7270_v16  ;;  %v7272_v6 = vadd.f32 %v7233_v17, %v13558_v46  ;;  %v7235_v14 = vpop.f32.mrb[87].mxu1  ;;  %v7339_v46 = vsel (!%p8476_p10), %vm2641_vm10, %v13064_v45, 0.0 }
0x1821   : > { %v13078_v39 = vadd.f32 %v13055_v54, %v7271_v29  ;;  %v7273_v27 = vadd.f32 %v7235_v14, %v13559_v13 }
0x1822   : > { %7318 = vst [vmem:[#allocation2 + $0x20] sm:$0xff] %v13074_v30  ;;  %v7302_v62 = vadd.f32 %v13052_v31, %v7272_v6  ;;  %v7410_v29 = vsel (!%p8476_p10), %vm7409_vm1, %v13074_v30, 0.0 }
0x1823   : > { %7319 = vst [vmem:[#allocation2 + $0x28] sm:$0xff] %v13078_v39  ;;  %v7303_v56 = vadd.f32 %v13055_v54, %v7273_v27  ;;  %v7411_v17 = vsel (!%p8476_p10), %vm7409_vm1, %v13078_v39, 0.0 }
0x1824   : > { %7320 = vst [vmem:[#allocation2 + $0x30] sm:$0xff] %v7302_v62  ;;  %v7412_v6 = vadd.f32 (!%p8476_p10), %v7411_v17, %v7410_v29  ;;  %v7407_v29 = vld [vmem:[#allocation23] sm:$0x3] (!%p8476_p10) }
0x1825   : > { %7321 = vst [vmem:[#allocation2 + $0x38] sm:$0xff] %v7303_v56  ;;  %v7239_v2 = vpop.f32.mrb[88].mxu1 }
0x1826   : > { %v7274_v25 = vadd.f32 %v7239_v2, %v13560_v26  ;;  %v7241_v55 = vpop.f32.mrb[89].mxu1 }
0x1827   : > { %v7275_v43 = vadd.f32 %v7241_v55, %v13561_v60  ;;  %v7243_v34 = vpop.f32.mrb[90].mxu1 }
0x1828   : > { %v13088_v19 = vadd.f32 %v13052_v31, %v7274_v25  ;;  %v7276_v9 = vadd.f32 %v7243_v34, %v13562_v21  ;;  %v7245_v48 = vpop.f32.mrb[91].mxu1 }
0x1829   : > { %v13092_v23 = vadd.f32 %v13055_v54, %v7275_v43  ;;  %v7277_v63 = vadd.f32 %v7245_v48, %v13563_v53 }
0x182a   : > { %7322 = vst [vmem:[#allocation2 + $0x40] sm:$0xff] %v13088_v19  ;;  %v7306_v42 = vadd.f32 %v13052_v31, %v7276_v9 }
0x182b   : > { %7323 = vst [vmem:[#allocation2 + $0x48] sm:$0xff] %v13092_v23  ;;  %v7307_v50 = vadd.f32 %v13055_v54, %v7277_v63 }
0x182c   : > { %7324 = vst [vmem:[#allocation2 + $0x50] sm:$0xff] %v7306_v42 }
0x182d   : > { %7325 = vst [vmem:[#allocation2 + $0x58] sm:$0xff] %v7307_v50  ;;  %v7249_v52 = vpop.f32.mrb[92].mxu1 }
0x182e   : > { %v7278_v4 = vadd.f32 %v7249_v52, %v13564_v33  ;;  %v7251_v36 = vpop.f32.mrb[93].mxu1 }
0x182f   : > { %v7279_v41 = vadd.f32 %v7251_v36, %v13565_v37  ;;  %v7253_v3 = vpop.f32.mrb[94].mxu1 }
0x1830   : > { %v7308_v18 = vadd.f32 %v13052_v31, %v7278_v4  ;;  %v7280_v40 = vadd.f32 %v7253_v3, %v13566_v7  ;;  %v7255_v47 = vpop.f32.mrb[95].mxu1 }
0x1831   : > { %v7309_v15 = vadd.f32 %v13055_v54, %v7279_v41  ;;  %v7281_v22 = vadd.f32 %v7255_v47, %v13567_v59 }
0x1832   : > { %7326 = vst [vmem:[#allocation2 + $0x60] sm:$0xff] %v7308_v18  ;;  %v7310_v0 = vadd.f32 %v13052_v31, %v7280_v40 }
0x1833   : > { %7327 = vst [vmem:[#allocation2 + $0x68] sm:$0xff] %v7309_v15  ;;  %v7311_v57 = vadd.f32 %v13055_v54, %v7281_v22  ;;  %v7551_v16 = vsel (!%p8476_p10), %vm7549_vm15, %v7309_v15, 0.0 }
0x1834   : > { %7328 = vst [vmem:[#allocation2 + $0x70] sm:$0xff] %v7310_v0 }
0x1835   : > { %7329 = vst [vmem:[#allocation2 + $0x78] sm:$0xff] %v7311_v57  ;;  %v7259_v38 = vpop.f32.mrb[108].mxu1 }
0x1836   : > { %v7260_v44 = vadd.f32 %v7259_v38, %v13045_v49  ;;  %v7261_v1 = vpop.f32.mrb[109].mxu1  ;;  %v7338_v49 = vsel (!%p8476_p10), %vm2641_vm10, %v13060_v58, 0.0 }
0x1837   : > { %v7262_v32 = vadd.f32 %v7261_v1, %v13047_v61  ;;  %v7263_v51 = vpop.f32.mrb[110].mxu1  ;;  %7335 = sbr.rel (%p8476_p10) target bundleno = 6532 (0x1984), region = 168  ;;  %v7550_v61 = vsel (!%p8476_p10), %vm7549_vm15, %v7308_v18, 0.0  ;;  %v7340_v14 = vadd.f32 (!%p8476_p10), %v7339_v46, %v7338_v49 }
0x1838   : > { %v7282_v28 = vadd.f32 %v7260_v44, %v13568_v12  ;;  %v7264_v11 = vpop.f32.mrb[111].mxu1  ;;  %v7552_v8 = vadd.f32 (!%p8476_p10), %v7551_v16, %v7550_v61  ;;  %v7477_v61 = vld [vmem:[#allocation23] sm:$0x3] (!%p8476_p10)  ;;  %v13571_v16 = vld [vmem:[#allocation53_spill] sm:$0xff] (!%p8476_p10) }
0x1839   : > { %v7283_v24 = vadd.f32 %v7262_v32, %v13569_v35 }
0x183a   : > { %v7312_v20 = vadd.f32 %v13052_v31, %v7282_v28  ;;  %v7480_v31 = vsel (!%p8476_p10), %vm7479_vm0, %v13088_v19, 0.0  ;;  %7553 = vadd.xlane.f32.xlu0 (!%p8476_p10), %v7552_v8  ;;  %v10381_v28 = vmov (!%p8476_p10), 1966171168  }
0x183b   : > { %v7313_v10 = vadd.f32 %v13055_v54, %v7283_v24  ;;  %v7481_v54 = vsel (!%p8476_p10), %vm7479_vm0, %v13092_v23, 0.0  ;;  %v7388_v11 = vunpack.c.l.s4 (!%p8476_p10), %v10381_v28 }
0x183c   : > { %7330 = vst [vmem:[#allocation2 + $0x80] sm:$0xf] %v7312_v20  ;;  %v7482_v5 = vadd.f32 (!%p8476_p10), %v7481_v54, %v7480_v31  ;;  %v7547_v20 = vld [vmem:[#allocation23] sm:$0x3] (!%p8476_p10) }
0x183d   : > { %7331 = vst [vmem:[#allocation2 + $0x88] sm:$0xf] %v7313_v10  ;;  %v7548_v10 = vld [vmem:[#allocation24] sm:$0x3] (!%p8476_p10)  ;;  %v7389_v49 = vunpack.c.0.s8 (!%p8476_p10), %v7388_v11  ;;  %v7574_v31 = vrot.slane (!%p8476_p10), %v7547_v20, %v13571_v16 }
0x183e   : > { %7483 = vadd.xlane.f32.xlu1 %v7482_v5  ;;  %7413 = vadd.xlane.f32.xlu0 %v7412_v6  ;;  %v13572_v54 = vld [vmem:[#allocation52_spill] sm:$0xff]  ;;  %v7587_v46 = vrot.slane %v7548_v10, %v13571_v16 }
0x183f   : > { %v7578_v8 = vrot.slane %v7547_v20, %v13572_v54  ;;  %v7478_v5 = vld [vmem:[#allocation24] sm:$0x3]  ;;  %v7591_v6 = vrot.slane %v7548_v10, %v13572_v54  ;;  %v13574_v10 = vlaneseq }
0x1841   : > { %vm7404_vm2 = vcmp.lt.s32.totalorder %v13574_v10, 256 }
0x1842   : > { %7341 = vadd.xlane.f32.xlu1 %v7340_v14  ;;  %v7408_v14 = vld [vmem:[#allocation24] sm:$0x3] }
0x18c7   : > { %v7554_v13 = vpop.xlane.xlu0 %7553 }
0x18c8   : > { %v7555_v62 = vmul.f32 0.00390625, %v7554_v13  ;;  %v13573_v13 = vld [vmem:[#allocation51_spill] sm:$0xff] }
0x18ca   : > { %v13128_v2 = vsub.f32 %v7308_v18, %v7555_v62  ;;  %v13130_v26 = vsub.f32 %v7309_v15, %v7555_v62 }
0x18cb   : > { %v7484_v27 = vpop.xlane.xlu1 %7483  ;;  %v7414_v60 = vpop.xlane.xlu0 %7413 }
0x18cc   : > { %v7485_v56 = vmul.f32 0.00390625, %v7484_v27  ;;  %v7415_v34 = vmul.f32 0.00390625, %v7414_v60  ;;  %v7558_v9 = vmul.f32 %v13128_v2, %v13128_v2  ;;  %v7559_v48 = vmul.f32 %v13130_v26, %v13130_v26 }
0x18cd   : > { %v13179_v27 = vsub.s32 %v7389_v49, %v13573_v13  ;;  %v7504_v60 = vrot.slane %v7477_v61, %v13571_v16 }
0x18ce   : > { %v13133_v25 = vsub.f32 %v13088_v19, %v7485_v56  ;;  %v13136_v55 = vsub.f32 %v13092_v23, %v7485_v56  ;;  %v13147_v63 = vsub.f32 %v13074_v30, %v7415_v34  ;;  %v13150_v23 = vsub.f32 %v13078_v39, %v7415_v34 }
0x18cf   : > { %v7342_v43 = vpop.xlane.xlu1 %7341  ;;  %v7560_v52 = vsel %vm7549_vm15, %v7558_v9, 0.0  ;;  %v7561_v33 = vsel %vm7549_vm15, %v7559_v48, 0.0  ;;  %v7508_v34 = vrot.slane %v7477_v61, %v13572_v54  ;;  %v7434_v9 = vrot.slane %v7407_v29, %v13571_v16 }
0x18d0   : > { %v7343_v21 = vmul.f32 0.00390625, %v7342_v43  ;;  %v7488_v53 = vmul.f32 %v13133_v25, %v13133_v25  ;;  %v7489_v19 = vmul.f32 %v13136_v55, %v13136_v55  ;;  %v7562_v37 = vadd.f32 %v7561_v33, %v7560_v52  ;;  %v7336_v43 = vld [vmem:[#allocation23] sm:$0x3] }
0x18d1   : > { %v7418_v30 = vmul.f32 %v13147_v63, %v13147_v63  ;;  %v7419_v39 = vmul.f32 %v13150_v23, %v13150_v23  ;;  %v7438_v48 = vrot.slane %v7407_v29, %v13572_v54  ;;  %v7521_v33 = vrot.slane %v7478_v5, %v13572_v54 }
0x18d2   : > { %v13153_v42 = vsub.f32 %v13060_v58, %v7343_v21  ;;  %v13156_v50 = vsub.f32 %v13064_v45, %v7343_v21  ;;  %v7490_v4 = vsel %vm7479_vm0, %v7488_v53, 0.0  ;;  %v7491_v36 = vsel %vm7479_vm0, %v7489_v19, 0.0  ;;  %7563 = vadd.xlane.f32.xlu0 %v7562_v37 }
0x18d3   : > { %v7492_v41 = vadd.f32 %v7491_v36, %v7490_v4  ;;  %v7420_v3 = vsel %vm7409_vm1, %v7418_v30, 0.0  ;;  %v7421_v18 = vsel %vm7409_vm1, %v7419_v39, 0.0  ;;  %v7517_v21 = vrot.slane %v7478_v5, %v13571_v16  ;;  %v7337_v4 = vld [vmem:[#allocation24] sm:$0x3] }
0x18d4   : > { %v7346_v58 = vmul.f32 %v13153_v42, %v13153_v42  ;;  %v7347_v45 = vmul.f32 %v13156_v50, %v13156_v50  ;;  %v7422_v7 = vadd.f32 %v7421_v18, %v7420_v3  ;;  %v7451_v36 = vrot.slane %v7408_v14, %v13572_v54 }
0x18d5   : > { %v7362_v39 = vrot.slane %v7336_v43, %v13571_v16 }
0x18d6   : > { %v7348_v40 = vsel %vm2641_vm10, %v7346_v58, 0.0  ;;  %v7349_v47 = vsel %vm2641_vm10, %v7347_v45, 0.0  ;;  %7423 = vadd.xlane.f32.xlu1 %v7422_v7  ;;  %7493 = vadd.xlane.f32.xlu0 %v7492_v41 }
0x18d7   : > { %v7350_v15 = vadd.f32 %v7349_v47, %v7348_v40  ;;  %v7366_v40 = vrot.slane %v7336_v43, %v13572_v54  ;;  %v7375_v47 = vrot.slane %v7337_v4, %v13571_v16 }
0x18da   : > { %7351 = vadd.xlane.f32.xlu1 %v7350_v15 }
0x195f   : > { %v7564_v59 = vpop.xlane.xlu0 %7563 }
0x1960   : > { %v7565_v22 = vmul.f32 0.00390625, %v7564_v59 }
0x1962   : > { %v7566_v0 = vadd.f32 1e-05, %v7565_v22 }
0x1963   : > { %v7424_v57 = vpop.xlane.xlu1 %7423  ;;  %v7494_v38 = vpop.xlane.xlu0 %7493 }
0x1964   : > { %v7425_v44 = vmul.f32 0.00390625, %v7424_v57  ;;  %9705 = vrsqrt.f32 %v7566_v0  ;;  %v7495_v1 = vmul.f32 0.00390625, %v7494_v38 }
0x1966   : > { %v7426_v32 = vadd.f32 1e-05, %v7425_v44  ;;  %v7496_v51 = vadd.f32 1e-05, %v7495_v1 }
0x1967   : > { %v7352_v12 = vpop.xlane.xlu1 %7351 }
0x1968   : > { %9707 = vrsqrt.f32 %v7426_v32  ;;  %v7353_v35 = vmul.f32 0.00390625, %v7352_v12 }
0x1969   : > { %9709 = vrsqrt.f32 %v7496_v51 }
0x196a   : > { %v7354_v24 = vadd.f32 1e-05, %v7353_v35 }
0x196c   : > { %9711 = vrsqrt.f32 %v7354_v24 }
0x196e   : > { %v9706_v17 = vpop.eup %9705 }
0x196f   : > { %v7568_v62 = vmul.f32 %v9706_v17, %v13128_v2  ;;  %v7569_v56 = vmul.f32 %v9706_v17, %v13130_v26  ;;  %v7447_v2 = vrot.slane %v7408_v14, %v13571_v16 }
0x1971   : > { %v7581_v19 = vmul.f32 %v7574_v31, %v7568_v62  ;;  %v7582_v52 = vmul.f32 %v7578_v8, %v7569_v56 }
0x1972   : > { %v9708_v53 = vpop.eup %9707 }
0x1973   : > { %v9710_v26 = vpop.eup %9709  ;;  %v7428_v37 = vmul.f32 %v9708_v53, %v13147_v63  ;;  %v7429_v30 = vmul.f32 %v9708_v53, %v13150_v23  ;;  %v7594_v58 = vadd.f32 %v7587_v46, %v7581_v19  ;;  %v7595_v45 = vadd.f32 %v7591_v6, %v7582_v52 }
0x1974   : > { %v7498_v41 = vmul.f32 %v9710_v26, %v13133_v25  ;;  %v7499_v3 = vmul.f32 %v9710_v26, %v13136_v55  ;;  %v7379_v23 = vrot.slane %v7337_v4, %v13572_v54 }
0x1975   : > { %v7441_v18 = vmul.f32 %v7434_v9, %v7428_v37  ;;  %v7442_v7 = vmul.f32 %v7438_v48, %v7429_v30  ;;  %v7598_v59 = vcombine.low %v7594_v58, %v7595_v45 }
0x1976   : > { %v9712_v15 = vpop.eup %9711  ;;  %v7511_v22 = vmul.f32 %v7504_v60, %v7498_v41  ;;  %v7512_v63 = vmul.f32 %v7508_v34, %v7499_v3 }
0x1977   : > { %v7454_v0 = vadd.f32 %v7447_v2, %v7441_v18  ;;  %v7455_v57 = vadd.f32 %v7451_v36, %v7442_v7  ;;  %v7356_v38 = vmul.f32 %v9712_v15, %v13153_v42  ;;  %v7357_v25 = vmul.f32 %v9712_v15, %v13156_v50 }
0x1978   : > { %v7605_v55 = vrot.slane %v7598_v59, %v13179_v27  ;;  %v7524_v44 = vadd.f32 %v7517_v21, %v7511_v22  ;;  %v7525_v1 = vadd.f32 %v7521_v33, %v7512_v63 }
0x1979   : > { %v7458_v32 = vcombine.low %v7454_v0, %v7455_v57  ;;  %v7369_v51 = vmul.f32 %v7362_v39, %v7356_v38  ;;  %v7370_v12 = vmul.f32 %v7366_v40, %v7357_v25 }
0x197a   : > { %v7606_v28 = vcombine.high %v7605_v55, %v7605_v55  ;;  %v7528_v11 = vcombine.low %v7524_v44, %v7525_v1 }
0x197b   : > { %v7465_v35 = vrot.slane %v7458_v32, %v13179_v27  ;;  %v7382_v24 = vadd.f32 %v7375_v47, %v7369_v51  ;;  %v7383_v20 = vadd.f32 %v7379_v23, %v7370_v12 }
0x197c   : > { %v7613_v42 = vrot.slane %v7606_v28, %v13179_v27  ;;  %v7535_v50 = vrot.slane %v7528_v11, %v13179_v27 }
0x197d   : > { %v7466_v49 = vcombine.high %v7465_v35, %v7465_v35  ;;  %v7386_v61 = vcombine.low %v7382_v24, %v7383_v20 }
0x197e   : > { %v7614_v16 = vcombine.high %v7613_v42, %v7613_v42  ;;  %v7542_v31 = vrot.slane %v7535_v50, %v13179_v27 }
0x197f   : > { %v7473_v54 = vrot.slane %v7466_v49, %v13179_v27  ;;  %v7393_v8 = vrot.slane %v7386_v61, %v13179_v27 }
0x1980   : > { %8479 = vst.msk [vmem:[%s11113_s18 + $0x6] sm:$0x3] %vm7404_vm2, %v7614_v16  ;;  %v7543_v5 = vcombine.high %v7542_v31, %v7542_v31 }
0x1981   : > { %8477 = vst.msk [vmem:[%s11113_s18 + $0x2] sm:$0x3] %vm7404_vm2, %v7473_v54  ;;  %v7400_v29 = vrot.slane %v7393_v8, %v13179_v27 }
0x1982   : > { %8478 = vst.msk [vmem:[%s11113_s18 + $0x4] sm:$0x3] %vm7404_vm2, %v7543_v5 }
0x1983   : > { %7406 = vst.msk [vmem:[%s11113_s18] sm:$0x3] %vm7404_vm2, %v7400_v29 }
0x1984 PF: > { %s13575_s24 = sld [smem:[#allocation39_spill]]  ;;  %s13577_s19 = sld [smem:[#allocation44_spill]] }
0x1985   : > { %s13578_s9 = sld [smem:[#allocation102_spill]]  ;;  %s7633_s22 = sshll.u32 %s11113_s18, 4  ;;  %s13221_s22 = int_to_ptr.vmem [resolvable:$true] %s7633_s22 }
0x1986   : > { %s13225_s27 = scalar_lea.sflag [#allocation6], %s1053_s30  ;;  %s10211_s5 = scalar_lea.vmem %s13221_s22, 128 }
0x1987   : > { %p10212_p9 = scmp.ne.s32.totalorder %s13221_s22, %s10211_s5  ;;  %s10382_s26 = smov [#allocation25]  }
0x1988   : > { %s10215_s28 = sshll.u32 %s10382_s26, 4  ;;  %s10216_s28 = int_to_ptr.vmem [resolvable:$false] %s10215_s28 }
0x1989   : > { %s10217_s25 = scalar_lea.vmem %s10216_s28, 256  ;;  %p10218_p2 = scmp.lt.s32.totalorder %s13221_s22, %s10216_s28 }
0x198a   : > { %s8498_s20 = sshll.u32 %s13575_s24, 7  ;;  %p13579_p8 = scmp.ne.s32.totalorder %s13577_s19, 0 }
0x198b   : > { %s13218_s3 = scalar_lea.hbm %s13578_s9, %s8498_s20  ;;  %p10219_p1 = scmp.lt.s32.totalorder %s10217_s25, %s10211_s5 }
0x198c   : > { %p10213_p4 = pnand %p10212_p9, %p13579_p8 }
0x198d   : > { %p10220_p3 = por %p10219_p1, %p10218_p2 }
0x198e   : > { %p10214_p6 = pneg %p10213_p4 }
0x1990   : > { %p10221_p5 = pnand %p10220_p3, %p10214_p6 }
0x1992   : > { %10224 = shalt.err (!%p10221_p5)
}
0x1993   : > { %s10225_s18 = scalar_lea.hbm %s13218_s3, 128  ;;  %s10229_s0 = scalar_lea.hbm %s13578_s9, 256 }
0x1994   : > { %p10226_p0 = scmp.ne.s32.totalorder %s13218_s3, %s10225_s18  ;;  %p10230_p11 = scmp.lt.u32.totalorder %s13218_s3, %s13578_s9 }
0x1995   : > { %p10231_p13 = scmp.lt.u32.totalorder %s10229_s0, %s10225_s18  ;;  %p10233_p9 = scmp.lt.u32.totalorder %s10225_s18, %s13218_s3 }
0x1996   : > { %p10227_p7 = pnand %p10226_p0, %p13579_p8 }
0x1997   : > { %p10232_p10 = por %p10231_p13, %p10230_p11 }
0x1998   : > { %p10228_p12 = pneg %p10227_p7 }
0x1999   : > { %p10234_p4 = por %p10233_p9, %p10232_p10 }
0x199b   : > { %p10235_p6 = pnand %p10234_p4, %p10228_p12 }
0x199d   : > { %10238 = shalt.err (!%p10235_p6)
}
0x199e   : > { %s10383_s1 = smov 32   ;;  %s10384_s23 = smov 2  }
0x199f   : > { %8812 = dma.vmem_to_hbm [thread:$0]  (%p13579_p8), %s13221_s22, 128, %s13218_s3, %s13225_s27, %s10383_s1, %s10383_s1, %s10384_s23  }
0x19a0 PF: > { %s13580_s24 = sld [smem:[#allocation41_spill]]  ;;  %s13581_s2 = sld [smem:[#allocation33_spill]] }
0x19a1   : > { %s13582_s20 = sld [smem:[#allocation45_spill]] }
0x19a6   : > { %p8884_p2 = scmp.ge.s32.totalorder %s13580_s24, 2  ;;  %s7648_s14 = sand.u32 1, %s13581_s2  }
0x19a7   : > { %p13583_p1 = scmp.ne.s32.totalorder %s13582_s20, 0  ;;  %s7649_s29 = scalar_lea.sflag [#allocation6], %s7648_s14 }
0x19a9   : > { %p8868_p3 = pnand %p8884_p2, %p13583_p1 }
0x19ab   : > { %10308 = dma.done.wait (!%p8868_p3), %s7649_s29, 128  }
0x19ac   : > { %10310 = vsyncadd (!%p8868_p3), %s7649_s29, 4294967168  ;;  %s34_s2 = sadd.s32 1, %s13580_s24   ;;  %s13584_s27 = sld [smem:[#allocation34_spill]] }
0x19ad   : > { %p31_p5 = scmp.ge.s32.totalorder %s34_s2, 10   ;;  %s13585_s28 = sld [smem:[#allocation35_spill]] }
0x19ae   : > { %s13586_s29 = sld [smem:[#allocation50_spill]]  ;;  %s13587_s30 = sld [smem:[#allocation36_spill]] }
0x19af   : > { %s13588_s0 = sld [smem:[#allocation37_spill]]  ;;  %s13589_s19 = sld [smem:[#allocation49_spill]] }
0x19b0   : > { %s13590_s20 = sld [smem:[#allocation40_spill]]  ;;  %s13591_s3 = sld [smem:[#allocation47_spill]] }
0x19b1   : > { %s13592_s22 = sld [smem:[#allocation48_spill]]  ;;  %s13593_s1 = smov %s10345_s21 }
0x19b2   :  { %33 = sbr.rel (!%p31_p5) target bundleno = 26 (0x1a), region = 287 }
0x19b6   : > { %s13594_s21 = smov %s13591_s3 }
0x19b9   :  { %7654 = vsyncpa [#allocation5], 1 }
0x19ba   :  { %7656 = vsyncpa [#allocation5 + $0x1], 1 }
0x19bb   :  { %7657 = vsyncpa [#allocation8], 1 }
0x19bc   :  { %7658 = vsyncpa [#allocation11], 1 }
0x19bd   :  { %7659 = vsyncpa [#allocation6], 1 }
0x19be   :  { %7661 = vsyncpa [#allocation6 + $0x1], 1 }

</bundles_post_ra>
